<compile_context>
chip_gen: v7x
topology: tpu7x:2x2x1
jax: 0.10.0
libtpu: 0.0.40
codegen_flags: <defaults>
</compile_context>

<pallas_src>
import functools

import numpy as np
import jax
import jax.numpy as jnp
from jax.experimental import pallas as pl
from jax.experimental.pallas import tpu as pltpu


# ----------------------------------------------------------------------------
# In-kernel helpers
# ----------------------------------------------------------------------------
def _layernorm(x, g, b, eps=1e-6):
    mu = jnp.mean(x, axis=-1, keepdims=True)
    xc = x - mu
    var = jnp.mean(xc * xc, axis=-1, keepdims=True)
    return xc * jax.lax.rsqrt(var + eps) * g + b


# ----------------------------------------------------------------------------
# Kernel 1: fused token path for one extractor
#   patch_embed + pos_embed  (d == 0)
#   -> CaiT block d (talking-heads attn + MLP, LayerScale residuals)
#   -> final LayerNorm + single HBM write (d == depth-1)
# x stays resident in a VMEM scratch across the whole depth axis; all weights
# are VMEM/SMEM-resident (const BlockSpecs) and indexed by d in-kernel.
# ----------------------------------------------------------------------------
def fused_tokens_kernel(patches_ref, pew_ref, pos_ref,
                        qkvw_ref, projw_ref, f1w_ref, f2w_ref,
                        vecs_ref, lnf_ref, th_ref,
                        out_ref, x_vmem, *, num_heads):
    d = pl.program_id(1)
    bf16 = jnp.bfloat16
    N, D = x_vmem.shape
    H = num_heads
    dh = D // H
    HH = H * H
    S = 2 * HH + 2 * H            # talking-heads scalars per block in SMEM
    base = d * S

    # ---- d == 0: patch embedding (strided conv as matmul) + pos embed ----
    @pl.when(d == 0)
    def _():
        p = patches_ref[...].astype(bf16)                         # (N, K)
        y = jnp.dot(p, pew_ref[...], preferred_element_type=jnp.float32)
        x_vmem[...] = y + pos_ref[...]        # pos_ref = pos_embed + patch bias

    x = x_vmem[...]                                               # (N, D) f32

    # per-block small vectors, one resident buffer, sliced statically
    vec = vecs_ref[d]                                             # (10, W) f32
    ln1_g, ln1_b = vec[0:1, :D], vec[1:2, :D]
    qkv_b = vec[2:3, :3 * D]
    proj_b = vec[3:4, :D]
    gamma1 = vec[4:5, :D]
    ln2_g, ln2_b = vec[5:6, :D], vec[6:7, :D]
    hid = f1w_ref.shape[2]
    f1_b = vec[7:8, :hid]
    f2_b = vec[8:9, :D]
    gamma2 = vec[9:10, :D]

    # ------------------- talking-heads attention branch -------------------
    h1 = _layernorm(x, ln1_g, ln1_b).astype(bf16)
    # fused QKV: ONE (N,D)@(D,3D) matmul (q columns pre-scaled at pack time)
    qkv = jnp.dot(h1, qkvw_ref[d], preferred_element_type=jnp.float32) + qkv_b
    qkv16 = qkv.astype(bf16)

    scores, vals = [], []
    for hd in range(H):                                           # static unroll
        qh = qkv16[:, hd * dh:(hd + 1) * dh]
        kh = qkv16[:, D + hd * dh:D + (hd + 1) * dh]
        vals.append(qkv16[:, 2 * D + hd * dh:2 * D + (hd + 1) * dh])
        scores.append(jax.lax.dot_general(                        # q_h @ k_h^T
            qh, kh, (((1,), (1,)), ((), ())),
            preferred_element_type=jnp.float32))                  # (N, N) f32

    # pre-softmax talking-heads mix: H^2 scalar-broadcast mul-adds (VPU),
    # scalars read from SMEM -- kron(W, I_N) MXU trick removed.
    probs = []
    for g in range(H):
        acc = th_ref[base + g * H] * scores[0]
        for h in range(1, H):
            acc = acc + th_ref[base + g * H + h] * scores[h]
        acc = acc + th_ref[base + HH + g]      # constant per head; kept for parity
        acc = acc - jnp.max(acc, axis=-1, keepdims=True)
        e = jnp.exp(acc)
        probs.append(e / jnp.sum(e, axis=-1, keepdims=True))      # exact softmax

    # post-softmax mix + attn @ v per head; head-concat folded into ONE proj
    outs = []
    for g in range(H):
        pm = th_ref[base + HH + H + g * H] * probs[0]
        for h in range(1, H):
            pm = pm + th_ref[base + HH + H + g * H + h] * probs[h]
        pm = pm + th_ref[base + 2 * HH + H + g]
        outs.append(jnp.dot(pm.astype(bf16), vals[g],
                            preferred_element_type=jnp.float32))  # (N, dh)
    o = jnp.concatenate(outs, axis=-1)                            # (N, D)
    o = jnp.dot(o.astype(bf16), projw_ref[d],
                preferred_element_type=jnp.float32) + proj_b      # single (D,D) proj
    x = x + gamma1 * o                                            # LayerScale residual

    # ------------------------------ MLP branch ----------------------------
    h2 = _layernorm(x, ln2_g, ln2_b).astype(bf16)
    h2 = jnp.dot(h2, f1w_ref[d], preferred_element_type=jnp.float32) + f1_b
    # TODO(synk): timm CaiT uses exact erf-GELU; tanh approximation used here
    # because erf has no guaranteed Mosaic lowering (difference ~1e-3).
    h2 = jax.nn.gelu(h2, approximate=True).astype(bf16)
    h2 = jnp.dot(h2, f2w_ref[d], preferred_element_type=jnp.float32) + f2_b
    x = x + gamma2 * h2                                           # LayerScale residual

    x_vmem[...] = x

    # ---- d == depth-1: final LayerNorm (extractor.norm) + single write ----
    @pl.when(d == pl.num_programs(1) - 1)
    def _():
        lnf = lnf_ref[...]
        out_ref[...] = _layernorm(x, lnf[0:1], lnf[1:2])


def _const_spec(arr):
    """BlockSpec for a fully-resident weight: same (all-zero) block index on
    every grid step -> DMA'd exactly once for the whole kernel."""
    nd = arr.ndim
    return pl.BlockSpec(arr.shape, lambda b, d, _nd=nd: (0,) * _nd)


def cait_tokens_fused(patches, pk, *, num_heads):
    """patch_embed -> +pos_embed -> pos_drop(identity) -> blocks -> norm."""
    B, N, K = patches.shape
    D = pk["pe_w"].shape[1]
    depth = pk["qkvw"].shape[0]

    return pl.pallas_call(
        functools.partial(fused_tokens_kernel, num_heads=num_heads),
        out_shape=jax.ShapeDtypeStruct((B, N, D), jnp.float32),
        grid=(B, depth),
        in_specs=[
            pl.BlockSpec((pl.Squeezed(), N, K), lambda b, d: (b, 0, 0)),  # patches
            _const_spec(pk["pe_w"]),
            _const_spec(pk["pos_pe"]),
            _const_spec(pk["qkvw"]),
            _const_spec(pk["projw"]),
            _const_spec(pk["f1w"]),
            _const_spec(pk["f2w"]),
            _const_spec(pk["vecs"]),
            _const_spec(pk["lnf"]),
            pl.BlockSpec(memory_space=pltpu.MemorySpace.SMEM),     # talking-heads scalars
        ],
        out_specs=pl.BlockSpec((pl.Squeezed(), N, D), lambda b, d: (b, 0, 0)),
        scratch_shapes=[pltpu.VMEM((N, D), jnp.float32)],
        compiler_params=pltpu.CompilerParams(
            dimension_semantics=("parallel", "arbitrary")),
    )(patches, pk["pe_w"], pk["pos_pe"], pk["qkvw"], pk["projw"],
      pk["f1w"], pk["f2w"], pk["vecs"], pk["lnf"], pk["th"])


# ----------------------------------------------------------------------------
# Kernel 2: separable bicubic resize (align_corners=True, a=-0.75), f32.
# Column pass is ONE batched matmul over all B*C planes; row pass is B*C small
# matmuls (B*C is tiny), single store.
# ----------------------------------------------------------------------------
def bicubic_kernel(x_ref, wr_ref, wct_ref, out_ref, *, planes, h_in):
    cols = jnp.dot(x_ref[...], wct_ref[...],
                   preferred_element_type=jnp.float32)            # (P*H, Wo) f32
    wr = wr_ref[...]                                              # (Ho, H) f32
    outs = []
    for p in range(planes):                                       # static unroll
        outs.append(jnp.dot(wr, cols[p * h_in:(p + 1) * h_in, :],
                            preferred_element_type=jnp.float32))  # (Ho, Wo)
    out_ref[...] = jnp.concatenate(outs, axis=0)                  # (P*Ho, Wo)


def _bicubic_matrix(in_size, out_size, a=-0.75):
    def cubic(t):
        t = abs(t)
        if t <= 1.0:
            return (a + 2.0) * t ** 3 - (a + 3.0) * t ** 2 + 1.0
        if t < 2.0:
            return a * t ** 3 - 5.0 * a * t ** 2 + 8.0 * a * t - 4.0 * a
        return 0.0

    mat = np.zeros((out_size, in_size), np.float32)
    for o in range(out_size):
        src = o * (in_size - 1) / (out_size - 1) if out_size > 1 else 0.0
        i0 = int(np.floor(src))
        t = src - i0
        taps = [cubic(t + 1.0), cubic(t), cubic(1.0 - t), cubic(2.0 - t)]
        for off, wgt in zip(range(-1, 3), taps):
            idx = min(max(i0 + off, 0), in_size - 1)   # border replicate
            mat[o, idx] += wgt
    return jnp.asarray(mat)


def bicubic_resize(img, out_size):
    B, C, H, W = img.shape
    wr = _bicubic_matrix(H, out_size)              # (Ho, H)  f32
    wct = _bicubic_matrix(W, out_size).T           # (W,  Wo) f32
    P = B * C
    flat = img.reshape(P * H, W)
    out = pl.pallas_call(
        functools.partial(bicubic_kernel, planes=P, h_in=H),
        out_shape=jax.ShapeDtypeStruct((P * out_size, out_size), jnp.float32),
        grid=(1,),
        in_specs=[pl.BlockSpec((P * H, W), lambda i: (0, 0)),
                  pl.BlockSpec((out_size, H), lambda i: (0, 0)),
                  pl.BlockSpec((W, out_size), lambda i: (0, 0))],
        out_specs=pl.BlockSpec((P * out_size, out_size), lambda i: (0, 0)),
        compiler_params=pltpu.CompilerParams(dimension_semantics=("arbitrary",)),
    )(flat, wr, wct)
    return out.reshape(B, C, out_size, out_size)


# ----------------------------------------------------------------------------
# Parameter construction (deterministic synthetic weights, timm-CaiT layout)
# ----------------------------------------------------------------------------
def make_cait_params(key, *, dim, depth, heads, num_tokens, patch,
                     in_chans=3, mlp_ratio=4):
    keys = iter(jax.random.split(key, 256))

    def init(shape, scale=0.02):
        return scale * jax.random.normal(next(keys), shape, jnp.float32)

    params = {
        "patch_w": init((in_chans * patch * patch, dim)),
        "patch_b": init((dim,)),
        "pos_embed": init((num_tokens, dim)),
        "norm_g": jnp.ones((dim,), jnp.float32),
        "norm_b": jnp.zeros((dim,), jnp.float32),
        "blocks": [],
    }
    hid = mlp_ratio * dim
    for _ in range(depth):
        params["blocks"].append({
            "ln1_g": jnp.ones((dim,), jnp.float32),
            "ln1_b": jnp.zeros((dim,), jnp.float32),
            "qkv_w": init((dim, 3 * dim)), "qkv_b": init((3 * dim,)),
            "proj_l_w": init((heads, heads)), "proj_l_b": init((heads,)),
            "proj_w_w": init((heads, heads)), "proj_w_b": init((heads,)),
            "proj_w": init((dim, dim)), "proj_b": init((dim,)),
            "gamma1": jnp.full((dim,), 1e-5, jnp.float32),
            "ln2_g": jnp.ones((dim,), jnp.float32),
            "ln2_b": jnp.zeros((dim,), jnp.float32),
            "fc1_w": init((dim, hid)), "fc1_b": init((hid,)),
            "fc2_w": init((hid, dim)), "fc2_b": init((dim,)),
            "gamma2": jnp.full((dim,), 1e-5, jnp.float32),
        })
    return params


def pack_for_kernel(params, *, num_heads):
    """Depth-stack, pre-scale q, pack small vectors, flatten TH scalars (once)."""
    D = params["patch_w"].shape[1]
    H = num_heads
    dh = D // H
    scale = float(dh) ** -0.5
    bf = jnp.bfloat16
    blocks = params["blocks"]
    hid = blocks[0]["fc1_w"].shape[1]
    W = max(3 * D, hid)

    # attention scale folded into the q third of the qkv weight + bias
    qscale = jnp.concatenate([jnp.full((D,), scale, jnp.float32),
                              jnp.ones((2 * D,), jnp.float32)])

    def padw(v):
        return jnp.pad(v, (0, W - v.shape[0]))

    vecs, qkvw, projw, f1w, f2w, th = [], [], [], [], [], []
    for b in blocks:
        qkvw.append((b["qkv_w"] * qscale[None, :]).astype(bf))
        projw.append(b["proj_w"].astype(bf))
        f1w.append(b["fc1_w"].astype(bf))
        f2w.append(b["fc2_w"].astype(bf))
        vecs.append(jnp.stack([
            padw(b["ln1_g"]), padw(b["ln1_b"]),
            padw(b["qkv_b"] * qscale),
            padw(b["proj_b"]), padw(b["gamma1"]),
            padw(b["ln2_g"]), padw(b["ln2_b"]),
            padw(b["fc1_b"]), padw(b["fc2_b"]), padw(b["gamma2"]),
        ]))
        # flat SMEM layout per block: [l_w (H*H), l_b (H), w_w (H*H), w_b (H)]
        th.append(jnp.concatenate([
            b["proj_l_w"].reshape(-1), b["proj_l_b"],
            b["proj_w_w"].reshape(-1), b["proj_w_b"]]))
    return {
        "pe_w": params["patch_w"].astype(bf),
        "pos_pe": params["pos_embed"] + params["patch_b"][None, :],
        "qkvw": jnp.stack(qkvw),           # (depth, D, 3D) bf16
        "projw": jnp.stack(projw),         # (depth, D, D)  bf16
        "f1w": jnp.stack(f1w),             # (depth, D, hid) bf16
        "f2w": jnp.stack(f2w),             # (depth, hid, D) bf16
        "vecs": jnp.stack(vecs),           # (depth, 10, W) f32
        "lnf": jnp.stack([params["norm_g"], params["norm_b"]]),   # (2, D) f32
        "th": jnp.concatenate(th),         # (depth*(2H^2+2H),) f32 -> SMEM
    }


def _extract_patches(img, patch):
    # NCHW -> (B, N, C*P*P) matching Conv2d(C, D, k=P, s=P) flattening order.
    B, C, H, W = img.shape
    Hp, Wp = H // patch, W // patch
    x = img.reshape(B, C, Hp, patch, Wp, patch)
    x = x.transpose(0, 2, 4, 1, 3, 5)
    return x.reshape(B, Hp * Wp, C * patch * patch)


# ----------------------------------------------------------------------------
# The module
# ----------------------------------------------------------------------------
class CaitFeatureExtractorPallas:
    """Scaled-down synthetic analog of anomalib's CaitFeatureExtractor.

    extractor1: dim=32, heads=4, depth=3, patch=4 on the full image     (scale 4)
    extractor2: dim=16, heads=2, depth=2, patch=4 on a bicubic /2 image (scale 8)
    The whole token path of each extractor (patch_embed -> blocks -> norm)
    runs as ONE fused Pallas kernel; both extractors + the resize run under a
    single jit so the tiny extractor-2 path can overlap with extractor 1.
    """

    def __init__(self, key):
        self.input_size = 32
        self.channels = [32, 16]
        self.scale_factors = [4, 8]
        self.heads = [4, 2]
        k1, k2 = jax.random.split(key)
        n1 = (self.input_size // 4) ** 2
        n2 = (self.input_size // 2 // 4) ** 2
        p1 = make_cait_params(k1, dim=32, depth=3, heads=4,
                              num_tokens=n1, patch=4)
        p2 = make_cait_params(k2, dim=16, depth=2, heads=2,
                              num_tokens=n2, patch=4)
        self.pk1 = pack_for_kernel(p1, num_heads=4)
        self.pk2 = pack_for_kernel(p2, num_heads=2)

    def extract_features(self, img):
        # NOTE: the final extractor.norm (applied in normalize_features in the
        # PyTorch module) is fused into the token kernel, so these tokens are
        # already LayerNorm'd; the end-to-end forward output is identical.
        x1 = cait_tokens_fused(_extract_patches(img, 4), self.pk1,
                               num_heads=self.heads[0])
        img_sub = bicubic_resize(img, self.input_size // 2)
        x2 = cait_tokens_fused(_extract_patches(img_sub, 4), self.pk2,
                               num_heads=self.heads[1])
        return x1, x2

    def normalize_features(self, features):
        normalized = []
        for x, sf in zip(features, self.scale_factors):
            B, _, C = x.shape
            s = self.input_size // sf
            y = x.transpose(0, 2, 1)                  # (B, C, N)
            normalized.append(y.reshape(B, C, s, s))  # (B, C, H/s, W/s)
        return normalized

    def __call__(self, img):
        return self.normalize_features(self.extract_features(img))


# ----------------------------------------------------------------------------
if __name__ == "__main__":
    key = jax.random.PRNGKey(0)
    k_img, k_model = jax.random.split(key)
    img = jax.random.normal(k_img, (2, 3, 32, 32), jnp.float32)   # NCHW like PyTorch

    model = CaitFeatureExtractorPallas(k_model)
    forward = jax.jit(model.__call__)
    feats = forward(img)
    feats = [jax.block_until_ready(f) for f in feats]

    assert feats[0].shape == (2, 32, 8, 8), feats[0].shape
    assert feats[1].shape == (2, 16, 4, 4), feats[1].shape
    assert all(bool(jnp.all(jnp.isfinite(f))) for f in feats)
    print("KERNEL_OK")
</pallas_src>

<mosaic_0001>
module attributes {stable_mosaic.version = 11 : i64} {
  func.func @fused_tokens_kernel(%arg0: i32, %arg1: i32, %arg2: memref<1x64x48xf32, #tpu.memory_space<vmem>>, %arg3: memref<48x32xbf16, #tpu.memory_space<vmem>>, %arg4: memref<64x32xf32, #tpu.memory_space<vmem>>, %arg5: memref<3x32x96xbf16, #tpu.memory_space<vmem>>, %arg6: memref<3x32x32xbf16, #tpu.memory_space<vmem>>, %arg7: memref<3x32x128xbf16, #tpu.memory_space<vmem>>, %arg8: memref<3x128x32xbf16, #tpu.memory_space<vmem>>, %arg9: memref<3x10x128xf32, #tpu.memory_space<vmem>>, %arg10: memref<2x32xf32, #tpu.memory_space<vmem>>, %arg11: memref<120xf32, #tpu.memory_space<smem>>, %arg12: memref<1x64x32xf32, #tpu.memory_space<vmem>>, %arg13: memref<64x32xf32, #tpu.memory_space<vmem>>) attributes {dimension_semantics = [#tpu.dimension_semantics<parallel>, #tpu.dimension_semantics<arbitrary>], iteration_bounds = array<i64: 2, 3>, scalar_prefetch = 0 : i64, scratch_operands = 1 : i64, tpu.core_type = #tpu.core_type<tc>, window_params = [{transform_indices = @transform_0, window_bounds = array<i64: 1, 64, 48>}, {pipeline_mode = #tpu.pipeline_mode<synchronous>, transform_indices = @transform_1, window_bounds = array<i64: 48, 32>}, {pipeline_mode = #tpu.pipeline_mode<synchronous>, transform_indices = @transform_2, window_bounds = array<i64: 64, 32>}, {pipeline_mode = #tpu.pipeline_mode<synchronous>, transform_indices = @transform_3, window_bounds = array<i64: 3, 32, 96>}, {pipeline_mode = #tpu.pipeline_mode<synchronous>, transform_indices = @transform_4, window_bounds = array<i64: 3, 32, 32>}, {pipeline_mode = #tpu.pipeline_mode<synchronous>, transform_indices = @transform_5, window_bounds = array<i64: 3, 32, 128>}, {pipeline_mode = #tpu.pipeline_mode<synchronous>, transform_indices = @transform_6, window_bounds = array<i64: 3, 128, 32>}, {pipeline_mode = #tpu.pipeline_mode<synchronous>, transform_indices = @transform_7, window_bounds = array<i64: 3, 10, 128>}, {pipeline_mode = #tpu.pipeline_mode<synchronous>, transform_indices = @transform_8, window_bounds = array<i64: 2, 32>}, {transform_indices = @transform_9, window_bounds = array<i64: 120>}, {transform_indices = @transform_10, window_bounds = array<i64: 1, 64, 32>}]} {
    %c40_i32 = arith.constant 40 : i32
    %0 = arith.muli %arg1, %c40_i32 : i32
    %c0_i32 = arith.constant 0 : i32
    %1 = arith.cmpi eq, %arg1, %c0_i32 : i32
    %2 = arith.extui %1 : i1 to i32
    %c0_i32_0 = arith.constant 0 : i32
    %3 = arith.cmpi ne, %2, %c0_i32_0 : i32
    scf.if %3 {
      %c0_149 = arith.constant 0 : index
      %c0_150 = arith.constant 0 : index
      %c0_151 = arith.constant 0 : index
      %463 = vector.load %arg2[%c0_149, %c0_150, %c0_151] : memref<1x64x48xf32, #tpu.memory_space<vmem>>, vector<1x64x48xf32>
      %464 = vector.shape_cast %463 : vector<1x64x48xf32> to vector<64x48xf32>
      %465 = arith.truncf %464 : vector<64x48xf32> to vector<64x48xbf16>
      %c0_152 = arith.constant 0 : index
      %c0_153 = arith.constant 0 : index
      %466 = vector.load %arg3[%c0_152, %c0_153] : memref<48x32xbf16, #tpu.memory_space<vmem>>, vector<48x32xbf16>
      %cst_154 = arith.constant dense<0.000000e+00> : vector<64x32xf32>
      %467 = tpu.matmul %465, %466, %cst_154 {dimension_numbers = #tpu.dot_dimension_numbers<[1], [0], [0], [1], [0, 0, 1, 1], [], []>} : vector<64x48xbf16>, vector<48x32xbf16>, vector<64x32xf32> -> vector<64x32xf32>
      %c0_155 = arith.constant 0 : index
      %c0_156 = arith.constant 0 : index
      %468 = vector.load %arg4[%c0_155, %c0_156] : memref<64x32xf32, #tpu.memory_space<vmem>>, vector<64x32xf32>
      %469 = arith.addf %467, %468 : vector<64x32xf32>
      %c0_157 = arith.constant 0 : index
      %c0_158 = arith.constant 0 : index
      %470 = vector.load %arg13[%c0_157, %c0_158] : memref<64x32xf32, #tpu.memory_space<vmem>>, vector<64x32xf32>
      tpu.vector_store %arg13[%c0_157, %c0_158], %469 {strides = array<i32>} : memref<64x32xf32, #tpu.memory_space<vmem>>, vector<64x32xf32>,
    } else {
    }
    %c0 = arith.constant 0 : index
    %c0_1 = arith.constant 0 : index
    %4 = vector.load %arg13[%c0, %c0_1] : memref<64x32xf32, #tpu.memory_space<vmem>>, vector<64x32xf32>
    %5 = arith.index_cast %arg1 : i32 to index
    %c0_2 = arith.constant 0 : index
    %c0_3 = arith.constant 0 : index
    %6 = vector.load %arg9[%5, %c0_2, %c0_3] : memref<3x10x128xf32, #tpu.memory_space<vmem>>, vector<1x10x128xf32>
    %7 = vector.shape_cast %6 : vector<1x10x128xf32> to vector<10x128xf32>
    %8 = vector.extract_strided_slice %7 {offsets = [0, 0], sizes = [1, 32], strides = [1, 1]} : vector<10x128xf32> to vector<1x32xf32>
    %9 = vector.extract_strided_slice %7 {offsets = [1, 0], sizes = [1, 32], strides = [1, 1]} : vector<10x128xf32> to vector<1x32xf32>
    %10 = vector.extract_strided_slice %7 {offsets = [2, 0], sizes = [1, 96], strides = [1, 1]} : vector<10x128xf32> to vector<1x96xf32>
    %11 = vector.extract_strided_slice %7 {offsets = [3, 0], sizes = [1, 32], strides = [1, 1]} : vector<10x128xf32> to vector<1x32xf32>
    %12 = vector.extract_strided_slice %7 {offsets = [4, 0], sizes = [1, 32], strides = [1, 1]} : vector<10x128xf32> to vector<1x32xf32>
    %13 = vector.extract_strided_slice %7 {offsets = [5, 0], sizes = [1, 32], strides = [1, 1]} : vector<10x128xf32> to vector<1x32xf32>
    %14 = vector.extract_strided_slice %7 {offsets = [6, 0], sizes = [1, 32], strides = [1, 1]} : vector<10x128xf32> to vector<1x32xf32>
    %15 = vector.extract_strided_slice %7 {offsets = [7, 0], sizes = [1, 128], strides = [1, 1]} : vector<10x128xf32> to vector<1x128xf32>
    %16 = vector.extract_strided_slice %7 {offsets = [8, 0], sizes = [1, 32], strides = [1, 1]} : vector<10x128xf32> to vector<1x32xf32>
    %17 = vector.extract_strided_slice %7 {offsets = [9, 0], sizes = [1, 32], strides = [1, 1]} : vector<10x128xf32> to vector<1x32xf32>
    %cst = arith.constant dense<0.000000e+00> : vector<64xf32>
    %18 = vector.multi_reduction <add>, %4, %cst [1] : vector<64x32xf32> to vector<64xf32>
    %19 = vector.shape_cast %18 : vector<64xf32> to vector<64x1xf32>
    %cst_4 = arith.constant 3.200000e+01 : f32
    %20 = vector.broadcast %cst_4 : f32 to vector<64x1xf32>
    %21 = arith.divf %19, %20 : vector<64x1xf32>
    %22 = vector.broadcast %21 : vector<64x1xf32> to vector<64x32xf32>
    %23 = arith.subf %4, %22 : vector<64x32xf32>
    %24 = arith.mulf %23, %23 : vector<64x32xf32>
    %cst_5 = arith.constant dense<0.000000e+00> : vector<64xf32>
    %25 = vector.multi_reduction <add>, %24, %cst_5 [1] : vector<64x32xf32> to vector<64xf32>
    %26 = vector.shape_cast %25 : vector<64xf32> to vector<64x1xf32>
    %cst_6 = arith.constant 3.200000e+01 : f32
    %27 = vector.broadcast %cst_6 : f32 to vector<64x1xf32>
    %28 = arith.divf %26, %27 : vector<64x1xf32>
    %cst_7 = arith.constant 9.99999997E-7 : f32
    %29 = vector.broadcast %cst_7 : f32 to vector<64x1xf32>
    %30 = arith.addf %28, %29 : vector<64x1xf32>
    %31 = math.rsqrt %30 : vector<64x1xf32>
    %32 = vector.broadcast %31 : vector<64x1xf32> to vector<64x32xf32>
    %33 = arith.mulf %23, %32 : vector<64x32xf32>
    %34 = vector.broadcast %8 : vector<1x32xf32> to vector<64x32xf32>
    %35 = arith.mulf %33, %34 : vector<64x32xf32>
    %36 = vector.broadcast %9 : vector<1x32xf32> to vector<64x32xf32>
    %37 = arith.addf %35, %36 : vector<64x32xf32>
    %38 = arith.truncf %37 : vector<64x32xf32> to vector<64x32xbf16>
    %39 = arith.index_cast %arg1 : i32 to index
    %c0_8 = arith.constant 0 : index
    %c0_9 = arith.constant 0 : index
    %40 = vector.load %arg5[%39, %c0_8, %c0_9] : memref<3x32x96xbf16, #tpu.memory_space<vmem>>, vector<1x32x96xbf16>
    %41 = vector.shape_cast %40 : vector<1x32x96xbf16> to vector<32x96xbf16>
    %cst_10 = arith.constant dense<0.000000e+00> : vector<64x96xf32>
    %42 = tpu.matmul %38, %41, %cst_10 {dimension_numbers = #tpu.dot_dimension_numbers<[1], [0], [0], [1], [0, 0, 1, 1], [], []>} : vector<64x32xbf16>, vector<32x96xbf16>, vector<64x96xf32> -> vector<64x96xf32>
    %43 = vector.broadcast %10 : vector<1x96xf32> to vector<64x96xf32>
    %44 = arith.addf %42, %43 : vector<64x96xf32>
    %45 = arith.truncf %44 : vector<64x96xf32> to vector<64x96xbf16>
    %46 = vector.extract_strided_slice %45 {offsets = [0, 0], sizes = [64, 8], strides = [1, 1]} : vector<64x96xbf16> to vector<64x8xbf16>
    %47 = vector.extract_strided_slice %45 {offsets = [0, 32], sizes = [64, 8], strides = [1, 1]} : vector<64x96xbf16> to vector<64x8xbf16>
    %48 = vector.extract_strided_slice %45 {offsets = [0, 64], sizes = [64, 8], strides = [1, 1]} : vector<64x96xbf16> to vector<64x8xbf16>
    %cst_11 = arith.constant dense<0.000000e+00> : vector<64x64xf32>
    %49 = tpu.matmul %46, %47, %cst_11 {dimension_numbers = #tpu.dot_dimension_numbers<[1], [1], [0], [0], [0, 0, 1, 0], [], []>} : vector<64x8xbf16>, vector<64x8xbf16>, vector<64x64xf32> -> vector<64x64xf32>
    %50 = vector.extract_strided_slice %45 {offsets = [0, 8], sizes = [64, 8], strides = [1, 1]} : vector<64x96xbf16> to vector<64x8xbf16>
    %51 = vector.extract_strided_slice %45 {offsets = [0, 40], sizes = [64, 8], strides = [1, 1]} : vector<64x96xbf16> to vector<64x8xbf16>
    %52 = vector.extract_strided_slice %45 {offsets = [0, 72], sizes = [64, 8], strides = [1, 1]} : vector<64x96xbf16> to vector<64x8xbf16>
    %cst_12 = arith.constant dense<0.000000e+00> : vector<64x64xf32>
    %53 = tpu.matmul %50, %51, %cst_12 {dimension_numbers = #tpu.dot_dimension_numbers<[1], [1], [0], [0], [0, 0, 1, 0], [], []>} : vector<64x8xbf16>, vector<64x8xbf16>, vector<64x64xf32> -> vector<64x64xf32>
    %54 = vector.extract_strided_slice %45 {offsets = [0, 16], sizes = [64, 8], strides = [1, 1]} : vector<64x96xbf16> to vector<64x8xbf16>
    %55 = vector.extract_strided_slice %45 {offsets = [0, 48], sizes = [64, 8], strides = [1, 1]} : vector<64x96xbf16> to vector<64x8xbf16>
    %56 = vector.extract_strided_slice %45 {offsets = [0, 80], sizes = [64, 8], strides = [1, 1]} : vector<64x96xbf16> to vector<64x8xbf16>
    %cst_13 = arith.constant dense<0.000000e+00> : vector<64x64xf32>
    %57 = tpu.matmul %54, %55, %cst_13 {dimension_numbers = #tpu.dot_dimension_numbers<[1], [1], [0], [0], [0, 0, 1, 0], [], []>} : vector<64x8xbf16>, vector<64x8xbf16>, vector<64x64xf32> -> vector<64x64xf32>
    %58 = vector.extract_strided_slice %45 {offsets = [0, 24], sizes = [64, 8], strides = [1, 1]} : vector<64x96xbf16> to vector<64x8xbf16>
    %59 = vector.extract_strided_slice %45 {offsets = [0, 56], sizes = [64, 8], strides = [1, 1]} : vector<64x96xbf16> to vector<64x8xbf16>
    %60 = vector.extract_strided_slice %45 {offsets = [0, 88], sizes = [64, 8], strides = [1, 1]} : vector<64x96xbf16> to vector<64x8xbf16>
    %cst_14 = arith.constant dense<0.000000e+00> : vector<64x64xf32>
    %61 = tpu.matmul %58, %59, %cst_14 {dimension_numbers = #tpu.dot_dimension_numbers<[1], [1], [0], [0], [0, 0, 1, 0], [], []>} : vector<64x8xbf16>, vector<64x8xbf16>, vector<64x64xf32> -> vector<64x64xf32>
    %c0_i32_15 = arith.constant 0 : i32
    %62 = arith.addi %0, %c0_i32_15 : i32
    %63 = arith.index_cast %62 : i32 to index
    %64 = memref.load %arg11[%63] : memref<120xf32, #tpu.memory_space<smem>>
    %65 = vector.broadcast %64 : f32 to vector<64x64xf32>
    %66 = arith.mulf %65, %49 : vector<64x64xf32>
    %c0_i32_16 = arith.constant 0 : i32
    %67 = arith.addi %0, %c0_i32_16 : i32
    %c1_i32 = arith.constant 1 : i32
    %68 = arith.addi %67, %c1_i32 : i32
    %69 = arith.index_cast %68 : i32 to index
    %70 = memref.load %arg11[%69] : memref<120xf32, #tpu.memory_space<smem>>
    %71 = vector.broadcast %70 : f32 to vector<64x64xf32>
    %72 = arith.mulf %71, %53 : vector<64x64xf32>
    %73 = arith.addf %66, %72 : vector<64x64xf32>
    %c0_i32_17 = arith.constant 0 : i32
    %74 = arith.addi %0, %c0_i32_17 : i32
    %c2_i32 = arith.constant 2 : i32
    %75 = arith.addi %74, %c2_i32 : i32
    %76 = arith.index_cast %75 : i32 to index
    %77 = memref.load %arg11[%76] : memref<120xf32, #tpu.memory_space<smem>>
    %78 = vector.broadcast %77 : f32 to vector<64x64xf32>
    %79 = arith.mulf %78, %57 : vector<64x64xf32>
    %80 = arith.addf %73, %79 : vector<64x64xf32>
    %c0_i32_18 = arith.constant 0 : i32
    %81 = arith.addi %0, %c0_i32_18 : i32
    %c3_i32 = arith.constant 3 : i32
    %82 = arith.addi %81, %c3_i32 : i32
    %83 = arith.index_cast %82 : i32 to index
    %84 = memref.load %arg11[%83] : memref<120xf32, #tpu.memory_space<smem>>
    %85 = vector.broadcast %84 : f32 to vector<64x64xf32>
    %86 = arith.mulf %85, %61 : vector<64x64xf32>
    %87 = arith.addf %80, %86 : vector<64x64xf32>
    %c16_i32 = arith.constant 16 : i32
    %88 = arith.addi %0, %c16_i32 : i32
    %c0_i32_19 = arith.constant 0 : i32
    %89 = arith.addi %88, %c0_i32_19 : i32
    %90 = arith.index_cast %89 : i32 to index
    %91 = memref.load %arg11[%90] : memref<120xf32, #tpu.memory_space<smem>>
    %92 = vector.broadcast %91 : f32 to vector<64x64xf32>
    %93 = arith.addf %87, %92 : vector<64x64xf32>
    %cst_20 = arith.constant dense<0xFF800000> : vector<64xf32>
    %94 = vector.multi_reduction <maximumf>, %93, %cst_20 [1] : vector<64x64xf32> to vector<64xf32>
    %95 = vector.shape_cast %94 : vector<64xf32> to vector<64x1xf32>
    %96 = vector.broadcast %95 : vector<64x1xf32> to vector<64x64xf32>
    %97 = arith.subf %93, %96 : vector<64x64xf32>
    %98 = math.exp %97 : vector<64x64xf32>
    %cst_21 = arith.constant dense<0.000000e+00> : vector<64xf32>
    %99 = vector.multi_reduction <add>, %98, %cst_21 [1] : vector<64x64xf32> to vector<64xf32>
    %100 = vector.shape_cast %99 : vector<64xf32> to vector<64x1xf32>
    %101 = vector.broadcast %100 : vector<64x1xf32> to vector<64x64xf32>
    %102 = arith.divf %98, %101 : vector<64x64xf32>
    %c4_i32 = arith.constant 4 : i32
    %103 = arith.addi %0, %c4_i32 : i32
    %104 = arith.index_cast %103 : i32 to index
    %105 = memref.load %arg11[%104] : memref<120xf32, #tpu.memory_space<smem>>
    %106 = vector.broadcast %105 : f32 to vector<64x64xf32>
    %107 = arith.mulf %106, %49 : vector<64x64xf32>
    %c4_i32_22 = arith.constant 4 : i32
    %108 = arith.addi %0, %c4_i32_22 : i32
    %c1_i32_23 = arith.constant 1 : i32
    %109 = arith.addi %108, %c1_i32_23 : i32
    %110 = arith.index_cast %109 : i32 to index
    %111 = memref.load %arg11[%110] : memref<120xf32, #tpu.memory_space<smem>>
    %112 = vector.broadcast %111 : f32 to vector<64x64xf32>
    %113 = arith.mulf %112, %53 : vector<64x64xf32>
    %114 = arith.addf %107, %113 : vector<64x64xf32>
    %c4_i32_24 = arith.constant 4 : i32
    %115 = arith.addi %0, %c4_i32_24 : i32
    %c2_i32_25 = arith.constant 2 : i32
    %116 = arith.addi %115, %c2_i32_25 : i32
    %117 = arith.index_cast %116 : i32 to index
    %118 = memref.load %arg11[%117] : memref<120xf32, #tpu.memory_space<smem>>
    %119 = vector.broadcast %118 : f32 to vector<64x64xf32>
    %120 = arith.mulf %119, %57 : vector<64x64xf32>
    %121 = arith.addf %114, %120 : vector<64x64xf32>
    %c4_i32_26 = arith.constant 4 : i32
    %122 = arith.addi %0, %c4_i32_26 : i32
    %c3_i32_27 = arith.constant 3 : i32
    %123 = arith.addi %122, %c3_i32_27 : i32
    %124 = arith.index_cast %123 : i32 to index
    %125 = memref.load %arg11[%124] : memref<120xf32, #tpu.memory_space<smem>>
    %126 = vector.broadcast %125 : f32 to vector<64x64xf32>
    %127 = arith.mulf %126, %61 : vector<64x64xf32>
    %128 = arith.addf %121, %127 : vector<64x64xf32>
    %c16_i32_28 = arith.constant 16 : i32
    %129 = arith.addi %0, %c16_i32_28 : i32
    %c1_i32_29 = arith.constant 1 : i32
    %130 = arith.addi %129, %c1_i32_29 : i32
    %131 = arith.index_cast %130 : i32 to index
    %132 = memref.load %arg11[%131] : memref<120xf32, #tpu.memory_space<smem>>
    %133 = vector.broadcast %132 : f32 to vector<64x64xf32>
    %134 = arith.addf %128, %133 : vector<64x64xf32>
    %cst_30 = arith.constant dense<0xFF800000> : vector<64xf32>
    %135 = vector.multi_reduction <maximumf>, %134, %cst_30 [1] : vector<64x64xf32> to vector<64xf32>
    %136 = vector.shape_cast %135 : vector<64xf32> to vector<64x1xf32>
    %137 = vector.broadcast %136 : vector<64x1xf32> to vector<64x64xf32>
    %138 = arith.subf %134, %137 : vector<64x64xf32>
    %139 = math.exp %138 : vector<64x64xf32>
    %cst_31 = arith.constant dense<0.000000e+00> : vector<64xf32>
    %140 = vector.multi_reduction <add>, %139, %cst_31 [1] : vector<64x64xf32> to vector<64xf32>
    %141 = vector.shape_cast %140 : vector<64xf32> to vector<64x1xf32>
    %142 = vector.broadcast %141 : vector<64x1xf32> to vector<64x64xf32>
    %143 = arith.divf %139, %142 : vector<64x64xf32>
    %c8_i32 = arith.constant 8 : i32
    %144 = arith.addi %0, %c8_i32 : i32
    %145 = arith.index_cast %144 : i32 to index
    %146 = memref.load %arg11[%145] : memref<120xf32, #tpu.memory_space<smem>>
    %147 = vector.broadcast %146 : f32 to vector<64x64xf32>
    %148 = arith.mulf %147, %49 : vector<64x64xf32>
    %c8_i32_32 = arith.constant 8 : i32
    %149 = arith.addi %0, %c8_i32_32 : i32
    %c1_i32_33 = arith.constant 1 : i32
    %150 = arith.addi %149, %c1_i32_33 : i32
    %151 = arith.index_cast %150 : i32 to index
    %152 = memref.load %arg11[%151] : memref<120xf32, #tpu.memory_space<smem>>
    %153 = vector.broadcast %152 : f32 to vector<64x64xf32>
    %154 = arith.mulf %153, %53 : vector<64x64xf32>
    %155 = arith.addf %148, %154 : vector<64x64xf32>
    %c8_i32_34 = arith.constant 8 : i32
    %156 = arith.addi %0, %c8_i32_34 : i32
    %c2_i32_35 = arith.constant 2 : i32
    %157 = arith.addi %156, %c2_i32_35 : i32
    %158 = arith.index_cast %157 : i32 to index
    %159 = memref.load %arg11[%158] : memref<120xf32, #tpu.memory_space<smem>>
    %160 = vector.broadcast %159 : f32 to vector<64x64xf32>
    %161 = arith.mulf %160, %57 : vector<64x64xf32>
    %162 = arith.addf %155, %161 : vector<64x64xf32>
    %c8_i32_36 = arith.constant 8 : i32
    %163 = arith.addi %0, %c8_i32_36 : i32
    %c3_i32_37 = arith.constant 3 : i32
    %164 = arith.addi %163, %c3_i32_37 : i32
    %165 = arith.index_cast %164 : i32 to index
    %166 = memref.load %arg11[%165] : memref<120xf32, #tpu.memory_space<smem>>
    %167 = vector.broadcast %166 : f32 to vector<64x64xf32>
    %168 = arith.mulf %167, %61 : vector<64x64xf32>
    %169 = arith.addf %162, %168 : vector<64x64xf32>
    %c16_i32_38 = arith.constant 16 : i32
    %170 = arith.addi %0, %c16_i32_38 : i32
    %c2_i32_39 = arith.constant 2 : i32
    %171 = arith.addi %170, %c2_i32_39 : i32
    %172 = arith.index_cast %171 : i32 to index
    %173 = memref.load %arg11[%172] : memref<120xf32, #tpu.memory_space<smem>>
    %174 = vector.broadcast %173 : f32 to vector<64x64xf32>
    %175 = arith.addf %169, %174 : vector<64x64xf32>
    %cst_40 = arith.constant dense<0xFF800000> : vector<64xf32>
    %176 = vector.multi_reduction <maximumf>, %175, %cst_40 [1] : vector<64x64xf32> to vector<64xf32>
    %177 = vector.shape_cast %176 : vector<64xf32> to vector<64x1xf32>
    %178 = vector.broadcast %177 : vector<64x1xf32> to vector<64x64xf32>
    %179 = arith.subf %175, %178 : vector<64x64xf32>
    %180 = math.exp %179 : vector<64x64xf32>
    %cst_41 = arith.constant dense<0.000000e+00> : vector<64xf32>
    %181 = vector.multi_reduction <add>, %180, %cst_41 [1] : vector<64x64xf32> to vector<64xf32>
    %182 = vector.shape_cast %181 : vector<64xf32> to vector<64x1xf32>
    %183 = vector.broadcast %182 : vector<64x1xf32> to vector<64x64xf32>
    %184 = arith.divf %180, %183 : vector<64x64xf32>
    %c12_i32 = arith.constant 12 : i32
    %185 = arith.addi %0, %c12_i32 : i32
    %186 = arith.index_cast %185 : i32 to index
    %187 = memref.load %arg11[%186] : memref<120xf32, #tpu.memory_space<smem>>
    %188 = vector.broadcast %187 : f32 to vector<64x64xf32>
    %189 = arith.mulf %188, %49 : vector<64x64xf32>
    %c12_i32_42 = arith.constant 12 : i32
    %190 = arith.addi %0, %c12_i32_42 : i32
    %c1_i32_43 = arith.constant 1 : i32
    %191 = arith.addi %190, %c1_i32_43 : i32
    %192 = arith.index_cast %191 : i32 to index
    %193 = memref.load %arg11[%192] : memref<120xf32, #tpu.memory_space<smem>>
    %194 = vector.broadcast %193 : f32 to vector<64x64xf32>
    %195 = arith.mulf %194, %53 : vector<64x64xf32>
    %196 = arith.addf %189, %195 : vector<64x64xf32>
    %c12_i32_44 = arith.constant 12 : i32
    %197 = arith.addi %0, %c12_i32_44 : i32
    %c2_i32_45 = arith.constant 2 : i32
    %198 = arith.addi %197, %c2_i32_45 : i32
    %199 = arith.index_cast %198 : i32 to index
    %200 = memref.load %arg11[%199] : memref<120xf32, #tpu.memory_space<smem>>
    %201 = vector.broadcast %200 : f32 to vector<64x64xf32>
    %202 = arith.mulf %201, %57 : vector<64x64xf32>
    %203 = arith.addf %196, %202 : vector<64x64xf32>
    %c12_i32_46 = arith.constant 12 : i32
    %204 = arith.addi %0, %c12_i32_46 : i32
    %c3_i32_47 = arith.constant 3 : i32
    %205 = arith.addi %204, %c3_i32_47 : i32
    %206 = arith.index_cast %205 : i32 to index
    %207 = memref.load %arg11[%206] : memref<120xf32, #tpu.memory_space<smem>>
    %208 = vector.broadcast %207 : f32 to vector<64x64xf32>
    %209 = arith.mulf %208, %61 : vector<64x64xf32>
    %210 = arith.addf %203, %209 : vector<64x64xf32>
    %c16_i32_48 = arith.constant 16 : i32
    %211 = arith.addi %0, %c16_i32_48 : i32
    %c3_i32_49 = arith.constant 3 : i32
    %212 = arith.addi %211, %c3_i32_49 : i32
    %213 = arith.index_cast %212 : i32 to index
    %214 = memref.load %arg11[%213] : memref<120xf32, #tpu.memory_space<smem>>
    %215 = vector.broadcast %214 : f32 to vector<64x64xf32>
    %216 = arith.addf %210, %215 : vector<64x64xf32>
    %cst_50 = arith.constant dense<0xFF800000> : vector<64xf32>
    %217 = vector.multi_reduction <maximumf>, %216, %cst_50 [1] : vector<64x64xf32> to vector<64xf32>
    %218 = vector.shape_cast %217 : vector<64xf32> to vector<64x1xf32>
    %219 = vector.broadcast %218 : vector<64x1xf32> to vector<64x64xf32>
    %220 = arith.subf %216, %219 : vector<64x64xf32>
    %221 = math.exp %220 : vector<64x64xf32>
    %cst_51 = arith.constant dense<0.000000e+00> : vector<64xf32>
    %222 = vector.multi_reduction <add>, %221, %cst_51 [1] : vector<64x64xf32> to vector<64xf32>
    %223 = vector.shape_cast %222 : vector<64xf32> to vector<64x1xf32>
    %224 = vector.broadcast %223 : vector<64x1xf32> to vector<64x64xf32>
    %225 = arith.divf %221, %224 : vector<64x64xf32>
    %c16_i32_52 = arith.constant 16 : i32
    %226 = arith.addi %0, %c16_i32_52 : i32
    %c4_i32_53 = arith.constant 4 : i32
    %227 = arith.addi %226, %c4_i32_53 : i32
    %c0_i32_54 = arith.constant 0 : i32
    %228 = arith.addi %227, %c0_i32_54 : i32
    %229 = arith.index_cast %228 : i32 to index
    %230 = memref.load %arg11[%229] : memref<120xf32, #tpu.memory_space<smem>>
    %231 = vector.broadcast %230 : f32 to vector<64x64xf32>
    %232 = arith.mulf %231, %102 : vector<64x64xf32>
    %c16_i32_55 = arith.constant 16 : i32
    %233 = arith.addi %0, %c16_i32_55 : i32
    %c4_i32_56 = arith.constant 4 : i32
    %234 = arith.addi %233, %c4_i32_56 : i32
    %c0_i32_57 = arith.constant 0 : i32
    %235 = arith.addi %234, %c0_i32_57 : i32
    %c1_i32_58 = arith.constant 1 : i32
    %236 = arith.addi %235, %c1_i32_58 : i32
    %237 = arith.index_cast %236 : i32 to index
    %238 = memref.load %arg11[%237] : memref<120xf32, #tpu.memory_space<smem>>
    %239 = vector.broadcast %238 : f32 to vector<64x64xf32>
    %240 = arith.mulf %239, %143 : vector<64x64xf32>
    %241 = arith.addf %232, %240 : vector<64x64xf32>
    %c16_i32_59 = arith.constant 16 : i32
    %242 = arith.addi %0, %c16_i32_59 : i32
    %c4_i32_60 = arith.constant 4 : i32
    %243 = arith.addi %242, %c4_i32_60 : i32
    %c0_i32_61 = arith.constant 0 : i32
    %244 = arith.addi %243, %c0_i32_61 : i32
    %c2_i32_62 = arith.constant 2 : i32
    %245 = arith.addi %244, %c2_i32_62 : i32
    %246 = arith.index_cast %245 : i32 to index
    %247 = memref.load %arg11[%246] : memref<120xf32, #tpu.memory_space<smem>>
    %248 = vector.broadcast %247 : f32 to vector<64x64xf32>
    %249 = arith.mulf %248, %184 : vector<64x64xf32>
    %250 = arith.addf %241, %249 : vector<64x64xf32>
    %c16_i32_63 = arith.constant 16 : i32
    %251 = arith.addi %0, %c16_i32_63 : i32
    %c4_i32_64 = arith.constant 4 : i32
    %252 = arith.addi %251, %c4_i32_64 : i32
    %c0_i32_65 = arith.constant 0 : i32
    %253 = arith.addi %252, %c0_i32_65 : i32
    %c3_i32_66 = arith.constant 3 : i32
    %254 = arith.addi %253, %c3_i32_66 : i32
    %255 = arith.index_cast %254 : i32 to index
    %256 = memref.load %arg11[%255] : memref<120xf32, #tpu.memory_space<smem>>
    %257 = vector.broadcast %256 : f32 to vector<64x64xf32>
    %258 = arith.mulf %257, %225 : vector<64x64xf32>
    %259 = arith.addf %250, %258 : vector<64x64xf32>
    %c32_i32 = arith.constant 32 : i32
    %260 = arith.addi %0, %c32_i32 : i32
    %c4_i32_67 = arith.constant 4 : i32
    %261 = arith.addi %260, %c4_i32_67 : i32
    %c0_i32_68 = arith.constant 0 : i32
    %262 = arith.addi %261, %c0_i32_68 : i32
    %263 = arith.index_cast %262 : i32 to index
    %264 = memref.load %arg11[%263] : memref<120xf32, #tpu.memory_space<smem>>
    %265 = vector.broadcast %264 : f32 to vector<64x64xf32>
    %266 = arith.addf %259, %265 : vector<64x64xf32>
    %267 = arith.truncf %266 : vector<64x64xf32> to vector<64x64xbf16>
    %cst_69 = arith.constant dense<0.000000e+00> : vector<64x8xf32>
    %268 = tpu.matmul %267, %48, %cst_69 {dimension_numbers = #tpu.dot_dimension_numbers<[1], [0], [0], [1], [0, 0, 1, 1], [], []>} : vector<64x64xbf16>, vector<64x8xbf16>, vector<64x8xf32> -> vector<64x8xf32>
    %c16_i32_70 = arith.constant 16 : i32
    %269 = arith.addi %0, %c16_i32_70 : i32
    %c4_i32_71 = arith.constant 4 : i32
    %270 = arith.addi %269, %c4_i32_71 : i32
    %c4_i32_72 = arith.constant 4 : i32
    %271 = arith.addi %270, %c4_i32_72 : i32
    %272 = arith.index_cast %271 : i32 to index
    %273 = memref.load %arg11[%272] : memref<120xf32, #tpu.memory_space<smem>>
    %274 = vector.broadcast %273 : f32 to vector<64x64xf32>
    %275 = arith.mulf %274, %102 : vector<64x64xf32>
    %c16_i32_73 = arith.constant 16 : i32
    %276 = arith.addi %0, %c16_i32_73 : i32
    %c4_i32_74 = arith.constant 4 : i32
    %277 = arith.addi %276, %c4_i32_74 : i32
    %c4_i32_75 = arith.constant 4 : i32
    %278 = arith.addi %277, %c4_i32_75 : i32
    %c1_i32_76 = arith.constant 1 : i32
    %279 = arith.addi %278, %c1_i32_76 : i32
    %280 = arith.index_cast %279 : i32 to index
    %281 = memref.load %arg11[%280] : memref<120xf32, #tpu.memory_space<smem>>
    %282 = vector.broadcast %281 : f32 to vector<64x64xf32>
    %283 = arith.mulf %282, %143 : vector<64x64xf32>
    %284 = arith.addf %275, %283 : vector<64x64xf32>
    %c16_i32_77 = arith.constant 16 : i32
    %285 = arith.addi %0, %c16_i32_77 : i32
    %c4_i32_78 = arith.constant 4 : i32
    %286 = arith.addi %285, %c4_i32_78 : i32
    %c4_i32_79 = arith.constant 4 : i32
    %287 = arith.addi %286, %c4_i32_79 : i32
    %c2_i32_80 = arith.constant 2 : i32
    %288 = arith.addi %287, %c2_i32_80 : i32
    %289 = arith.index_cast %288 : i32 to index
    %290 = memref.load %arg11[%289] : memref<120xf32, #tpu.memory_space<smem>>
    %291 = vector.broadcast %290 : f32 to vector<64x64xf32>
    %292 = arith.mulf %291, %184 : vector<64x64xf32>
    %293 = arith.addf %284, %292 : vector<64x64xf32>
    %c16_i32_81 = arith.constant 16 : i32
    %294 = arith.addi %0, %c16_i32_81 : i32
    %c4_i32_82 = arith.constant 4 : i32
    %295 = arith.addi %294, %c4_i32_82 : i32
    %c4_i32_83 = arith.constant 4 : i32
    %296 = arith.addi %295, %c4_i32_83 : i32
    %c3_i32_84 = arith.constant 3 : i32
    %297 = arith.addi %296, %c3_i32_84 : i32
    %298 = arith.index_cast %297 : i32 to index
    %299 = memref.load %arg11[%298] : memref<120xf32, #tpu.memory_space<smem>>
    %300 = vector.broadcast %299 : f32 to vector<64x64xf32>
    %301 = arith.mulf %300, %225 : vector<64x64xf32>
    %302 = arith.addf %293, %301 : vector<64x64xf32>
    %c32_i32_85 = arith.constant 32 : i32
    %303 = arith.addi %0, %c32_i32_85 : i32
    %c4_i32_86 = arith.constant 4 : i32
    %304 = arith.addi %303, %c4_i32_86 : i32
    %c1_i32_87 = arith.constant 1 : i32
    %305 = arith.addi %304, %c1_i32_87 : i32
    %306 = arith.index_cast %305 : i32 to index
    %307 = memref.load %arg11[%306] : memref<120xf32, #tpu.memory_space<smem>>
    %308 = vector.broadcast %307 : f32 to vector<64x64xf32>
    %309 = arith.addf %302, %308 : vector<64x64xf32>
    %310 = arith.truncf %309 : vector<64x64xf32> to vector<64x64xbf16>
    %cst_88 = arith.constant dense<0.000000e+00> : vector<64x8xf32>
    %311 = tpu.matmul %310, %52, %cst_88 {dimension_numbers = #tpu.dot_dimension_numbers<[1], [0], [0], [1], [0, 0, 1, 1], [], []>} : vector<64x64xbf16>, vector<64x8xbf16>, vector<64x8xf32> -> vector<64x8xf32>
    %c16_i32_89 = arith.constant 16 : i32
    %312 = arith.addi %0, %c16_i32_89 : i32
    %c4_i32_90 = arith.constant 4 : i32
    %313 = arith.addi %312, %c4_i32_90 : i32
    %c8_i32_91 = arith.constant 8 : i32
    %314 = arith.addi %313, %c8_i32_91 : i32
    %315 = arith.index_cast %314 : i32 to index
    %316 = memref.load %arg11[%315] : memref<120xf32, #tpu.memory_space<smem>>
    %317 = vector.broadcast %316 : f32 to vector<64x64xf32>
    %318 = arith.mulf %317, %102 : vector<64x64xf32>
    %c16_i32_92 = arith.constant 16 : i32
    %319 = arith.addi %0, %c16_i32_92 : i32
    %c4_i32_93 = arith.constant 4 : i32
    %320 = arith.addi %319, %c4_i32_93 : i32
    %c8_i32_94 = arith.constant 8 : i32
    %321 = arith.addi %320, %c8_i32_94 : i32
    %c1_i32_95 = arith.constant 1 : i32
    %322 = arith.addi %321, %c1_i32_95 : i32
    %323 = arith.index_cast %322 : i32 to index
    %324 = memref.load %arg11[%323] : memref<120xf32, #tpu.memory_space<smem>>
    %325 = vector.broadcast %324 : f32 to vector<64x64xf32>
    %326 = arith.mulf %325, %143 : vector<64x64xf32>
    %327 = arith.addf %318, %326 : vector<64x64xf32>
    %c16_i32_96 = arith.constant 16 : i32
    %328 = arith.addi %0, %c16_i32_96 : i32
    %c4_i32_97 = arith.constant 4 : i32
    %329 = arith.addi %328, %c4_i32_97 : i32
    %c8_i32_98 = arith.constant 8 : i32
    %330 = arith.addi %329, %c8_i32_98 : i32
    %c2_i32_99 = arith.constant 2 : i32
    %331 = arith.addi %330, %c2_i32_99 : i32
    %332 = arith.index_cast %331 : i32 to index
    %333 = memref.load %arg11[%332] : memref<120xf32, #tpu.memory_space<smem>>
    %334 = vector.broadcast %333 : f32 to vector<64x64xf32>
    %335 = arith.mulf %334, %184 : vector<64x64xf32>
    %336 = arith.addf %327, %335 : vector<64x64xf32>
    %c16_i32_100 = arith.constant 16 : i32
    %337 = arith.addi %0, %c16_i32_100 : i32
    %c4_i32_101 = arith.constant 4 : i32
    %338 = arith.addi %337, %c4_i32_101 : i32
    %c8_i32_102 = arith.constant 8 : i32
    %339 = arith.addi %338, %c8_i32_102 : i32
    %c3_i32_103 = arith.constant 3 : i32
    %340 = arith.addi %339, %c3_i32_103 : i32
    %341 = arith.index_cast %340 : i32 to index
    %342 = memref.load %arg11[%341] : memref<120xf32, #tpu.memory_space<smem>>
    %343 = vector.broadcast %342 : f32 to vector<64x64xf32>
    %344 = arith.mulf %343, %225 : vector<64x64xf32>
    %345 = arith.addf %336, %344 : vector<64x64xf32>
    %c32_i32_104 = arith.constant 32 : i32
    %346 = arith.addi %0, %c32_i32_104 : i32
    %c4_i32_105 = arith.constant 4 : i32
    %347 = arith.addi %346, %c4_i32_105 : i32
    %c2_i32_106 = arith.constant 2 : i32
    %348 = arith.addi %347, %c2_i32_106 : i32
    %349 = arith.index_cast %348 : i32 to index
    %350 = memref.load %arg11[%349] : memref<120xf32, #tpu.memory_space<smem>>
    %351 = vector.broadcast %350 : f32 to vector<64x64xf32>
    %352 = arith.addf %345, %351 : vector<64x64xf32>
    %353 = arith.truncf %352 : vector<64x64xf32> to vector<64x64xbf16>
    %cst_107 = arith.constant dense<0.000000e+00> : vector<64x8xf32>
    %354 = tpu.matmul %353, %56, %cst_107 {dimension_numbers = #tpu.dot_dimension_numbers<[1], [0], [0], [1], [0, 0, 1, 1], [], []>} : vector<64x64xbf16>, vector<64x8xbf16>, vector<64x8xf32> -> vector<64x8xf32>
    %c16_i32_108 = arith.constant 16 : i32
    %355 = arith.addi %0, %c16_i32_108 : i32
    %c4_i32_109 = arith.constant 4 : i32
    %356 = arith.addi %355, %c4_i32_109 : i32
    %c12_i32_110 = arith.constant 12 : i32
    %357 = arith.addi %356, %c12_i32_110 : i32
    %358 = arith.index_cast %357 : i32 to index
    %359 = memref.load %arg11[%358] : memref<120xf32, #tpu.memory_space<smem>>
    %360 = vector.broadcast %359 : f32 to vector<64x64xf32>
    %361 = arith.mulf %360, %102 : vector<64x64xf32>
    %c16_i32_111 = arith.constant 16 : i32
    %362 = arith.addi %0, %c16_i32_111 : i32
    %c4_i32_112 = arith.constant 4 : i32
    %363 = arith.addi %362, %c4_i32_112 : i32
    %c12_i32_113 = arith.constant 12 : i32
    %364 = arith.addi %363, %c12_i32_113 : i32
    %c1_i32_114 = arith.constant 1 : i32
    %365 = arith.addi %364, %c1_i32_114 : i32
    %366 = arith.index_cast %365 : i32 to index
    %367 = memref.load %arg11[%366] : memref<120xf32, #tpu.memory_space<smem>>
    %368 = vector.broadcast %367 : f32 to vector<64x64xf32>
    %369 = arith.mulf %368, %143 : vector<64x64xf32>
    %370 = arith.addf %361, %369 : vector<64x64xf32>
    %c16_i32_115 = arith.constant 16 : i32
    %371 = arith.addi %0, %c16_i32_115 : i32
    %c4_i32_116 = arith.constant 4 : i32
    %372 = arith.addi %371, %c4_i32_116 : i32
    %c12_i32_117 = arith.constant 12 : i32
    %373 = arith.addi %372, %c12_i32_117 : i32
    %c2_i32_118 = arith.constant 2 : i32
    %374 = arith.addi %373, %c2_i32_118 : i32
    %375 = arith.index_cast %374 : i32 to index
    %376 = memref.load %arg11[%375] : memref<120xf32, #tpu.memory_space<smem>>
    %377 = vector.broadcast %376 : f32 to vector<64x64xf32>
    %378 = arith.mulf %377, %184 : vector<64x64xf32>
    %379 = arith.addf %370, %378 : vector<64x64xf32>
    %c16_i32_119 = arith.constant 16 : i32
    %380 = arith.addi %0, %c16_i32_119 : i32
    %c4_i32_120 = arith.constant 4 : i32
    %381 = arith.addi %380, %c4_i32_120 : i32
    %c12_i32_121 = arith.constant 12 : i32
    %382 = arith.addi %381, %c12_i32_121 : i32
    %c3_i32_122 = arith.constant 3 : i32
    %383 = arith.addi %382, %c3_i32_122 : i32
    %384 = arith.index_cast %383 : i32 to index
    %385 = memref.load %arg11[%384] : memref<120xf32, #tpu.memory_space<smem>>
    %386 = vector.broadcast %385 : f32 to vector<64x64xf32>
    %387 = arith.mulf %386, %225 : vector<64x64xf32>
    %388 = arith.addf %379, %387 : vector<64x64xf32>
    %c32_i32_123 = arith.constant 32 : i32
    %389 = arith.addi %0, %c32_i32_123 : i32
    %c4_i32_124 = arith.constant 4 : i32
    %390 = arith.addi %389, %c4_i32_124 : i32
    %c3_i32_125 = arith.constant 3 : i32
    %391 = arith.addi %390, %c3_i32_125 : i32
    %392 = arith.index_cast %391 : i32 to index
    %393 = memref.load %arg11[%392] : memref<120xf32, #tpu.memory_space<smem>>
    %394 = vector.broadcast %393 : f32 to vector<64x64xf32>
    %395 = arith.addf %388, %394 : vector<64x64xf32>
    %396 = arith.truncf %395 : vector<64x64xf32> to vector<64x64xbf16>
    %cst_126 = arith.constant dense<0.000000e+00> : vector<64x8xf32>
    %397 = tpu.matmul %396, %60, %cst_126 {dimension_numbers = #tpu.dot_dimension_numbers<[1], [0], [0], [1], [0, 0, 1, 1], [], []>} : vector<64x64xbf16>, vector<64x8xbf16>, vector<64x8xf32> -> vector<64x8xf32>
    %398 = tpu.concatenate %268, %311, %354, %397 in 1 : vector<64x8xf32>, vector<64x8xf32>, vector<64x8xf32>, vector<64x8xf32> -> vector<64x32xf32>
    %399 = arith.truncf %398 : vector<64x32xf32> to vector<64x32xbf16>
    %400 = arith.index_cast %arg1 : i32 to index
    %c0_127 = arith.constant 0 : index
    %c0_128 = arith.constant 0 : index
    %401 = vector.load %arg6[%400, %c0_127, %c0_128] : memref<3x32x32xbf16, #tpu.memory_space<vmem>>, vector<1x32x32xbf16>
    %402 = vector.shape_cast %401 : vector<1x32x32xbf16> to vector<32x32xbf16>
    %cst_129 = arith.constant dense<0.000000e+00> : vector<64x32xf32>
    %403 = tpu.matmul %399, %402, %cst_129 {dimension_numbers = #tpu.dot_dimension_numbers<[1], [0], [0], [1], [0, 0, 1, 1], [], []>} : vector<64x32xbf16>, vector<32x32xbf16>, vector<64x32xf32> -> vector<64x32xf32>
    %404 = vector.broadcast %11 : vector<1x32xf32> to vector<64x32xf32>
    %405 = arith.addf %403, %404 : vector<64x32xf32>
    %406 = vector.broadcast %12 : vector<1x32xf32> to vector<64x32xf32>
    %407 = arith.mulf %406, %405 : vector<64x32xf32>
    %408 = arith.addf %4, %407 : vector<64x32xf32>
    %cst_130 = arith.constant dense<0.000000e+00> : vector<64xf32>
    %409 = vector.multi_reduction <add>, %408, %cst_130 [1] : vector<64x32xf32> to vector<64xf32>
    %410 = vector.shape_cast %409 : vector<64xf32> to vector<64x1xf32>
    %cst_131 = arith.constant 3.200000e+01 : f32
    %411 = vector.broadcast %cst_131 : f32 to vector<64x1xf32>
    %412 = arith.divf %410, %411 : vector<64x1xf32>
    %413 = vector.broadcast %412 : vector<64x1xf32> to vector<64x32xf32>
    %414 = arith.subf %408, %413 : vector<64x32xf32>
    %415 = arith.mulf %414, %414 : vector<64x32xf32>
    %cst_132 = arith.constant dense<0.000000e+00> : vector<64xf32>
    %416 = vector.multi_reduction <add>, %415, %cst_132 [1] : vector<64x32xf32> to vector<64xf32>
    %417 = vector.shape_cast %416 : vector<64xf32> to vector<64x1xf32>
    %cst_133 = arith.constant 3.200000e+01 : f32
    %418 = vector.broadcast %cst_133 : f32 to vector<64x1xf32>
    %419 = arith.divf %417, %418 : vector<64x1xf32>
    %cst_134 = arith.constant 9.99999997E-7 : f32
    %420 = vector.broadcast %cst_134 : f32 to vector<64x1xf32>
    %421 = arith.addf %419, %420 : vector<64x1xf32>
    %422 = math.rsqrt %421 : vector<64x1xf32>
    %423 = vector.broadcast %422 : vector<64x1xf32> to vector<64x32xf32>
    %424 = arith.mulf %414, %423 : vector<64x32xf32>
    %425 = vector.broadcast %13 : vector<1x32xf32> to vector<64x32xf32>
    %426 = arith.mulf %424, %425 : vector<64x32xf32>
    %427 = vector.broadcast %14 : vector<1x32xf32> to vector<64x32xf32>
    %428 = arith.addf %426, %427 : vector<64x32xf32>
    %429 = arith.truncf %428 : vector<64x32xf32> to vector<64x32xbf16>
    %430 = arith.index_cast %arg1 : i32 to index
    %c0_135 = arith.constant 0 : index
    %c0_136 = arith.constant 0 : index
    %431 = vector.load %arg7[%430, %c0_135, %c0_136] : memref<3x32x128xbf16, #tpu.memory_space<vmem>>, vector<1x32x128xbf16>
    %432 = vector.shape_cast %431 : vector<1x32x128xbf16> to vector<32x128xbf16>
    %cst_137 = arith.constant dense<0.000000e+00> : vector<64x128xf32>
    %433 = tpu.matmul %429, %432, %cst_137 {dimension_numbers = #tpu.dot_dimension_numbers<[1], [0], [0], [1], [0, 0, 1, 1], [], []>} : vector<64x32xbf16>, vector<32x128xbf16>, vector<64x128xf32> -> vector<64x128xf32>
    %434 = vector.broadcast %15 : vector<1x128xf32> to vector<64x128xf32>
    %435 = arith.addf %433, %434 : vector<64x128xf32>
    %436 = arith.mulf %435, %435 : vector<64x128xf32>
    %437 = arith.mulf %435, %436 : vector<64x128xf32>
    %cst_138 = arith.constant 4.471500e-02 : f32
    %438 = vector.broadcast %cst_138 : f32 to vector<64x128xf32>
    %439 = arith.mulf %438, %437 : vector<64x128xf32>
    %440 = arith.addf %435, %439 : vector<64x128xf32>
    %cst_139 = arith.constant 0.797884583 : f32
    %441 = vector.broadcast %cst_139 : f32 to vector<64x128xf32>
    %442 = arith.mulf %441, %440 : vector<64x128xf32>
    %443 = math.tanh %442 : vector<64x128xf32>
    %cst_140 = arith.constant 1.000000e+00 : f32
    %444 = vector.broadcast %cst_140 : f32 to vector<64x128xf32>
    %445 = arith.addf %444, %443 : vector<64x128xf32>
    %cst_141 = arith.constant 5.000000e-01 : f32
    %446 = vector.broadcast %cst_141 : f32 to vector<64x128xf32>
    %447 = arith.mulf %446, %445 : vector<64x128xf32>
    %448 = arith.mulf %435, %447 : vector<64x128xf32>
    %449 = arith.truncf %448 : vector<64x128xf32> to vector<64x128xbf16>
    %450 = arith.index_cast %arg1 : i32 to index
    %c0_142 = arith.constant 0 : index
    %c0_143 = arith.constant 0 : index
    %451 = vector.load %arg8[%450, %c0_142, %c0_143] : memref<3x128x32xbf16, #tpu.memory_space<vmem>>, vector<1x128x32xbf16>
    %452 = vector.shape_cast %451 : vector<1x128x32xbf16> to vector<128x32xbf16>
    %cst_144 = arith.constant dense<0.000000e+00> : vector<64x32xf32>
    %453 = tpu.matmul %449, %452, %cst_144 {dimension_numbers = #tpu.dot_dimension_numbers<[1], [0], [0], [1], [0, 0, 1, 1], [], []>} : vector<64x128xbf16>, vector<128x32xbf16>, vector<64x32xf32> -> vector<64x32xf32>
    %454 = vector.broadcast %16 : vector<1x32xf32> to vector<64x32xf32>
    %455 = arith.addf %453, %454 : vector<64x32xf32>
    %456 = vector.broadcast %17 : vector<1x32xf32> to vector<64x32xf32>
    %457 = arith.mulf %456, %455 : vector<64x32xf32>
    %458 = arith.addf %408, %457 : vector<64x32xf32>
    %c0_145 = arith.constant 0 : index
    %c0_146 = arith.constant 0 : index
    %459 = vector.load %arg13[%c0_145, %c0_146] : memref<64x32xf32, #tpu.memory_space<vmem>>, vector<64x32xf32>
    tpu.vector_store %arg13[%c0_145, %c0_146], %458 {strides = array<i32>} : memref<64x32xf32, #tpu.memory_space<vmem>>, vector<64x32xf32>,
    %c2_i32_147 = arith.constant 2 : i32
    %460 = arith.cmpi eq, %arg1, %c2_i32_147 : i32
    %461 = arith.extui %460 : i1 to i32
    %c0_i32_148 = arith.constant 0 : i32
    %462 = arith.cmpi ne, %461, %c0_i32_148 : i32
    scf.if %462 {
      %c0_149 = arith.constant 0 : index
      %c0_150 = arith.constant 0 : index
      %463 = vector.load %arg10[%c0_149, %c0_150] : memref<2x32xf32, #tpu.memory_space<vmem>>, vector<2x32xf32>
      %464 = vector.extract_strided_slice %463 {offsets = [0, 0], sizes = [1, 32], strides = [1, 1]} : vector<2x32xf32> to vector<1x32xf32>
      %465 = vector.extract_strided_slice %463 {offsets = [1, 0], sizes = [1, 32], strides = [1, 1]} : vector<2x32xf32> to vector<1x32xf32>
      %cst_151 = arith.constant dense<0.000000e+00> : vector<64xf32>
      %466 = vector.multi_reduction <add>, %458, %cst_151 [1] : vector<64x32xf32> to vector<64xf32>
      %467 = vector.shape_cast %466 : vector<64xf32> to vector<64x1xf32>
      %cst_152 = arith.constant 3.200000e+01 : f32
      %468 = vector.broadcast %cst_152 : f32 to vector<64x1xf32>
      %469 = arith.divf %467, %468 : vector<64x1xf32>
      %470 = vector.broadcast %469 : vector<64x1xf32> to vector<64x32xf32>
      %471 = arith.subf %458, %470 : vector<64x32xf32>
      %472 = arith.mulf %471, %471 : vector<64x32xf32>
      %cst_153 = arith.constant dense<0.000000e+00> : vector<64xf32>
      %473 = vector.multi_reduction <add>, %472, %cst_153 [1] : vector<64x32xf32> to vector<64xf32>
      %474 = vector.shape_cast %473 : vector<64xf32> to vector<64x1xf32>
      %cst_154 = arith.constant 3.200000e+01 : f32
      %475 = vector.broadcast %cst_154 : f32 to vector<64x1xf32>
      %476 = arith.divf %474, %475 : vector<64x1xf32>
      %cst_155 = arith.constant 9.99999997E-7 : f32
      %477 = vector.broadcast %cst_155 : f32 to vector<64x1xf32>
      %478 = arith.addf %476, %477 : vector<64x1xf32>
      %479 = math.rsqrt %478 : vector<64x1xf32>
      %480 = vector.broadcast %479 : vector<64x1xf32> to vector<64x32xf32>
      %481 = arith.mulf %471, %480 : vector<64x32xf32>
      %482 = vector.broadcast %464 : vector<1x32xf32> to vector<64x32xf32>
      %483 = arith.mulf %481, %482 : vector<64x32xf32>
      %484 = vector.broadcast %465 : vector<1x32xf32> to vector<64x32xf32>
      %485 = arith.addf %483, %484 : vector<64x32xf32>
      %c0_156 = arith.constant 0 : index
      %c0_157 = arith.constant 0 : index
      %c0_158 = arith.constant 0 : index
      %486 = vector.load %arg12[%c0_156, %c0_157, %c0_158] : memref<1x64x32xf32, #tpu.memory_space<vmem>>, vector<1x64x32xf32>
      %487 = vector.shape_cast %486 : vector<1x64x32xf32> to vector<64x32xf32>
      %488 = vector.shape_cast %485 : vector<64x32xf32> to vector<1x64x32xf32>
      tpu.vector_store %arg12[%c0_156, %c0_157, %c0_158], %488 {strides = array<i32>} : memref<1x64x32xf32, #tpu.memory_space<vmem>>, vector<1x64x32xf32>,
    } else {
    }
    return
  }
  func.func @transform_0(%arg0: i32, %arg1: i32) -> (i32, i32, i32) {
    %c0_i32 = arith.constant 0 : i32
    %c0_i32_0 = arith.constant 0 : i32
    %c0_i32_1 = arith.constant 0 : i32
    return %arg0, %c0_i32, %c0_i32_0 : i32, i32, i32
  }
  func.func @transform_1(%arg0: i32, %arg1: i32) -> (i32, i32) {
    %c0_i32 = arith.constant 0 : i32
    %c0_i32_0 = arith.constant 0 : i32
    %c0_i32_1 = arith.constant 0 : i32
    return %c0_i32, %c0_i32_0 : i32, i32
  }
  func.func @transform_2(%arg0: i32, %arg1: i32) -> (i32, i32) {
    %c0_i32 = arith.constant 0 : i32
    %c0_i32_0 = arith.constant 0 : i32
    %c0_i32_1 = arith.constant 0 : i32
    return %c0_i32, %c0_i32_0 : i32, i32
  }
  func.func @transform_3(%arg0: i32, %arg1: i32) -> (i32, i32, i32) {
    %c0_i32 = arith.constant 0 : i32
    %c0_i32_0 = arith.constant 0 : i32
    %c0_i32_1 = arith.constant 0 : i32
    %c0_i32_2 = arith.constant 0 : i32
    return %c0_i32, %c0_i32_0, %c0_i32_1 : i32, i32, i32
  }
  func.func @transform_4(%arg0: i32, %arg1: i32) -> (i32, i32, i32) {
    %c0_i32 = arith.constant 0 : i32
    %c0_i32_0 = arith.constant 0 : i32
    %c0_i32_1 = arith.constant 0 : i32
    %c0_i32_2 = arith.constant 0 : i32
    return %c0_i32, %c0_i32_0, %c0_i32_1 : i32, i32, i32
  }
  func.func @transform_5(%arg0: i32, %arg1: i32) -> (i32, i32, i32) {
    %c0_i32 = arith.constant 0 : i32
    %c0_i32_0 = arith.constant 0 : i32
    %c0_i32_1 = arith.constant 0 : i32
    %c0_i32_2 = arith.constant 0 : i32
    return %c0_i32, %c0_i32_0, %c0_i32_1 : i32, i32, i32
  }
  func.func @transform_6(%arg0: i32, %arg1: i32) -> (i32, i32, i32) {
    %c0_i32 = arith.constant 0 : i32
    %c0_i32_0 = arith.constant 0 : i32
    %c0_i32_1 = arith.constant 0 : i32
    %c0_i32_2 = arith.constant 0 : i32
    return %c0_i32, %c0_i32_0, %c0_i32_1 : i32, i32, i32
  }
  func.func @transform_7(%arg0: i32, %arg1: i32) -> (i32, i32, i32) {
    %c0_i32 = arith.constant 0 : i32
    %c0_i32_0 = arith.constant 0 : i32
    %c0_i32_1 = arith.constant 0 : i32
    %c0_i32_2 = arith.constant 0 : i32
    return %c0_i32, %c0_i32_0, %c0_i32_1 : i32, i32, i32
  }
  func.func @transform_8(%arg0: i32, %arg1: i32) -> (i32, i32) {
    %c0_i32 = arith.constant 0 : i32
    %c0_i32_0 = arith.constant 0 : i32
    %c0_i32_1 = arith.constant 0 : i32
    return %c0_i32, %c0_i32_0 : i32, i32
  }
  func.func @transform_9(%arg0: i32, %arg1: i32) -> i32 {
    %c0_i32 = arith.constant 0 : i32
    %c0_i32_0 = arith.constant 0 : i32
    return %c0_i32 : i32
  }
  func.func @transform_10(%arg0: i32, %arg1: i32) -> (i32, i32, i32) {
    %c0_i32 = arith.constant 0 : i32
    %c0_i32_0 = arith.constant 0 : i32
    %c0_i32_1 = arith.constant 0 : i32
    return %arg0, %c0_i32, %c0_i32_0 : i32, i32, i32
  }
}

module attributes {stable_mosaic.version = 11 : i64} {
  func.func @bicubic_kernel(%arg0: i32, %arg1: memref<192x32xf32, #tpu.memory_space<vmem>>, %arg2: memref<16x32xf32, #tpu.memory_space<vmem>>, %arg3: memref<32x16xf32, #tpu.memory_space<vmem>>, %arg4: memref<96x16xf32, #tpu.memory_space<vmem>>) attributes {dimension_semantics = [#tpu.dimension_semantics<arbitrary>], iteration_bounds = array<i64: 1>, scalar_prefetch = 0 : i64, scratch_operands = 0 : i64, tpu.core_type = #tpu.core_type<tc>, window_params = [{pipeline_mode = #tpu.pipeline_mode<synchronous>, transform_indices = @transform_0, window_bounds = array<i64: 192, 32>}, {pipeline_mode = #tpu.pipeline_mode<synchronous>, transform_indices = @transform_1, window_bounds = array<i64: 16, 32>}, {pipeline_mode = #tpu.pipeline_mode<synchronous>, transform_indices = @transform_2, window_bounds = array<i64: 32, 16>}, {pipeline_mode = #tpu.pipeline_mode<synchronous>, transform_indices = @transform_3, window_bounds = array<i64: 96, 16>}]} {
    %c0 = arith.constant 0 : index
    %c0_0 = arith.constant 0 : index
    %0 = vector.load %arg1[%c0, %c0_0] : memref<192x32xf32, #tpu.memory_space<vmem>>, vector<192x32xf32>
    %c0_1 = arith.constant 0 : index
    %c0_2 = arith.constant 0 : index
    %1 = vector.load %arg3[%c0_1, %c0_2] : memref<32x16xf32, #tpu.memory_space<vmem>>, vector<32x16xf32>
    %cst = arith.constant dense<0.000000e+00> : vector<192x16xf32>
    %2 = tpu.matmul %0, %1, %cst {dimension_numbers = #tpu.dot_dimension_numbers<[1], [0], [0], [1], [0, 0, 1, 1], [], []>} : vector<192x32xf32>, vector<32x16xf32>, vector<192x16xf32> -> vector<192x16xf32>
    %c0_3 = arith.constant 0 : index
    %c0_4 = arith.constant 0 : index
    %3 = vector.load %arg2[%c0_3, %c0_4] : memref<16x32xf32, #tpu.memory_space<vmem>>, vector<16x32xf32>
    %4 = vector.extract_strided_slice %2 {offsets = [0, 0], sizes = [32, 16], strides = [1, 1]} : vector<192x16xf32> to vector<32x16xf32>
    %cst_5 = arith.constant dense<0.000000e+00> : vector<16x16xf32>
    %5 = tpu.matmul %3, %4, %cst_5 {dimension_numbers = #tpu.dot_dimension_numbers<[1], [0], [0], [1], [0, 0, 1, 1], [], []>} : vector<16x32xf32>, vector<32x16xf32>, vector<16x16xf32> -> vector<16x16xf32>
    %6 = vector.extract_strided_slice %2 {offsets = [32, 0], sizes = [32, 16], strides = [1, 1]} : vector<192x16xf32> to vector<32x16xf32>
    %cst_6 = arith.constant dense<0.000000e+00> : vector<16x16xf32>
    %7 = tpu.matmul %3, %6, %cst_6 {dimension_numbers = #tpu.dot_dimension_numbers<[1], [0], [0], [1], [0, 0, 1, 1], [], []>} : vector<16x32xf32>, vector<32x16xf32>, vector<16x16xf32> -> vector<16x16xf32>
    %8 = vector.extract_strided_slice %2 {offsets = [64, 0], sizes = [32, 16], strides = [1, 1]} : vector<192x16xf32> to vector<32x16xf32>
    %cst_7 = arith.constant dense<0.000000e+00> : vector<16x16xf32>
    %9 = tpu.matmul %3, %8, %cst_7 {dimension_numbers = #tpu.dot_dimension_numbers<[1], [0], [0], [1], [0, 0, 1, 1], [], []>} : vector<16x32xf32>, vector<32x16xf32>, vector<16x16xf32> -> vector<16x16xf32>
    %10 = vector.extract_strided_slice %2 {offsets = [96, 0], sizes = [32, 16], strides = [1, 1]} : vector<192x16xf32> to vector<32x16xf32>
    %cst_8 = arith.constant dense<0.000000e+00> : vector<16x16xf32>
    %11 = tpu.matmul %3, %10, %cst_8 {dimension_numbers = #tpu.dot_dimension_numbers<[1], [0], [0], [1], [0, 0, 1, 1], [], []>} : vector<16x32xf32>, vector<32x16xf32>, vector<16x16xf32> -> vector<16x16xf32>
    %12 = vector.extract_strided_slice %2 {offsets = [128, 0], sizes = [32, 16], strides = [1, 1]} : vector<192x16xf32> to vector<32x16xf32>
    %cst_9 = arith.constant dense<0.000000e+00> : vector<16x16xf32>
    %13 = tpu.matmul %3, %12, %cst_9 {dimension_numbers = #tpu.dot_dimension_numbers<[1], [0], [0], [1], [0, 0, 1, 1], [], []>} : vector<16x32xf32>, vector<32x16xf32>, vector<16x16xf32> -> vector<16x16xf32>
    %14 = vector.extract_strided_slice %2 {offsets = [160, 0], sizes = [32, 16], strides = [1, 1]} : vector<192x16xf32> to vector<32x16xf32>
    %cst_10 = arith.constant dense<0.000000e+00> : vector<16x16xf32>
    %15 = tpu.matmul %3, %14, %cst_10 {dimension_numbers = #tpu.dot_dimension_numbers<[1], [0], [0], [1], [0, 0, 1, 1], [], []>} : vector<16x32xf32>, vector<32x16xf32>, vector<16x16xf32> -> vector<16x16xf32>
    %16 = tpu.concatenate %5, %7, %9, %11, %13, %15 in 0 : vector<16x16xf32>, vector<16x16xf32>, vector<16x16xf32>, vector<16x16xf32>, vector<16x16xf32>, vector<16x16xf32> -> vector<96x16xf32>
    %c0_11 = arith.constant 0 : index
    %c0_12 = arith.constant 0 : index
    %17 = vector.load %arg4[%c0_11, %c0_12] : memref<96x16xf32, #tpu.memory_space<vmem>>, vector<96x16xf32>
    tpu.vector_store %arg4[%c0_11, %c0_12], %16 {strides = array<i32>} : memref<96x16xf32, #tpu.memory_space<vmem>>, vector<96x16xf32>,
    return
  }
  func.func @transform_0(%arg0: i32) -> (i32, i32) {
    %c0_i32 = arith.constant 0 : i32
    %c0_i32_0 = arith.constant 0 : i32
    %c0_i32_1 = arith.constant 0 : i32
    return %c0_i32, %c0_i32_0 : i32, i32
  }
  func.func @transform_1(%arg0: i32) -> (i32, i32) {
    %c0_i32 = arith.constant 0 : i32
    %c0_i32_0 = arith.constant 0 : i32
    %c0_i32_1 = arith.constant 0 : i32
    return %c0_i32, %c0_i32_0 : i32, i32
  }
  func.func @transform_2(%arg0: i32) -> (i32, i32) {
    %c0_i32 = arith.constant 0 : i32
    %c0_i32_0 = arith.constant 0 : i32
    %c0_i32_1 = arith.constant 0 : i32
    return %c0_i32, %c0_i32_0 : i32, i32
  }
  func.func @transform_3(%arg0: i32) -> (i32, i32) {
    %c0_i32 = arith.constant 0 : i32
    %c0_i32_0 = arith.constant 0 : i32
    %c0_i32_1 = arith.constant 0 : i32
    return %c0_i32, %c0_i32_0 : i32, i32
  }
}

module attributes {stable_mosaic.version = 11 : i64} {
  func.func @fused_tokens_kernel(%arg0: i32, %arg1: i32, %arg2: memref<1x16x48xf32, #tpu.memory_space<vmem>>, %arg3: memref<48x16xbf16, #tpu.memory_space<vmem>>, %arg4: memref<16x16xf32, #tpu.memory_space<vmem>>, %arg5: memref<2x16x48xbf16, #tpu.memory_space<vmem>>, %arg6: memref<2x16x16xbf16, #tpu.memory_space<vmem>>, %arg7: memref<2x16x64xbf16, #tpu.memory_space<vmem>>, %arg8: memref<2x64x16xbf16, #tpu.memory_space<vmem>>, %arg9: memref<2x10x64xf32, #tpu.memory_space<vmem>>, %arg10: memref<2x16xf32, #tpu.memory_space<vmem>>, %arg11: memref<24xf32, #tpu.memory_space<smem>>, %arg12: memref<1x16x16xf32, #tpu.memory_space<vmem>>, %arg13: memref<16x16xf32, #tpu.memory_space<vmem>>) attributes {dimension_semantics = [#tpu.dimension_semantics<parallel>, #tpu.dimension_semantics<arbitrary>], iteration_bounds = array<i64: 2, 2>, scalar_prefetch = 0 : i64, scratch_operands = 1 : i64, tpu.core_type = #tpu.core_type<tc>, window_params = [{transform_indices = @transform_0, window_bounds = array<i64: 1, 16, 48>}, {pipeline_mode = #tpu.pipeline_mode<synchronous>, transform_indices = @transform_1, window_bounds = array<i64: 48, 16>}, {pipeline_mode = #tpu.pipeline_mode<synchronous>, transform_indices = @transform_2, window_bounds = array<i64: 16, 16>}, {pipeline_mode = #tpu.pipeline_mode<synchronous>, transform_indices = @transform_3, window_bounds = array<i64: 2, 16, 48>}, {pipeline_mode = #tpu.pipeline_mode<synchronous>, transform_indices = @transform_4, window_bounds = array<i64: 2, 16, 16>}, {pipeline_mode = #tpu.pipeline_mode<synchronous>, transform_indices = @transform_5, window_bounds = array<i64: 2, 16, 64>}, {pipeline_mode = #tpu.pipeline_mode<synchronous>, transform_indices = @transform_6, window_bounds = array<i64: 2, 64, 16>}, {pipeline_mode = #tpu.pipeline_mode<synchronous>, transform_indices = @transform_7, window_bounds = array<i64: 2, 10, 64>}, {pipeline_mode = #tpu.pipeline_mode<synchronous>, transform_indices = @transform_8, window_bounds = array<i64: 2, 16>}, {transform_indices = @transform_9, window_bounds = array<i64: 24>}, {transform_indices = @transform_10, window_bounds = array<i64: 1, 16, 16>}]} {
    %c12_i32 = arith.constant 12 : i32
    %0 = arith.muli %arg1, %c12_i32 : i32
    %c0_i32 = arith.constant 0 : i32
    %1 = arith.cmpi eq, %arg1, %c0_i32 : i32
    %2 = arith.extui %1 : i1 to i32
    %c0_i32_0 = arith.constant 0 : i32
    %3 = arith.cmpi ne, %2, %c0_i32_0 : i32
    scf.if %3 {
      %c0_67 = arith.constant 0 : index
      %c0_68 = arith.constant 0 : index
      %c0_69 = arith.constant 0 : index
      %223 = vector.load %arg2[%c0_67, %c0_68, %c0_69] : memref<1x16x48xf32, #tpu.memory_space<vmem>>, vector<1x16x48xf32>
      %224 = vector.shape_cast %223 : vector<1x16x48xf32> to vector<16x48xf32>
      %225 = arith.truncf %224 : vector<16x48xf32> to vector<16x48xbf16>
      %c0_70 = arith.constant 0 : index
      %c0_71 = arith.constant 0 : index
      %226 = vector.load %arg3[%c0_70, %c0_71] : memref<48x16xbf16, #tpu.memory_space<vmem>>, vector<48x16xbf16>
      %cst_72 = arith.constant dense<0.000000e+00> : vector<16x16xf32>
      %227 = tpu.matmul %225, %226, %cst_72 {dimension_numbers = #tpu.dot_dimension_numbers<[1], [0], [0], [1], [0, 0, 1, 1], [], []>} : vector<16x48xbf16>, vector<48x16xbf16>, vector<16x16xf32> -> vector<16x16xf32>
      %c0_73 = arith.constant 0 : index
      %c0_74 = arith.constant 0 : index
      %228 = vector.load %arg4[%c0_73, %c0_74] : memref<16x16xf32, #tpu.memory_space<vmem>>, vector<16x16xf32>
      %229 = arith.addf %227, %228 : vector<16x16xf32>
      %c0_75 = arith.constant 0 : index
      %c0_76 = arith.constant 0 : index
      %230 = vector.load %arg13[%c0_75, %c0_76] : memref<16x16xf32, #tpu.memory_space<vmem>>, vector<16x16xf32>
      tpu.vector_store %arg13[%c0_75, %c0_76], %229 {strides = array<i32>} : memref<16x16xf32, #tpu.memory_space<vmem>>, vector<16x16xf32>,
    } else {
    }
    %c0 = arith.constant 0 : index
    %c0_1 = arith.constant 0 : index
    %4 = vector.load %arg13[%c0, %c0_1] : memref<16x16xf32, #tpu.memory_space<vmem>>, vector<16x16xf32>
    %5 = arith.index_cast %arg1 : i32 to index
    %c0_2 = arith.constant 0 : index
    %c0_3 = arith.constant 0 : index
    %6 = vector.load %arg9[%5, %c0_2, %c0_3] : memref<2x10x64xf32, #tpu.memory_space<vmem>>, vector<1x10x64xf32>
    %7 = vector.shape_cast %6 : vector<1x10x64xf32> to vector<10x64xf32>
    %8 = vector.extract_strided_slice %7 {offsets = [0, 0], sizes = [1, 16], strides = [1, 1]} : vector<10x64xf32> to vector<1x16xf32>
    %9 = vector.extract_strided_slice %7 {offsets = [1, 0], sizes = [1, 16], strides = [1, 1]} : vector<10x64xf32> to vector<1x16xf32>
    %10 = vector.extract_strided_slice %7 {offsets = [2, 0], sizes = [1, 48], strides = [1, 1]} : vector<10x64xf32> to vector<1x48xf32>
    %11 = vector.extract_strided_slice %7 {offsets = [3, 0], sizes = [1, 16], strides = [1, 1]} : vector<10x64xf32> to vector<1x16xf32>
    %12 = vector.extract_strided_slice %7 {offsets = [4, 0], sizes = [1, 16], strides = [1, 1]} : vector<10x64xf32> to vector<1x16xf32>
    %13 = vector.extract_strided_slice %7 {offsets = [5, 0], sizes = [1, 16], strides = [1, 1]} : vector<10x64xf32> to vector<1x16xf32>
    %14 = vector.extract_strided_slice %7 {offsets = [6, 0], sizes = [1, 16], strides = [1, 1]} : vector<10x64xf32> to vector<1x16xf32>
    %15 = vector.extract_strided_slice %7 {offsets = [7, 0], sizes = [1, 64], strides = [1, 1]} : vector<10x64xf32> to vector<1x64xf32>
    %16 = vector.extract_strided_slice %7 {offsets = [8, 0], sizes = [1, 16], strides = [1, 1]} : vector<10x64xf32> to vector<1x16xf32>
    %17 = vector.extract_strided_slice %7 {offsets = [9, 0], sizes = [1, 16], strides = [1, 1]} : vector<10x64xf32> to vector<1x16xf32>
    %cst = arith.constant dense<0.000000e+00> : vector<16xf32>
    %18 = vector.multi_reduction <add>, %4, %cst [1] : vector<16x16xf32> to vector<16xf32>
    %19 = vector.shape_cast %18 : vector<16xf32> to vector<16x1xf32>
    %cst_4 = arith.constant 1.600000e+01 : f32
    %20 = vector.broadcast %cst_4 : f32 to vector<16x1xf32>
    %21 = arith.divf %19, %20 : vector<16x1xf32>
    %22 = vector.broadcast %21 : vector<16x1xf32> to vector<16x16xf32>
    %23 = arith.subf %4, %22 : vector<16x16xf32>
    %24 = arith.mulf %23, %23 : vector<16x16xf32>
    %cst_5 = arith.constant dense<0.000000e+00> : vector<16xf32>
    %25 = vector.multi_reduction <add>, %24, %cst_5 [1] : vector<16x16xf32> to vector<16xf32>
    %26 = vector.shape_cast %25 : vector<16xf32> to vector<16x1xf32>
    %cst_6 = arith.constant 1.600000e+01 : f32
    %27 = vector.broadcast %cst_6 : f32 to vector<16x1xf32>
    %28 = arith.divf %26, %27 : vector<16x1xf32>
    %cst_7 = arith.constant 9.99999997E-7 : f32
    %29 = vector.broadcast %cst_7 : f32 to vector<16x1xf32>
    %30 = arith.addf %28, %29 : vector<16x1xf32>
    %31 = math.rsqrt %30 : vector<16x1xf32>
    %32 = vector.broadcast %31 : vector<16x1xf32> to vector<16x16xf32>
    %33 = arith.mulf %23, %32 : vector<16x16xf32>
    %34 = vector.broadcast %8 : vector<1x16xf32> to vector<16x16xf32>
    %35 = arith.mulf %33, %34 : vector<16x16xf32>
    %36 = vector.broadcast %9 : vector<1x16xf32> to vector<16x16xf32>
    %37 = arith.addf %35, %36 : vector<16x16xf32>
    %38 = arith.truncf %37 : vector<16x16xf32> to vector<16x16xbf16>
    %39 = arith.index_cast %arg1 : i32 to index
    %c0_8 = arith.constant 0 : index
    %c0_9 = arith.constant 0 : index
    %40 = vector.load %arg5[%39, %c0_8, %c0_9] : memref<2x16x48xbf16, #tpu.memory_space<vmem>>, vector<1x16x48xbf16>
    %41 = vector.shape_cast %40 : vector<1x16x48xbf16> to vector<16x48xbf16>
    %cst_10 = arith.constant dense<0.000000e+00> : vector<16x48xf32>
    %42 = tpu.matmul %38, %41, %cst_10 {dimension_numbers = #tpu.dot_dimension_numbers<[1], [0], [0], [1], [0, 0, 1, 1], [], []>} : vector<16x16xbf16>, vector<16x48xbf16>, vector<16x48xf32> -> vector<16x48xf32>
    %43 = vector.broadcast %10 : vector<1x48xf32> to vector<16x48xf32>
    %44 = arith.addf %42, %43 : vector<16x48xf32>
    %45 = arith.truncf %44 : vector<16x48xf32> to vector<16x48xbf16>
    %46 = vector.extract_strided_slice %45 {offsets = [0, 0], sizes = [16, 8], strides = [1, 1]} : vector<16x48xbf16> to vector<16x8xbf16>
    %47 = vector.extract_strided_slice %45 {offsets = [0, 16], sizes = [16, 8], strides = [1, 1]} : vector<16x48xbf16> to vector<16x8xbf16>
    %48 = vector.extract_strided_slice %45 {offsets = [0, 32], sizes = [16, 8], strides = [1, 1]} : vector<16x48xbf16> to vector<16x8xbf16>
    %cst_11 = arith.constant dense<0.000000e+00> : vector<16x16xf32>
    %49 = tpu.matmul %46, %47, %cst_11 {dimension_numbers = #tpu.dot_dimension_numbers<[1], [1], [0], [0], [0, 0, 1, 0], [], []>} : vector<16x8xbf16>, vector<16x8xbf16>, vector<16x16xf32> -> vector<16x16xf32>
    %50 = vector.extract_strided_slice %45 {offsets = [0, 8], sizes = [16, 8], strides = [1, 1]} : vector<16x48xbf16> to vector<16x8xbf16>
    %51 = vector.extract_strided_slice %45 {offsets = [0, 24], sizes = [16, 8], strides = [1, 1]} : vector<16x48xbf16> to vector<16x8xbf16>
    %52 = vector.extract_strided_slice %45 {offsets = [0, 40], sizes = [16, 8], strides = [1, 1]} : vector<16x48xbf16> to vector<16x8xbf16>
    %cst_12 = arith.constant dense<0.000000e+00> : vector<16x16xf32>
    %53 = tpu.matmul %50, %51, %cst_12 {dimension_numbers = #tpu.dot_dimension_numbers<[1], [1], [0], [0], [0, 0, 1, 0], [], []>} : vector<16x8xbf16>, vector<16x8xbf16>, vector<16x16xf32> -> vector<16x16xf32>
    %c0_i32_13 = arith.constant 0 : i32
    %54 = arith.addi %0, %c0_i32_13 : i32
    %55 = arith.index_cast %54 : i32 to index
    %56 = memref.load %arg11[%55] : memref<24xf32, #tpu.memory_space<smem>>
    %57 = vector.broadcast %56 : f32 to vector<16x16xf32>
    %58 = arith.mulf %57, %49 : vector<16x16xf32>
    %c0_i32_14 = arith.constant 0 : i32
    %59 = arith.addi %0, %c0_i32_14 : i32
    %c1_i32 = arith.constant 1 : i32
    %60 = arith.addi %59, %c1_i32 : i32
    %61 = arith.index_cast %60 : i32 to index
    %62 = memref.load %arg11[%61] : memref<24xf32, #tpu.memory_space<smem>>
    %63 = vector.broadcast %62 : f32 to vector<16x16xf32>
    %64 = arith.mulf %63, %53 : vector<16x16xf32>
    %65 = arith.addf %58, %64 : vector<16x16xf32>
    %c4_i32 = arith.constant 4 : i32
    %66 = arith.addi %0, %c4_i32 : i32
    %c0_i32_15 = arith.constant 0 : i32
    %67 = arith.addi %66, %c0_i32_15 : i32
    %68 = arith.index_cast %67 : i32 to index
    %69 = memref.load %arg11[%68] : memref<24xf32, #tpu.memory_space<smem>>
    %70 = vector.broadcast %69 : f32 to vector<16x16xf32>
    %71 = arith.addf %65, %70 : vector<16x16xf32>
    %cst_16 = arith.constant dense<0xFF800000> : vector<16xf32>
    %72 = vector.multi_reduction <maximumf>, %71, %cst_16 [1] : vector<16x16xf32> to vector<16xf32>
    %73 = vector.shape_cast %72 : vector<16xf32> to vector<16x1xf32>
    %74 = vector.broadcast %73 : vector<16x1xf32> to vector<16x16xf32>
    %75 = arith.subf %71, %74 : vector<16x16xf32>
    %76 = math.exp %75 : vector<16x16xf32>
    %cst_17 = arith.constant dense<0.000000e+00> : vector<16xf32>
    %77 = vector.multi_reduction <add>, %76, %cst_17 [1] : vector<16x16xf32> to vector<16xf32>
    %78 = vector.shape_cast %77 : vector<16xf32> to vector<16x1xf32>
    %79 = vector.broadcast %78 : vector<16x1xf32> to vector<16x16xf32>
    %80 = arith.divf %76, %79 : vector<16x16xf32>
    %c2_i32 = arith.constant 2 : i32
    %81 = arith.addi %0, %c2_i32 : i32
    %82 = arith.index_cast %81 : i32 to index
    %83 = memref.load %arg11[%82] : memref<24xf32, #tpu.memory_space<smem>>
    %84 = vector.broadcast %83 : f32 to vector<16x16xf32>
    %85 = arith.mulf %84, %49 : vector<16x16xf32>
    %c2_i32_18 = arith.constant 2 : i32
    %86 = arith.addi %0, %c2_i32_18 : i32
    %c1_i32_19 = arith.constant 1 : i32
    %87 = arith.addi %86, %c1_i32_19 : i32
    %88 = arith.index_cast %87 : i32 to index
    %89 = memref.load %arg11[%88] : memref<24xf32, #tpu.memory_space<smem>>
    %90 = vector.broadcast %89 : f32 to vector<16x16xf32>
    %91 = arith.mulf %90, %53 : vector<16x16xf32>
    %92 = arith.addf %85, %91 : vector<16x16xf32>
    %c4_i32_20 = arith.constant 4 : i32
    %93 = arith.addi %0, %c4_i32_20 : i32
    %c1_i32_21 = arith.constant 1 : i32
    %94 = arith.addi %93, %c1_i32_21 : i32
    %95 = arith.index_cast %94 : i32 to index
    %96 = memref.load %arg11[%95] : memref<24xf32, #tpu.memory_space<smem>>
    %97 = vector.broadcast %96 : f32 to vector<16x16xf32>
    %98 = arith.addf %92, %97 : vector<16x16xf32>
    %cst_22 = arith.constant dense<0xFF800000> : vector<16xf32>
    %99 = vector.multi_reduction <maximumf>, %98, %cst_22 [1] : vector<16x16xf32> to vector<16xf32>
    %100 = vector.shape_cast %99 : vector<16xf32> to vector<16x1xf32>
    %101 = vector.broadcast %100 : vector<16x1xf32> to vector<16x16xf32>
    %102 = arith.subf %98, %101 : vector<16x16xf32>
    %103 = math.exp %102 : vector<16x16xf32>
    %cst_23 = arith.constant dense<0.000000e+00> : vector<16xf32>
    %104 = vector.multi_reduction <add>, %103, %cst_23 [1] : vector<16x16xf32> to vector<16xf32>
    %105 = vector.shape_cast %104 : vector<16xf32> to vector<16x1xf32>
    %106 = vector.broadcast %105 : vector<16x1xf32> to vector<16x16xf32>
    %107 = arith.divf %103, %106 : vector<16x16xf32>
    %c4_i32_24 = arith.constant 4 : i32
    %108 = arith.addi %0, %c4_i32_24 : i32
    %c2_i32_25 = arith.constant 2 : i32
    %109 = arith.addi %108, %c2_i32_25 : i32
    %c0_i32_26 = arith.constant 0 : i32
    %110 = arith.addi %109, %c0_i32_26 : i32
    %111 = arith.index_cast %110 : i32 to index
    %112 = memref.load %arg11[%111] : memref<24xf32, #tpu.memory_space<smem>>
    %113 = vector.broadcast %112 : f32 to vector<16x16xf32>
    %114 = arith.mulf %113, %80 : vector<16x16xf32>
    %c4_i32_27 = arith.constant 4 : i32
    %115 = arith.addi %0, %c4_i32_27 : i32
    %c2_i32_28 = arith.constant 2 : i32
    %116 = arith.addi %115, %c2_i32_28 : i32
    %c0_i32_29 = arith.constant 0 : i32
    %117 = arith.addi %116, %c0_i32_29 : i32
    %c1_i32_30 = arith.constant 1 : i32
    %118 = arith.addi %117, %c1_i32_30 : i32
    %119 = arith.index_cast %118 : i32 to index
    %120 = memref.load %arg11[%119] : memref<24xf32, #tpu.memory_space<smem>>
    %121 = vector.broadcast %120 : f32 to vector<16x16xf32>
    %122 = arith.mulf %121, %107 : vector<16x16xf32>
    %123 = arith.addf %114, %122 : vector<16x16xf32>
    %c8_i32 = arith.constant 8 : i32
    %124 = arith.addi %0, %c8_i32 : i32
    %c2_i32_31 = arith.constant 2 : i32
    %125 = arith.addi %124, %c2_i32_31 : i32
    %c0_i32_32 = arith.constant 0 : i32
    %126 = arith.addi %125, %c0_i32_32 : i32
    %127 = arith.index_cast %126 : i32 to index
    %128 = memref.load %arg11[%127] : memref<24xf32, #tpu.memory_space<smem>>
    %129 = vector.broadcast %128 : f32 to vector<16x16xf32>
    %130 = arith.addf %123, %129 : vector<16x16xf32>
    %131 = arith.truncf %130 : vector<16x16xf32> to vector<16x16xbf16>
    %cst_33 = arith.constant dense<0.000000e+00> : vector<16x8xf32>
    %132 = tpu.matmul %131, %48, %cst_33 {dimension_numbers = #tpu.dot_dimension_numbers<[1], [0], [0], [1], [0, 0, 1, 1], [], []>} : vector<16x16xbf16>, vector<16x8xbf16>, vector<16x8xf32> -> vector<16x8xf32>
    %c4_i32_34 = arith.constant 4 : i32
    %133 = arith.addi %0, %c4_i32_34 : i32
    %c2_i32_35 = arith.constant 2 : i32
    %134 = arith.addi %133, %c2_i32_35 : i32
    %c2_i32_36 = arith.constant 2 : i32
    %135 = arith.addi %134, %c2_i32_36 : i32
    %136 = arith.index_cast %135 : i32 to index
    %137 = memref.load %arg11[%136] : memref<24xf32, #tpu.memory_space<smem>>
    %138 = vector.broadcast %137 : f32 to vector<16x16xf32>
    %139 = arith.mulf %138, %80 : vector<16x16xf32>
    %c4_i32_37 = arith.constant 4 : i32
    %140 = arith.addi %0, %c4_i32_37 : i32
    %c2_i32_38 = arith.constant 2 : i32
    %141 = arith.addi %140, %c2_i32_38 : i32
    %c2_i32_39 = arith.constant 2 : i32
    %142 = arith.addi %141, %c2_i32_39 : i32
    %c1_i32_40 = arith.constant 1 : i32
    %143 = arith.addi %142, %c1_i32_40 : i32
    %144 = arith.index_cast %143 : i32 to index
    %145 = memref.load %arg11[%144] : memref<24xf32, #tpu.memory_space<smem>>
    %146 = vector.broadcast %145 : f32 to vector<16x16xf32>
    %147 = arith.mulf %146, %107 : vector<16x16xf32>
    %148 = arith.addf %139, %147 : vector<16x16xf32>
    %c8_i32_41 = arith.constant 8 : i32
    %149 = arith.addi %0, %c8_i32_41 : i32
    %c2_i32_42 = arith.constant 2 : i32
    %150 = arith.addi %149, %c2_i32_42 : i32
    %c1_i32_43 = arith.constant 1 : i32
    %151 = arith.addi %150, %c1_i32_43 : i32
    %152 = arith.index_cast %151 : i32 to index
    %153 = memref.load %arg11[%152] : memref<24xf32, #tpu.memory_space<smem>>
    %154 = vector.broadcast %153 : f32 to vector<16x16xf32>
    %155 = arith.addf %148, %154 : vector<16x16xf32>
    %156 = arith.truncf %155 : vector<16x16xf32> to vector<16x16xbf16>
    %cst_44 = arith.constant dense<0.000000e+00> : vector<16x8xf32>
    %157 = tpu.matmul %156, %52, %cst_44 {dimension_numbers = #tpu.dot_dimension_numbers<[1], [0], [0], [1], [0, 0, 1, 1], [], []>} : vector<16x16xbf16>, vector<16x8xbf16>, vector<16x8xf32> -> vector<16x8xf32>
    %158 = tpu.concatenate %132, %157 in 1 : vector<16x8xf32>, vector<16x8xf32> -> vector<16x16xf32>
    %159 = arith.truncf %158 : vector<16x16xf32> to vector<16x16xbf16>
    %160 = arith.index_cast %arg1 : i32 to index
    %c0_45 = arith.constant 0 : index
    %c0_46 = arith.constant 0 : index
    %161 = vector.load %arg6[%160, %c0_45, %c0_46] : memref<2x16x16xbf16, #tpu.memory_space<vmem>>, vector<1x16x16xbf16>
    %162 = vector.shape_cast %161 : vector<1x16x16xbf16> to vector<16x16xbf16>
    %cst_47 = arith.constant dense<0.000000e+00> : vector<16x16xf32>
    %163 = tpu.matmul %159, %162, %cst_47 {dimension_numbers = #tpu.dot_dimension_numbers<[1], [0], [0], [1], [0, 0, 1, 1], [], []>} : vector<16x16xbf16>, vector<16x16xbf16>, vector<16x16xf32> -> vector<16x16xf32>
    %164 = vector.broadcast %11 : vector<1x16xf32> to vector<16x16xf32>
    %165 = arith.addf %163, %164 : vector<16x16xf32>
    %166 = vector.broadcast %12 : vector<1x16xf32> to vector<16x16xf32>
    %167 = arith.mulf %166, %165 : vector<16x16xf32>
    %168 = arith.addf %4, %167 : vector<16x16xf32>
    %cst_48 = arith.constant dense<0.000000e+00> : vector<16xf32>
    %169 = vector.multi_reduction <add>, %168, %cst_48 [1] : vector<16x16xf32> to vector<16xf32>
    %170 = vector.shape_cast %169 : vector<16xf32> to vector<16x1xf32>
    %cst_49 = arith.constant 1.600000e+01 : f32
    %171 = vector.broadcast %cst_49 : f32 to vector<16x1xf32>
    %172 = arith.divf %170, %171 : vector<16x1xf32>
    %173 = vector.broadcast %172 : vector<16x1xf32> to vector<16x16xf32>
    %174 = arith.subf %168, %173 : vector<16x16xf32>
    %175 = arith.mulf %174, %174 : vector<16x16xf32>
    %cst_50 = arith.constant dense<0.000000e+00> : vector<16xf32>
    %176 = vector.multi_reduction <add>, %175, %cst_50 [1] : vector<16x16xf32> to vector<16xf32>
    %177 = vector.shape_cast %176 : vector<16xf32> to vector<16x1xf32>
    %cst_51 = arith.constant 1.600000e+01 : f32
    %178 = vector.broadcast %cst_51 : f32 to vector<16x1xf32>
    %179 = arith.divf %177, %178 : vector<16x1xf32>
    %cst_52 = arith.constant 9.99999997E-7 : f32
    %180 = vector.broadcast %cst_52 : f32 to vector<16x1xf32>
    %181 = arith.addf %179, %180 : vector<16x1xf32>
    %182 = math.rsqrt %181 : vector<16x1xf32>
    %183 = vector.broadcast %182 : vector<16x1xf32> to vector<16x16xf32>
    %184 = arith.mulf %174, %183 : vector<16x16xf32>
    %185 = vector.broadcast %13 : vector<1x16xf32> to vector<16x16xf32>
    %186 = arith.mulf %184, %185 : vector<16x16xf32>
    %187 = vector.broadcast %14 : vector<1x16xf32> to vector<16x16xf32>
    %188 = arith.addf %186, %187 : vector<16x16xf32>
    %189 = arith.truncf %188 : vector<16x16xf32> to vector<16x16xbf16>
    %190 = arith.index_cast %arg1 : i32 to index
    %c0_53 = arith.constant 0 : index
    %c0_54 = arith.constant 0 : index
    %191 = vector.load %arg7[%190, %c0_53, %c0_54] : memref<2x16x64xbf16, #tpu.memory_space<vmem>>, vector<1x16x64xbf16>
    %192 = vector.shape_cast %191 : vector<1x16x64xbf16> to vector<16x64xbf16>
    %cst_55 = arith.constant dense<0.000000e+00> : vector<16x64xf32>
    %193 = tpu.matmul %189, %192, %cst_55 {dimension_numbers = #tpu.dot_dimension_numbers<[1], [0], [0], [1], [0, 0, 1, 1], [], []>} : vector<16x16xbf16>, vector<16x64xbf16>, vector<16x64xf32> -> vector<16x64xf32>
    %194 = vector.broadcast %15 : vector<1x64xf32> to vector<16x64xf32>
    %195 = arith.addf %193, %194 : vector<16x64xf32>
    %196 = arith.mulf %195, %195 : vector<16x64xf32>
    %197 = arith.mulf %195, %196 : vector<16x64xf32>
    %cst_56 = arith.constant 4.471500e-02 : f32
    %198 = vector.broadcast %cst_56 : f32 to vector<16x64xf32>
    %199 = arith.mulf %198, %197 : vector<16x64xf32>
    %200 = arith.addf %195, %199 : vector<16x64xf32>
    %cst_57 = arith.constant 0.797884583 : f32
    %201 = vector.broadcast %cst_57 : f32 to vector<16x64xf32>
    %202 = arith.mulf %201, %200 : vector<16x64xf32>
    %203 = math.tanh %202 : vector<16x64xf32>
    %cst_58 = arith.constant 1.000000e+00 : f32
    %204 = vector.broadcast %cst_58 : f32 to vector<16x64xf32>
    %205 = arith.addf %204, %203 : vector<16x64xf32>
    %cst_59 = arith.constant 5.000000e-01 : f32
    %206 = vector.broadcast %cst_59 : f32 to vector<16x64xf32>
    %207 = arith.mulf %206, %205 : vector<16x64xf32>
    %208 = arith.mulf %195, %207 : vector<16x64xf32>
    %209 = arith.truncf %208 : vector<16x64xf32> to vector<16x64xbf16>
    %210 = arith.index_cast %arg1 : i32 to index
    %c0_60 = arith.constant 0 : index
    %c0_61 = arith.constant 0 : index
    %211 = vector.load %arg8[%210, %c0_60, %c0_61] : memref<2x64x16xbf16, #tpu.memory_space<vmem>>, vector<1x64x16xbf16>
    %212 = vector.shape_cast %211 : vector<1x64x16xbf16> to vector<64x16xbf16>
    %cst_62 = arith.constant dense<0.000000e+00> : vector<16x16xf32>
    %213 = tpu.matmul %209, %212, %cst_62 {dimension_numbers = #tpu.dot_dimension_numbers<[1], [0], [0], [1], [0, 0, 1, 1], [], []>} : vector<16x64xbf16>, vector<64x16xbf16>, vector<16x16xf32> -> vector<16x16xf32>
    %214 = vector.broadcast %16 : vector<1x16xf32> to vector<16x16xf32>
    %215 = arith.addf %213, %214 : vector<16x16xf32>
    %216 = vector.broadcast %17 : vector<1x16xf32> to vector<16x16xf32>
    %217 = arith.mulf %216, %215 : vector<16x16xf32>
    %218 = arith.addf %168, %217 : vector<16x16xf32>
    %c0_63 = arith.constant 0 : index
    %c0_64 = arith.constant 0 : index
    %219 = vector.load %arg13[%c0_63, %c0_64] : memref<16x16xf32, #tpu.memory_space<vmem>>, vector<16x16xf32>
    tpu.vector_store %arg13[%c0_63, %c0_64], %218 {strides = array<i32>} : memref<16x16xf32, #tpu.memory_space<vmem>>, vector<16x16xf32>,
    %c1_i32_65 = arith.constant 1 : i32
    %220 = arith.cmpi eq, %arg1, %c1_i32_65 : i32
    %221 = arith.extui %220 : i1 to i32
    %c0_i32_66 = arith.constant 0 : i32
    %222 = arith.cmpi ne, %221, %c0_i32_66 : i32
    scf.if %222 {
      %c0_67 = arith.constant 0 : index
      %c0_68 = arith.constant 0 : index
      %223 = vector.load %arg10[%c0_67, %c0_68] : memref<2x16xf32, #tpu.memory_space<vmem>>, vector<2x16xf32>
      %224 = vector.extract_strided_slice %223 {offsets = [0, 0], sizes = [1, 16], strides = [1, 1]} : vector<2x16xf32> to vector<1x16xf32>
      %225 = vector.extract_strided_slice %223 {offsets = [1, 0], sizes = [1, 16], strides = [1, 1]} : vector<2x16xf32> to vector<1x16xf32>
      %cst_69 = arith.constant dense<0.000000e+00> : vector<16xf32>
      %226 = vector.multi_reduction <add>, %218, %cst_69 [1] : vector<16x16xf32> to vector<16xf32>
      %227 = vector.shape_cast %226 : vector<16xf32> to vector<16x1xf32>
      %cst_70 = arith.constant 1.600000e+01 : f32
      %228 = vector.broadcast %cst_70 : f32 to vector<16x1xf32>
      %229 = arith.divf %227, %228 : vector<16x1xf32>
      %230 = vector.broadcast %229 : vector<16x1xf32> to vector<16x16xf32>
      %231 = arith.subf %218, %230 : vector<16x16xf32>
      %232 = arith.mulf %231, %231 : vector<16x16xf32>
      %cst_71 = arith.constant dense<0.000000e+00> : vector<16xf32>
      %233 = vector.multi_reduction <add>, %232, %cst_71 [1] : vector<16x16xf32> to vector<16xf32>
      %234 = vector.shape_cast %233 : vector<16xf32> to vector<16x1xf32>
      %cst_72 = arith.constant 1.600000e+01 : f32
      %235 = vector.broadcast %cst_72 : f32 to vector<16x1xf32>
      %236 = arith.divf %234, %235 : vector<16x1xf32>
      %cst_73 = arith.constant 9.99999997E-7 : f32
      %237 = vector.broadcast %cst_73 : f32 to vector<16x1xf32>
      %238 = arith.addf %236, %237 : vector<16x1xf32>
      %239 = math.rsqrt %238 : vector<16x1xf32>
      %240 = vector.broadcast %239 : vector<16x1xf32> to vector<16x16xf32>
      %241 = arith.mulf %231, %240 : vector<16x16xf32>
      %242 = vector.broadcast %224 : vector<1x16xf32> to vector<16x16xf32>
      %243 = arith.mulf %241, %242 : vector<16x16xf32>
      %244 = vector.broadcast %225 : vector<1x16xf32> to vector<16x16xf32>
      %245 = arith.addf %243, %244 : vector<16x16xf32>
      %c0_74 = arith.constant 0 : index
      %c0_75 = arith.constant 0 : index
      %c0_76 = arith.constant 0 : index
      %246 = vector.load %arg12[%c0_74, %c0_75, %c0_76] : memref<1x16x16xf32, #tpu.memory_space<vmem>>, vector<1x16x16xf32>
      %247 = vector.shape_cast %246 : vector<1x16x16xf32> to vector<16x16xf32>
      %248 = vector.shape_cast %245 : vector<16x16xf32> to vector<1x16x16xf32>
      tpu.vector_store %arg12[%c0_74, %c0_75, %c0_76], %248 {strides = array<i32>} : memref<1x16x16xf32, #tpu.memory_space<vmem>>, vector<1x16x16xf32>,
    } else {
    }
    return
  }
  func.func @transform_0(%arg0: i32, %arg1: i32) -> (i32, i32, i32) {
    %c0_i32 = arith.constant 0 : i32
    %c0_i32_0 = arith.constant 0 : i32
    %c0_i32_1 = arith.constant 0 : i32
    return %arg0, %c0_i32, %c0_i32_0 : i32, i32, i32
  }
  func.func @transform_1(%arg0: i32, %arg1: i32) -> (i32, i32) {
    %c0_i32 = arith.constant 0 : i32
    %c0_i32_0 = arith.constant 0 : i32
    %c0_i32_1 = arith.constant 0 : i32
    return %c0_i32, %c0_i32_0 : i32, i32
  }
  func.func @transform_2(%arg0: i32, %arg1: i32) -> (i32, i32) {
    %c0_i32 = arith.constant 0 : i32
    %c0_i32_0 = arith.constant 0 : i32
    %c0_i32_1 = arith.constant 0 : i32
    return %c0_i32, %c0_i32_0 : i32, i32
  }
  func.func @transform_3(%arg0: i32, %arg1: i32) -> (i32, i32, i32) {
    %c0_i32 = arith.constant 0 : i32
    %c0_i32_0 = arith.constant 0 : i32
    %c0_i32_1 = arith.constant 0 : i32
    %c0_i32_2 = arith.constant 0 : i32
    return %c0_i32, %c0_i32_0, %c0_i32_1 : i32, i32, i32
  }
  func.func @transform_4(%arg0: i32, %arg1: i32) -> (i32, i32, i32) {
    %c0_i32 = arith.constant 0 : i32
    %c0_i32_0 = arith.constant 0 : i32
    %c0_i32_1 = arith.constant 0 : i32
    %c0_i32_2 = arith.constant 0 : i32
    return %c0_i32, %c0_i32_0, %c0_i32_1 : i32, i32, i32
  }
  func.func @transform_5(%arg0: i32, %arg1: i32) -> (i32, i32, i32) {
    %c0_i32 = arith.constant 0 : i32
    %c0_i32_0 = arith.constant 0 : i32
    %c0_i32_1 = arith.constant 0 : i32
    %c0_i32_2 = arith.constant 0 : i32
    return %c0_i32, %c0_i32_0, %c0_i32_1 : i32, i32, i32
  }
  func.func @transform_6(%arg0: i32, %arg1: i32) -> (i32, i32, i32) {
    %c0_i32 = arith.constant 0 : i32
    %c0_i32_0 = arith.constant 0 : i32
    %c0_i32_1 = arith.constant 0 : i32
    %c0_i32_2 = arith.constant 0 : i32
    return %c0_i32, %c0_i32_0, %c0_i32_1 : i32, i32, i32
  }
  func.func @transform_7(%arg0: i32, %arg1: i32) -> (i32, i32, i32) {
    %c0_i32 = arith.constant 0 : i32
    %c0_i32_0 = arith.constant 0 : i32
    %c0_i32_1 = arith.constant 0 : i32
    %c0_i32_2 = arith.constant 0 : i32
    return %c0_i32, %c0_i32_0, %c0_i32_1 : i32, i32, i32
  }
  func.func @transform_8(%arg0: i32, %arg1: i32) -> (i32, i32) {
    %c0_i32 = arith.constant 0 : i32
    %c0_i32_0 = arith.constant 0 : i32
    %c0_i32_1 = arith.constant 0 : i32
    return %c0_i32, %c0_i32_0 : i32, i32
  }
  func.func @transform_9(%arg0: i32, %arg1: i32) -> i32 {
    %c0_i32 = arith.constant 0 : i32
    %c0_i32_0 = arith.constant 0 : i32
    return %c0_i32 : i32
  }
  func.func @transform_10(%arg0: i32, %arg1: i32) -> (i32, i32, i32) {
    %c0_i32 = arith.constant 0 : i32
    %c0_i32_0 = arith.constant 0 : i32
    %c0_i32_1 = arith.constant 0 : i32
    return %arg0, %c0_i32, %c0_i32_0 : i32, i32, i32
  }
}

</mosaic_0001>

<bundles_post_ra>
// kernel: a_call__.4
= control target key start
LH: loop header
LB: loop body
LE: loop exit
PB: predicated region body
PF: predicated region fallthrough
CT: control target
= control target key end

     0   :  { %vm42_vm0 = vcmask 261120   ;;  %vm758_vm1 = vcmask 130048   ;;  %s1243_s2 = inlined_call_operand.vmem [shape: f32[32,16], index: 2, kind: input, shape index: {}]   ;;  %s1244_s0 = inlined_call_operand.vmem [shape: f32[192,32], index: 0, kind: input, shape index: {}]   ;;  %s1245_s1 = inlined_call_operand.vmem [shape: f32[16,32], index: 1, kind: input, shape index: {}]   ;;  %s1246_s3 = inlined_call_operand.vmem [shape: f32[96,16], index: 3, kind: output, shape index: {}]  }
   0x1   :  { %v38_v0 = vld [vmem:[%s1243_s2] sm:$0xff]  ;;  %v39_v1 = vld [vmem:[%s1243_s2 + $0x8] sm:$0xff]  ;;  %v40_v2 = vld [vmem:[%s1243_s2 + $0x10] sm:$0xff] }
   0x2   :  { %v985_v3 = vpack.c.bf16 %v39_v1, %v38_v0  ;;  %v41_v4 = vld [vmem:[%s1243_s2 + $0x18] sm:$0xff]  ;;  %v14_v5 = vld [vmem:[%s1244_s0] sm:$0xff]  ;;  %v15_v7 = vld [vmem:[%s1244_s0 + $0x8] sm:$0xff] }
   0x3   :  { %v989_v6 = vpack.c.bf16 %v41_v4, %v40_v2  ;;  %883 = vmatprep.mubr.msk.f32.mxu0 %vm42_vm0, %v14_v5  ;;  %v16_v8 = vld [vmem:[%s1244_s0 + $0x10] sm:$0xff]  ;;  %v17_v9 = vld [vmem:[%s1244_s0 + $0x18] sm:$0xff]  ;;  %v18_v10 = vld [vmem:[%s1244_s0 + $0x20] sm:$0xff] }
   0x4   :  { %986 = vmatprep.subr.bf16.mxu0 %v985_v3  ;;  %v19_v11 = vld [vmem:[%s1244_s0 + $0x28] sm:$0xff]  ;;  %v20_v12 = vld [vmem:[%s1244_s0 + $0x30] sm:$0xff]  ;;  %v21_v13 = vld [vmem:[%s1244_s0 + $0x38] sm:$0xff] }
   0x5   :  { %988 = vmatpush3.bf16.msra.mxu0 %v985_v3  ;;  %v22_v14 = vld [vmem:[%s1244_s0 + $0x40] sm:$0xff]  ;;  %v23_v15 = vld [vmem:[%s1244_s0 + $0x48] sm:$0xff]  ;;  %v24_v16 = vld [vmem:[%s1244_s0 + $0x50] sm:$0xff] }
   0x6   :  { %990 = vmatprep.subr.bf16.mxu0 %v989_v6  ;;  %v25_v17 = vld [vmem:[%s1244_s0 + $0x58] sm:$0xff]  ;;  %v26_v18 = vld [vmem:[%s1244_s0 + $0x60] sm:$0xff]  ;;  %v27_v19 = vld [vmem:[%s1244_s0 + $0x68] sm:$0xff] }
   0x7   :  { %v28_v20 = vld [vmem:[%s1244_s0 + $0x70] sm:$0xff]  ;;  %v29_v21 = vld [vmem:[%s1244_s0 + $0x78] sm:$0xff]  ;;  %v30_v22 = vld [vmem:[%s1244_s0 + $0x80] sm:$0xff] }
   0x8   :  { %v31_v23 = vld [vmem:[%s1244_s0 + $0x88] sm:$0xff]  ;;  %v32_v24 = vld [vmem:[%s1244_s0 + $0x90] sm:$0xff]  ;;  %v33_v25 = vld [vmem:[%s1244_s0 + $0x98] sm:$0xff] }
   0x9   :  { %992 = vmatpush3.bf16.msra.mxu0 %v989_v6  ;;  %v34_v26 = vld [vmem:[%s1244_s0 + $0xa0] sm:$0xff]  ;;  %v35_v27 = vld [vmem:[%s1244_s0 + $0xa8] sm:$0xff]  ;;  %v36_v28 = vld [vmem:[%s1244_s0 + $0xb0] sm:$0xff] }
   0xa   :  { %v37_v29 = vld [vmem:[%s1244_s0 + $0xb8] sm:$0xff]  ;;  %v1172_v30 = vld [vmem:[%s1245_s1] sm:$0xff]  ;;  %v301_v39 = vld [vmem:[%s1245_s1 + $0x8] sm:$0xff] }
   0xb   :  { %927 = vmatprep.mubr.msk.f32.mxu1 %vm42_vm0, %v1172_v30 }
   0xc   :  { %884 = vmatmul.mubr.msk.f32.vlgmr.msra.gmra.mrb[0].mxu0 %vm42_vm0, %v15_v7 }
   0xd   :  { %886 = vmatprep.mubr.msk.f32.mxu0 %vm42_vm0, %v16_v8 }
  0x10   :  { %887 = vmatmul.mubr.msk.f32.gmra.mrb[2].mxu0 %vm42_vm0, %v17_v9 }
  0x11   :  { %889 = vmatprep.mubr.msk.f32.mxu0 %vm42_vm0, %v18_v10 }
  0x14   :  { %890 = vmatmul.mubr.msk.f32.gmra.mrb[4].mxu0 %vm42_vm0, %v19_v11 }
  0x15   :  { %892 = vmatprep.mubr.msk.f32.mxu0 %vm42_vm0, %v20_v12 }
  0x18   :  { %893 = vmatmul.mubr.msk.f32.gmra.mrb[6].mxu0 %vm42_vm0, %v21_v13 }
  0x19   :  { %895 = vmatprep.mubr.msk.f32.mxu0 %vm42_vm0, %v22_v14 }
  0x1c   :  { %896 = vmatmul.mubr.msk.f32.gmra.mrb[8].mxu0 %vm42_vm0, %v23_v15 }
  0x1d   :  { %898 = vmatprep.mubr.msk.f32.mxu0 %vm42_vm0, %v24_v16 }
  0x20   :  { %899 = vmatmul.mubr.msk.f32.gmra.mrb[10].mxu0 %vm42_vm0, %v25_v17 }
  0x21   :  { %901 = vmatprep.mubr.msk.f32.mxu0 %vm42_vm0, %v26_v18 }
  0x24   :  { %902 = vmatmul.mubr.msk.f32.gmra.mrb[12].mxu0 %vm42_vm0, %v27_v19 }
  0x25   :  { %904 = vmatprep.mubr.msk.f32.mxu0 %vm42_vm0, %v28_v20 }
  0x28   :  { %905 = vmatmul.mubr.msk.f32.gmra.mrb[14].mxu0 %vm42_vm0, %v29_v21 }
  0x29   :  { %907 = vmatprep.mubr.msk.f32.mxu0 %vm42_vm0, %v30_v22 }
  0x2c   :  { %908 = vmatmul.mubr.msk.f32.gmra.mrb[16].mxu0 %vm42_vm0, %v31_v23 }
  0x2d   :  { %910 = vmatprep.mubr.msk.f32.mxu0 %vm42_vm0, %v32_v24 }
  0x30   :  { %911 = vmatmul.mubr.msk.f32.gmra.mrb[18].mxu0 %vm42_vm0, %v33_v25 }
  0x31   :  { %913 = vmatprep.mubr.msk.f32.mxu0 %vm42_vm0, %v34_v26 }
  0x34   :  { %914 = vmatmul.mubr.msk.f32.gmra.mrb[20].mxu0 %vm42_vm0, %v35_v27 }
  0x35   :  { %916 = vmatprep.mubr.msk.f32.mxu0 %vm42_vm0, %v36_v28 }
  0x38   :  { %917 = vmatmul.mubr.msk.f32.gmra.mrb[22].mxu0 %vm42_vm0, %v37_v29 }
  0xdf   :  { %v885_v31 = vpop.f32.mrb[0].mxu0 }
  0xe0   :  { %v181_v32 = vpop.f32.mrb[1].mxu0 }
  0xe1   :  { %v993_v33 = vpack.c.bf16 %v885_v31, %v181_v32 }
  0xe3   :  { %v888_v34 = vpop.f32.mrb[2].mxu0  ;;  %994 = vmatprep.subr.bf16.mxu1 %v993_v33 }
  0xe4   :  { %v191_v35 = vpop.f32.mrb[3].mxu0  ;;  %996 = vmatpush3.bf16.msra.mxu1 %v993_v33 }
  0xe5   :  { %v997_v36 = vpack.c.bf16 %v888_v34, %v191_v35 }
  0xe7   :  { %v891_v37 = vpop.f32.mrb[4].mxu0  ;;  %998 = vmatprep.subr.bf16.mxu1 %v997_v36 }
  0xe8   :  { %v201_v38 = vpop.f32.mrb[5].mxu0  ;;  %1000 = vmatpush3.bf16.msra.mxu1 %v997_v36 }
  0xe9   :  { %v1001_v40 = vpack.c.bf16 %v891_v37, %v201_v38 }
  0xeb   :  { %v894_v41 = vpop.f32.mrb[6].mxu0  ;;  %928 = vmatmul.mubr.msk.f32.vlgmr.msra.gmra.mrb[0].mxu1 %vm42_vm0, %v301_v39  ;;  %1002 = vmatprep.subr.bf16.mxu1 %v1001_v40 }
  0xec   :  { %v211_v42 = vpop.f32.mrb[7].mxu0  ;;  %1004 = vmatpush3.bf16.msra.mxu1 %v1001_v40  ;;  %938 = vmatprep.mubr.msk.f32.mxu1 %vm42_vm0, %v1172_v30 }
  0xed   :  { %v1005_v43 = vpack.c.bf16 %v894_v41, %v211_v42 }
  0xef   :  { %v897_v44 = vpop.f32.mrb[8].mxu0  ;;  %1006 = vmatprep.subr.bf16.mxu1 %v1005_v43 }
  0xf0   :  { %v221_v45 = vpop.f32.mrb[9].mxu0  ;;  %1008 = vmatpush3.bf16.msra.mxu1 %v1005_v43 }
  0xf1   :  { %v1009_v46 = vpack.c.bf16 %v897_v44, %v221_v45 }
  0xf3   :  { %v900_v47 = vpop.f32.mrb[10].mxu0  ;;  %939 = vmatmul.mubr.msk.f32.vlgmr.msra.gmra.mrb[2].mxu1 %vm42_vm0, %v301_v39  ;;  %1010 = vmatprep.subr.bf16.mxu1 %v1009_v46 }
  0xf4   :  { %v231_v48 = vpop.f32.mrb[11].mxu0  ;;  %1012 = vmatpush3.bf16.msra.mxu1 %v1009_v46  ;;  %949 = vmatprep.mubr.msk.f32.mxu1 %vm42_vm0, %v1172_v30 }
  0xf5   :  { %v1013_v49 = vpack.c.bf16 %v900_v47, %v231_v48 }
  0xf7   :  { %v903_v50 = vpop.f32.mrb[12].mxu0  ;;  %1014 = vmatprep.subr.bf16.mxu1 %v1013_v49 }
  0xf8   :  { %v241_v51 = vpop.f32.mrb[13].mxu0  ;;  %1016 = vmatpush3.bf16.msra.mxu1 %v1013_v49 }
  0xf9   :  { %v1017_v52 = vpack.c.bf16 %v903_v50, %v241_v51 }
  0xfb   :  { %v906_v53 = vpop.f32.mrb[14].mxu0  ;;  %950 = vmatmul.mubr.msk.f32.vlgmr.msra.gmra.mrb[4].mxu1 %vm42_vm0, %v301_v39  ;;  %1018 = vmatprep.subr.bf16.mxu1 %v1017_v52 }
  0xfc   :  { %v251_v54 = vpop.f32.mrb[15].mxu0  ;;  %1020 = vmatpush3.bf16.msra.mxu1 %v1017_v52  ;;  %960 = vmatprep.mubr.msk.f32.mxu1 %vm42_vm0, %v1172_v30 }
  0xfd   :  { %v1021_v55 = vpack.c.bf16 %v906_v53, %v251_v54 }
  0xff   :  { %v909_v56 = vpop.f32.mrb[16].mxu0  ;;  %1022 = vmatprep.subr.bf16.mxu1 %v1021_v55 }
 0x100   :  { %v261_v57 = vpop.f32.mrb[17].mxu0  ;;  %1024 = vmatpush3.bf16.msra.mxu1 %v1021_v55 }
 0x101   :  { %v1025_v58 = vpack.c.bf16 %v909_v56, %v261_v57 }
 0x103   :  { %v912_v59 = vpop.f32.mrb[18].mxu0  ;;  %961 = vmatmul.mubr.msk.f32.vlgmr.msra.gmra.mrb[6].mxu1 %vm42_vm0, %v301_v39  ;;  %1026 = vmatprep.subr.bf16.mxu1 %v1025_v58 }
 0x104   :  { %v271_v60 = vpop.f32.mrb[19].mxu0  ;;  %1028 = vmatpush3.bf16.msra.mxu1 %v1025_v58  ;;  %971 = vmatprep.mubr.msk.f32.mxu1 %vm42_vm0, %v1172_v30 }
 0x105   :  { %v1029_v61 = vpack.c.bf16 %v912_v59, %v271_v60 }
 0x107   :  { %v915_v62 = vpop.f32.mrb[20].mxu0  ;;  %1030 = vmatprep.subr.bf16.mxu1 %v1029_v61 }
 0x108   :  { %v281_v63 = vpop.f32.mrb[21].mxu0  ;;  %1032 = vmatpush3.bf16.msra.mxu1 %v1029_v61 }
 0x109   :  { %v1033_v0 = vpack.c.bf16 %v915_v62, %v281_v63 }
 0x10b   :  { %v918_v1 = vpop.f32.mrb[22].mxu0  ;;  %972 = vmatmul.mubr.msk.f32.vlgmr.msra.gmra.mrb[8].mxu1 %vm42_vm0, %v301_v39  ;;  %1034 = vmatprep.subr.bf16.mxu1 %v1033_v0 }
 0x10c   :  { %v291_v2 = vpop.f32.mrb[23].mxu0  ;;  %1036 = vmatpush3.bf16.msra.mxu1 %v1033_v0  ;;  %982 = vmatprep.mubr.msk.f32.mxu1 %vm42_vm0, %v1172_v30 }
 0x10d   :  { %v1037_v3 = vpack.c.bf16 %v918_v1, %v291_v2 }
 0x10f   :  { %1038 = vmatprep.subr.bf16.mxu1 %v1037_v3 }
 0x110   :  { %1040 = vmatpush3.bf16.msra.mxu1 %v1037_v3 }
 0x113   :  { %983 = vmatmul.mubr.msk.f32.vlgmr.msra.gmra.mrb[10].mxu1 %vm42_vm0, %v301_v39 }
 0x1be   :  { %v929_v4 = vpop.f32.mrb[0].mxu1 }
 0x1bf   :  { %760 = vst.msk [vmem:[%s1246_s3 + $0x8] sm:$0xff] %vm758_vm1, %v929_v4  ;;  %v374_v5 = vpop.f32.mrb[1].mxu1 }
 0x1c0   :  { %759 = vst.msk [vmem:[%s1246_s3] sm:$0xff] %vm758_vm1, %v374_v5 }
 0x1c6   :  { %v940_v6 = vpop.f32.mrb[2].mxu1 }
 0x1c7   :  { %762 = vst.msk [vmem:[%s1246_s3 + $0x18] sm:$0xff] %vm758_vm1, %v940_v6  ;;  %v449_v7 = vpop.f32.mrb[3].mxu1 }
 0x1c8   :  { %761 = vst.msk [vmem:[%s1246_s3 + $0x10] sm:$0xff] %vm758_vm1, %v449_v7 }
 0x1ce   :  { %v951_v8 = vpop.f32.mrb[4].mxu1 }
 0x1cf   :  { %764 = vst.msk [vmem:[%s1246_s3 + $0x28] sm:$0xff] %vm758_vm1, %v951_v8  ;;  %v524_v9 = vpop.f32.mrb[5].mxu1 }
 0x1d0   :  { %763 = vst.msk [vmem:[%s1246_s3 + $0x20] sm:$0xff] %vm758_vm1, %v524_v9 }
 0x1d6   :  { %v962_v10 = vpop.f32.mrb[6].mxu1 }
 0x1d7   :  { %766 = vst.msk [vmem:[%s1246_s3 + $0x38] sm:$0xff] %vm758_vm1, %v962_v10  ;;  %v599_v11 = vpop.f32.mrb[7].mxu1 }
 0x1d8   :  { %765 = vst.msk [vmem:[%s1246_s3 + $0x30] sm:$0xff] %vm758_vm1, %v599_v11 }
 0x1de   :  { %v973_v12 = vpop.f32.mrb[8].mxu1 }
 0x1df   :  { %768 = vst.msk [vmem:[%s1246_s3 + $0x48] sm:$0xff] %vm758_vm1, %v973_v12  ;;  %v674_v13 = vpop.f32.mrb[9].mxu1 }
 0x1e0   :  { %767 = vst.msk [vmem:[%s1246_s3 + $0x40] sm:$0xff] %vm758_vm1, %v674_v13 }
 0x1e6   :  { %v984_v14 = vpop.f32.mrb[10].mxu1 }
 0x1e7   :  { %770 = vst.msk [vmem:[%s1246_s3 + $0x58] sm:$0xff] %vm758_vm1, %v984_v14  ;;  %v749_v15 = vpop.f32.mrb[11].mxu1 }
 0x1e8   :  { %769 = vst.msk [vmem:[%s1246_s3 + $0x50] sm:$0xff] %vm758_vm1, %v749_v15 }

// kernel: a_call__.3
= control target key start
LH: loop header
LB: loop body
LE: loop exit
PB: predicated region body
PF: predicated region fallthrough
CT: control target
= control target key end

     0   :  { %s6602_s0 = inlined_call_operand.vmem [shape: f32[2,64,48], index: 0, kind: input, shape index: {}]   ;;  %s6603_s1 = inlined_call_operand.vmem [shape: bf16[48,32], index: 1, kind: input, shape index: {}]   ;;  %s6604_s2 = inlined_call_operand.vmem [shape: f32[64,32], index: 2, kind: input, shape index: {}]   ;;  %s6605_s3 = inlined_call_operand.vmem [shape: bf16[3,32,96], index: 3, kind: input, shape index: {}]   ;;  %s6606_s4 = inlined_call_operand.vmem [shape: bf16[3,32,32], index: 4, kind: input, shape index: {}]   ;;  %s6607_s5 = inlined_call_operand.vmem [shape: bf16[3,32,128], index: 5, kind: input, shape index: {}]   ;;  %s6608_s6 = inlined_call_operand.vmem [shape: bf16[3,128,32], index: 6, kind: input, shape index: {}]   ;;  %s6609_s7 = inlined_call_operand.vmem [shape: f32[3,10,128], index: 7, kind: input, shape index: {}]   ;;  %s6610_s8 = inlined_call_operand.vmem [shape: f32[2,32], index: 8, kind: input, shape index: {}]   ;;  %s6611_s9 = inlined_call_operand.vmem [shape: f32[120], index: 9, kind: input, shape index: {}]   ;;  %s6612_s10 = inlined_call_operand.hbm [shape: f32[2,64,32], index: 10, kind: output, shape index: {}]  }
   0x1   :  { %6665 = sst [smem:[#allocation71_spill]] %s6602_s0 }
   0x2   :  { %6666 = sst [smem:[#allocation72_spill]] %s6603_s1 }
   0x3   :  { %6667 = sst [smem:[#allocation73_spill]] %s6604_s2 }
   0x4   :  { %6668 = sst [smem:[#allocation74_spill]] %s6605_s3 }
   0x5   :  { %6669 = sst [smem:[#allocation75_spill]] %s6609_s7 }
   0x6   :  { %6670 = sst [smem:[#allocation76_spill]] %s6611_s9 }
   0x7   :  { %15 = vsyncpa [#allocation5], 0 }
   0x8   :  { %16 = vsyncpa [#allocation4], 0 }
   0x9   :  { %18 = vsyncpa [#allocation4 + $0x1], 0  ;;  %s4489_s13 = smov 0   ;;  %s4491_s14 = smov 0  }
   0xa   :  { %s4493_s15 = smov 0   ;;  %s4495_s16 = smov 0  }
   0xb   :  { %s4497_s17 = smov 0   ;;  %s4499_s18 = smov 0  }
   0xc   :  { %s4501_s19 = smov 0   ;;  %s4503_s20 = smov 0  }
   0xd LB: > { %6671 = sst [smem:[#allocation9_spill]] %s4387_s13  ;;  %s3509_s21 = sadd.s32 4294967295, %s4415_s20   ;;  %s4415_s20 = sphi %s4503_s20, %s24_s20   ;;  %s4411_s19 = sphi %s4501_s19, %s6860_s19   ;;  %s4407_s18 = sphi %s4499_s18, %s6859_s18   ;;  %s4403_s17 = sphi %s4497_s17, %s6858_s17   ;;  %s4399_s16 = sphi %s4495_s16, %s6857_s16   ;;  %s4395_s15 = sphi %s4493_s15, %s6856_s15   ;;  %s4391_s14 = sphi %s4491_s14, %s6862_s14   ;;  %s4387_s13 = sphi %s4489_s13, %s6861_s13  }
   0xe   : > { %6672 = sst [smem:[#allocation10_spill]] %s4395_s15  ;;  %s3510_s22 = sadd.s32 4294967294, %s4415_s20  }
   0xf   : > { %6673 = sst [smem:[#allocation11_spill]] %s4407_s18  ;;  %s33_s23 = sadd.s32 1, %s4407_s18 }
  0x10   : > { %6674 = sst [smem:[#allocation12_spill]] %s4411_s19  ;;  %s36_s24 = sadd.s32 1, %s4411_s19 }
  0x11   : > { %p34_p0 = scmp.ge.s32.totalorder %s33_s23, 3  ;;  %s258_s25 = sadd.s32 1, %s4395_s15 }
  0x12   : > { %p268_p1 = scmp.ne.s32.totalorder %s4395_s15, %s4391_s14  ;;  %p269_p2 = scmp.eq.s32.totalorder %s3509_s21, 5 }
  0x13   : > { %s6864_s23 = smov (%p34_p0, %s33_s23), 0  ;;  %s6866_s24 = smov (!%p34_p0, %s36_s24), %s4411_s19 }
  0x14   : > { %6675 = sst [smem:[#allocation13_spill]] %s6864_s23  ;;  %p4539_p3 = por %p269_p2, %p268_p1 }
  0x15   : > { %p274_p4 = scmp.ne.s32.totalorder %s4391_s14, %s4387_s13  ;;  %p38_p5 = scmp.ge.s32.totalorder %s6866_s24, 2 }
  0x16   : > { %p275_p6 = scmp.eq.s32.totalorder %s3510_s22, 5  ;;  %p3511_p7 = scmp.ge.s32.totalorder %s4415_s20, 1 }
  0x17   : > { %p282_p8 = scmp.lt.s32.totalorder %s4415_s20, 7  ;;  %s6868_s24 = smov (%p38_p5, %s6866_s24), 0 }
  0x18   : > { %6677 = sst [smem:[#allocation14_spill]] %s6868_s24  ;;  %p4549_p9 = por %p275_p6, %p274_p4 }
  0x19   : > { %p4553_p10 = pnand %p3511_p7, %p282_p8  ;;  %s255_s29 = ssub.s32 %s4411_s19, %s6868_s24 }
  0x1a   : > { %s6678_s27 = scalar_select %p4549_p9, 1, 0 }
  0x1b   : > { %p256_p11 = scmp.eq.s32.totalorder %s255_s29, 0  ;;  %p3934_p12 = pneg %p4553_p10 }
  0x1c   : > { %6679 = sst [smem:[#allocation15_spill]] %s6678_s27  ;;  %p4561_p13 = scmp.eq.s32.totalorder %s3509_s21, 0 }
  0x1d   : > { %s6682_s9 = sld [smem:[#allocation76_spill]] }
  0x1e   : > { %s4569_s23 = scalar_select %p256_p11, %s4395_s15, %s258_s25  }
  0x1f   : > { %p3935_p0 = pnand %p4561_p13, %p3934_p12 }
  0x20   : > { %6683 = sst [smem:[#allocation16_spill]] %s4569_s23 }
  0x21   : > { %p4304_p2 = pneg %p3935_p0 }
  0x23   : > { %s319_s22 = sshll.u32 %s6682_s9, 4  ;;  %s320_s22 = int_to_ptr.vmem [resolvable:$true] %s319_s22 }
  0x24   : > { %s4302_s18 = scalar_lea.vmem %s320_s22, 16  ;;  %p4310_p6 = scmp.lt.s32.totalorder %s320_s22, %s320_s22 }
  0x25   : > { %p4303_p1 = scmp.ne.s32.totalorder %s320_s22, %s4302_s18  ;;  %p4311_p7 = scmp.lt.s32.totalorder %s4302_s18, %s4302_s18 }
  0x27   : > { %p4305_p4 = pnand %p4304_p2, %p4303_p1  ;;  %p4312_p8 = por %p4311_p7, %p4310_p6 }
  0x29   : > { %p4306_p5 = pneg %p4305_p4 }
  0x2b   : > { %p4313_p9 = pnand %p4312_p8, %p4306_p5 }
  0x2d   : > { %4316 = shalt.err (!%p4313_p9)
}
  0x2e   : > { %s4417_s21 = smov [#allocation3]   ;;  %340 = sbr.rel (%p4553_p10) target bundleno = 3422 (0xd5e), region = 60 }
  0x2f   : > { %3937 = dma.vmem_to_smem (!%p3935_p0), %s320_s22, 16, %s4417_s21, [#allocation5]  }
  0x35   : > { %4378 = dma.done.wait (%p4561_p13), [#allocation5], 16  }
  0x36   : > { %4380 = vsyncadd (%p4561_p13), [#allocation5], 4294967280 }
  0x37   : > { %346 = sfence }
  0x38   : > { %s6616_s18 = sand.u32 1, %s4391_s14   ;;  %p379_p11 = scmp.lt.s32.totalorder %s4403_s17, 1 }
  0x39   : > { %s3516_s25 = sshll.u32 %s6616_s18, 6  ;;  %s4584_s29 = smul.u32 40, %s4399_s16 }
  0x3a   : > { %s380_s28 = scalar_select %p379_p11, %s4403_s17, 1 }
  0x3b   : > { %s6684_s0 = sld [smem:[#allocation71_spill]]  ;;  %s4590_s30 = scalar_lea.vmem [#allocation6], %s3516_s25 }
  0x3c   : > { %s3597_s11 = sshll.u32 %s380_s28, 6  ;;  %p3519_p9 = scmp.ne.s32.totalorder %s4399_s16, 0 }
  0x3d   : > { %s6685_s1 = sld [smem:[#allocation72_spill]] (!%p3519_p9)  ;;  %vm434_vm0 = vcmask (!%p3519_p9), 392192   ;;  %s6686_s2 = sld [smem:[#allocation73_spill]] (!%p3519_p9)  ;;  %vm512_vm1 = vcmask (!%p3519_p9), 261120  }
  0x3e   : > { %389 = sbr.rel (%p3519_p9) target bundleno = 298 (0x12a), region = 68 }
  0x41   : > { %s383_s21 = scalar_lea.vmem %s6684_s0, %s3597_s11 }
  0x42   : > { %v390_v2 = vld [vmem:[%s383_s21] sm:$0xff] (!%p3519_p9)  ;;  %v391_v3 = vld [vmem:[%s383_s21 + $0x8] sm:$0xff] (!%p3519_p9)  ;;  %v392_v9 = vld [vmem:[%s383_s21 + $0x10] sm:$0xff] (!%p3519_p9) }
  0x43   : > { %v4025_v0 = vld [vmem:[%s6685_s1] sm:$0xff] (!%p3519_p9)   ;;  %v4026_v1 = vld [vmem:[%s6685_s1 + $0x8] sm:$0xff] (!%p3519_p9)   ;;  %v4027_v5 = vld [vmem:[%s6685_s1 + $0x10] sm:$0xff] (!%p3519_p9)   ;;  %v398_v6 = vpack.c.bf16 (!%p3519_p9), %v391_v3, %v390_v2 }
  0x44   : > { %3704 = vmatprep.subr.bf16.mxu0 (!%p3519_p9), %v4025_v0  ;;  %3906 = vmatprep.subr.bf16.mxu1 (!%p3519_p9), %v4025_v0  ;;  %v394_v4 = vld [vmem:[%s383_s21 + $0x20] sm:$0xff] (!%p3519_p9)  ;;  %v395_v7 = vld [vmem:[%s383_s21 + $0x28] sm:$0xff] (!%p3519_p9)  ;;  %v393_v10 = vld [vmem:[%s383_s21 + $0x18] sm:$0xff] (!%p3519_p9) }
  0x45   : > { %3705 = vmatpush3.bf16.msra.mxu0 %v4025_v0  ;;  %3909 = vmatpush3.bf16.msra.mxu1 %v4025_v0  ;;  %v400_v8 = vpack.c.bf16 %v395_v7, %v394_v4  ;;  %v396_v11 = vld [vmem:[%s383_s21 + $0x30] sm:$0xff]  ;;  %v397_v12 = vld [vmem:[%s383_s21 + $0x38] sm:$0xff]  ;;  %v399_v13 = vpack.c.bf16 %v393_v10, %v392_v9  ;;  %v408_v17 = vld [vmem:[%s6686_s2] sm:$0xff] }
  0x46   : > { %3706 = vmatprep.subr.bf16.mxu0 %v4026_v1  ;;  %3907 = vmatprep.subr.bf16.mxu1 %v4026_v1  ;;  %v401_v14 = vpack.c.bf16 %v397_v12, %v396_v11  ;;  %v410_v15 = vld [vmem:[%s6686_s2 + $0x10] sm:$0xff]  ;;  %v412_v18 = vld [vmem:[%s6686_s2 + $0x20] sm:$0xff]  ;;  %v411_v21 = vld [vmem:[%s6686_s2 + $0x18] sm:$0xff] }
  0x47   : > { %3710 = vmatprep.mubr.msk.bf16.mxu0 %vm434_vm0, %v398_v6  ;;  %3714 = vmatprep.mubr.msk.bf16.mxu1 %vm434_vm0, %v400_v8  ;;  %v414_v16 = vld [vmem:[%s6686_s2 + $0x30] sm:$0xff]  ;;  %v415_v22 = vld [vmem:[%s6686_s2 + $0x38] sm:$0xff]  ;;  %v409_v27 = vld [vmem:[%s6686_s2 + $0x8] sm:$0xff] }
  0x48   : > { %v413_v28 = vld [vmem:[%s6686_s2 + $0x28] sm:$0xff] }
  0x49   : > { %3707 = vmatpush3.bf16.msra.mxu0 %v4026_v1  ;;  %3910 = vmatpush3.bf16.msra.mxu1 %v4026_v1 }
  0x4a   : > { %3708 = vmatprep.subr.bf16.mxu0 %v4027_v5  ;;  %3908 = vmatprep.subr.bf16.mxu1 %v4027_v5 }
  0x4d   : > { %3709 = vmatpush3.bf16.msra.mxu0 %v4027_v5  ;;  %3911 = vmatpush3.bf16.msra.mxu1 %v4027_v5 }
  0x50   : > { %3711 = vmatmul.mubr.msk.bf16.vlgmr.msra.gmra.mrb[0].mxu0 %vm434_vm0, %v399_v13  ;;  %3715 = vmatmul.mubr.msk.bf16.vlgmr.msra.gmra.mrb[0].mxu1 %vm434_vm0, %v401_v14 }
 0x123   : > { %v3712_v19 = vpop.f32.mrb[0].mxu0  ;;  %v3716_v20 = vpop.f32.mrb[0].mxu1 }
 0x124   : > { %v490_v23 = vadd.f32 %v3712_v19, %v410_v15  ;;  %v506_v24 = vadd.f32 %v3716_v20, %v414_v16  ;;  %v481_v25 = vpop.f32.mrb[1].mxu0  ;;  %v497_v26 = vpop.f32.mrb[1].mxu1 }
 0x125   : > { %v482_v29 = vadd.f32 %v481_v25, %v408_v17  ;;  %v498_v30 = vadd.f32 %v497_v26, %v412_v18  ;;  %v3713_v31 = vpop.f32.mrb[2].mxu0  ;;  %v3717_v32 = vpop.f32.mrb[2].mxu1 }
 0x126   : > { %515 = vst.msk [vmem:[#allocation2 + $0x10] sm:$0xff] %vm512_vm1, %v490_v23  ;;  %519 = vst.msk [vmem:[#allocation2 + $0x30] sm:$0xff] %vm512_vm1, %v506_v24  ;;  %v493_v33 = vadd.f32 %v3713_v31, %v411_v21  ;;  %v509_v34 = vadd.f32 %v3717_v32, %v415_v22  ;;  %v484_v35 = vpop.f32.mrb[3].mxu0  ;;  %v500_v36 = vpop.f32.mrb[3].mxu1 }
 0x127   : > { %513 = vst.msk [vmem:[#allocation2] sm:$0xff] %vm512_vm1, %v482_v29  ;;  %517 = vst.msk [vmem:[#allocation2 + $0x20] sm:$0xff] %vm512_vm1, %v498_v30  ;;  %v485_v37 = vadd.f32 %v484_v35, %v409_v27  ;;  %v501_v38 = vadd.f32 %v500_v36, %v413_v28 }
 0x128   : > { %516 = vst.msk [vmem:[#allocation2 + $0x18] sm:$0xff] %vm512_vm1, %v493_v33  ;;  %520 = vst.msk [vmem:[#allocation2 + $0x38] sm:$0xff] %vm512_vm1, %v509_v34 }
 0x129   : > { %514 = vst.msk [vmem:[#allocation2 + $0x8] sm:$0xff] %vm512_vm1, %v485_v37  ;;  %518 = vst.msk [vmem:[#allocation2 + $0x28] sm:$0xff] %vm512_vm1, %v501_v38 }
 0x12a PF: > { %vm533_vm2 = vcmask 261120   ;;  %v639_v31 = vlaneseq  ;;  %s4687_s22 = sshll.u32 %s4399_s16, 4  ;;  %s6687_s7 = sld [smem:[#allocation75_spill]]  ;;  %vm783_vm3 = vcmask 64512   ;;  %vm1266_vm4 = vcmask 523264  }
 0x12b   : > { %s6690_s3 = sld [smem:[#allocation74_spill]]  ;;  %s4418_s24 = smov 88   ;;  %vm2648_vm5 = vcmask 130048   ;;  %vm2657_vm6 = vcmask 195584  }
 0x12c   : > { %v640_v32 = vshrl.u32 %v639_v31, 7  ;;  %s4419_s11 = smov 96   ;;  %s4420_s12 = smov 80  }
 0x12d   : > { %v523_v40 = vld [vmem:[#allocation2 + $0x10] sm:$0xff]  ;;  %s4421_s21 = smov 120   ;;  %s4422_s25 = smov 72  }
 0x12e   : > { %v521_v39 = vld [vmem:[#allocation2] sm:$0xff]  ;;  %v540_v43 = vsel %vm533_vm2, %v523_v40, 0.0  ;;  %v527_v51 = vld [vmem:[#allocation2 + $0x30] sm:$0xff]  ;;  %v4693_v34 = vsub.s32 0, %v640_v32  ;;  %v4695_v35 = vsub.s32 1, %v640_v32  ;;  %v676_v37 = vsub.s32 2, %v640_v32 }
 0x12f   : > { %v534_v42 = vsel %vm533_vm2, %v521_v39, 0.0  ;;  %v524_v44 = vld [vmem:[#allocation2 + $0x18] sm:$0xff]  ;;  %541 = vadd.xlane.f32.xlu1 %v540_v43  ;;  %v525_v47 = vld [vmem:[#allocation2 + $0x20] sm:$0xff]  ;;  %v552_v53 = vsel %vm533_vm2, %v527_v51, 0.0  ;;  %v2678_v38 = vsub.s32 3, %v640_v32  ;;  %s4424_s9 = smov 104  }
 0x130   : > { %v522_v41 = vld [vmem:[#allocation2 + $0x8] sm:$0xff]  ;;  %535 = vadd.xlane.f32.xlu0 %v534_v42  ;;  %v543_v46 = vsel %vm533_vm2, %v524_v44, 0.0  ;;  %v546_v49 = vsel %vm533_vm2, %v525_v47, 0.0  ;;  %v528_v52 = vld [vmem:[#allocation2 + $0x38] sm:$0xff]  ;;  %s530_s28 = scalar_lea.vmem %s6687_s7, %s4687_s22  ;;  %6688 = vst [vmem:[#allocation17_spill] sm:$0xff] %v4693_v34  ;;  %6689 = vst [vmem:[#allocation18_spill] sm:$0xff] %v4695_v35 }
 0x131   : > { %v537_v45 = vsel %vm533_vm2, %v522_v41, 0.0  ;;  %v526_v48 = vld [vmem:[#allocation2 + $0x28] sm:$0xff]  ;;  %v555_v54 = vsel %vm533_vm2, %v528_v52, 0.0  ;;  %v531_v33 = vld [vmem:[%s530_s28] sm:$0xff]  ;;  %s669_s23 = scalar_lea.vmem %s6690_s3, %s4687_s22  ;;  %v2907_v42 = vsub.s32 6, %v640_v32  ;;  %s1355_s19 = sadd.s32 4, %s4584_s29 }
 0x132   : > { %v549_v50 = vsel %vm533_vm2, %v526_v48, 0.0  ;;  %v532_v36 = vld [vmem:[%s530_s28 + $0x8] sm:$0x3]  ;;  %s4423_s28 = smov 112   ;;  %p3591_p10 = scmp.ne.s32.totalorder %s4399_s16, 2 }
 0x133   : > { %544 = vadd.xlane.f32.xlu1 %v543_v46  ;;  %v4702_v43 = vrot.slane %v532_v36, %v4693_v34  ;;  %v4709_v46 = vrot.slane %v531_v33, %v2678_v38 }
 0x134   : > { %538 = vadd.xlane.f32.xlu0 %v537_v45  ;;  %v4707_v45 = vrot.slane %v531_v33, %v676_v37 }
 0x135   : > { %6691 = vst [vmem:[#allocation19_spill] sm:$0xff] %v4702_v43  ;;  %6693 = vst [vmem:[#allocation21_spill] sm:$0xff] %v4709_v46 }
 0x137   : > { %550 = vadd.xlane.f32.xlu1 %v549_v50  ;;  %v4715_v50 = vrot.slane %v531_v33, %v2907_v42 }
 0x138   : > { %547 = vadd.xlane.f32.xlu0 %v546_v49  ;;  %v4089_v49 = vld [vmem:[%s669_s23 + $0x8] sm:$0xff]  }
 0x139   : > { %6696 = vst [vmem:[#allocation24_spill] sm:$0xff] %v4715_v50 }
 0x13b   : > { %556 = vadd.xlane.f32.xlu1 %v555_v54 }
 0x13c   : > { %553 = vadd.xlane.f32.xlu0 %v552_v53 }
 0x1bc   : > { %v542_v56 = vpop.xlane.xlu1 %541 }
 0x1bd   : > { %v536_v55 = vpop.xlane.xlu0 %535  ;;  %v561_v58 = vmul.f32 0.03125, %v542_v56 }
 0x1be   : > { %v559_v57 = vmul.f32 0.03125, %v536_v55 }
 0x1bf   : > { %v4648_v60 = vsub.f32 %v523_v40, %v561_v58  ;;  %v2895_v40 = vsub.s32 5, %v640_v32 }
 0x1c0   : > { %v4646_v59 = vsub.f32 %v521_v39, %v559_v57  ;;  %v545_v62 = vpop.xlane.xlu1 %544  ;;  %v2771_v39 = vsub.s32 4, %v640_v32 }
 0x1c1   : > { %v539_v61 = vpop.xlane.xlu0 %538  ;;  %v562_v0 = vmul.f32 0.03125, %v545_v62  ;;  %v577_v2 = vmul.f32 %v4648_v60, %v4648_v60 }
 0x1c2   : > { %v560_v63 = vmul.f32 0.03125, %v539_v61  ;;  %v575_v1 = vmul.f32 %v4646_v59, %v4646_v59 }
 0x1c3   : > { %v4656_v4 = vsub.f32 %v524_v44, %v562_v0  ;;  %v589_v8 = vsel %vm533_vm2, %v577_v2, 0.0  ;;  %v4705_v44 = vrot.slane %v532_v36, %v4695_v35 }
 0x1c4   : > { %v4654_v3 = vsub.f32 %v522_v41, %v560_v63  ;;  %v583_v5 = vsel %vm533_vm2, %v575_v1, 0.0  ;;  %v551_v7 = vpop.xlane.xlu1 %550  ;;  %v4088_v41 = vld [vmem:[%s669_s23] sm:$0xff]   ;;  %s1188_s23 = sld [smem:[#allocation3 + %s4584_s29]] }
 0x1c5   : > { %584 = vadd.xlane.f32.xlu0 %v583_v5  ;;  %v548_v6 = vpop.xlane.xlu0 %547  ;;  %v564_v10 = vmul.f32 0.03125, %v551_v7  ;;  %v578_v12 = vmul.f32 %v4656_v4, %v4656_v4  ;;  %6692 = vst [vmem:[#allocation20_spill] sm:$0xff] %v4705_v44  ;;  %3718 = vmatprep.subr.bf16.mxu0 %v4088_v41 }
 0x1c6   : > { %v563_v9 = vmul.f32 0.03125, %v548_v6  ;;  %v576_v11 = vmul.f32 %v4654_v3, %v4654_v3  ;;  %3719 = vmatpush3.bf16.msra.mxu0 %v4088_v41 }
 0x1c7   : > { %v4666_v14 = vsub.f32 %v526_v48, %v564_v10  ;;  %v592_v18 = vsel %vm533_vm2, %v578_v12, 0.0  ;;  %v4713_v48 = vrot.slane %v531_v33, %v2895_v40  ;;  %3720 = vmatprep.subr.bf16.mxu0 %v4089_v49 }
 0x1c8   : > { %v4664_v13 = vsub.f32 %v525_v47, %v563_v9  ;;  %v586_v15 = vsel %vm533_vm2, %v576_v11, 0.0  ;;  %v557_v17 = vpop.xlane.xlu1 %556  ;;  %v4711_v47 = vrot.slane %v531_v33, %v2771_v39 }
 0x1c9   : > { %590 = vadd.xlane.f32.xlu0 %v589_v8  ;;  %587 = vadd.xlane.f32.xlu1 %v586_v15  ;;  %v554_v16 = vpop.xlane.xlu0 %553  ;;  %v566_v20 = vmul.f32 0.03125, %v557_v17  ;;  %v580_v22 = vmul.f32 %v4666_v14, %v4666_v14  ;;  %6695 = vst [vmem:[#allocation23_spill] sm:$0xff] %v4713_v48 }
 0x1ca   : > { %v565_v19 = vmul.f32 0.03125, %v554_v16  ;;  %v579_v21 = vmul.f32 %v4664_v13, %v4664_v13  ;;  %6694 = vst [vmem:[#allocation22_spill] sm:$0xff] %v4711_v47  ;;  %3721 = vmatpush3.bf16.msra.mxu0 %v4089_v49 }
 0x1cb   : > { %v4676_v24 = vsub.f32 %v528_v52, %v566_v20  ;;  %v598_v26 = vsel %vm533_vm2, %v580_v22, 0.0 }
 0x1cc   : > { %v4674_v23 = vsub.f32 %v527_v51, %v565_v19  ;;  %v595_v25 = vsel %vm533_vm2, %v579_v21, 0.0  ;;  %v2929_v51 = vsub.s32 7, %v640_v32 }
 0x1cd   : > { %593 = vadd.xlane.f32.xlu1 %v592_v18  ;;  %596 = vadd.xlane.f32.xlu0 %v595_v25  ;;  %v582_v28 = vmul.f32 %v4676_v24, %v4676_v24  ;;  %v642_v18 = vrot.slane %v531_v33, %v4693_v34 }
 0x1ce   : > { %v581_v27 = vmul.f32 %v4674_v23, %v4674_v23  ;;  %v4717_v52 = vrot.slane %v531_v33, %v2929_v51 }
 0x1cf   : > { %v604_v30 = vsel %vm533_vm2, %v582_v28, 0.0 }
 0x1d0   : > { %v601_v29 = vsel %vm533_vm2, %v581_v27, 0.0  ;;  %6697 = vst [vmem:[#allocation25_spill] sm:$0xff] %v4717_v52 }
 0x1d1   : > { %599 = vadd.xlane.f32.xlu1 %v598_v26  ;;  %602 = vadd.xlane.f32.xlu0 %v601_v29  ;;  %v654_v26 = vrot.slane %v531_v33, %v4695_v35 }
 0x1d5   : > { %605 = vadd.xlane.f32.xlu1 %v604_v30 }
 0x252   : > { %v585_v53 = vpop.xlane.xlu0 %584 }
 0x253   : > { %v607_v54 = vmul.f32 0.03125, %v585_v53 }
 0x255   : > { %v615_v55 = vadd.f32 1e-06, %v607_v54 }
 0x256   : > { %v588_v56 = vpop.xlane.xlu1 %587  ;;  %v591_v57 = vpop.xlane.xlu0 %590 }
 0x257   : > { %4102 = vrsqrt.f32 %v615_v55  ;;  %v608_v58 = vmul.f32 0.03125, %v588_v56  ;;  %v609_v61 = vmul.f32 0.03125, %v591_v57 }
 0x259   : > { %v616_v62 = vadd.f32 1e-06, %v608_v58  ;;  %v617_v63 = vadd.f32 1e-06, %v609_v61 }
 0x25a   : > { %v594_v0 = vpop.xlane.xlu1 %593  ;;  %v597_v1 = vpop.xlane.xlu0 %596 }
 0x25b   : > { %4104 = vrsqrt.f32 %v616_v62  ;;  %v610_v2 = vmul.f32 0.03125, %v594_v0  ;;  %v611_v5 = vmul.f32 0.03125, %v597_v1 }
 0x25c   : > { %4106 = vrsqrt.f32 %v617_v63 }
 0x25d   : > { %v618_v6 = vadd.f32 1e-06, %v610_v2  ;;  %v619_v7 = vadd.f32 1e-06, %v611_v5 }
 0x25e   : > { %v600_v8 = vpop.xlane.xlu1 %599  ;;  %v603_v9 = vpop.xlane.xlu0 %602 }
 0x25f   : > { %4108 = vrsqrt.f32 %v618_v6  ;;  %v612_v10 = vmul.f32 0.03125, %v600_v8  ;;  %v613_v11 = vmul.f32 0.03125, %v603_v9 }
 0x260   : > { %4110 = vrsqrt.f32 %v619_v7 }
 0x261   : > { %v4103_v12 = vpop.eup %4102  ;;  %v620_v15 = vadd.f32 1e-06, %v612_v10  ;;  %v621_v16 = vadd.f32 1e-06, %v613_v11 }
 0x262   : > { %v606_v17 = vpop.xlane.xlu1 %605  ;;  %v631_v19 = vmul.f32 %v4103_v12, %v4646_v59 }
 0x263   : > { %4112 = vrsqrt.f32 %v620_v15  ;;  %v614_v20 = vmul.f32 0.03125, %v606_v17 }
 0x264   : > { %4114 = vrsqrt.f32 %v621_v16  ;;  %v643_v28 = vmul.f32 %v642_v18, %v631_v19 }
 0x265   : > { %v4105_v21 = vpop.eup %4104  ;;  %v622_v22 = vadd.f32 1e-06, %v614_v20 }
 0x266   : > { %v4107_v25 = vpop.eup %4106  ;;  %v632_v27 = vmul.f32 %v4105_v21, %v4654_v3  ;;  %v655_v36 = vadd.f32 %v654_v26, %v643_v28 }
 0x267   : > { %4116 = vrsqrt.f32 %v622_v22  ;;  %v633_v29 = vmul.f32 %v4107_v25, %v4648_v60 }
 0x268   : > { %v644_v30 = vmul.f32 %v642_v18, %v632_v27 }
 0x269   : > { %v4109_v31 = vpop.eup %4108  ;;  %v645_v38 = vmul.f32 %v642_v18, %v633_v29 }
 0x26a   : > { %v4111_v32 = vpop.eup %4110  ;;  %v656_v37 = vadd.f32 %v654_v26, %v644_v30  ;;  %v634_v59 = vmul.f32 %v4109_v31, %v4656_v4 }
 0x26b   : > { %v635_v39 = vmul.f32 %v4111_v32, %v4664_v13  ;;  %v657_v3 = vadd.f32 %v654_v26, %v645_v38 }
 0x26c   : > { %v663_v40 = vpack.c.bf16 %v656_v37, %v655_v36  ;;  %v646_v41 = vmul.f32 %v642_v18, %v634_v59 }
 0x26d   : > { %v4113_v42 = vpop.eup %4112  ;;  %v647_v51 = vmul.f32 %v642_v18, %v635_v39 }
 0x26e   : > { %v4115_v33 = vpop.eup %4114  ;;  %3722 = vmatprep.mubr.msk.bf16.mxu0 %vm533_vm2, %v663_v40  ;;  %v658_v49 = vadd.f32 %v654_v26, %v646_v41  ;;  %v636_v60 = vmul.f32 %v4113_v42, %v4666_v14 }
 0x26f   : > { %v637_v53 = vmul.f32 %v4115_v33, %v4674_v23  ;;  %v659_v4 = vadd.f32 %v654_v26, %v647_v51 }
 0x270   : > { %v664_v54 = vpack.c.bf16 %v658_v49, %v657_v3  ;;  %v648_v55 = vmul.f32 %v642_v18, %v636_v60 }
 0x271   : > { %v4117_v56 = vpop.eup %4116  ;;  %v649_v58 = vmul.f32 %v642_v18, %v637_v53 }
 0x272   : > { %3723 = vmatmul.mubr.msk.bf16.vlgmr.msra.gmra.mrb[0].mxu0 %vm533_vm2, %v664_v54  ;;  %v660_v13 = vadd.f32 %v654_v26, %v648_v55  ;;  %v638_v57 = vmul.f32 %v4117_v56, %v4676_v24 }
 0x273   : > { %v661_v63 = vadd.f32 %v654_v26, %v649_v58 }
 0x274   : > { %v665_v61 = vpack.c.bf16 %v660_v13, %v659_v4  ;;  %v650_v62 = vmul.f32 %v642_v18, %v638_v57 }
 0x276   : > { %3726 = vmatprep.mubr.msk.bf16.mxu0 %vm533_vm2, %v665_v61  ;;  %v662_v0 = vadd.f32 %v654_v26, %v650_v62 }
 0x278   : > { %v666_v14 = vpack.c.bf16 %v662_v0, %v661_v63 }
 0x27a   : > { %3727 = vmatmul.mubr.msk.bf16.gmra.mrb[4].mxu0 %vm533_vm2, %v666_v14 }
 0x345   : > { %v3724_v23 = vpop.f32.mrb[0].mxu0 }
 0x346   : > { %v745_v1 = vadd.f32 %v3724_v23, %v4707_v45  ;;  %v736_v2 = vpop.f32.mrb[1].mxu0 }
 0x347   : > { %v737_v5 = vadd.f32 %v736_v2, %v4707_v45  ;;  %v3725_v6 = vpop.f32.mrb[2].mxu0 }
 0x348   : > { %v748_v7 = vadd.f32 %v3725_v6, %v4707_v45  ;;  %v739_v24 = vpop.f32.mrb[3].mxu0 }
 0x349   : > { %v740_v8 = vadd.f32 %v739_v24, %v4707_v45 }
 0x34a   : > { %v4737_v9 = vpack.c.bf16 %v748_v7, %v745_v1 }
 0x34b   : > { %v4739_v10 = vpack.c.bf16 %v740_v8, %v737_v5 }
 0x34c   : > { %6698 = vst [vmem:[#allocation26_spill] sm:$0xff] %v4737_v9 }
 0x34d   : > { %6699 = vst [vmem:[#allocation27_spill] sm:$0xff] %v4739_v10  ;;  %881 = vrot.lane.b32.xlu1 %v4739_v10, %s4418_s24  ;;  %775 = vrot.lane.b32.xlu0 %v4739_v10, %s4419_s11  ;;  %v3728_v11 = vpop.f32.mrb[4].mxu0 }
 0x34e   : > { %v761_v12 = vadd.f32 %v3728_v11, %v4707_v45  ;;  %3738 = vmatprep.mubr.msk.bf16.mxu1 %vm783_vm3, %v4739_v10  ;;  %v752_v15 = vpop.f32.mrb[5].mxu0 }
 0x34f   : > { %v753_v16 = vadd.f32 %v752_v15, %v4707_v45  ;;  %v3729_v17 = vpop.f32.mrb[6].mxu0 }
 0x350   : > { %v764_v18 = vadd.f32 %v3729_v17, %v4707_v45  ;;  %v755_v19 = vpop.f32.mrb[7].mxu0 }
 0x351   : > { %v756_v20 = vadd.f32 %v755_v19, %v4707_v45  ;;  %777 = vrot.lane.b32.xlu1 %v4737_v9, %s4419_s11 }
 0x352   : > { %v4750_v21 = vpack.c.bf16 %v764_v18, %v761_v12  ;;  %v4837_v12 = vstv %s1188_s23 }
 0x353   : > { %v4752_v22 = vpack.c.bf16 %v756_v20, %v753_v16 }
 0x354   : > { %6700 = vst [vmem:[#allocation28_spill] sm:$0xff] %v4750_v21 }
 0x355   : > { %6701 = vst [vmem:[#allocation29_spill] sm:$0xff] %v4752_v22  ;;  %883 = vrot.lane.b32.xlu1 %v4737_v9, %s4418_s24  ;;  %779 = vrot.lane.b32.xlu0 %v4752_v22, %s4419_s11 }
 0x359   : > { %885 = vrot.lane.b32.xlu1 %v4752_v22, %s4418_s24  ;;  %781 = vrot.lane.b32.xlu0 %v4750_v21, %s4419_s11  ;;  %s1356_s11 = sld [smem:[#allocation3 + %s1355_s19]] }
 0x35d   : > { %887 = vrot.lane.b32.xlu1 %v4750_v21, %s4418_s24  ;;  %986 = vrot.lane.b32.xlu0 %v4739_v10, %s4420_s12  ;;  %s1522_s24 = sadd.s32 8, %s4584_s29 }
 0x35e   : > { %s1523_s18 = sld [smem:[#allocation3 + %s1522_s24]] }
 0x35f   : > { %v4839_v15 = vstv %s1356_s11 }
 0x361   : > { %873 = vrot.lane.b32.xlu1 %v4739_v10, %s4421_s21  ;;  %1091 = vrot.lane.b32.xlu0 %v4739_v10, %s4422_s25 }
 0x364   : > { %v4841_v16 = vstv %s1523_s18  ;;  %s1404_s18 = sadd.s32 7, %s4584_s29 }
 0x365   : > { %875 = vrot.lane.b32.xlu1 %v4737_v9, %s4421_s21  ;;  %988 = vrot.lane.b32.xlu0 %v4737_v9, %s4420_s12 }
 0x369   : > { %1093 = vrot.lane.b32.xlu1 %v4737_v9, %s4422_s25  ;;  %990 = vrot.lane.b32.xlu0 %v4752_v22, %s4420_s12 }
 0x36d   : > { %1095 = vrot.lane.b32.xlu1 %v4752_v22, %s4422_s25  ;;  %992 = vrot.lane.b32.xlu0 %v4750_v21, %s4420_s12  ;;  %s1689_s12 = sadd.s32 12, %s4584_s29 }
 0x36e   : > { %s1690_s0 = sld [smem:[#allocation3 + %s1689_s12]] }
 0x371   : > { %877 = vrot.lane.b32.xlu1 %v4752_v22, %s4421_s21  ;;  %879 = vrot.lane.b32.xlu0 %v4750_v21, %s4421_s21  ;;  %s1198_s21 = sadd.s32 1, %s4584_s29 }
 0x372   : > { %s1199_s1 = sld [smem:[#allocation3 + %s1198_s21]] }
 0x373   : > { %s1405_s21 = sld [smem:[#allocation3 + %s1404_s18]] }
 0x374   : > { %v4843_v17 = vstv %s1690_s0  ;;  %s1217_s0 = sadd.s32 2, %s4584_s29 }
 0x375   : > { %1097 = vrot.lane.b32.xlu1 %v4750_v21, %s4422_s25  ;;  %978 = vrot.lane.b32.xlu0 %v4739_v10, %s4423_s28  ;;  %s1366_s25 = sadd.s32 5, %s4584_s29  ;;  %s4963_s19 = sld [smem:[#allocation3 + %s1217_s0]] }
 0x376   : > { %s1367_s2 = sld [smem:[#allocation3 + %s1366_s25]]  ;;  %s1571_s25 = sadd.s32 11, %s4584_s29 }
 0x377   : > { %s1423_s0 = sadd.s32 17, %s4584_s29 }
 0x378   : > { %v4845_v18 = vstv %s1199_s1  ;;  %s1385_s1 = sadd.s32 6, %s4584_s29  ;;  %s1424_s15 = sld [smem:[#allocation3 + %s1423_s0]] }
 0x379   : > { %980 = vrot.lane.b32.xlu1 %v4737_v9, %s4423_s28  ;;  %1083 = vrot.lane.b32.xlu0 %v4739_v10, %s4424_s9  ;;  %s4965_s23 = sld [smem:[#allocation3 + %s1385_s1]]  ;;  %s1590_s1 = sadd.s32 18, %s4584_s29 }
 0x37a   : > { %s1591_s27 = sld [smem:[#allocation3 + %s1590_s1]]  ;;  %s2058_s0 = sadd.s32 26, %s4584_s29 }
 0x37b   : > { %s2402_s1 = sadd.s32 34, %s4584_s29 }
 0x37c   : > { %v4847_v19 = vstv %s1367_s2  ;;  %s1552_s2 = sadd.s32 10, %s4584_s29 }
 0x37d   : > { %1085 = vrot.lane.b32.xlu1 %v4737_v9, %s4424_s9  ;;  %982 = vrot.lane.b32.xlu0 %v4752_v22, %s4423_s28  ;;  %s4971_s24 = sld [smem:[#allocation3 + %s1552_s2]]  ;;  %s1757_s2 = sadd.s32 19, %s4584_s29 }
 0x37e   : > { %s1758_s13 = sld [smem:[#allocation3 + %s1757_s2]]  ;;  %s1856_s2 = sadd.s32 20, %s4584_s29 }
 0x380   : > { %v5029_v34 = vstv %s1591_s27  ;;  %s4427_s27 = smov 48  }
 0x381   : > { %984 = vrot.lane.b32.xlu1 %v4750_v21, %s4423_s28  ;;  %1087 = vrot.lane.b32.xlu0 %v4752_v22, %s4424_s9  ;;  %s1533_s28 = sadd.s32 9, %s4584_s29 }
 0x382   : > { %s1534_s3 = sld [smem:[#allocation3 + %s1533_s28]]  ;;  %s1738_s28 = sadd.s32 15, %s4584_s29 }
 0x384   : > { %v5031_v44 = vstv %s1758_s13  ;;  %s4425_s13 = smov 64  }
 0x385   : > { %1089 = vrot.lane.b32.xlu1 %v4750_v21, %s4424_s9  ;;  %s1700_s9 = sadd.s32 13, %s4584_s29 }
 0x386   : > { %s1701_s7 = sld [smem:[#allocation3 + %s1700_s9]]  ;;  %s1255_s9 = sadd.s32 16, %s4584_s29 }
 0x387   : > { %s1256_s18 = sld [smem:[#allocation3 + %s1255_s9]] }
 0x388   : > { %v4849_v20 = vstv %s1534_s3  ;;  %s1719_s3 = sadd.s32 14, %s4584_s29 }
 0x389   : > { %s4973_s11 = sld [smem:[#allocation3 + %s1719_s3]] }
 0x38a   : > { %s1572_s3 = sld [smem:[#allocation3 + %s1571_s25]] }
 0x3bf   : > { %v882_v45 = vpop.permute.xlu1 %881  ;;  %v776_v25 = vpop.permute.xlu0 %775 }
 0x3c0   : > { %3912 = vmatprep.subr.msk.bf16.mxu1 %vm783_vm3, %v776_v25  ;;  %3916 = vmatprep.subr.msk.bf16.mxu0 %vm783_vm3, %v882_v45  ;;  %v797_v26 = vsel %vm783_vm3, %v776_v25, 0  ;;  %v902_v27 = vsel %vm783_vm3, %v882_v45, 0  ;;  %v4851_v45 = vstv %s1701_s7  ;;  %s1236_s7 = sadd.s32 3, %s4584_s29 }
 0x3c1   : > { %3731 = vmatpush3.bf16.xpose.msra.mxu1 %v797_v26  ;;  %3747 = vmatpush3.bf16.xpose.msra.mxu0 %v902_v27  ;;  %s1237_s12 = sld [smem:[#allocation3 + %s1236_s7]] }
 0x3c2   : > { %s1739_s7 = sld [smem:[#allocation3 + %s1738_s28]] }
 0x3c3   : > { %v778_v28 = vpop.permute.xlu1 %777 }
 0x3c4   : > { %3913 = vmatprep.subr.msk.bf16.mxu1 %vm783_vm3, %v778_v28  ;;  %v800_v31 = vsel %vm783_vm3, %v778_v28, 0 }
 0x3c7   : > { %v884_v29 = vpop.permute.xlu1 %883  ;;  %v780_v30 = vpop.permute.xlu0 %779 }
 0x3c8   : > { %3917 = vmatprep.subr.msk.bf16.mxu0 %vm783_vm3, %v884_v29  ;;  %v905_v32 = vsel %vm783_vm3, %v884_v29, 0  ;;  %v803_v39 = vsel %vm783_vm3, %v780_v30, 0 }
 0x3c9   : > { %3733 = vmatpush3.bf16.xpose.msra.mxu1 %v800_v31  ;;  %3749 = vmatpush3.bf16.xpose.msra.mxu0 %v905_v32 }
 0x3ca   : > { %3914 = vmatprep.subr.msk.bf16.mxu1 %vm783_vm3, %v780_v30 }
 0x3cb   : > { %v886_v36 = vpop.permute.xlu1 %885  ;;  %v782_v37 = vpop.permute.xlu0 %781 }
 0x3cc   : > { %3918 = vmatprep.subr.msk.bf16.mxu0 %vm783_vm3, %v886_v36  ;;  %v908_v40 = vsel %vm783_vm3, %v886_v36, 0  ;;  %v806_v49 = vsel %vm783_vm3, %v782_v37, 0 }
 0x3cf   : > { %v888_v59 = vpop.permute.xlu1 %887  ;;  %v987_v38 = vpop.permute.xlu0 %986 }
 0x3d0   : > { %v911_v60 = vsel %vm783_vm3, %v888_v59, 0  ;;  %v1007_v56 = vsel %vm783_vm3, %v987_v38, 0 }
 0x3d1   : > { %3735 = vmatpush3.bf16.xpose.msra.mxu1 %v803_v39  ;;  %3751 = vmatpush3.bf16.xpose.msra.mxu0 %v908_v40 }
 0x3d2   : > { %3915 = vmatprep.subr.msk.bf16.mxu1 %vm783_vm3, %v782_v37  ;;  %3919 = vmatprep.subr.msk.bf16.mxu0 %vm783_vm3, %v888_v59 }
 0x3d3   : > { %v874_v41 = vpop.permute.xlu1 %873  ;;  %v1092_v42 = vpop.permute.xlu0 %1091 }
 0x3d4   : > { %3754 = vmatprep.mubr.msk.bf16.mxu0 %vm783_vm3, %v874_v41  ;;  %v1112_v4 = vsel %vm783_vm3, %v1092_v42, 0 }
 0x3d7   : > { %v876_v33 = vpop.permute.xlu1 %875  ;;  %v989_v3 = vpop.permute.xlu0 %988 }
 0x3d8   : > { %v1010_v61 = vsel %vm783_vm3, %v989_v3, 0 }
 0x3d9   : > { %3737 = vmatpush3.bf16.xpose.msra.mxu1 %v806_v49  ;;  %3753 = vmatpush3.bf16.xpose.msra.mxu0 %v911_v60 }
 0x3da   : > { %3920 = vmatprep.subr.msk.bf16.mxu1 %vm783_vm3, %v987_v38  ;;  %3924 = vmatprep.subr.msk.bf16.mxu0 %vm783_vm3, %v1092_v42 }
 0x3db   : > { %v1094_v51 = vpop.permute.xlu1 %1093  ;;  %v991_v53 = vpop.permute.xlu0 %990 }
 0x3dc   : > { %v1115_v62 = vsel %vm783_vm3, %v1094_v51, 0  ;;  %v1013_v14 = vsel %vm783_vm3, %v991_v53, 0 }
 0x3df   : > { %v1096_v54 = vpop.permute.xlu1 %1095  ;;  %v993_v55 = vpop.permute.xlu0 %992 }
 0x3e0   : > { %3739 = vmatmul.mubr.msk.bf16.vlgmr.msra.gmra.mrb[0].mxu1 %vm783_vm3, %v4737_v9  ;;  %3755 = vmatmul.mubr.msk.bf16.vlgmr.msra.gmra.mrb[8].mxu0 %vm783_vm3, %v876_v33  ;;  %v1118_v23 = vsel %vm783_vm3, %v1096_v54, 0  ;;  %v1016_v2 = vsel %vm783_vm3, %v993_v55, 0 }
 0x3e1   : > { %3742 = vmatprep.mubr.msk.bf16.mxu1 %vm783_vm3, %v4752_v22  ;;  %3763 = vmatpush3.bf16.xpose.msra.mxu1 %v1007_v56 }
 0x3e2   : > { %3779 = vmatpush3.bf16.xpose.msra.mxu0 %v1112_v4  ;;  %3921 = vmatprep.subr.msk.bf16.mxu1 %vm783_vm3, %v989_v3 }
 0x3e3   : > { %3925 = vmatprep.subr.msk.bf16.mxu0 %vm783_vm3, %v1094_v51  ;;  %v878_v13 = vpop.permute.xlu1 %877  ;;  %v880_v57 = vpop.permute.xlu0 %879 }
 0x3e4   : > { %3758 = vmatprep.mubr.msk.bf16.mxu0 %vm783_vm3, %v878_v13 }
 0x3e7   : > { %v979_v58 = vpop.permute.xlu0 %978  ;;  %v1098_v0 = vpop.permute.xlu1 %1097 }
 0x3e8   : > { %3743 = vmatmul.mubr.msk.bf16.gmra.mrb[4].mxu1 %vm783_vm3, %v4750_v21  ;;  %3759 = vmatmul.mubr.msk.bf16.gmra.mrb[12].mxu0 %vm783_vm3, %v880_v57  ;;  %v1121_v5 = vsel %vm783_vm3, %v1098_v0, 0 }
 0x3e9   : > { %3765 = vmatpush3.bf16.xpose.msra.mxu1 %v1010_v61  ;;  %3770 = vmatprep.mubr.msk.bf16.mxu1 %vm783_vm3, %v979_v58 }
 0x3ea   : > { %3781 = vmatpush3.bf16.xpose.msra.mxu0 %v1115_v62  ;;  %3922 = vmatprep.subr.msk.bf16.mxu1 %vm783_vm3, %v991_v53 }
 0x3eb   : > { %3926 = vmatprep.subr.msk.bf16.mxu0 %vm783_vm3, %v1096_v54  ;;  %v1084_v63 = vpop.permute.xlu0 %1083  ;;  %v981_v1 = vpop.permute.xlu1 %980 }
 0x3ec   : > { %3786 = vmatprep.mubr.msk.bf16.mxu0 %vm783_vm3, %v1084_v63 }
 0x3ef   : > { %v983_v6 = vpop.permute.xlu0 %982  ;;  %v1086_v7 = vpop.permute.xlu1 %1085 }
 0x3f1   : > { %3767 = vmatpush3.bf16.xpose.msra.mxu1 %v1013_v14 }
 0x3f2   : > { %3783 = vmatpush3.bf16.xpose.msra.mxu0 %v1118_v23  ;;  %3923 = vmatprep.subr.msk.bf16.mxu1 %vm783_vm3, %v993_v55 }
 0x3f3   : > { %3927 = vmatprep.subr.msk.bf16.mxu0 %vm783_vm3, %v1098_v0  ;;  %v1088_v24 = vpop.permute.xlu0 %1087  ;;  %v985_v8 = vpop.permute.xlu1 %984 }
 0x3f7   : > { %v1090_v11 = vpop.permute.xlu1 %1089 }
 0x3f9   : > { %3769 = vmatpush3.bf16.xpose.msra.mxu1 %v1016_v2 }
 0x3fa   : > { %3785 = vmatpush3.bf16.xpose.msra.mxu0 %v1121_v5 }
 0x400   : > { %3771 = vmatmul.mubr.msk.bf16.vlgmr.msra.gmra.mrb[8].mxu1 %vm783_vm3, %v981_v1 }
 0x401   : > { %3787 = vmatmul.mubr.msk.bf16.vlgmr.msra.gmra.mrb[16].mxu0 %vm783_vm3, %v1086_v7  ;;  %3774 = vmatprep.mubr.msk.bf16.mxu1 %vm783_vm3, %v983_v6 }
 0x402   : > { %3790 = vmatprep.mubr.msk.bf16.mxu0 %vm783_vm3, %v1088_v24 }
 0x408   : > { %3775 = vmatmul.mubr.msk.bf16.gmra.mrb[12].mxu1 %vm783_vm3, %v985_v8 }
 0x409   : > { %3791 = vmatmul.mubr.msk.bf16.gmra.mrb[20].mxu0 %vm783_vm3, %v1090_v11 }
 0x4b3   : > { %v3740_v25 = vpop.f32.mrb[0].mxu1  ;;  %v3756_v26 = vpop.f32.mrb[8].mxu0 }
 0x4b4   : > { %v1192_v27 = vmul.f32 %v3740_v25, %v4837_v12  ;;  %v1360_v28 = vmul.f32 %v3740_v25, %v4839_v15  ;;  %v1527_v29 = vmul.f32 %v3740_v25, %v4841_v16  ;;  %v1694_v30 = vmul.f32 %v3740_v25, %v4843_v17  ;;  %v842_v31 = vpop.f32.mrb[1].mxu1  ;;  %v947_v32 = vpop.f32.mrb[9].mxu0 }
 0x4b5   : > { %v1203_v36 = vmul.f32 %v3756_v26, %v4845_v18  ;;  %v1371_v37 = vmul.f32 %v3756_v26, %v4847_v19  ;;  %v1538_v59 = vmul.f32 %v3756_v26, %v4849_v20  ;;  %v1705_v38 = vmul.f32 %v3756_v26, %v4851_v45  ;;  %v3741_v39 = vpop.f32.mrb[2].mxu1  ;;  %v3757_v40 = vpop.f32.mrb[10].mxu0 }
 0x4b6   : > { %v1190_v41 = vmul.f32 %v4837_v12, %v842_v31  ;;  %v1358_v42 = vmul.f32 %v4839_v15, %v842_v31  ;;  %v1525_v33 = vmul.f32 %v4841_v16, %v842_v31  ;;  %v1692_v3 = vmul.f32 %v4843_v17, %v842_v31  ;;  %v845_v49 = vpop.f32.mrb[3].mxu1  ;;  %v950_v60 = vpop.f32.mrb[11].mxu0 }
 0x4b7   : > { %v4865_v51 = vadd.f32 %v1203_v36, %v1192_v27  ;;  %v4867_v53 = vadd.f32 %v1371_v37, %v1360_v28  ;;  %v4869_v54 = vadd.f32 %v1538_v59, %v1527_v29  ;;  %v4871_v55 = vadd.f32 %v1705_v38, %v1694_v30 }
 0x4b8   : > { %v1201_v56 = vmul.f32 %v4845_v18, %v947_v32  ;;  %v1369_v4 = vmul.f32 %v4847_v19, %v947_v32  ;;  %v1536_v13 = vmul.f32 %v4849_v20, %v947_v32  ;;  %v1703_v57 = vmul.f32 %v4851_v45, %v947_v32 }
 0x4b9   : > { %v1193_v58 = vmul.f32 %v3741_v39, %v4837_v12  ;;  %v1361_v61 = vmul.f32 %v3741_v39, %v4839_v15  ;;  %v1528_v62 = vmul.f32 %v3741_v39, %v4841_v16  ;;  %v1695_v63 = vmul.f32 %v3741_v39, %v4843_v17 }
 0x4ba   : > { %v4881_v0 = vadd.f32 %v1201_v56, %v1190_v41  ;;  %v4883_v14 = vadd.f32 %v1369_v4, %v1358_v42  ;;  %v4885_v23 = vadd.f32 %v1536_v13, %v1525_v33  ;;  %v4887_v1 = vadd.f32 %v1703_v57, %v1692_v3 }
 0x4bb   : > { %v1204_v2 = vmul.f32 %v3757_v40, %v4845_v18  ;;  %v1372_v5 = vmul.f32 %v3757_v40, %v4847_v19  ;;  %v1539_v6 = vmul.f32 %v3757_v40, %v4849_v20  ;;  %v1706_v7 = vmul.f32 %v3757_v40, %v4851_v45  ;;  %v3744_v24 = vpop.f32.mrb[4].mxu1  ;;  %v3760_v8 = vpop.f32.mrb[12].mxu0 }
 0x4bc   : > { %6702 = vst [vmem:[#allocation30_spill] sm:$0xff] %v4887_v1  ;;  %v1191_v11 = vmul.f32 %v4837_v12, %v845_v49  ;;  %v1359_v25 = vmul.f32 %v4839_v15, %v845_v49  ;;  %v1526_v26 = vmul.f32 %v4841_v16, %v845_v49  ;;  %v1693_v27 = vmul.f32 %v4843_v17, %v845_v49  ;;  %v858_v28 = vpop.f32.mrb[5].mxu1  ;;  %v963_v29 = vpop.f32.mrb[13].mxu0 }
 0x4bd   : > { %v4897_v30 = vadd.f32 %v1204_v2, %v1193_v58  ;;  %v4899_v31 = vadd.f32 %v1372_v5, %v1361_v61  ;;  %v4901_v32 = vadd.f32 %v1539_v6, %v1528_v62  ;;  %v4903_v36 = vadd.f32 %v1706_v7, %v1695_v63  ;;  %v3745_v37 = vpop.f32.mrb[6].mxu1  ;;  %v3761_v59 = vpop.f32.mrb[14].mxu0 }
 0x4be   : > { %v1202_v38 = vmul.f32 %v4845_v18, %v950_v60  ;;  %v1370_v39 = vmul.f32 %v4847_v19, %v950_v60  ;;  %v1537_v40 = vmul.f32 %v4849_v20, %v950_v60  ;;  %v1704_v41 = vmul.f32 %v4851_v45, %v950_v60  ;;  %v861_v42 = vpop.f32.mrb[7].mxu1  ;;  %v966_v33 = vpop.f32.mrb[15].mxu0 }
 0x4bf   : > { %v1196_v3 = vmul.f32 %v3744_v24, %v4837_v12  ;;  %v1364_v49 = vmul.f32 %v3744_v24, %v4839_v15  ;;  %v1531_v56 = vmul.f32 %v3744_v24, %v4841_v16  ;;  %v1698_v4 = vmul.f32 %v3744_v24, %v4843_v17 }
 0x4c0   : > { %v4913_v13 = vadd.f32 %v1202_v38, %v1191_v11  ;;  %v4915_v57 = vadd.f32 %v1370_v39, %v1359_v25  ;;  %v4917_v58 = vadd.f32 %v1537_v40, %v1526_v26  ;;  %v4919_v61 = vadd.f32 %v1704_v41, %v1693_v27 }
 0x4c1   : > { %v1207_v60 = vmul.f32 %v3760_v8, %v4845_v18  ;;  %v1375_v62 = vmul.f32 %v3760_v8, %v4847_v19  ;;  %v1542_v63 = vmul.f32 %v3760_v8, %v4849_v20  ;;  %v1709_v2 = vmul.f32 %v3760_v8, %v4851_v45 }
 0x4c2   : > { %6703 = vst [vmem:[#allocation31_spill] sm:$0xff] %v4915_v57  ;;  %v1194_v5 = vmul.f32 %v4837_v12, %v858_v28  ;;  %v1362_v6 = vmul.f32 %v4839_v15, %v858_v28  ;;  %v1529_v7 = vmul.f32 %v4841_v16, %v858_v28  ;;  %v1696_v24 = vmul.f32 %v4843_v17, %v858_v28 }
 0x4c3   : > { %v4929_v11 = vadd.f32 %v1207_v60, %v1196_v3  ;;  %v4931_v25 = vadd.f32 %v1375_v62, %v1364_v49  ;;  %v4933_v26 = vadd.f32 %v1542_v63, %v1531_v56  ;;  %v4935_v27 = vadd.f32 %v1709_v2, %v1698_v4 }
 0x4c4   : > { %v1205_v8 = vmul.f32 %v4845_v18, %v963_v29  ;;  %v1373_v38 = vmul.f32 %v4847_v19, %v963_v29  ;;  %v1540_v39 = vmul.f32 %v4849_v20, %v963_v29  ;;  %v1707_v40 = vmul.f32 %v4851_v45, %v963_v29 }
 0x4c5   : > { %6704 = vst [vmem:[#allocation32_spill] sm:$0xff] %v4929_v11  ;;  %6705 = vst [vmem:[#allocation33_spill] sm:$0xff] %v4931_v25  ;;  %v1197_v28 = vmul.f32 %v3745_v37, %v4837_v12  ;;  %v1365_v41 = vmul.f32 %v3745_v37, %v4839_v15  ;;  %v1532_v3 = vmul.f32 %v3745_v37, %v4841_v16 }
 0x4c6   : > { %6706 = vst [vmem:[#allocation34_spill] sm:$0xff] %v4933_v26  ;;  %6707 = vst [vmem:[#allocation35_spill] sm:$0xff] %v4935_v27  ;;  %v1699_v49 = vmul.f32 %v3745_v37, %v4843_v17  ;;  %v4949_v56 = vadd.f32 %v1205_v8, %v1194_v5  ;;  %v4951_v4 = vadd.f32 %v1373_v38, %v1362_v6 }
 0x4c7   : > { %v4953_v60 = vadd.f32 %v1540_v39, %v1529_v7  ;;  %v4955_v62 = vadd.f32 %v1707_v40, %v1696_v24  ;;  %v1208_v29 = vmul.f32 %v3761_v59, %v4845_v18  ;;  %v1376_v63 = vmul.f32 %v3761_v59, %v4847_v19 }
 0x4c8   : > { %6708 = vst [vmem:[#allocation36_spill] sm:$0xff] %v4949_v56  ;;  %6709 = vst [vmem:[#allocation37_spill] sm:$0xff] %v4951_v4  ;;  %v1543_v2 = vmul.f32 %v3761_v59, %v4849_v20  ;;  %v1710_v37 = vmul.f32 %v3761_v59, %v4851_v45  ;;  %v1195_v5 = vmul.f32 %v4837_v12, %v861_v42 }
 0x4c9   : > { %6710 = vst [vmem:[#allocation38_spill] sm:$0xff] %v4953_v60  ;;  %6711 = vst [vmem:[#allocation39_spill] sm:$0xff] %v4955_v62  ;;  %v1363_v6 = vmul.f32 %v4839_v15, %v861_v42  ;;  %v1530_v7 = vmul.f32 %v4841_v16, %v861_v42  ;;  %v1697_v24 = vmul.f32 %v4843_v17, %v861_v42 }
 0x4ca   : > { %v4975_v59 = vadd.f32 %v1208_v29, %v1197_v28  ;;  %v4977_v8 = vadd.f32 %v1376_v63, %v1365_v41  ;;  %v4979_v38 = vadd.f32 %v1543_v2, %v1532_v3  ;;  %v4981_v12 = vadd.f32 %v1710_v37, %v1699_v49 }
 0x4cb   : > { %v1206_v15 = vmul.f32 %v4845_v18, %v966_v33  ;;  %v1374_v16 = vmul.f32 %v4847_v19, %v966_v33  ;;  %v1541_v17 = vmul.f32 %v4849_v20, %v966_v33  ;;  %v1708_v42 = vmul.f32 %v4851_v45, %v966_v33 }
 0x4cc   : > { %6712 = vst [vmem:[#allocation40_spill] sm:$0xff] %v4975_v59  ;;  %6713 = vst [vmem:[#allocation41_spill] sm:$0xff] %v4977_v8  ;;  %v5002_v20 = vstv %s4963_s19  ;;  %v5005_v45 = vstv %s4965_s23  ;;  %v5008_v3 = vstv %s4971_s24  ;;  %v5011_v49 = vstv %s4973_s11  ;;  %s4428_s19 = smov 40   ;;  %s2028_s23 = sadd.s32 24, %s4584_s29 }
 0x4cd   : > { %6714 = vst [vmem:[#allocation42_spill] sm:$0xff] %v4979_v38  ;;  %6715 = vst [vmem:[#allocation43_spill] sm:$0xff] %v4981_v12  ;;  %v4991_v39 = vadd.f32 %v1206_v15, %v1195_v5  ;;  %v4993_v40 = vadd.f32 %v1374_v16, %v1363_v6  ;;  %v4995_v28 = vadd.f32 %v1541_v17, %v1530_v7  ;;  %v5013_v29 = vstv %s1237_s12  ;;  %s2372_s24 = sadd.s32 32, %s4584_s29  ;;  %s2039_s11 = sadd.s32 25, %s4584_s29 }
 0x4ce   : > { %v4997_v18 = vadd.f32 %v1708_v42, %v1697_v24  ;;  %v5015_v63 = vstv %s1405_s21  ;;  %v5017_v5 = vstv %s1572_s3  ;;  %v5019_v6 = vstv %s1739_s7  ;;  %s2383_s12 = sadd.s32 33, %s4584_s29  ;;  %s2029_s21 = sld [smem:[#allocation3 + %s2028_s23]] }
 0x4cf   : > { %6716 = vst [vmem:[#allocation44_spill] sm:$0xff] %v4991_v39  ;;  %6717 = vst [vmem:[#allocation45_spill] sm:$0xff] %v4993_v40  ;;  %v5021_v15 = vstv %s1256_s18  ;;  %v5023_v16 = vstv %s1424_s15  ;;  %s4426_s15 = smov 56   ;;  %s2373_s25 = sld [smem:[#allocation3 + %s2372_s24]] }
 0x4d0   : > { %6718 = vst [vmem:[#allocation46_spill] sm:$0xff] %v4995_v28  ;;  %6719 = vst [vmem:[#allocation47_spill] sm:$0xff] %v4997_v18  ;;  %s2040_s28 = sld [smem:[#allocation3 + %s2039_s11]]  ;;  %s1867_s3 = sadd.s32 21, %s4584_s29 }
 0x4d1   : > { %s2384_s9 = sld [smem:[#allocation3 + %s2383_s12]]  ;;  %s2200_s23 = sadd.s32 28, %s4584_s29 }
 0x4d2   : > { %s5636_s7 = sld [smem:[#allocation3 + %s2058_s0]]  ;;  %s2211_s24 = sadd.s32 29, %s4584_s29 }
 0x4d3   : > { %v3772_v19 = vpop.f32.mrb[8].mxu1  ;;  %s5638_s18 = sld [smem:[#allocation3 + %s2402_s1]]  ;;  %s1905_s12 = sadd.s32 23, %s4584_s29 }
 0x4d4   : > { %v3788_v33 = vpop.f32.mrb[16].mxu0  ;;  %v1052_v41 = vpop.f32.mrb[9].mxu1  ;;  %v1222_v17 = vmul.f32 %v3772_v19, %v5002_v20  ;;  %v5027_v42 = vmul.f32 %v3772_v19, %v5005_v45  ;;  %v5034_v43 = vmul.f32 %v3772_v19, %v5008_v3  ;;  %v5037_v52 = vmul.f32 %v3772_v19, %v5011_v49  ;;  %s5688_s0 = sld [smem:[#allocation3 + %s1905_s12]]  ;;  %s4429_s12 = smov 16  }
 0x4d5   : > { %v1157_v2 = vpop.f32.mrb[17].mxu0  ;;  %v3773_v37 = vpop.f32.mrb[10].mxu1  ;;  %v1241_v50 = vmul.f32 %v3788_v33, %v5013_v29  ;;  %v5041_v48 = vmul.f32 %v3788_v33, %v5015_v63  ;;  %v5044_v47 = vmul.f32 %v3788_v33, %v5017_v5  ;;  %v5047_v46 = vmul.f32 %v3788_v33, %v5019_v6  ;;  %s5690_s1 = sld [smem:[#allocation3 + %s2211_s24]] }
 0x4d6   : > { %v3789_v7 = vpop.f32.mrb[18].mxu0  ;;  %v1055_v24 = vpop.f32.mrb[11].mxu1  ;;  %v5050_v21 = vmul.f32 %v5002_v20, %v1052_v41  ;;  %v5053_v10 = vmul.f32 %v5005_v45, %v1052_v41  ;;  %v5056_v19 = vmul.f32 %v5008_v3, %v1052_v41  ;;  %v5059_v22 = vmul.f32 %v5011_v49, %v1052_v41 }
 0x4d7   : > { %v1160_v35 = vpop.f32.mrb[19].mxu0  ;;  %v5062_v9 = vmul.f32 %v5013_v29, %v1157_v2  ;;  %v5065_v18 = vmul.f32 %v5015_v63, %v1157_v2  ;;  %v5068_v33 = vmul.f32 %v5017_v5, %v1157_v2  ;;  %v5071_v28 = vmul.f32 %v5019_v6, %v1157_v2 }
 0x4d8   : > { %6720 = vst [vmem:[#allocation48_spill] sm:$0xff] %v5059_v22  ;;  %v1223_v40 = vmul.f32 %v3773_v37, %v5002_v20  ;;  %v1391_v39 = vmul.f32 %v3773_v37, %v5005_v45  ;;  %v1558_v41 = vmul.f32 %v3773_v37, %v5008_v3  ;;  %v1725_v38 = vmul.f32 %v3773_v37, %v5011_v49 }
 0x4d9   : > { %6721 = vst [vmem:[#allocation49_spill] sm:$0xff] %v5065_v18  ;;  %6722 = vst [vmem:[#allocation50_spill] sm:$0xff] %v5068_v33  ;;  %v1242_v8 = vmul.f32 %v3789_v7, %v5013_v29  ;;  %v1410_v59 = vmul.f32 %v3789_v7, %v5015_v63  ;;  %v1577_v2 = vmul.f32 %v3789_v7, %v5017_v5 }
 0x4da   : > { %6723 = vst [vmem:[#allocation51_spill] sm:$0xff] %v5071_v28  ;;  %v1744_v4 = vmul.f32 %v3789_v7, %v5019_v6  ;;  %v5088_v56 = vmul.f32 %v5002_v20, %v1055_v24  ;;  %v5091_v27 = vmul.f32 %v5005_v45, %v1055_v24  ;;  %v5096_v25 = vmul.f32 %v5008_v3, %v1055_v24 }
 0x4db   : > { %v5075_v12 = vpop.f32.mrb[12].mxu1  ;;  %v5099_v11 = vmul.f32 %v5011_v49, %v1055_v24  ;;  %v5105_v7 = vmul.f32 %v5015_v63, %v1160_v35  ;;  %v5108_v18 = vmul.f32 %v5017_v5, %v1160_v35  ;;  %v1230_v22 = vadd.f32 %v1222_v17, %v4865_v51 }
 0x4dc   : > { %v5081_v62 = vpop.f32.mrb[20].mxu0  ;;  %v5083_v60 = vpop.f32.mrb[13].mxu1  ;;  %6725 = vst [vmem:[#allocation53_spill] sm:$0xff] %v5091_v27  ;;  %v5115_v27 = vmul.f32 %v5075_v12, %v5002_v20  ;;  %v5119_v24 = vmul.f32 %v5075_v12, %v5005_v45 }
 0x4dd   : > { %6724 = vst [vmem:[#allocation52_spill] sm:$0xff] %v5083_v60  ;;  %v5093_v26 = vpop.f32.mrb[21].mxu0  ;;  %v3777_v37 = vpop.f32.mrb[14].mxu1  ;;  %v5102_v60 = vmul.f32 %v5013_v29, %v1160_v35  ;;  %6727 = vst [vmem:[#allocation55_spill] sm:$0xff] %v5105_v7  ;;  %v1249_v17 = vadd.f32 %v1241_v50, %v1230_v22 }
 0x4de   : > { %6726 = vst [vmem:[#allocation54_spill] sm:$0xff] %v5093_v26  ;;  %v3793_v28 = vpop.f32.mrb[22].mxu0  ;;  %v1071_v33 = vpop.f32.mrb[15].mxu1  ;;  %v5111_v26 = vmul.f32 %v5019_v6, %v1160_v35  ;;  %6729 = vst [vmem:[#allocation57_spill] sm:$0xff] %v5115_v27  ;;  %v5123_v7 = vmul.f32 %v3777_v37, %v5002_v20  ;;  %v5126_v1 = vmul.f32 %v3777_v37, %v5005_v45 }
 0x4df   : > { %6730 = vst [vmem:[#allocation58_spill] sm:$0xff] %v5119_v24  ;;  %v1176_v57 = vpop.f32.mrb[23].mxu0  ;;  %v5129_v35 = vmul.f32 %v3777_v37, %v5008_v3  ;;  %v5135_v27 = vmul.f32 %v3793_v28, %v5013_v29  ;;  %v5138_v24 = vmul.f32 %v3793_v28, %v5015_v63  ;;  %v5141_v51 = vmul.f32 %v3793_v28, %v5017_v5 }
 0x4e0   : > { %6728 = vst [vmem:[#allocation56_spill] sm:$0xff] %v5111_v26  ;;  %6731 = vst [vmem:[#allocation59_spill] sm:$0xff] %v5123_v7  ;;  %v5132_v26 = vmul.f32 %v3777_v37, %v5011_v49  ;;  %v5144_v7 = vmul.f32 %v3793_v28, %v5019_v6  ;;  %v5153_v37 = vmul.f32 %v5008_v3, %v1071_v33 }
 0x4e1   : > { %6732 = vst [vmem:[#allocation60_spill] sm:$0xff] %v5126_v1  ;;  %6733 = vst [vmem:[#allocation61_spill] sm:$0xff] %v5129_v35  ;;  %v5147_v1 = vmul.f32 %v5002_v20, %v1071_v33  ;;  %v5150_v35 = vmul.f32 %v5005_v45, %v1071_v33  ;;  %v5162_v50 = vmul.f32 %v5015_v63, %v1176_v57 }
 0x4e2   : > { %6734 = vst [vmem:[#allocation62_spill] sm:$0xff] %v5132_v26  ;;  %6735 = vst [vmem:[#allocation63_spill] sm:$0xff] %v5138_v24  ;;  %v5156_v26 = vmul.f32 %v5011_v49, %v1071_v33  ;;  %v5159_v24 = vmul.f32 %v5013_v29, %v1176_v57  ;;  %v5165_v22 = vadd.f32 %v5021_v15, %v1249_v17 }
 0x4e3   : > { %6736 = vst [vmem:[#allocation64_spill] sm:$0xff] %v5141_v51  ;;  %6737 = vst [vmem:[#allocation65_spill] sm:$0xff] %v5144_v7  ;;  %v5168_v28 = vmul.f32 %v5017_v5, %v1176_v57  ;;  %v5171_v7 = vmul.f32 %v5019_v6, %v1176_v57  ;;  %v1231_v51 = vadd.f32 %v1223_v40, %v4897_v30 }
 0x4e4   : > { %6738 = vst [vmem:[#allocation66_spill] sm:$0xff] %v5153_v37  ;;  %6739 = vst [vmem:[#allocation67_spill] sm:$0xff] %v5156_v26  ;;  %v1398_v33 = vadd.f32 %v5027_v42, %v4867_v53  ;;  %v1399_v26 = vadd.f32 %v1391_v39, %v4899_v31  ;;  %v1273_v17 = vsel %vm1266_vm4, %v5165_v22, -inf  ;;  %v1732_v57 = vadd.f32 %v5037_v52, %v4871_v55 }
 0x4e5   : > { %6740 = vst [vmem:[#allocation68_spill] sm:$0xff] %v5159_v24  ;;  %6741 = vst [vmem:[#allocation69_spill] sm:$0xff] %v5162_v50  ;;  %v1565_v24 = vadd.f32 %v5034_v43, %v4869_v54  ;;  %v1566_v50 = vadd.f32 %v1558_v41, %v4901_v32  ;;  %v1250_v37 = vadd.f32 %v1242_v8, %v1231_v51  ;;  %1274 = vmax.xlane.f32.xlu0 %v1273_v17  ;;  %v6746_v17 = vld [vmem:[#allocation53_spill] sm:$0xff] }
 0x4e6   : > { %6742 = vst [vmem:[#allocation70_spill] sm:$0xff] %v5171_v7  ;;  %v1733_v7 = vadd.f32 %v1725_v38, %v4903_v36  ;;  %v1417_v30 = vadd.f32 %v5041_v48, %v1398_v33  ;;  %v1418_v53 = vadd.f32 %v1410_v59, %v1399_v26  ;;  %v1751_v54 = vadd.f32 %v5047_v46, %v1732_v57  ;;  %v6744_v33 = vld [vmem:[#allocation48_spill] sm:$0xff] }
 0x4e7   : > { %v1584_v31 = vadd.f32 %v5044_v47, %v1565_v24  ;;  %v1585_v39 = vadd.f32 %v1577_v2, %v1566_v50  ;;  %v5188_v43 = vadd.f32 %v5021_v15, %v1250_v37  ;;  %v1228_v8 = vadd.f32 %v5050_v21, %v4881_v0  ;;  %v6743_v50 = vld [vmem:[#allocation30_spill] sm:$0xff]  ;;  %v6749_v57 = vld [vmem:[#allocation56_spill] sm:$0xff] }
 0x4e8   : > { %v1752_v32 = vadd.f32 %v1744_v4, %v1733_v7  ;;  %v1561_v52 = vmul.f32 %v5075_v12, %v5008_v3  ;;  %v1728_v55 = vmul.f32 %v5075_v12, %v5011_v49  ;;  %v5198_v48 = vadd.f32 %v5023_v16, %v1417_v30 }
 0x4e9   : > { %v5201_v47 = vadd.f32 %v5023_v16, %v1418_v53  ;;  %v1245_v36 = vmul.f32 %v5081_v62, %v5013_v29  ;;  %v1276_v46 = vsel %vm1266_vm4, %v5188_v43, -inf  ;;  %v5208_v21 = vadd.f32 %v5029_v34, %v1584_v31  ;;  %v6751_v53 = vld [vmem:[#allocation55_spill] sm:$0xff] }
 0x4ea   : > { %v1247_v0 = vadd.f32 %v5062_v9, %v1228_v8  ;;  %v1413_v26 = vmul.f32 %v5081_v62, %v5015_v63  ;;  %v1580_v4 = vmul.f32 %v5081_v62, %v5017_v5  ;;  %1277 = vmax.xlane.f32.xlu1 %v1276_v46  ;;  %v1440_v59 = vsel %vm1266_vm4, %v5198_v48, -inf }
 0x4eb   : > { %v5218_v38 = vadd.f32 %v5029_v34, %v1585_v39  ;;  %1441 = vmax.xlane.f32.xlu0 %v1440_v59  ;;  %v1443_v12 = vsel %vm1266_vm4, %v5201_v47, -inf  ;;  %v5223_v40 = vadd.f32 %v5031_v44, %v1751_v54  ;;  %v5226_v9 = vadd.f32 %v5031_v44, %v1752_v32  ;;  %v6752_v39 = vld [vmem:[#allocation32_spill] sm:$0xff]  ;;  %v6753_v54 = vld [vmem:[#allocation57_spill] sm:$0xff] }
 0x4ec   : > { %v1229_v42 = vadd.f32 %v5088_v56, %v4913_v13  ;;  %v1396_v41 = vadd.f32 %v5053_v10, %v4883_v14  ;;  %v1564_v2 = vadd.f32 %v5096_v25, %v4917_v58  ;;  %v1563_v7 = vadd.f32 %v5056_v19, %v4885_v23  ;;  %v6745_v56 = vld [vmem:[#allocation31_spill] sm:$0xff]  ;;  %v6747_v14 = vld [vmem:[#allocation49_spill] sm:$0xff]  ;;  %v6748_v23 = vld [vmem:[#allocation50_spill] sm:$0xff] }
 0x4ed   : > { %v1731_v24 = vadd.f32 %v5099_v11, %v4919_v61  ;;  %v1607_v51 = vsel %vm1266_vm4, %v5208_v21, -inf  ;;  %v1730_v13 = vadd.f32 %v6744_v33, %v6743_v50  ;;  %v1397_v10 = vadd.f32 %v6746_v17, %v6745_v56  ;;  %v6761_v17 = vld [vmem:[#allocation37_spill] sm:$0xff] }
 0x4ee   : > { %v1248_v37 = vadd.f32 %v5102_v60, %v1229_v42  ;;  %1444 = vmax.xlane.f32.xlu1 %v1443_v12  ;;  %v1415_v58 = vadd.f32 %v6747_v14, %v1396_v41  ;;  %v1583_v25 = vadd.f32 %v5108_v18, %v1564_v2  ;;  %v1582_v19 = vadd.f32 %v6748_v23, %v1563_v7  ;;  %v6750_v60 = vld [vmem:[#allocation51_spill] sm:$0xff]  ;;  %v6754_v18 = vld [vmem:[#allocation52_spill] sm:$0xff]  ;;  %v6755_v42 = vld [vmem:[#allocation54_spill] sm:$0xff] }
 0x4ef   : > { %v1750_v61 = vadd.f32 %v6749_v57, %v1731_v24  ;;  %1608 = vmax.xlane.f32.xlu0 %v1607_v51  ;;  %v5250_v11 = vadd.f32 %v5021_v15, %v1247_v0  ;;  %v1749_v30 = vadd.f32 %v6750_v60, %v1730_v13  ;;  %v5254_v31 = vadd.f32 %v6751_v53, %v1397_v10  ;;  %v6757_v24 = vld [vmem:[#allocation58_spill] sm:$0xff]  ;;  %v6760_v13 = vld [vmem:[#allocation36_spill] sm:$0xff]  ;;  %v6763_v53 = vld [vmem:[#allocation39_spill] sm:$0xff] }
 0x4f0   : > { %v1234_v32 = vadd.f32 %v6753_v54, %v6752_v39  ;;  %v1747_v8 = vmul.f32 %v5081_v62, %v5019_v6  ;;  %v1224_v46 = vmul.f32 %v5002_v20, %v6754_v18  ;;  %v1392_v59 = vmul.f32 %v5005_v45, %v6754_v18  ;;  %v6758_v51 = vld [vmem:[#allocation34_spill] sm:$0xff] }
 0x4f1   : > { %v1559_v0 = vmul.f32 %v5008_v3, %v6754_v18  ;;  %v1726_v12 = vmul.f32 %v5011_v49, %v6754_v18  ;;  %v1243_v41 = vmul.f32 %v5013_v29, %v6755_v42  ;;  %v1610_v2 = vsel %vm1266_vm4, %v5218_v38, -inf  ;;  %v6762_v57 = vld [vmem:[#allocation38_spill] sm:$0xff] }
 0x4f2   : > { %v5272_v7 = vadd.f32 %v1245_v36, %v1234_v32  ;;  %v1411_v62 = vmul.f32 %v5015_v63, %v6755_v42  ;;  %v1578_v20 = vmul.f32 %v5017_v5, %v6755_v42  ;;  %v1745_v45 = vmul.f32 %v5019_v6, %v6755_v42  ;;  %1611 = vmax.xlane.f32.xlu1 %v1610_v2  ;;  %v6756_v63 = vld [vmem:[#allocation33_spill] sm:$0xff]  ;;  %v6759_v6 = vld [vmem:[#allocation35_spill] sm:$0xff] }
 0x4f3   : > { %v1774_v3 = vsel %vm1266_vm4, %v5223_v40, -inf  ;;  %v1777_v49 = vsel %vm1266_vm4, %v5226_v9, -inf  ;;  %v1267_v29 = vsel %vm1266_vm4, %v5250_v11, -inf  ;;  %v5287_v36 = vadd.f32 %v5021_v15, %v1248_v37 }
 0x4f4   : > { %1775 = vmax.xlane.f32.xlu0 %v1774_v3  ;;  %v1402_v5 = vadd.f32 %v6757_v24, %v6756_v63  ;;  %v1569_v50 = vadd.f32 %v1561_v52, %v6758_v51  ;;  %v1736_v33 = vadd.f32 %v1728_v55, %v6759_v6  ;;  %v1232_v56 = vadd.f32 %v1224_v46, %v6760_v13  ;;  %v6772_v63 = vld [vmem:[#allocation44_spill] sm:$0xff]  ;;  %v6776_v13 = vld [vmem:[#allocation66_spill] sm:$0xff] }
 0x4f5   : > { %v1400_v10 = vadd.f32 %v1392_v59, %v6761_v17  ;;  %v5296_v14 = vadd.f32 %v5023_v16, %v1415_v58  ;;  %v1567_v60 = vadd.f32 %v1559_v0, %v6762_v57  ;;  %v1734_v37 = vadd.f32 %v1726_v12, %v6763_v53  ;;  %v6764_v58 = vld [vmem:[#allocation40_spill] sm:$0xff]  ;;  %v6777_v17 = vld [vmem:[#allocation47_spill] sm:$0xff] }
 0x4f6   : > { %v1421_v23 = vadd.f32 %v1413_v26, %v1402_v5  ;;  %1778 = vmax.xlane.f32.xlu1 %v1777_v49  ;;  %v1588_v39 = vadd.f32 %v1580_v4, %v1569_v50  ;;  %v1755_v54 = vadd.f32 %v1747_v8, %v1736_v33  ;;  %v1251_v32 = vadd.f32 %v1243_v41, %v1232_v56  ;;  %v6765_v26 = vld [vmem:[#allocation59_spill] sm:$0xff]  ;;  %v6773_v5 = vld [vmem:[#allocation45_spill] sm:$0xff]  ;;  %v6775_v33 = vld [vmem:[#allocation46_spill] sm:$0xff] }
 0x4f7   : > { %v5300_v18 = vadd.f32 %v1411_v62, %v1400_v10  ;;  %v5303_v52 = vadd.f32 %v5029_v34, %v1583_v25  ;;  %v5305_v55 = vadd.f32 %v1578_v20, %v1567_v60  ;;  %v5307_v46 = vadd.f32 %v1745_v45, %v1734_v37  ;;  %v6767_v62 = vld [vmem:[#allocation60_spill] sm:$0xff]  ;;  %v6768_v20 = vld [vmem:[#allocation42_spill] sm:$0xff]  ;;  %v6769_v45 = vld [vmem:[#allocation61_spill] sm:$0xff] }
 0x4f8   : > { %1268 = vmax.xlane.f32.xlu0 %v1267_v29  ;;  %v1235_v59 = vadd.f32 %v6765_v26, %v6764_v58  ;;  %v1270_v0 = vsel %vm1266_vm4, %v5287_v36, -inf  ;;  %v5314_v4 = vadd.f32 %v5029_v34, %v1582_v19  ;;  %v1434_v25 = vsel %vm1266_vm4, %v5296_v14, -inf  ;;  %v6766_v19 = vld [vmem:[#allocation41_spill] sm:$0xff]  ;;  %v6770_v49 = vld [vmem:[#allocation43_spill] sm:$0xff]  ;;  %v6771_v29 = vld [vmem:[#allocation62_spill] sm:$0xff] }
 0x4f9   : > { %v5320_v12 = vadd.f32 %v5031_v44, %v1750_v61  ;;  %v1604_v42 = vsel %vm1266_vm4, %v5303_v52, -inf  ;;  %v5325_v41 = vadd.f32 %v5031_v44, %v1749_v30  ;;  %v1570_v3 = vadd.f32 %v6769_v45, %v6768_v20  ;;  %v6774_v50 = vld [vmem:[#allocation63_spill] sm:$0xff]  ;;  %v6779_v60 = vld [vmem:[#allocation64_spill] sm:$0xff]  ;;  %v6780_v37 = vld [vmem:[#allocation65_spill] sm:$0xff] }
 0x4fa   : > { %v1254_v8 = vadd.f32 %v5135_v27, %v1235_v59  ;;  %1271 = vmax.xlane.f32.xlu1 %v1270_v0  ;;  %v1403_v27 = vadd.f32 %v6767_v62, %v6766_v19  ;;  %v1737_v61 = vadd.f32 %v6771_v29, %v6770_v49  ;;  %v1233_v24 = vadd.f32 %v5147_v1, %v6772_v63  ;;  %v6778_v10 = vld [vmem:[#allocation67_spill] sm:$0xff]  ;;  %v6781_v1 = vld [vmem:[#allocation68_spill] sm:$0xff]  ;;  %v6782_v59 = vld [vmem:[#allocation69_spill] sm:$0xff] }
 0x4fb   : > { %v1401_v51 = vadd.f32 %v5150_v35, %v6773_v5  ;;  %v1601_v30 = vsel %vm1266_vm4, %v5314_v4, -inf  ;;  %v1568_v56 = vadd.f32 %v6776_v13, %v6775_v33  ;;  %v1735_v57 = vadd.f32 %v6778_v10, %v6777_v17 }
 0x4fc   : > { %1435 = vmax.xlane.f32.xlu0 %v1434_v25  ;;  %v5328_v2 = vadd.f32 %v5021_v15, %v1254_v8  ;;  %v1422_v6 = vadd.f32 %v6774_v50, %v1403_v27  ;;  %v1589_v53 = vadd.f32 %v6779_v60, %v1570_v3  ;;  %v1756_v58 = vadd.f32 %v6780_v37, %v1737_v61  ;;  %v6783_v25 = vld [vmem:[#allocation70_spill] sm:$0xff] }
 0x4fd   : > { %v1252_v26 = vadd.f32 %v6781_v1, %v1233_v24  ;;  %v1420_v35 = vadd.f32 %v6782_v59, %v1401_v51  ;;  %v1587_v8 = vadd.f32 %v5168_v28, %v1568_v56  ;;  %v1754_v19 = vadd.f32 %v6783_v25, %v1735_v57  ;;  %v6784_v50 = vld [vmem:[#allocation26_spill] sm:$0xff] }
 0x4fe   : > { %1605 = vmax.xlane.f32.xlu1 %v1604_v42  ;;  %v5352_v0 = vadd.f32 %v5023_v16, %v1422_v6  ;;  %v5357_v62 = vadd.f32 %v5029_v34, %v1589_v53  ;;  %v5360_v42 = vadd.f32 %v5031_v44, %v1756_v58  ;;  %v1771_v45 = vsel %vm1266_vm4, %v5320_v12, -inf  ;;  %v6787_v53 = vld [vmem:[#allocation28_spill] sm:$0xff] }
 0x4ff   : > { %v5363_v27 = vadd.f32 %v5021_v15, %v1252_v26  ;;  %v5366_v20 = vadd.f32 %v5023_v16, %v1420_v35  ;;  %v5371_v3 = vadd.f32 %v5029_v34, %v1587_v8  ;;  %v5374_v28 = vadd.f32 %v5031_v44, %v1754_v19 }
 0x500   : > { %1602 = vmax.xlane.f32.xlu0 %v1601_v30  ;;  %v1768_v49 = vsel %vm1266_vm4, %v5325_v41, -inf  ;;  %v5380_v29 = vadd.f32 %v5023_v16, %v5254_v31  ;;  %v5386_v63 = vadd.f32 %v5021_v15, %v5272_v7  ;;  %v5391_v5 = vadd.f32 %v5023_v16, %v1421_v23 }
 0x501   : > { %v5396_v51 = vadd.f32 %v5029_v34, %v1588_v39  ;;  %v5401_v7 = vadd.f32 %v5031_v44, %v1755_v54  ;;  %v5408_v6 = vadd.f32 %v5021_v15, %v1251_v32  ;;  %v6785_v39 = vld [vmem:[#allocation29_spill] sm:$0xff]  ;;  %v5416_v54 = vadd.f32 %v5023_v16, %v5300_v18 }
 0x502   : > { %1772 = vmax.xlane.f32.xlu1 %v1771_v45  ;;  %v1437_v61 = vsel %vm1266_vm4, %v5380_v29, -inf  ;;  %v1285_v24 = vsel %vm1266_vm4, %v5386_v63, -inf  ;;  %v1452_v31 = vsel %vm1266_vm4, %v5391_v5, -inf  ;;  %v5422_v56 = vadd.f32 %v5029_v34, %v5305_v55  ;;  %v6786_v34 = vld [vmem:[#allocation27_spill] sm:$0xff] }
 0x503   : > { %v1619_v30 = vsel %vm1266_vm4, %v5396_v51, -inf  ;;  %v1786_v23 = vsel %vm1266_vm4, %v5401_v7, -inf  ;;  %v1279_v33 = vsel %vm1266_vm4, %v5408_v6, -inf  ;;  %v1446_v13 = vsel %vm1266_vm4, %v5416_v54, -inf }
 0x504   : > { %1769 = vmax.xlane.f32.xlu0 %v1768_v49  ;;  %v1613_v15 = vsel %vm1266_vm4, %v5422_v56, -inf  ;;  %v5428_v32 = vadd.f32 %v5031_v44, %v5307_v46  ;;  %v1288_v18 = vsel %vm1266_vm4, %v5328_v2, -inf  ;;  %v1455_v55 = vsel %vm1266_vm4, %v5352_v0, -inf }
 0x505   : > { %v1622_v44 = vsel %vm1266_vm4, %v5357_v62, -inf  ;;  %v1789_v46 = vsel %vm1266_vm4, %v5360_v42, -inf  ;;  %v1282_v17 = vsel %vm1266_vm4, %v5363_v27, -inf  ;;  %v1449_v10 = vsel %vm1266_vm4, %v5366_v20, -inf }
 0x506   : > { %v1780_v16 = vsel %vm1266_vm4, %v5428_v32, -inf  ;;  %v1616_v57 = vsel %vm1266_vm4, %v5371_v3, -inf  ;;  %v1783_v60 = vsel %vm1266_vm4, %v5374_v28, -inf }
 0x508   : > { %1438 = vmax.xlane.f32.xlu0 %v1437_v61 }
 0x50c   : > { %1286 = vmax.xlane.f32.xlu0 %v1285_v24 }
 0x510   : > { %1453 = vmax.xlane.f32.xlu0 %v1452_v31 }
 0x513   : > { %1941 = vrot.lane.b32.xlu1 %v6784_v50, %s4425_s13 }
 0x514   : > { %1620 = vmax.xlane.f32.xlu0 %v1619_v30 }
 0x517   : > { %1943 = vrot.lane.b32.xlu1 %v6785_v39, %s4425_s13 }
 0x518   : > { %1787 = vmax.xlane.f32.xlu0 %v1786_v23 }
 0x51c   : > { %1280 = vmax.xlane.f32.xlu0 %v1279_v33 }
 0x520   : > { %1447 = vmax.xlane.f32.xlu0 %v1446_v13 }
 0x524   : > { %1614 = vmax.xlane.f32.xlu0 %v1613_v15 }
 0x528   : > { %1781 = vmax.xlane.f32.xlu0 %v1780_v16 }
 0x53b   : > { %1289 = vmax.xlane.f32.xlu1 %v1288_v18 }
 0x53e   : > { %1939 = vrot.lane.b32.xlu0 %v6786_v34, %s4425_s13 }
 0x53f   : > { %1456 = vmax.xlane.f32.xlu1 %v1455_v55 }
 0x543   : > { %1623 = vmax.xlane.f32.xlu1 %v1622_v44 }
 0x547   : > { %1790 = vmax.xlane.f32.xlu1 %v1789_v46 }
 0x54b   : > { %1283 = vmax.xlane.f32.xlu1 %v1282_v17 }
 0x54f   : > { %1450 = vmax.xlane.f32.xlu1 %v1449_v10 }
 0x553   : > { %1617 = vmax.xlane.f32.xlu1 %v1616_v57 }
 0x557   : > { %1784 = vmax.xlane.f32.xlu1 %v1783_v60 }
 0x568   : > { %1945 = vrot.lane.b32.xlu1 %v6787_v53, %s4425_s13  ;;  %s5647_s13 = sld [smem:[#allocation3 + %s1867_s3]] }
 0x572   : > { %v1275_v37 = vpop.xlane.xlu0 %1274 }
 0x573   : > { %v1293_v58 = vsub.f32 %v5165_v22, %v1275_v37 }
 0x575   : > { %v1303_v1 = vmul.f32 1.442695, %v1293_v58 }
 0x577   : > { %v1278_v26 = vpop.xlane.xlu1 %1277  ;;  %4118 = vpow2.f32 %v1303_v1 }
 0x578   : > { %v1294_v59 = vsub.f32 %v5188_v43, %v1278_v26  ;;  %v1442_v35 = vpop.xlane.xlu0 %1441 }
 0x579   : > { %v1460_v8 = vsub.f32 %v5198_v48, %v1442_v35 }
 0x57a   : > { %v1305_v25 = vmul.f32 1.442695, %v1294_v59 }
 0x57b   : > { %v1470_v19 = vmul.f32 1.442695, %v1460_v8  ;;  %v1445_v45 = vpop.xlane.xlu1 %1444 }
 0x57c   : > { %v1461_v49 = vsub.f32 %v5201_v47, %v1445_v45  ;;  %v1609_v61 = vpop.xlane.xlu0 %1608 }
 0x57d   : > { %4120 = vpow2.f32 %v1470_v19  ;;  %v1627_v24 = vsub.f32 %v5208_v21, %v1609_v61 }
 0x57e   : > { %4122 = vpow2.f32 %v1305_v25  ;;  %v1472_v31 = vmul.f32 1.442695, %v1461_v49 }
 0x57f   : > { %v1637_v22 = vmul.f32 1.442695, %v1627_v24  ;;  %v1612_v30 = vpop.xlane.xlu1 %1611 }
 0x580   : > { %v1628_v23 = vsub.f32 %v5218_v38, %v1612_v30 }
 0x581   : > { %v1776_v33 = vpop.xlane.xlu0 %1775  ;;  %4124 = vpow2.f32 %v1637_v22  ;;  %v5459_v48 = vpop.eup %4118 }
 0x582   : > { %v1794_v43 = vsub.f32 %v5223_v40, %v1776_v33  ;;  %4126 = vpow2.f32 %v1472_v31  ;;  %v1639_v13 = vmul.f32 1.442695, %v1628_v23  ;;  %v1321_v16 = vsel %vm1266_vm4, %v5459_v48, 0.0 }
 0x583   : > { %v1779_v47 = vpop.xlane.xlu1 %1778  ;;  %1322 = vadd.xlane.f32.xlu0 %v1321_v16 }
 0x584   : > { %v1804_v15 = vmul.f32 1.442695, %v1794_v43  ;;  %v1795_v21 = vsub.f32 %v5226_v9, %v1779_v47 }
 0x585   : > { %v1269_v18 = vpop.xlane.xlu0 %1268 }
 0x586   : > { %4128 = vpow2.f32 %v1804_v15  ;;  %v1291_v38 = vsub.f32 %v5250_v11, %v1269_v18  ;;  %v1806_v55 = vmul.f32 1.442695, %v1795_v21 }
 0x587   : > { %4130 = vpow2.f32 %v1639_v13  ;;  %v5465_v44 = vpop.eup %4120  ;;  %v1272_v46 = vpop.xlane.xlu1 %1271 }
 0x588   : > { %v1299_v40 = vmul.f32 1.442695, %v1291_v38  ;;  %v5467_v17 = vpop.eup %4122  ;;  %v1292_v10 = vsub.f32 %v5287_v36, %v1272_v46  ;;  %v1488_v60 = vsel %vm1266_vm4, %v5465_v44, 0.0 }
 0x589   : > { %v1436_v57 = vpop.xlane.xlu0 %1435  ;;  %1489 = vadd.xlane.f32.xlu0 %v1488_v60  ;;  %v1324_v1 = vsel %vm1266_vm4, %v5467_v17, 0.0 }
 0x58a   : > { %4132 = vpow2.f32 %v1299_v40  ;;  %v1458_v9 = vsub.f32 %v5296_v14, %v1436_v57  ;;  %v1301_v11 = vmul.f32 1.442695, %v1292_v10 }
 0x58b   : > { %4134 = vpow2.f32 %v1806_v55  ;;  %v5473_v37 = vpop.eup %4124  ;;  %v1606_v14 = vpop.xlane.xlu1 %1605 }
 0x58c   : > { %v1466_v58 = vmul.f32 1.442695, %v1458_v9  ;;  %v5477_v26 = vpop.eup %4126  ;;  %1325 = vadd.xlane.f32.xlu1 %v1324_v1  ;;  %v1655_v59 = vsel %vm1266_vm4, %v5473_v37, 0.0  ;;  %v1626_v31 = vsub.f32 %v5303_v52, %v1606_v14 }
 0x58d   : > { %v1603_v36 = vpop.xlane.xlu0 %1602  ;;  %1656 = vadd.xlane.f32.xlu0 %v1655_v59  ;;  %v1491_v19 = vsel %vm1266_vm4, %v5477_v26, 0.0 }
 0x58e   : > { %4136 = vpow2.f32 %v1466_v58  ;;  %v1625_v35 = vsub.f32 %v5314_v4, %v1603_v36  ;;  %v1635_v47 = vmul.f32 1.442695, %v1626_v31 }
 0x58f   : > { %4138 = vpow2.f32 %v1301_v11  ;;  %v1773_v33 = vpop.xlane.xlu1 %1772 }
 0x590   : > { %v5482_v8 = vpop.eup %4128  ;;  %v1633_v25 = vmul.f32 1.442695, %v1625_v35  ;;  %1492 = vadd.xlane.f32.xlu1 %v1491_v19  ;;  %v1793_v52 = vsub.f32 %v5320_v12, %v1773_v33 }
 0x591   : > { %v5486_v45 = vpop.eup %4130  ;;  %v1770_v49 = vpop.xlane.xlu0 %1769  ;;  %v1822_v61 = vsel %vm1266_vm4, %v5482_v8, 0.0 }
 0x592   : > { %4140 = vpow2.f32 %v1633_v25  ;;  %v1792_v24 = vsub.f32 %v5325_v41, %v1770_v49  ;;  %1823 = vadd.xlane.f32.xlu0 %v1822_v61  ;;  %v1658_v30 = vsel %vm1266_vm4, %v5486_v45, 0.0  ;;  %v1802_v46 = vmul.f32 1.442695, %v1793_v52 }
 0x594   : > { %v5491_v4 = vpop.eup %4132  ;;  %v1800_v22 = vmul.f32 1.442695, %v1792_v24  ;;  %1659 = vadd.xlane.f32.xlu1 %v1658_v30 }
 0x595   : > { %v5496_v23 = vpop.eup %4134  ;;  %v1439_v43 = vpop.xlane.xlu0 %1438  ;;  %v1315_v13 = vsel %vm1266_vm4, %v5491_v4, 0.0 }
 0x596   : > { %4142 = vpow2.f32 %v1800_v22  ;;  %v1459_v41 = vsub.f32 %v5380_v29, %v1439_v43  ;;  %1316 = vadd.xlane.f32.xlu0 %v1315_v13  ;;  %v1825_v21 = vsel %vm1266_vm4, %v5496_v23, 0.0 }
 0x598   : > { %v5501_v15 = vpop.eup %4136  ;;  %v1468_v16 = vmul.f32 1.442695, %v1459_v41  ;;  %1826 = vadd.xlane.f32.xlu1 %v1825_v21 }
 0x599   : > { %v5506_v18 = vpop.eup %4138  ;;  %v1287_v38 = vpop.xlane.xlu0 %1286  ;;  %v1482_v55 = vsel %vm1266_vm4, %v5501_v15, 0.0 }
 0x59a   : > { %4144 = vpow2.f32 %v1468_v16  ;;  %v1297_v29 = vsub.f32 %v5386_v63, %v1287_v38  ;;  %1483 = vadd.xlane.f32.xlu0 %v1482_v55  ;;  %v1318_v10 = vsel %vm1266_vm4, %v5506_v18, 0.0 }
 0x59b   : > { %4146 = vpow2.f32 %v1635_v47 }
 0x59c   : > { %v5511_v40 = vpop.eup %4140  ;;  %v1311_v12 = vmul.f32 1.442695, %v1297_v29  ;;  %1319 = vadd.xlane.f32.xlu1 %v1318_v10 }
 0x59d   : > { %v1454_v57 = vpop.xlane.xlu0 %1453  ;;  %v1649_v60 = vsel %vm1266_vm4, %v5511_v40, 0.0 }
 0x59e   : > { %4148 = vpow2.f32 %v1311_v12  ;;  %v1464_v9 = vsub.f32 %v5391_v5, %v1454_v57  ;;  %1650 = vadd.xlane.f32.xlu0 %v1649_v60  ;;  %v1942_v60 = vpop.permute.xlu1 %1941 }
 0x59f   : > { %4150 = vpow2.f32 %v1802_v46 }
 0x5a0   : > { %v5518_v11 = vpop.eup %4142  ;;  %v1478_v63 = vmul.f32 1.442695, %v1464_v9 }
 0x5a1   : > { %v1621_v58 = vpop.xlane.xlu0 %1620  ;;  %v1816_v1 = vsel %vm1266_vm4, %v5518_v11, 0.0 }
 0x5a2   : > { %4152 = vpow2.f32 %v1478_v63  ;;  %v1631_v36 = vsub.f32 %v5396_v51, %v1621_v58  ;;  %1817 = vadd.xlane.f32.xlu0 %v1816_v1 }
 0x5a4   : > { %v5523_v59 = vpop.eup %4144  ;;  %v1645_v35 = vmul.f32 1.442695, %v1631_v36 }
 0x5a5   : > { %v1788_v14 = vpop.xlane.xlu0 %1787  ;;  %v1485_v5 = vsel %vm1266_vm4, %v5523_v59, 0.0  ;;  %v5527_v25 = vpop.eup %4146 }
 0x5a6   : > { %4154 = vpow2.f32 %v1645_v35  ;;  %v1798_v19 = vsub.f32 %v5401_v7, %v1788_v14  ;;  %1486 = vadd.xlane.f32.xlu1 %v1485_v5  ;;  %v1652_v51 = vsel %vm1266_vm4, %v5527_v25, 0.0 }
 0x5a8   : > { %v5530_v49 = vpop.eup %4148  ;;  %v1812_v61 = vmul.f32 1.442695, %v1798_v19 }
 0x5a9   : > { %v1281_v24 = vpop.xlane.xlu0 %1280  ;;  %v1333_v31 = vsel %vm1266_vm4, %v5530_v49, 0.0  ;;  %v5536_v22 = vpop.eup %4150 }
 0x5aa   : > { %4156 = vpow2.f32 %v1812_v61  ;;  %v1295_v30 = vsub.f32 %v5408_v6, %v1281_v24  ;;  %1653 = vadd.xlane.f32.xlu1 %v1652_v51  ;;  %1334 = vadd.xlane.f32.xlu0 %v1333_v31  ;;  %v1819_v13 = vsel %vm1266_vm4, %v5536_v22, 0.0 }
 0x5ac   : > { %v5539_v33 = vpop.eup %4152  ;;  %v1307_v7 = vmul.f32 1.442695, %v1295_v30 }
 0x5ad   : > { %v1448_v43 = vpop.xlane.xlu0 %1447  ;;  %v1500_v41 = vsel %vm1266_vm4, %v5539_v33, 0.0 }
 0x5ae   : > { %4158 = vpow2.f32 %v1307_v7  ;;  %v1462_v47 = vsub.f32 %v5416_v54, %v1448_v43  ;;  %1820 = vadd.xlane.f32.xlu1 %v1819_v13  ;;  %1501 = vadd.xlane.f32.xlu0 %v1500_v41 }
 0x5b0   : > { %v5546_v52 = vpop.eup %4154  ;;  %v1474_v6 = vmul.f32 1.442695, %v1462_v47 }
 0x5b1   : > { %v1615_v16 = vpop.xlane.xlu0 %1614  ;;  %v1667_v21 = vsel %vm1266_vm4, %v5546_v52, 0.0 }
 0x5b2   : > { %4160 = vpow2.f32 %v1474_v6  ;;  %v1629_v38 = vsub.f32 %v5422_v56, %v1615_v16  ;;  %1668 = vadd.xlane.f32.xlu0 %v1667_v21 }
 0x5b4   : > { %v5551_v55 = vpop.eup %4156  ;;  %v1641_v29 = vmul.f32 1.442695, %v1629_v38 }
 0x5b5   : > { %v1782_v46 = vpop.xlane.xlu0 %1781  ;;  %v1834_v54 = vsel %vm1266_vm4, %v5551_v55, 0.0 }
 0x5b6   : > { %4162 = vpow2.f32 %v1641_v29  ;;  %v1796_v12 = vsub.f32 %v5428_v32, %v1782_v46  ;;  %1835 = vadd.xlane.f32.xlu0 %v1834_v54  ;;  %v1944_v32 = vpop.permute.xlu1 %1943 }
 0x5b8   : > { %v5556_v10 = vpop.eup %4158  ;;  %v1808_v57 = vmul.f32 1.442695, %v1796_v12 }
 0x5b9   : > { %6788 = vst [vmem:[#allocation30_spill] sm:$0xff] %v5556_v10  ;;  %v1940_v9 = vpop.permute.xlu0 %1939  ;;  %v1327_v56 = vsel %vm1266_vm4, %v5556_v10, 0.0 }
 0x5ba   : > { %4164 = vpow2.f32 %v1808_v57  ;;  %1328 = vadd.xlane.f32.xlu0 %v1327_v56  ;;  %3794 = vmatprep.subr.bf16.mxu0 %v1940_v9 }
 0x5bb   : > { %3795 = vmatpush3.bf16.msra.mxu0 %v1940_v9 }
 0x5bc   : > { %v5560_v63 = vpop.eup %4160  ;;  %3796 = vmatprep.subr.bf16.mxu0 %v1942_v60 }
 0x5bd   : > { %6789 = vst [vmem:[#allocation48_spill] sm:$0xff] %v5560_v63  ;;  %v1494_v58 = vsel %vm1266_vm4, %v5560_v63, 0.0 }
 0x5be   : > { %1495 = vadd.xlane.f32.xlu0 %v1494_v58 }
 0x5bf   : > { %3797 = vmatpush3.bf16.msra.mxu0 %v1942_v60 }
 0x5c0   : > { %v5564_v1 = vpop.eup %4162  ;;  %3798 = vmatprep.subr.bf16.mxu0 %v1944_v32 }
 0x5c1   : > { %6790 = vst [vmem:[#allocation31_spill] sm:$0xff] %v5564_v1  ;;  %v1661_v36 = vsel %vm1266_vm4, %v5564_v1, 0.0 }
 0x5c2   : > { %1662 = vadd.xlane.f32.xlu0 %v1661_v36 }
 0x5c3   : > { %3799 = vmatpush3.bf16.msra.mxu0 %v1944_v32 }
 0x5c4   : > { %v5568_v35 = vpop.eup %4164 }
 0x5c5   : > { %6791 = vst [vmem:[#allocation53_spill] sm:$0xff] %v5568_v35  ;;  %v1828_v14 = vsel %vm1266_vm4, %v5568_v35, 0.0 }
 0x5c6   : > { %1829 = vadd.xlane.f32.xlu0 %v1828_v14 }
 0x5c8   : > { %v1290_v5 = vpop.xlane.xlu1 %1289 }
 0x5c9   : > { %v1298_v19 = vsub.f32 %v5328_v2, %v1290_v5 }
 0x5cb   : > { %v1313_v61 = vmul.f32 1.442695, %v1298_v19 }
 0x5cc   : > { %v1457_v24 = vpop.xlane.xlu1 %1456 }
 0x5cd   : > { %4166 = vpow2.f32 %v1313_v61  ;;  %v1465_v51 = vsub.f32 %v5352_v0, %v1457_v24 }
 0x5cf   : > { %v1480_v31 = vmul.f32 1.442695, %v1465_v51 }
 0x5d0   : > { %v1624_v30 = vpop.xlane.xlu1 %1623 }
 0x5d1   : > { %4168 = vpow2.f32 %v1480_v31  ;;  %v1632_v7 = vsub.f32 %v5357_v62, %v1624_v30 }
 0x5d3   : > { %v1647_v43 = vmul.f32 1.442695, %v1632_v7 }
 0x5d4   : > { %v1791_v13 = vpop.xlane.xlu1 %1790 }
 0x5d5   : > { %4170 = vpow2.f32 %v1647_v43  ;;  %v1799_v41 = vsub.f32 %v5360_v42, %v1791_v13  ;;  %v5640_v13 = vstv %s2029_s21  ;;  %s2230_s21 = sadd.s32 30, %s4584_s29 }
 0x5d6   : > { %6800 = vst [vmem:[#allocation54_spill] sm:$0xff] %v5640_v13 }
 0x5d7   : > { %v5576_v47 = vpop.eup %4166  ;;  %v1814_v6 = vmul.f32 1.442695, %v1799_v41 }
 0x5d8   : > { %6792 = vst [vmem:[#allocation49_spill] sm:$0xff] %v5576_v47  ;;  %v1284_v16 = vpop.xlane.xlu1 %1283  ;;  %v1336_v2 = vsel %vm1266_vm4, %v5576_v47, 0.0 }
 0x5d9   : > { %4172 = vpow2.f32 %v1814_v6  ;;  %v1296_v0 = vsub.f32 %v5363_v27, %v1284_v16  ;;  %1337 = vadd.xlane.f32.xlu1 %v1336_v2  ;;  %v5645_v6 = vstv %s2373_s25  ;;  %v5649_v16 = vstv %s2040_s28  ;;  %s2249_s28 = sadd.s32 31, %s4584_s29 }
 0x5da   : > { %v5651_v2 = vstv %s2384_s9  ;;  %s5677_s9 = sld [smem:[#allocation3 + %s2200_s23]] }
 0x5db   : > { %v5581_v21 = vpop.eup %4168  ;;  %v1309_v38 = vmul.f32 1.442695, %v1296_v0  ;;  %s5703_s3 = sld [smem:[#allocation3 + %s2249_s28]]  ;;  %s2671_s28 = scalar_lea.vmem %s6606_s4, %s4687_s22 }
 0x5dc   : > { %6793 = vst [vmem:[#allocation50_spill] sm:$0xff] %v5581_v21  ;;  %2111 = vrot.lane.b32.xlu0 %v6786_v34, %s4426_s15  ;;  %v1451_v62 = vpop.xlane.xlu1 %1450  ;;  %v1503_v42 = vsel %vm1266_vm4, %v5581_v21, 0.0 }
 0x5dd   : > { %4174 = vpow2.f32 %v1309_v38  ;;  %v1463_v29 = vsub.f32 %v5366_v20, %v1451_v62  ;;  %1504 = vadd.xlane.f32.xlu1 %v1503_v42 }
 0x5df   : > { %v5588_v46 = vpop.eup %4170  ;;  %v1476_v54 = vmul.f32 1.442695, %v1463_v29 }
 0x5e0   : > { %6794 = vst [vmem:[#allocation56_spill] sm:$0xff] %v5588_v46  ;;  %2115 = vrot.lane.b32.xlu0 %v6785_v39, %s4426_s15  ;;  %v1618_v27 = vpop.xlane.xlu1 %1617  ;;  %v1670_v12 = vsel %vm1266_vm4, %v5588_v46, 0.0 }
 0x5e1   : > { %4176 = vpow2.f32 %v1476_v54  ;;  %v1630_v57 = vsub.f32 %v5371_v3, %v1618_v27  ;;  %1671 = vadd.xlane.f32.xlu1 %v1670_v12 }
 0x5e3   : > { %v5595_v60 = vpop.eup %4172  ;;  %v1643_v9 = vmul.f32 1.442695, %v1630_v57 }
 0x5e4   : > { %6795 = vst [vmem:[#allocation51_spill] sm:$0xff] %v5595_v60  ;;  %2283 = vrot.lane.b32.xlu0 %v6786_v34, %s4427_s27  ;;  %v1785_v20 = vpop.xlane.xlu1 %1784  ;;  %v1837_v56 = vsel %vm1266_vm4, %v5595_v60, 0.0 }
 0x5e5   : > { %4178 = vpow2.f32 %v1643_v9  ;;  %v1797_v58 = vsub.f32 %v5374_v28, %v1785_v20  ;;  %1838 = vadd.xlane.f32.xlu1 %v1837_v56 }
 0x5e7   : > { %v5601_v32 = vpop.eup %4174  ;;  %v1810_v36 = vmul.f32 1.442695, %v1797_v58  ;;  %v5683_v58 = vstv %s5636_s7  ;;  %s2421_s7 = sadd.s32 35, %s4584_s29 }
 0x5e8   : > { %6796 = vst [vmem:[#allocation55_spill] sm:$0xff] %v5601_v32  ;;  %2285 = vrot.lane.b32.xlu0 %v6784_v50, %s4427_s27  ;;  %v1946_v3 = vpop.permute.xlu1 %1945  ;;  %v1330_v14 = vsel %vm1266_vm4, %v5601_v32, 0.0 }
 0x5e9   : > { %4180 = vpow2.f32 %v1810_v36  ;;  %1331 = vadd.xlane.f32.xlu1 %v1330_v14  ;;  %3800 = vmatprep.subr.bf16.mxu0 %v1946_v3  ;;  %v5686_v36 = vstv %s5638_s18  ;;  %s1924_s18 = sadd.s32 36, %s4584_s29 }
 0x5ea   : > { %3801 = vmatpush3.bf16.msra.mxu0 %v1946_v3 }
 0x5eb   : > { %v5606_v5 = vpop.eup %4176 }
 0x5ec   : > { %6797 = vst [vmem:[#allocation32_spill] sm:$0xff] %v5606_v5  ;;  %2287 = vrot.lane.b32.xlu0 %v6785_v39, %s4427_s27  ;;  %v1497_v28 = vsel %vm1266_vm4, %v5606_v5, 0.0 }
 0x5ed   : > { %1498 = vadd.xlane.f32.xlu1 %v1497_v28 }
 0x5ef   : > { %v5611_v19 = vpop.eup %4178 }
 0x5f0   : > { %6798 = vst [vmem:[#allocation57_spill] sm:$0xff] %v5611_v19  ;;  %2289 = vrot.lane.b32.xlu0 %v6787_v53, %s4427_s27  ;;  %v1664_v61 = vsel %vm1266_vm4, %v5611_v19, 0.0  ;;  %s5654_s27 = sld [smem:[#allocation3 + %s1856_s2]] }
 0x5f1   : > { %1665 = vadd.xlane.f32.xlu1 %v1664_v61  ;;  %s5692_s2 = sld [smem:[#allocation3 + %s2230_s21]] }
 0x5f3   : > { %v5616_v24 = vpop.eup %4180 }
 0x5f4   : > { %6799 = vst [vmem:[#allocation52_spill] sm:$0xff] %v5616_v24  ;;  %v1831_v51 = vsel %vm1266_vm4, %v5616_v24, 0.0 }
 0x5f5   : > { %1832 = vadd.xlane.f32.xlu1 %v1831_v51 }
 0x5f6   : > { %v5707_v61 = vstv %s5654_s27  ;;  %s2096_s27 = sadd.s32 37, %s4584_s29 }
 0x5f7   : > { %6804 = vst [vmem:[#allocation35_spill] sm:$0xff] %v5707_v61  ;;  %s5755_s24 = sld [smem:[#allocation3 + %s2096_s27]] }
 0x606   : > { %2113 = vrot.lane.b32.xlu1 %v6784_v50, %s4426_s15 }
 0x60a   : > { %2117 = vrot.lane.b32.xlu1 %v6787_v53, %s4426_s15  ;;  %s1886_s15 = sadd.s32 22, %s4584_s29 }
 0x60b   : > { %s5670_s11 = sld [smem:[#allocation3 + %s1886_s15]] }
 0x60c   : > { %s5730_s15 = sld [smem:[#allocation3 + %s2421_s7]] }
 0x60e   : > { %2455 = vrot.lane.b32.xlu1 %v6786_v34, %s4428_s19 }
 0x610   : > { %v1323_v31 = vpop.xlane.xlu0 %1322 }
 0x611   : > { %4182 = vrcp.f32 %v1323_v31 }
 0x612   : > { %2457 = vrot.lane.b32.xlu1 %v6784_v50, %s4428_s19  ;;  %v5791_v21 = vstv %s5730_s15 }
 0x616   : > { %2459 = vrot.lane.b32.xlu1 %v6785_v39, %s4428_s19  ;;  %v1490_v30 = vpop.xlane.xlu0 %1489 }
 0x617   : > { %4184 = vrcp.f32 %v1490_v30 }
 0x619   : > { %v1326_v34 = vpop.xlane.xlu1 %1325 }
 0x61a   : > { %4186 = vrcp.f32 %v1326_v34  ;;  %2461 = vrot.lane.b32.xlu1 %v6787_v53, %s4428_s19  ;;  %v1657_v50 = vpop.xlane.xlu0 %1656  ;;  %s2077_s19 = sadd.s32 27, %s4584_s29 }
 0x61b   : > { %4188 = vrcp.f32 %v1657_v50  ;;  %v4183_v39 = vpop.eup %4182  ;;  %s5674_s25 = sld [smem:[#allocation3 + %s2077_s19]] }
 0x61c   : > { %v5643_v53 = vmul.f32 %v4183_v39, %v5459_v48  ;;  %s5736_s19 = sld [smem:[#allocation3 + %s1924_s18]] }
 0x61d   : > { %v1493_v7 = vpop.xlane.xlu1 %1492 }
 0x61e   : > { %4190 = vrcp.f32 %v1493_v7  ;;  %6801 = vst [vmem:[#allocation33_spill] sm:$0xff] %v5643_v53  ;;  %v2033_v42 = vmul.f32 %v5640_v13, %v5643_v53  ;;  %v2377_v29 = vmul.f32 %v5645_v6, %v5643_v53 }
 0x61f   : > { %v1824_v43 = vpop.xlane.xlu0 %1823 }
 0x620   : > { %4192 = vrcp.f32 %v1824_v43 }
 0x621   : > { %v4185_v41 = vpop.eup %4184  ;;  %v1660_v0 = vpop.xlane.xlu1 %1659 }
 0x622   : > { %v5657_v38 = vmul.f32 %v4185_v41, %v5465_v44  ;;  %4194 = vrcp.f32 %v1660_v0  ;;  %v5726_v0 = vstv %s5670_s11  ;;  %s2440_s11 = sadd.s32 39, %s4584_s29 }
 0x623   : > { %v1317_v48 = vpop.xlane.xlu0 %1316 }
 0x624   : > { %v4187_v62 = vpop.eup %4186  ;;  %v2044_v54 = vmul.f32 %v5649_v16, %v5657_v38  ;;  %v2388_v44 = vmul.f32 %v5651_v2, %v5657_v38  ;;  %4196 = vrcp.f32 %v1317_v48 }
 0x625   : > { %v4189_v27 = vpop.eup %4188  ;;  %v1827_v12 = vpop.xlane.xlu1 %1826  ;;  %v5680_v56 = vmul.f32 %v4187_v62, %v5467_v17  ;;  %v5698_v17 = vstv %s5647_s13  ;;  %s2268_s13 = sadd.s32 38, %s4584_s29  ;;  %s5905_s29 = sld [smem:[#allocation3 + %s2440_s11]] }
 0x626   : > { %v2052_v57 = vadd.f32 %v2044_v54, %v2033_v42  ;;  %v2396_v9 = vadd.f32 %v2388_v44, %v2377_v29  ;;  %v5695_v14 = vmul.f32 %v4189_v27, %v5473_v37  ;;  %4198 = vrcp.f32 %v1827_v12  ;;  %6803 = vst [vmem:[#allocation34_spill] sm:$0xff] %v5698_v17  ;;  %s5738_s23 = sld [smem:[#allocation3 + %s2268_s13]] }
 0x627   : > { %v1484_v20 = vpop.xlane.xlu0 %1483  ;;  %v2034_v30 = vmul.f32 %v5640_v13, %v5680_v56  ;;  %v2378_v34 = vmul.f32 %v5645_v6, %v5680_v56  ;;  %v1872_v41 = vmul.f32 %v5698_v17, %v5657_v38  ;;  %v5734_v54 = vstv %s5674_s25 }
 0x628   : > { %v4191_v3 = vpop.eup %4190  ;;  %6802 = vst [vmem:[#allocation58_spill] sm:$0xff] %v5695_v14  ;;  %4200 = vrcp.f32 %v1484_v20  ;;  %v2063_v51 = vmul.f32 %v5683_v58, %v5695_v14  ;;  %v2407_v37 = vmul.f32 %v5686_v36, %v5695_v14  ;;  %v1861_v44 = vmul.f32 %v5707_v61, %v5643_v53 }
 0x629   : > { %v5701_v28 = vmul.f32 %v4191_v3, %v5477_v26  ;;  %v1320_v7 = vpop.xlane.xlu1 %1319  ;;  %v5753_v20 = vstv %s5688_s0  ;;  %s4431_s0 = smov 24  }
 0x62a   : > { %v4193_v26 = vpop.eup %4192  ;;  %v2071_v48 = vadd.f32 %v2063_v51, %v2052_v57  ;;  %v5728_v62 = vadd.f32 %v2407_v37, %v2396_v9  ;;  %4202 = vrcp.f32 %v1320_v7  ;;  %v1891_v57 = vmul.f32 %v5726_v0, %v5695_v14 }
 0x62b   : > { %v1651_v31 = vpop.xlane.xlu0 %1650  ;;  %v2045_v50 = vmul.f32 %v5649_v16, %v5701_v28  ;;  %v2389_v39 = vmul.f32 %v5651_v2, %v5701_v28  ;;  %v5743_v27 = vmul.f32 %v4193_v26, %v5482_v8  ;;  %v1873_v9 = vmul.f32 %v5698_v17, %v5701_v28 }
 0x62c   : > { %v4195_v43 = vpop.eup %4194  ;;  %4204 = vrcp.f32 %v1651_v31  ;;  %v5758_v51 = vstv %s5677_s9  ;;  %v5761_v8 = vstv %s5690_s1  ;;  %v5764_v37 = vstv %s5692_s2  ;;  %s4430_s9 = smov 8  }
 0x62d   : > { %v2053_v42 = vadd.f32 %v2045_v50, %v2034_v30  ;;  %v2397_v29 = vadd.f32 %v2389_v39, %v2378_v34  ;;  %6805 = vst [vmem:[#allocation36_spill] sm:$0xff] %v5743_v27  ;;  %v5746_v12 = vmul.f32 %v4195_v43, %v5486_v45  ;;  %v1880_v45 = vadd.f32 %v1872_v41, %v1861_v44 }
 0x62e   : > { %v4197_v26 = vpop.eup %4196  ;;  %v1862_v30 = vmul.f32 %v5707_v61, %v5680_v56  ;;  %v2082_v34 = vmul.f32 %v5734_v54, %v5743_v27  ;;  %v5775_v7 = vstv %s5703_s3  ;;  %v1910_v43 = vmul.f32 %v5753_v20, %v5743_v27  ;;  %s2922_s3 = scalar_lea.vmem %s6607_s5, %s4687_s22  ;;  %s3601_s22 = sshll.u32 %s4399_s16, 6 }
 0x62f   : > { %6806 = vst [vmem:[#allocation37_spill] sm:$0xff] %v5746_v12  ;;  %v1818_v3 = vpop.xlane.xlu0 %1817  ;;  %v2064_v31 = vmul.f32 %v5683_v58, %v5746_v12  ;;  %v2408_v50 = vmul.f32 %v5686_v36, %v5746_v12  ;;  %v1892_v41 = vmul.f32 %v5726_v0, %v5746_v12  ;;  %v1899_v19 = vadd.f32 %v1891_v57, %v1880_v45  ;;  %s3097_s13 = scalar_lea.vmem %s6608_s6, %s3601_s22 }
 0x630   : > { %v4199_v39 = vpop.eup %4198  ;;  %4206 = vrcp.f32 %v1818_v3  ;;  %v1881_v32 = vadd.f32 %v1873_v9, %v1862_v30  ;;  %v1340_v46 = vmul.f32 %v4197_v26, %v5491_v4  ;;  %v5794_v3 = vstv %s5736_s19 }
 0x631   : > { %v2072_v60 = vadd.f32 %v2064_v31, %v2053_v42  ;;  %v5781_v5 = vadd.f32 %v2408_v50, %v2397_v29  ;;  %v5785_v47 = vmul.f32 %v4199_v39, %v5496_v23  ;;  %v5797_v1 = vstv %s5738_s23 }
 0x632   : > { %v4201_v24 = vpop.eup %4200  ;;  %v2090_v57 = vadd.f32 %v2082_v34, %v2071_v48  ;;  %v1900_v42 = vadd.f32 %v1892_v41, %v1881_v32  ;;  %v1918_v45 = vadd.f32 %v1910_v43, %v1899_v19  ;;  %v5808_v26 = vstv %s5755_s24 }
 0x633   : > { %v1487_v44 = vpop.xlane.xlu1 %1486  ;;  %v5788_v35 = vmul.f32 %v4201_v24, %v5501_v15  ;;  %v1911_v29 = vmul.f32 %v5753_v20, %v5785_v47  ;;  %v2083_v4 = vmul.f32 %v5734_v54, %v5785_v47  ;;  %v2031_v30 = vmul.f32 %v5640_v13, %v1340_v46 }
 0x634   : > { %4208 = vrcp.f32 %v1487_v44  ;;  %v4203_v48 = vpop.eup %4202  ;;  %v1859_v50 = vmul.f32 %v5707_v61, %v1340_v46  ;;  %v2203_v39 = vmul.f32 %v5758_v51, %v1340_v46  ;;  %v5818_v41 = vmul.f32 %v5791_v21, %v5743_v27 }
 0x635   : > { %v1870_v15 = vmul.f32 %v5698_v17, %v5788_v35  ;;  %v2214_v24 = vmul.f32 %v5761_v8, %v5788_v35  ;;  %v1919_v32 = vadd.f32 %v1911_v29, %v1900_v42  ;;  %v2042_v34 = vmul.f32 %v5649_v16, %v5788_v35 }
 0x636   : > { %v4205_v31 = vpop.eup %4204  ;;  %v1342_v19 = vmul.f32 %v4203_v48, %v5506_v18  ;;  %v2091_v43 = vadd.f32 %v2083_v4, %v2072_v60  ;;  %v2375_v10 = vmul.f32 %v5645_v6, %v1340_v46 }
 0x637   : > { %v1654_v23 = vpop.xlane.xlu1 %1653  ;;  %v1335_v9 = vpop.xlane.xlu0 %1334  ;;  %v5821_v44 = vmul.f32 %v4205_v31, %v5511_v40  ;;  %v1878_v18 = vadd.f32 %v1870_v15, %v1859_v50  ;;  %v2222_v48 = vadd.f32 %v2214_v24, %v2203_v39  ;;  %v5832_v4 = vadd.f32 %v5794_v3, %v1919_v32 }
 0x638   : > { %4210 = vrcp.f32 %v1654_v23  ;;  %v5824_v23 = vadd.f32 %v5794_v3, %v1918_v45  ;;  %v2204_v15 = vmul.f32 %v5758_v51, %v1342_v19  ;;  %v5842_v39 = vadd.f32 %v5808_v26, %v2090_v57 }
 0x639   : > { %4212 = vrcp.f32 %v1335_v9  ;;  %v2050_v9 = vadd.f32 %v2042_v34, %v2031_v30  ;;  %v1889_v60 = vmul.f32 %v5726_v0, %v5821_v44  ;;  %v2233_v40 = vmul.f32 %v5764_v37, %v5821_v44 }
 0x63a   : > { %v4207_v63 = vpop.eup %4206  ;;  %v1860_v30 = vmul.f32 %v5707_v61, %v1342_v19  ;;  %v2061_v46 = vmul.f32 %v5683_v58, %v5821_v44  ;;  %6807 = vst [vmem:[#allocation38_spill] sm:$0xff] %v5842_v39  ;;  %v5845_v32 = vadd.f32 %v5808_v26, %v2091_v43  ;;  %v2386_v57 = vmul.f32 %v5651_v2, %v5788_v35 }
 0x63b   : > { %v1821_v42 = vpop.xlane.xlu1 %1820  ;;  %v1502_v29 = vpop.xlane.xlu0 %1501  ;;  %v5835_v45 = vmul.f32 %v4207_v63, %v5518_v11  ;;  %v1897_v31 = vadd.f32 %v1889_v60, %v1878_v18  ;;  %v2241_v50 = vadd.f32 %v2233_v40, %v2222_v48 }
 0x63c   : > { %4214 = vrcp.f32 %v1821_v42  ;;  %6808 = vst [vmem:[#allocation39_spill] sm:$0xff] %v5845_v32  ;;  %v2069_v27 = vadd.f32 %v2061_v46, %v2050_v9  ;;  %v2376_v46 = vmul.f32 %v5645_v6, %v1342_v19 }
 0x63d   : > { %4216 = vrcp.f32 %v1502_v29  ;;  %v1908_v63 = vmul.f32 %v5753_v20, %v5835_v45  ;;  %v2252_v42 = vmul.f32 %v5775_v7, %v5835_v45  ;;  %v2032_v29 = vmul.f32 %v5640_v13, %v1342_v19 }
 0x63e   : > { %v4209_v24 = vpop.eup %4208  ;;  %v2080_v18 = vmul.f32 %v5734_v54, %v5835_v45 }
 0x63f   : > { %v1669_v34 = vpop.xlane.xlu0 %1668  ;;  %v1509_v11 = vmul.f32 %v4209_v24, %v5523_v59  ;;  %v1916_v59 = vadd.f32 %v1908_v63, %v1897_v31  ;;  %v2260_v40 = vadd.f32 %v2252_v42, %v2241_v50 }
 0x640   : > { %4218 = vrcp.f32 %v1669_v34  ;;  %v2088_v9 = vadd.f32 %v2080_v18, %v2069_v27 }
 0x641   : > { %v1871_v48 = vmul.f32 %v5698_v17, %v1509_v11  ;;  %v2215_v60 = vmul.f32 %v5761_v8, %v1509_v11  ;;  %v2043_v53 = vmul.f32 %v5649_v16, %v1509_v11  ;;  %v2387_v31 = vmul.f32 %v5651_v2, %v1509_v11 }
 0x642   : > { %v4211_v43 = vpop.eup %4210  ;;  %v2271_v19 = vadd.f32 %v5797_v1, %v2260_v40 }
 0x643   : > { %v4213_v24 = vpop.eup %4212  ;;  %v1676_v34 = vmul.f32 %v4211_v43, %v5527_v25  ;;  %v1836_v14 = vpop.xlane.xlu0 %1835  ;;  %v1879_v63 = vadd.f32 %v1871_v48, %v1860_v30  ;;  %v1927_v25 = vadd.f32 %v5794_v3, %v1916_v59  ;;  %v2223_v27 = vadd.f32 %v2215_v60, %v2204_v15 }
 0x644   : > { %v5863_v12 = vmul.f32 %v4213_v24, %v5530_v49  ;;  %4220 = vrcp.f32 %v1836_v14  ;;  %v2051_v18 = vadd.f32 %v2043_v53, %v2032_v29 }
 0x645   : > { %v1890_v50 = vmul.f32 %v5726_v0, %v1676_v34  ;;  %v2234_v42 = vmul.f32 %v5764_v37, %v1676_v34  ;;  %v2062_v49 = vmul.f32 %v5683_v58, %v1676_v34 }
 0x646   : > { %v4215_v43 = vpop.eup %4214  ;;  %v1865_v30 = vmul.f32 %v5707_v61, %v5863_v12  ;;  %v2209_v48 = vmul.f32 %v5758_v51, %v5863_v12  ;;  %v2037_v29 = vmul.f32 %v5640_v13, %v5863_v12  ;;  %v5899_v13 = vadd.f32 %v5808_v26, %v2088_v9 }
 0x647   : > { %v4217_v14 = vpop.eup %4216  ;;  %v1843_v24 = vmul.f32 %v4215_v43, %v5536_v22  ;;  %v5874_v35 = vpop.xlane.xlu0 %1328  ;;  %v1898_v11 = vadd.f32 %v1890_v50, %v1879_v63  ;;  %v2242_v59 = vadd.f32 %v2234_v42, %v2223_v27  ;;  %v2070_v53 = vadd.f32 %v2062_v49, %v2051_v18 }
 0x648   : > { %6809 = vst [vmem:[#allocation40_spill] sm:$0xff] %v5874_v35  ;;  %v5881_v15 = vmul.f32 %v4217_v14, %v5539_v33  ;;  %v2394_v63 = vadd.f32 %v2386_v57, %v2375_v10  ;;  %v2395_v27 = vadd.f32 %v2387_v31, %v2376_v46  ;;  %v2405_v9 = vmul.f32 %v5686_v36, %v5821_v44 }
 0x649   : > { %v1909_v22 = vmul.f32 %v5753_v20, %v1843_v24  ;;  %v2253_v60 = vmul.f32 %v5775_v7, %v1843_v24  ;;  %v2081_v40 = vmul.f32 %v5734_v54, %v1843_v24 }
 0x64a   : > { %v4219_v50 = vpop.eup %4218  ;;  %v1876_v43 = vmul.f32 %v5698_v17, %v5881_v15  ;;  %v2220_v33 = vmul.f32 %v5761_v8, %v5881_v15  ;;  %v2048_v42 = vmul.f32 %v5649_v16, %v5881_v15 }
 0x64b   : > { %v1686_v18 = vmul.f32 %v4219_v50, %v5546_v52  ;;  %v5896_v49 = vpop.xlane.xlu0 %1495  ;;  %v1917_v14 = vadd.f32 %v1909_v22, %v1898_v11  ;;  %v2261_v39 = vadd.f32 %v2253_v60, %v2242_v59  ;;  %v2089_v32 = vadd.f32 %v2081_v40, %v2070_v53 }
 0x64c   : > { %v1884_v10 = vadd.f32 %v1876_v43, %v1865_v30  ;;  %v2228_v57 = vadd.f32 %v2220_v33, %v2209_v48  ;;  %v2056_v61 = vadd.f32 %v2048_v42, %v2037_v29  ;;  %v2406_v48 = vmul.f32 %v5686_v36, %v1676_v34 }
 0x64d   : > { %v1928_v17 = vadd.f32 %v5794_v3, %v1917_v14  ;;  %v2272_v35 = vadd.f32 %v5797_v1, %v2261_v39  ;;  %v1895_v46 = vmul.f32 %v5726_v0, %v1686_v18  ;;  %v2239_v31 = vmul.f32 %v5764_v37, %v1686_v18 }
 0x64e   : > { %v4221_v52 = vpop.eup %4220  ;;  %v5908_v11 = vadd.f32 %v5808_v26, %v2089_v32  ;;  %v2067_v30 = vmul.f32 %v5683_v58, %v1686_v18  ;;  %v1936_v60 = vpack.c.bf16 %v5832_v4, %v5824_v23  ;;  %v2413_v34 = vadd.f32 %v2405_v9, %v2394_v63 }
 0x64f   : > { %v1853_v59 = vmul.f32 %v4221_v52, %v5551_v55  ;;  %v5915_v39 = vpop.xlane.xlu0 %1662  ;;  %v1935_v53 = vpack.c.bf16 %v1928_v17, %v1927_v25  ;;  %v2279_v29 = vpack.c.bf16 %v2272_v35, %v2271_v19  ;;  %v1903_v22 = vadd.f32 %v1895_v46, %v1884_v10 }
 0x650   : > { %v2247_v40 = vadd.f32 %v2239_v31, %v2228_v57  ;;  %v2075_v50 = vadd.f32 %v2067_v30, %v2056_v61  ;;  %v2414_v23 = vadd.f32 %v2406_v48, %v2395_v27  ;;  %v2424_v4 = vmul.f32 %v5791_v21, %v5835_v45 }
 0x651   : > { %3802 = vmatprep.mubr.msk.bf16.mxu0 %vm1266_vm4, %v1935_v53  ;;  %3834 = vmatprep.mubr.msk.bf16.mxu1 %vm1266_vm4, %v2279_v29  ;;  %v1914_v44 = vmul.f32 %v5753_v20, %v1853_v59  ;;  %v2258_v55 = vmul.f32 %v5775_v7, %v1853_v59  ;;  %v2086_v17 = vmul.f32 %v5734_v54, %v1853_v59  ;;  %v5941_v27 = vstv %s5905_s29 }
 0x652   : > { %3803 = vmatmul.mubr.msk.bf16.vlgmr.msra.gmra.mrb[24].mxu0 %vm1266_vm4, %v1936_v60  ;;  %v2425_v61 = vmul.f32 %v5791_v21, %v1843_v24  ;;  %v2427_v25 = vmul.f32 %v5791_v21, %v5785_v47  ;;  %v2432_v42 = vadd.f32 %v2424_v4, %v2413_v34  ;;  %v2434_v63 = vadd.f32 %v5818_v41, %v5728_v62  ;;  %v6816_v4 = vld [vmem:[#allocation36_spill] sm:$0xff] }
 0x653   : > { %v1830_v19 = vpop.xlane.xlu0 %1829  ;;  %v5932_v35 = vadd.f32 %v1914_v44, %v1903_v22  ;;  %v5934_v43 = vadd.f32 %v2258_v55, %v2247_v40  ;;  %v5936_v33 = vadd.f32 %v2086_v17, %v2075_v50  ;;  %v2381_v31 = vmul.f32 %v5645_v6, %v5863_v12  ;;  %v6813_v40 = vld [vmem:[#allocation37_spill] sm:$0xff]  ;;  %v6815_v55 = vld [vmem:[#allocation58_spill] sm:$0xff]  ;;  %v6831_v12 = vld [vmem:[#allocation52_spill] sm:$0xff] }
 0x654   : > { %v2433_v14 = vadd.f32 %v2425_v61, %v2414_v23  ;;  %v5944_v45 = vadd.f32 %v5941_v27, %v2432_v42  ;;  %v2435_v57 = vadd.f32 %v2427_v25, %v5781_v5  ;;  %v2392_v62 = vmul.f32 %v5651_v2, %v5881_v15  ;;  %v6814_v50 = vld [vmem:[#allocation33_spill] sm:$0xff] }
 0x655   : > { %v2411_v41 = vmul.f32 %v5686_v36, %v1686_v18  ;;  %v5961_v30 = vadd.f32 %v5941_v27, %v2434_v63  ;;  %v2430_v9 = vmul.f32 %v5791_v21, %v1853_v59  ;;  %v2217_v15 = vmul.f32 %v5761_v8, %v5701_v28 }
 0x656   : > { %v5947_v24 = vadd.f32 %v5941_v27, %v2433_v14  ;;  %v5958_v52 = vadd.f32 %v5941_v27, %v2435_v57  ;;  %v2400_v5 = vadd.f32 %v2392_v62, %v2381_v31  ;;  %v2216_v22 = vmul.f32 %v5761_v8, %v5657_v38 }
 0x657   : > { %v2112_v10 = vpop.permute.xlu0 %2111  ;;  %6811 = vst [vmem:[#allocation41_spill] sm:$0xff] %v5961_v30  ;;  %v2206_v60 = vmul.f32 %v5758_v51, %v5680_v56  ;;  %v2236_v59 = vmul.f32 %v5764_v37, %v6813_v40  ;;  %v2205_v44 = vmul.f32 %v5758_v51, %v6814_v50  ;;  %v2235_v28 = vmul.f32 %v5764_v37, %v6815_v55 }
 0x658   : > { %3810 = vmatprep.subr.bf16.mxu0 %v2112_v10  ;;  %6810 = vst [vmem:[#allocation59_spill] sm:$0xff] %v5958_v52  ;;  %v2419_v53 = vadd.f32 %v2411_v41, %v2400_v5  ;;  %v2255_v34 = vmul.f32 %v5775_v7, %v5785_v47  ;;  %v2254_v56 = vmul.f32 %v5775_v7, %v6816_v4  ;;  %4222 = vrcp.f32 %v5896_v49  ;;  %v6821_v4 = vld [vmem:[#allocation34_spill] sm:$0xff] }
 0x659   : > { %3811 = vmatpush3.bf16.msra.mxu0 %v2112_v10  ;;  %v2225_v17 = vadd.f32 %v2217_v15, %v2206_v60  ;;  %v2224_v38 = vadd.f32 %v2216_v22, %v2205_v44 }
 0x65a   : > { %v5970_v18 = vadd.f32 %v2430_v9, %v2419_v53  ;;  %v6817_v9 = vld [vmem:[#allocation40_spill] sm:$0xff] }
 0x65b   : > { %v5964_v48 = vpop.permute.xlu0 %2115  ;;  %v2244_v61 = vadd.f32 %v2236_v59, %v2225_v17  ;;  %v2243_v25 = vadd.f32 %v2235_v28, %v2224_v38  ;;  %4224 = vrcp.f32 %v6817_v9  ;;  %v6818_v59 = vld [vmem:[#allocation48_spill] sm:$0xff]  ;;  %v6820_v28 = vld [vmem:[#allocation31_spill] sm:$0xff] }
 0x65c   : > { %6812 = vst [vmem:[#allocation60_spill] sm:$0xff] %v5970_v18  ;;  %4226 = vrcp.f32 %v5915_v39  ;;  %v6819_v39 = vld [vmem:[#allocation30_spill] sm:$0xff] }
 0x65d   : > { %v2263_v42 = vadd.f32 %v2255_v34, %v2244_v61  ;;  %v2262_v10 = vadd.f32 %v2254_v56, %v2243_v25  ;;  %4228 = vrcp.f32 %v1830_v19  ;;  %v6822_v25 = vld [vmem:[#allocation50_spill] sm:$0xff] }
 0x65f   : > { %v2284_v29 = vpop.permute.xlu0 %2283  ;;  %v2274_v57 = vadd.f32 %v5797_v1, %v2263_v42  ;;  %v2273_v47 = vadd.f32 %v5797_v1, %v2262_v10  ;;  %v6823_v10 = vld [vmem:[#allocation53_spill] sm:$0xff] }
 0x660   : > { %3826 = vmatprep.subr.bf16.mxu1 %v2284_v29 }
 0x661   : > { %3827 = vmatpush3.bf16.msra.mxu1 %v2284_v29  ;;  %v2280_v41 = vpack.c.bf16 %v2274_v57, %v2273_v47 }
 0x662   : > { %v4223_v22 = vpop.eup %4222 }
 0x663   : > { %v2286_v23 = vpop.permute.xlu0 %2285  ;;  %v5993_v50 = vmul.f32 %v4223_v22, %v6818_v59  ;;  %v6827_v22 = vld [vmem:[#allocation32_spill] sm:$0xff] }
 0x664   : > { %3828 = vmatprep.subr.bf16.mxu1 %v2286_v23 }
 0x665   : > { %3829 = vmatpush3.bf16.msra.mxu1 %v2286_v23  ;;  %v4225_v60 = vpop.eup %4224  ;;  %v1874_v56 = vmul.f32 %v6821_v4, %v5993_v50 }
 0x666   : > { %v1338_v14 = vpop.xlane.xlu1 %1337  ;;  %v4227_v40 = vpop.eup %4226  ;;  %v5996_v19 = vmul.f32 %v4225_v60, %v6819_v39 }
 0x667   : > { %v2288_v63 = vpop.permute.xlu0 %2287  ;;  %v4229_v44 = vpop.eup %4228  ;;  %v5999_v17 = vmul.f32 %v4227_v40, %v6820_v28 }
 0x668   : > { %3830 = vmatprep.subr.bf16.mxu1 %v2288_v63  ;;  %v6009_v57 = vmul.f32 %v4229_v44, %v6823_v10 }
 0x669   : > { %3831 = vmatpush3.bf16.msra.mxu1 %v2288_v63  ;;  %v1893_v47 = vmul.f32 %v5726_v0, %v5999_v17 }
 0x66a   : > { %v1505_v31 = vpop.xlane.xlu1 %1504 }
 0x66b   : > { %v2290_v62 = vpop.permute.xlu0 %2289  ;;  %4230 = vrcp.f32 %v1505_v31  ;;  %v6824_v31 = vld [vmem:[#allocation35_spill] sm:$0xff] }
 0x66c   : > { %3832 = vmatprep.subr.bf16.mxu1 %v2290_v62  ;;  %4232 = vrcp.f32 %v1338_v14  ;;  %v2218_v14 = vmul.f32 %v5761_v8, %v5993_v50 }
 0x66d   : > { %3833 = vmatpush3.bf16.msra.mxu1 %v2290_v62  ;;  %v1863_v62 = vmul.f32 %v6824_v31, %v5996_v19 }
 0x66e   : > { %v1672_v5 = vpop.xlane.xlu1 %1671 }
 0x66f   : > { %4234 = vrcp.f32 %v1672_v5  ;;  %v6825_v5 = vld [vmem:[#allocation49_spill] sm:$0xff]  ;;  %v1882_v59 = vadd.f32 %v1874_v56, %v1863_v62  ;;  %v2237_v56 = vmul.f32 %v5764_v37, %v5999_v17 }
 0x670   : > { %3835 = vmatmul.mubr.msk.bf16.vlgmr.msra.gmra.mrb[16].mxu1 %vm1266_vm4, %v2280_v41 }
 0x672   : > { %v1839_v53 = vpop.xlane.xlu1 %1838 }
 0x673   : > { %4236 = vrcp.f32 %v1839_v53  ;;  %v6826_v53 = vld [vmem:[#allocation56_spill] sm:$0xff] }
 0x675   : > { %v4231_v55 = vpop.eup %4230 }
 0x676   : > { %v1332_v15 = vpop.xlane.xlu1 %1331  ;;  %v4233_v34 = vpop.eup %4232  ;;  %v6004_v42 = vmul.f32 %v4231_v55, %v6822_v25  ;;  %v1912_v25 = vmul.f32 %v5753_v20, %v6009_v57 }
 0x677   : > { %4238 = vrcp.f32 %v1332_v15  ;;  %v6016_v9 = vmul.f32 %v4233_v34, %v6825_v5  ;;  %v6829_v34 = vld [vmem:[#allocation55_spill] sm:$0xff] }
 0x678   : > { %v1877_v39 = vmul.f32 %v6821_v4, %v6004_v42  ;;  %v2221_v28 = vmul.f32 %v5761_v8, %v6004_v42 }
 0x679   : > { %v4235_v23 = vpop.eup %4234 }
 0x67a   : > { %v1499_v29 = vpop.xlane.xlu1 %1498  ;;  %v6019_v15 = vmul.f32 %v4235_v23, %v6826_v53 }
 0x67b   : > { %4240 = vrcp.f32 %v1499_v29  ;;  %v2207_v29 = vmul.f32 %v5758_v51, %v5996_v19 }
 0x67c   : > { %v1896_v10 = vmul.f32 %v5726_v0, %v6019_v15  ;;  %v2240_v62 = vmul.f32 %v5764_v37, %v6019_v15 }
 0x67d   : > { %v4237_v61 = vpop.eup %4236  ;;  %v2226_v55 = vadd.f32 %v2218_v14, %v2207_v29  ;;  %v1866_v14 = vmul.f32 %v6824_v31, %v6016_v9 }
 0x67e   : > { %v1666_v49 = vpop.xlane.xlu1 %1665 }
 0x67f   : > { %4242 = vrcp.f32 %v1666_v49  ;;  %v6828_v49 = vld [vmem:[#allocation51_spill] sm:$0xff] }
 0x680   : > { %v6027_v44 = vmul.f32 %v4237_v61, %v6828_v49 }
 0x681   : > { %v4239_v63 = vpop.eup %4238 }
 0x682   : > { %v1833_v38 = vpop.xlane.xlu1 %1832  ;;  %v6034_v23 = vmul.f32 %v4239_v63, %v6829_v34  ;;  %v2210_v63 = vmul.f32 %v5758_v51, %v6016_v9  ;;  %v2259_v34 = vmul.f32 %v5775_v7, %v6027_v44 }
 0x683   : > { %4244 = vrcp.f32 %v1833_v38  ;;  %v1901_v38 = vadd.f32 %v1893_v47, %v1882_v59  ;;  %v6830_v47 = vld [vmem:[#allocation57_spill] sm:$0xff]  ;;  %v1915_v59 = vmul.f32 %v5753_v20, %v6027_v44 }
 0x684   : > { %v2229_v49 = vadd.f32 %v2221_v28, %v2210_v63  ;;  %v2245_v28 = vadd.f32 %v2237_v56, %v2226_v55 }
 0x685   : > { %v4241_v41 = vpop.eup %4240  ;;  %v1920_v32 = vadd.f32 %v1912_v25, %v1901_v38  ;;  %v6832_v38 = vld [vmem:[#allocation54_spill] sm:$0xff] }
 0x686   : > { %v6024_v60 = vmul.f32 %v4241_v41, %v6827_v22  ;;  %v2114_v40 = vpop.permute.xlu1 %2113  ;;  %v2256_v22 = vmul.f32 %v5775_v7, %v6009_v57  ;;  %v2035_v25 = vmul.f32 %v6832_v38, %v5996_v19 }
 0x687   : > { %3812 = vmatprep.subr.bf16.mxu0 %v2114_v40 }
 0x688   : > { %3813 = vmatpush3.bf16.msra.mxu0 %v2114_v40  ;;  %v1875_v53 = vmul.f32 %v6821_v4, %v6024_v60  ;;  %v2219_v29 = vmul.f32 %v5761_v8, %v6024_v60  ;;  %v1885_v40 = vadd.f32 %v1877_v39, %v1866_v14  ;;  %v2208_v8 = vmul.f32 %v5758_v51, %v6034_v23 }
 0x689   : > { %v4243_v61 = vpop.eup %4242  ;;  %3814 = vmatprep.subr.bf16.mxu0 %v5964_v48  ;;  %v2264_v18 = vadd.f32 %v2256_v22, %v2245_v28  ;;  %v2047_v51 = vmul.f32 %v5649_v16, %v6024_v60  ;;  %v2084_v28 = vmul.f32 %v5734_v54, %v6009_v57 }
 0x68a   : > { %v6050_v41 = vmul.f32 %v4243_v61, %v6830_v47  ;;  %v2118_v5 = vpop.permute.xlu1 %2117  ;;  %v1864_v61 = vmul.f32 %v6824_v31, %v6034_v23  ;;  %v1904_v63 = vadd.f32 %v1896_v10, %v1885_v40  ;;  %v2248_v47 = vadd.f32 %v2240_v62, %v2229_v49 }
 0x68b   : > { %v2227_v31 = vadd.f32 %v2219_v29, %v2208_v8  ;;  %v2046_v10 = vmul.f32 %v5649_v16, %v5993_v50  ;;  %v2065_v62 = vmul.f32 %v5683_v58, %v5999_v17  ;;  %v2036_v29 = vmul.f32 %v6832_v38, %v6034_v23 }
 0x68c   : > { %3815 = vmatpush3.bf16.msra.mxu0 %v5964_v48  ;;  %v1894_v4 = vmul.f32 %v5726_v0, %v6050_v41  ;;  %v2238_v39 = vmul.f32 %v5764_v37, %v6050_v41  ;;  %v1883_v48 = vadd.f32 %v1875_v53, %v1864_v61  ;;  %v1923_v30 = vadd.f32 %v1915_v59, %v1904_v63 }
 0x68d   : > { %v4245_v14 = vpop.eup %4244  ;;  %3816 = vmatprep.subr.bf16.mxu0 %v2118_v5  ;;  %v2267_v0 = vadd.f32 %v2259_v34, %v2248_v47  ;;  %v2275_v22 = vadd.f32 %v5797_v1, %v2264_v18  ;;  %v2055_v61 = vadd.f32 %v2047_v51, %v2036_v29  ;;  %v1933_v8 = vadd.f32 %v5794_v3, %v5932_v35 }
 0x68e   : > { %v6072_v46 = vmul.f32 %v4245_v14, %v6831_v12  ;;  %v2456_v52 = vpop.permute.xlu1 %2455  ;;  %v1902_v37 = vadd.f32 %v1894_v4, %v1883_v48  ;;  %v2246_v56 = vadd.f32 %v2238_v39, %v2227_v31  ;;  %v1934_v40 = vadd.f32 %v5794_v3, %v1923_v30 }
 0x68f   : > { %v2278_v59 = vadd.f32 %v5797_v1, %v2267_v0  ;;  %v2054_v39 = vadd.f32 %v2046_v10, %v2035_v25  ;;  %v2049_v48 = vmul.f32 %v5649_v16, %v6004_v42  ;;  %v6833_v31 = vpack.c.bf16 %v5908_v11, %v5899_v13  ;;  %v6834_v10 = vld [vmem:[#allocation39_spill] sm:$0xff]  ;;  %v6835_v13 = vld [vmem:[#allocation38_spill] sm:$0xff] }
 0x690   : > { %3817 = vmatpush3.bf16.msra.mxu0 %v2118_v5  ;;  %v1913_v55 = vmul.f32 %v5753_v20, %v6072_v46  ;;  %v2257_v12 = vmul.f32 %v5775_v7, %v6072_v46  ;;  %v2066_v20 = vmul.f32 %v5683_v58, %v6050_v41  ;;  %v1931_v7 = vadd.f32 %v5794_v3, %v1920_v32 }
 0x691   : > { %3842 = vmatprep.subr.bf16.mxu0 %v2456_v52  ;;  %v2085_v4 = vmul.f32 %v5734_v54, %v6072_v46  ;;  %v2277_v32 = vadd.f32 %v5797_v1, %v5934_v43  ;;  %v1938_v63 = vpack.c.bf16 %v1934_v40, %v1933_v8  ;;  %v2068_v43 = vmul.f32 %v5683_v58, %v6019_v15 }
 0x692   : > { %v1921_v53 = vadd.f32 %v1913_v55, %v1902_v37  ;;  %v2265_v5 = vadd.f32 %v2257_v12, %v2246_v56  ;;  %v2074_v30 = vadd.f32 %v2066_v20, %v2055_v61  ;;  %v2087_v51 = vmul.f32 %v5734_v54, %v6027_v44  ;;  %v2458_v56 = vpop.permute.xlu1 %2457 }
 0x693   : > { %v2282_v47 = vpack.c.bf16 %v2278_v59, %v2277_v32  ;;  %v2391_v58 = vmul.f32 %v5651_v2, %v6024_v60  ;;  %v6836_v11 = vpack.c.bf16 %v6834_v10, %v6835_v13  ;;  %v2380_v54 = vmul.f32 %v5645_v6, %v6034_v23  ;;  %v4091_v13 = vld [vmem:[%s2671_s28 + $0x8] sm:$0xff]  }
 0x694   : > { %v1932_v49 = vadd.f32 %v5794_v3, %v1921_v53  ;;  %v2276_v34 = vadd.f32 %v5797_v1, %v2265_v5  ;;  %v2073_v3 = vadd.f32 %v2065_v62, %v2054_v39  ;;  %v2093_v35 = vadd.f32 %v2085_v4, %v2074_v30  ;;  %v6839_v4 = vld [vmem:[#allocation41_spill] sm:$0xff] }
 0x695   : > { %v2038_v1 = vmul.f32 %v6832_v38, %v6016_v9  ;;  %v2390_v62 = vmul.f32 %v5651_v2, %v5993_v50  ;;  %v2410_v53 = vmul.f32 %v5686_v36, %v6050_v41  ;;  %v2379_v29 = vmul.f32 %v5645_v6, %v5996_v19 }
 0x696   : > { %v1937_v18 = vpack.c.bf16 %v1932_v49, %v1931_v7  ;;  %v2281_v14 = vpack.c.bf16 %v2276_v34, %v2275_v22  ;;  %v2092_v16 = vadd.f32 %v2084_v28, %v2073_v3  ;;  %v2104_v37 = vadd.f32 %v5808_v26, %v2093_v35  ;;  %v2460_v5 = vpop.permute.xlu1 %2459 }
 0x697   : > { %v2057_v0 = vadd.f32 %v2049_v48, %v2038_v1  ;;  %v2399_v20 = vadd.f32 %v2391_v58, %v2380_v54  ;;  %v2429_v23 = vmul.f32 %v5791_v21, %v6072_v46  ;;  %v2105_v50 = vadd.f32 %v5808_v26, %v5936_v33 }
 0x698   : > { %3806 = vmatprep.mubr.msk.bf16.mxu0 %vm1266_vm4, %v1937_v18  ;;  %3838 = vmatprep.mubr.msk.bf16.mxu1 %vm1266_vm4, %v2281_v14  ;;  %v2103_v12 = vadd.f32 %v5808_v26, %v2092_v16  ;;  %v2398_v7 = vadd.f32 %v2390_v62, %v2379_v29  ;;  %v2428_v22 = vmul.f32 %v5791_v21, %v6009_v57 }
 0x699   : > { %3807 = vmatmul.mubr.msk.bf16.gmra.mrb[28].mxu0 %vm1266_vm4, %v1938_v63  ;;  %3839 = vmatmul.mubr.msk.bf16.gmra.mrb[20].mxu1 %vm1266_vm4, %v2282_v47  ;;  %v2076_v55 = vadd.f32 %v2068_v43, %v2057_v0  ;;  %v2418_v41 = vadd.f32 %v2410_v53, %v2399_v20  ;;  %v2393_v19 = vmul.f32 %v5651_v2, %v6004_v42 }
 0x69a   : > { %3818 = vmatprep.mubr.msk.bf16.mxu0 %vm1266_vm4, %v6833_v31  ;;  %v2109_v25 = vpack.c.bf16 %v2104_v37, %v2103_v12  ;;  %v2382_v46 = vmul.f32 %v5645_v6, %v6016_v9  ;;  %v2462_v33 = vpop.permute.xlu1 %2461  ;;  %v2431_v42 = vmul.f32 %v5791_v21, %v6027_v44 }
 0x69b   : > { %v2095_v38 = vadd.f32 %v2087_v51, %v2076_v55  ;;  %v2437_v49 = vadd.f32 %v2429_v23, %v2418_v41 }
 0x69c   : > { %v2401_v2 = vadd.f32 %v2393_v19, %v2382_v46 }
 0x69d   : > { %v2106_v60 = vadd.f32 %v5808_v26, %v2095_v38  ;;  %v2412_v26 = vmul.f32 %v5686_v36, %v6019_v15  ;;  %v2448_v34 = vadd.f32 %v5941_v27, %v2437_v49  ;;  %v6838_v15 = vld [vmem:[#allocation59_spill] sm:$0xff] }
 0x69e   : > { %v6840_v8 = vpack.c.bf16 %v6838_v15, %v6839_v4 }
 0x69f   : > { %v2110_v40 = vpack.c.bf16 %v2106_v60, %v2105_v50  ;;  %v2420_v61 = vadd.f32 %v2412_v26, %v2401_v2 }
 0x6a1   : > { %3819 = vmatmul.mubr.msk.bf16.vlgmr.msra.gmra.mrb[32].mxu0 %vm1266_vm4, %v6836_v11 }
 0x6a2   : > { %3843 = vmatpush3.bf16.msra.mxu0 %v2456_v52  ;;  %3822 = vmatprep.mubr.msk.bf16.mxu0 %vm1266_vm4, %v2109_v25  ;;  %v2409_v52 = vmul.f32 %v5686_v36, %v5999_v17  ;;  %v6837_v17 = vpack.c.bf16 %v5947_v24, %v5944_v45  ;;  %v2439_v36 = vadd.f32 %v2431_v42, %v2420_v61  ;;  %v6841_v24 = vld [vmem:[#allocation60_spill] sm:$0xff] }
 0x6a3   : > { %3844 = vmatprep.subr.bf16.mxu0 %v2458_v56  ;;  %v2449_v21 = vadd.f32 %v5941_v27, %v6841_v24 }
 0x6a4   : > { %v2417_v59 = vadd.f32 %v2409_v52, %v2398_v7  ;;  %v2450_v45 = vadd.f32 %v5941_v27, %v2439_v36 }
 0x6a6   : > { %3845 = vmatpush3.bf16.msra.mxu0 %v2458_v56  ;;  %v2436_v57 = vadd.f32 %v2428_v22, %v2417_v59  ;;  %v2454_v44 = vpack.c.bf16 %v2450_v45, %v2449_v21  ;;  %v4090_v56 = vld [vmem:[%s2671_s28] sm:$0xff]  }
 0x6a7   : > { %3846 = vmatprep.subr.bf16.mxu0 %v2460_v5  ;;  %3858 = vmatprep.subr.bf16.mxu1 %v4090_v56 }
 0x6a8   : > { %v2447_v6 = vadd.f32 %v5941_v27, %v2436_v57  ;;  %3859 = vmatpush3.bf16.msra.mxu1 %v4090_v56 }
 0x6a9   : > { %3823 = vmatmul.mubr.msk.bf16.gmra.mrb[36].mxu0 %vm1266_vm4, %v2110_v40  ;;  %3860 = vmatprep.subr.bf16.mxu1 %v4091_v13 }
 0x6aa   : > { %3847 = vmatpush3.bf16.msra.mxu0 %v2460_v5  ;;  %3850 = vmatprep.mubr.msk.bf16.mxu0 %vm1266_vm4, %v6837_v17  ;;  %v2453_v9 = vpack.c.bf16 %v2448_v34, %v2447_v6 }
 0x6ab   : > { %3848 = vmatprep.subr.bf16.mxu0 %v2462_v33 }
 0x6ac   : > { %3861 = vmatpush3.bf16.msra.mxu1 %v4091_v13 }
 0x6ae   : > { %3849 = vmatpush3.bf16.msra.mxu0 %v2462_v33 }
 0x6b1   : > { %3851 = vmatmul.mubr.msk.bf16.vlgmr.msra.gmra.mrb[40].mxu0 %vm1266_vm4, %v6840_v8 }
 0x6b2   : > { %3854 = vmatprep.mubr.msk.bf16.mxu0 %vm1266_vm4, %v2453_v9 }
 0x6b9   : > { %3855 = vmatmul.mubr.msk.bf16.gmra.mrb[44].mxu0 %vm1266_vm4, %v2454_v44 }
 0x725   : > { %v6170_v32 = vpop.f32.mrb[24].mxu0 }
 0x726   : > { %v6172_v39 = vpop.f32.mrb[25].mxu0 }
 0x727   : > { %v6174_v18 = vpop.f32.mrb[26].mxu0 }
 0x728   : > { %v6176_v14 = vpop.f32.mrb[27].mxu0 }
 0x743   : > { %v3836_v30 = vpop.f32.mrb[16].mxu1 }
 0x744   : > { %v2341_v28 = vpop.f32.mrb[17].mxu1 }
 0x745   : > { %v3837_v63 = vpop.f32.mrb[18].mxu1 }
 0x746   : > { %v4028_v47 = vpack.i.bf16 %v3837_v63, %v3836_v30  ;;  %v2344_v48 = vpop.f32.mrb[19].mxu1 }
 0x747   : > { %v4033_v3 = vpack.i.bf16 %v2344_v48, %v2341_v28 }
 0x748   : > { %4029 = vrot.lane.b32.xlu1 %v4028_v47, %s4429_s12 }
 0x749   : > { %4034 = vrot.lane.b32.xlu0 %v4033_v3, %s4429_s12 }
 0x76c   : > { %v6180_v27 = vpop.f32.mrb[28].mxu0  ;;  %v3840_v35 = vpop.f32.mrb[20].mxu1 }
 0x76d   : > { %v6182_v1 = vpop.f32.mrb[29].mxu0  ;;  %v2357_v43 = vpop.f32.mrb[21].mxu1 }
 0x76e   : > { %v6184_v31 = vpop.f32.mrb[30].mxu0  ;;  %v3841_v16 = vpop.f32.mrb[22].mxu1 }
 0x76f   : > { %v4073_v0 = vpack.i.bf16 %v3841_v16, %v3840_v35  ;;  %v6186_v51 = vpop.f32.mrb[31].mxu0  ;;  %v2360_v37 = vpop.f32.mrb[23].mxu1 }
 0x770   : > { %v4068_v55 = vpack.i.bf16 %v2360_v37, %v2357_v43 }
 0x774   : > { %v3820_v12 = vpop.f32.mrb[32].mxu0 }
 0x775   : > { %v2169_v38 = vpop.f32.mrb[33].mxu0 }
 0x776   : > { %v3821_v25 = vpop.f32.mrb[34].mxu0 }
 0x777   : > { %v4038_v58 = vpack.i.bf16 %v3821_v25, %v3820_v12  ;;  %v2172_v10 = vpop.f32.mrb[35].mxu0 }
 0x778   : > { %v4043_v11 = vpack.i.bf16 %v2172_v10, %v2169_v38 }
 0x779   : > { %4039 = vrot.lane.b32.xlu1 %v4038_v58, %s4430_s9 }
 0x77a   : > { %4044 = vrot.lane.b32.xlu0 %v4043_v11, %s4430_s9 }
 0x77c   : > { %v3824_v54 = vpop.f32.mrb[36].mxu0 }
 0x77d   : > { %v2185_v62 = vpop.f32.mrb[37].mxu0 }
 0x77e   : > { %v3825_v53 = vpop.f32.mrb[38].mxu0 }
 0x77f   : > { %v4048_v60 = vpack.i.bf16 %v3825_v53, %v3824_v54  ;;  %v2188_v5 = vpop.f32.mrb[39].mxu0 }
 0x780   : > { %v4053_v29 = vpack.i.bf16 %v2188_v5, %v2185_v62 }
 0x781   : > { %4049 = vrot.lane.b32.xlu1 %v4048_v60, %s4430_s9 }
 0x782   : > { %4054 = vrot.lane.b32.xlu0 %v4053_v29, %s4430_s9 }
 0x784   : > { %v3852_v20 = vpop.f32.mrb[40].mxu0 }
 0x785   : > { %v2513_v52 = vpop.f32.mrb[41].mxu0 }
 0x786   : > { %v3853_v23 = vpop.f32.mrb[42].mxu0 }
 0x787   : > { %v4058_v50 = vpack.i.bf16 %v3853_v23, %v3852_v20  ;;  %v2516_v7 = vpop.f32.mrb[43].mxu0 }
 0x788   : > { %v4063_v41 = vpack.i.bf16 %v2516_v7, %v2513_v52 }
 0x789   : > { %4059 = vrot.lane.b32.xlu1 %v4058_v50, %s4431_s0 }
 0x78a   : > { %4064 = vrot.lane.b32.xlu0 %v4063_v41, %s4431_s0 }
 0x78c   : > { %v3856_v22 = vpop.f32.mrb[44].mxu0 }
 0x78d   : > { %v2529_v40 = vpop.f32.mrb[45].mxu0  ;;  %4074 = vrot.lane.b32.xlu1 %v4073_v0, %s4429_s12 }
 0x78e   : > { %v3857_v19 = vpop.f32.mrb[46].mxu0  ;;  %4069 = vrot.lane.b32.xlu0 %v4068_v55, %s4429_s12 }
 0x78f   : > { %v4083_v59 = vpack.i.bf16 %v3857_v19, %v3856_v22  ;;  %v2532_v49 = vpop.f32.mrb[47].mxu0 }
 0x790   : > { %v4078_v46 = vpack.i.bf16 %v2532_v49, %v2529_v40 }
 0x791   : > { %4084 = vrot.lane.b32.xlu1 %v4083_v59, %s4431_s0 }
 0x792   : > { %4079 = vrot.lane.b32.xlu0 %v4078_v46, %s4431_s0 }
 0x7ba   : > { %v4030_v26 = vpop.permute.xlu1 %4029 }
 0x7bb   : > { %v4035_v33 = vpop.permute.xlu0 %4034  ;;  %v4031_v15 = vunpack.i.l.bf16 %v4030_v26  ;;  %v4032_v45 = vunpack.i.h.bf16 %v4030_v26 }
 0x7bc   : > { %v4036_v24 = vunpack.i.l.bf16 %v4035_v33  ;;  %v4037_v30 = vunpack.i.h.bf16 %v4035_v33  ;;  %v6842_v33 = vld [vmem:[#allocation21_spill] sm:$0xff] }
 0x7eb   : > { %v4040_v17 = vpop.permute.xlu1 %4039 }
 0x7ec   : > { %v4045_v57 = vpop.permute.xlu0 %4044  ;;  %v4041_v2 = vunpack.i.l.bf16 %v4040_v17  ;;  %v4042_v42 = vunpack.i.h.bf16 %v4040_v17 }
 0x7ed   : > { %v4046_v34 = vunpack.i.l.bf16 %v4045_v57  ;;  %v4047_v61 = vunpack.i.h.bf16 %v4045_v57 }
 0x7ee   : > { %v2642_v9 = vsel %vm783_vm3, %v6170_v32, %v4041_v2  ;;  %v2643_v4 = vsel %vm783_vm3, %v6174_v18, %v4042_v42 }
 0x7ef   : > { %v2640_v8 = vsel %vm783_vm3, %v6172_v39, %v4046_v34  ;;  %v2641_v21 = vsel %vm783_vm3, %v6176_v14, %v4047_v61  ;;  %v2651_v32 = vsel %vm2648_vm5, %v2642_v9, %v4031_v15  ;;  %v2652_v48 = vsel %vm2648_vm5, %v2643_v4, %v4032_v45  ;;  %v6843_v34 = vld [vmem:[#allocation22_spill] sm:$0xff] }
 0x7f0   : > { %v2649_v35 = vsel %vm2648_vm5, %v2640_v8, %v4036_v24  ;;  %v2650_v14 = vsel %vm2648_vm5, %v2641_v21, %v4037_v30  ;;  %v4278_v8 = vld [vmem:[#allocation2] sm:$0xff]  ;;  %v4279_v21 = vld [vmem:[#allocation2 + $0x10] sm:$0xff]  ;;  %v4280_v30 = vld [vmem:[#allocation2 + $0x8] sm:$0xff] }
 0x7f3   : > { %v4050_v6 = vpop.permute.xlu1 %4049 }
 0x7f4   : > { %v4055_v36 = vpop.permute.xlu0 %4054  ;;  %v4052_v39 = vunpack.i.h.bf16 %v4050_v6  ;;  %v4051_v0 = vunpack.i.l.bf16 %v4050_v6 }
 0x7f5   : > { %v4057_v38 = vunpack.i.h.bf16 %v4055_v36  ;;  %v4056_v25 = vunpack.i.l.bf16 %v4055_v36 }
 0x7f6   : > { %v2647_v53 = vsel %vm783_vm3, %v6184_v31, %v4052_v39  ;;  %v2646_v60 = vsel %vm783_vm3, %v6180_v27, %v4051_v0 }
 0x7f7   : > { %v2645_v29 = vsel %vm783_vm3, %v6186_v51, %v4057_v38  ;;  %v2644_v20 = vsel %vm783_vm3, %v6182_v1, %v4056_v25  ;;  %v4282_v25 = vld [vmem:[#allocation2 + $0x20] sm:$0xff] }
 0x7fb   : > { %v4060_v44 = vpop.permute.xlu1 %4059 }
 0x7fc   : > { %v4062_v28 = vunpack.i.h.bf16 %v4060_v44  ;;  %v4061_v63 = vunpack.i.l.bf16 %v4060_v44  ;;  %v4065_v47 = vpop.permute.xlu0 %4064 }
 0x7fd   : > { %v4067_v3 = vunpack.i.h.bf16 %v4065_v47  ;;  %v4066_v18 = vunpack.i.l.bf16 %v4065_v47 }
 0x7fe   : > { %v2660_v43 = vsel %vm2657_vm6, %v2651_v32, %v4061_v63  ;;  %v2661_v16 = vsel %vm2657_vm6, %v2652_v48, %v4062_v28 }
 0x7ff   : > { %v2667_v37 = vpack.c.bf16 %v2661_v16, %v2660_v43  ;;  %v2658_v55 = vsel %vm2657_vm6, %v2649_v35, %v4066_v18  ;;  %v2659_v56 = vsel %vm2657_vm6, %v2650_v14, %v4067_v3  ;;  %v4075_v12 = vpop.permute.xlu1 %4074  ;;  %v4281_v14 = vld [vmem:[#allocation2 + $0x18] sm:$0xff] }
 0x800   : > { %v2666_v58 = vpack.c.bf16 %v2659_v56, %v2658_v55  ;;  %v4070_v10 = vpop.permute.xlu0 %4069  ;;  %v4077_v13 = vunpack.i.h.bf16 %v4075_v12  ;;  %v4076_v11 = vunpack.i.l.bf16 %v4075_v12 }
 0x801   : > { %v4072_v54 = vunpack.i.h.bf16 %v4070_v10  ;;  %v4071_v62 = vunpack.i.l.bf16 %v4070_v10  ;;  %v4283_v10 = vld [vmem:[#allocation2 + $0x28] sm:$0xff] }
 0x802   : > { %3862 = vmatprep.mubr.msk.bf16.mxu1 %vm533_vm2, %v2666_v58  ;;  %v2656_v7 = vsel %vm2648_vm5, %v2647_v53, %v4077_v13  ;;  %v2655_v41 = vsel %vm2648_vm5, %v2646_v60, %v4076_v11  ;;  %v4285_v60 = vld [vmem:[#allocation2 + $0x30] sm:$0xff] }
 0x803   : > { %3863 = vmatmul.mubr.msk.bf16.vlgmr.msra.gmra.mrb[24].mxu1 %vm533_vm2, %v2667_v37  ;;  %v4085_v5 = vpop.permute.xlu1 %4084  ;;  %v2654_v27 = vsel %vm2648_vm5, %v2645_v29, %v4072_v54  ;;  %v2653_v40 = vsel %vm2648_vm5, %v2644_v20, %v4071_v62  ;;  %v4284_v54 = vld [vmem:[#allocation2 + $0x38] sm:$0xff] }
 0x804   : > { %v4087_v52 = vunpack.i.h.bf16 %v4085_v5  ;;  %v4086_v23 = vunpack.i.l.bf16 %v4085_v5  ;;  %v4080_v50 = vpop.permute.xlu0 %4079 }
 0x805   : > { %v4082_v31 = vunpack.i.h.bf16 %v4080_v50  ;;  %v4081_v22 = vunpack.i.l.bf16 %v4080_v50 }
 0x806   : > { %v2664_v19 = vsel %vm2657_vm6, %v2655_v41, %v4086_v23  ;;  %v2665_v51 = vsel %vm2657_vm6, %v2656_v7, %v4087_v52 }
 0x807   : > { %v2669_v59 = vpack.c.bf16 %v2665_v51, %v2664_v19  ;;  %v2662_v1 = vsel %vm2657_vm6, %v2653_v40, %v4081_v22  ;;  %v2663_v49 = vsel %vm2657_vm6, %v2654_v27, %v4082_v31 }
 0x808   : > { %v2668_v46 = vpack.c.bf16 %v2663_v49, %v2662_v1 }
 0x80a   : > { %3866 = vmatprep.mubr.msk.bf16.mxu1 %vm533_vm2, %v2668_v46 }
 0x80b   : > { %3867 = vmatmul.mubr.msk.bf16.gmra.mrb[28].mxu1 %vm533_vm2, %v2669_v59 }
 0x8d6   : > { %v3864_v26 = vpop.f32.mrb[24].mxu1 }
 0x8d7   : > { %v2747_v17 = vadd.f32 %v3864_v26, %v6842_v33  ;;  %v2738_v57 = vpop.f32.mrb[25].mxu1 }
 0x8d8   : > { %v2739_v2 = vadd.f32 %v2738_v57, %v6842_v33  ;;  %v3865_v42 = vpop.f32.mrb[26].mxu1 }
 0x8d9   : > { %v2775_v61 = vmul.f32 %v6843_v34, %v2747_v17  ;;  %v2750_v6 = vadd.f32 %v3865_v42, %v6842_v33  ;;  %v2741_v36 = vpop.f32.mrb[27].mxu1 }
 0x8da   : > { %v2773_v9 = vmul.f32 %v6843_v34, %v2739_v2  ;;  %v2742_v15 = vadd.f32 %v2741_v36, %v6842_v33 }
 0x8db   : > { %v2776_v4 = vmul.f32 %v6843_v34, %v2750_v6  ;;  %v6244_v44 = vadd.f32 %v4279_v21, %v2775_v61 }
 0x8dc   : > { %v6241_v45 = vadd.f32 %v4278_v8, %v2773_v9  ;;  %v2774_v24 = vmul.f32 %v6843_v34, %v2742_v15 }
 0x8dd   : > { %v6256_v0 = vadd.f32 %v4281_v14, %v2776_v4  ;;  %v2795_v56 = vsel %vm533_vm2, %v6244_v44, 0.0  ;;  %v4093_v14 = vld [vmem:[%s2922_s3 + $0x8] sm:$0xff]  }
 0x8de   : > { %v6246_v28 = vadd.f32 %v4280_v30, %v2774_v24  ;;  %v3868_v63 = vpop.f32.mrb[28].mxu1  ;;  %v2789_v32 = vsel %vm533_vm2, %v6241_v45, 0.0 }
 0x8df   : > { %v2763_v47 = vadd.f32 %v3868_v63, %v6842_v33  ;;  %v2754_v48 = vpop.f32.mrb[29].mxu1  ;;  %2790 = vadd.xlane.f32.xlu0 %v2789_v32  ;;  %v2798_v11 = vsel %vm533_vm2, %v6256_v0, 0.0 }
 0x8e0   : > { %v2755_v3 = vadd.f32 %v2754_v48, %v6842_v33  ;;  %v3869_v18 = vpop.f32.mrb[30].mxu1  ;;  %v2792_v35 = vsel %vm533_vm2, %v6246_v28, 0.0 }
 0x8e1   : > { %v2779_v39 = vmul.f32 %v6843_v34, %v2763_v47  ;;  %v2766_v43 = vadd.f32 %v3869_v18, %v6842_v33  ;;  %v2757_v16 = vpop.f32.mrb[31].mxu1  ;;  %2793 = vadd.xlane.f32.xlu1 %v2792_v35 }
 0x8e2   : > { %v2777_v37 = vmul.f32 %v6843_v34, %v2755_v3  ;;  %v2758_v55 = vadd.f32 %v2757_v16, %v6842_v33  ;;  %v4092_v16 = vld [vmem:[%s2922_s3] sm:$0xff]  }
 0x8e3   : > { %v2780_v12 = vmul.f32 %v6843_v34, %v2766_v43  ;;  %2796 = vadd.xlane.f32.xlu0 %v2795_v56  ;;  %v6274_v5 = vadd.f32 %v4285_v60, %v2779_v39  ;;  %3870 = vmatprep.subr.bf16.mxu0 %v4092_v16 }
 0x8e4   : > { %v2778_v38 = vmul.f32 %v6843_v34, %v2758_v55  ;;  %v6264_v58 = vadd.f32 %v4282_v25, %v2777_v37  ;;  %3871 = vmatpush3.bf16.msra.mxu0 %v4092_v16 }
 0x8e5   : > { %v6270_v62 = vadd.f32 %v4284_v54, %v2780_v12  ;;  %v2807_v52 = vsel %vm533_vm2, %v6274_v5, 0.0  ;;  %3872 = vmatprep.subr.bf16.mxu0 %v4093_v14 }
 0x8e6   : > { %v6266_v13 = vadd.f32 %v4283_v10, %v2778_v38  ;;  %v2801_v29 = vsel %vm533_vm2, %v6264_v58, 0.0 }
 0x8e7   : > { %2799 = vadd.xlane.f32.xlu0 %v2798_v11  ;;  %v2810_v20 = vsel %vm533_vm2, %v6270_v62, 0.0 }
 0x8e8   : > { %v2804_v53 = vsel %vm533_vm2, %v6266_v13, 0.0  ;;  %3873 = vmatpush3.bf16.msra.mxu0 %v4093_v14 }
 0x8e9   : > { %2805 = vadd.xlane.f32.xlu1 %v2804_v53 }
 0x8eb   : > { %2802 = vadd.xlane.f32.xlu0 %v2801_v29 }
 0x8ed   : > { %2811 = vadd.xlane.f32.xlu1 %v2810_v20 }
 0x8ef   : > { %2808 = vadd.xlane.f32.xlu0 %v2807_v52 }
 0x96c   : > { %v2791_v23 = vpop.xlane.xlu0 %2790 }
 0x96d   : > { %v2813_v50 = vmul.f32 0.03125, %v2791_v23 }
 0x96e   : > { %v2794_v7 = vpop.xlane.xlu1 %2793 }
 0x96f   : > { %v6283_v41 = vsub.f32 %v6241_v45, %v2813_v50  ;;  %v2814_v31 = vmul.f32 0.03125, %v2794_v7 }
 0x970   : > { %v2797_v22 = vpop.xlane.xlu0 %2796 }
 0x971   : > { %v6286_v27 = vsub.f32 %v6246_v28, %v2814_v31  ;;  %v2815_v40 = vmul.f32 0.03125, %v2797_v22  ;;  %v2829_v19 = vmul.f32 %v6283_v41, %v6283_v41 }
 0x973   : > { %v6291_v51 = vsub.f32 %v6244_v44, %v2815_v40  ;;  %v2837_v59 = vsel %vm533_vm2, %v2829_v19, 0.0  ;;  %v2830_v1 = vmul.f32 %v6286_v27, %v6286_v27 }
 0x974   : > { %2838 = vadd.xlane.f32.xlu0 %v2837_v59  ;;  %v2800_v49 = vpop.xlane.xlu0 %2799 }
 0x975   : > { %v2816_v46 = vmul.f32 0.03125, %v2800_v49  ;;  %v2840_v26 = vsel %vm533_vm2, %v2830_v1, 0.0  ;;  %v2831_v33 = vmul.f32 %v6291_v51, %v6291_v51 }
 0x976   : > { %2841 = vadd.xlane.f32.xlu1 %v2840_v26  ;;  %v2806_v17 = vpop.xlane.xlu1 %2805 }
 0x977   : > { %v6300_v57 = vsub.f32 %v6256_v0, %v2816_v46  ;;  %v2818_v2 = vmul.f32 0.03125, %v2806_v17  ;;  %v2843_v42 = vsel %vm533_vm2, %v2831_v33, 0.0  ;;  %v6844_v33 = vld [vmem:[#allocation23_spill] sm:$0xff] }
 0x978   : > { %2844 = vadd.xlane.f32.xlu0 %v2843_v42  ;;  %v2803_v34 = vpop.xlane.xlu0 %2802 }
 0x979   : > { %v6304_v61 = vsub.f32 %v6266_v13, %v2818_v2  ;;  %v2817_v6 = vmul.f32 0.03125, %v2803_v34  ;;  %v2832_v36 = vmul.f32 %v6300_v57, %v6300_v57 }
 0x97a   : > { %v2812_v9 = vpop.xlane.xlu1 %2811 }
 0x97b   : > { %v6309_v15 = vsub.f32 %v6264_v58, %v2817_v6  ;;  %v2820_v4 = vmul.f32 0.03125, %v2812_v9  ;;  %v2846_v8 = vsel %vm533_vm2, %v2832_v36, 0.0  ;;  %v2834_v24 = vmul.f32 %v6304_v61, %v6304_v61  ;;  %v6845_v9 = vld [vmem:[#allocation24_spill] sm:$0xff] }
 0x97c   : > { %2847 = vadd.xlane.f32.xlu1 %v2846_v8  ;;  %v2809_v21 = vpop.xlane.xlu0 %2808 }
 0x97d   : > { %v6315_v30 = vsub.f32 %v6270_v62, %v2820_v4  ;;  %v2819_v63 = vmul.f32 0.03125, %v2809_v21  ;;  %v2833_v32 = vmul.f32 %v6309_v15, %v6309_v15  ;;  %v2852_v48 = vsel %vm533_vm2, %v2834_v24, 0.0 }
 0x97f   : > { %v6320_v47 = vsub.f32 %v6274_v5, %v2819_v63  ;;  %v2849_v3 = vsel %vm533_vm2, %v2833_v32, 0.0  ;;  %v2836_v18 = vmul.f32 %v6315_v30, %v6315_v30 }
 0x980   : > { %2853 = vadd.xlane.f32.xlu1 %v2852_v48  ;;  %2850 = vadd.xlane.f32.xlu0 %v2849_v3 }
 0x981   : > { %v2835_v35 = vmul.f32 %v6320_v47, %v6320_v47  ;;  %v2858_v39 = vsel %vm533_vm2, %v2836_v18, 0.0 }
 0x983   : > { %v2855_v43 = vsel %vm533_vm2, %v2835_v35, 0.0 }
 0x984   : > { %2859 = vadd.xlane.f32.xlu1 %v2858_v39  ;;  %2856 = vadd.xlane.f32.xlu0 %v2855_v43 }
 0xa01   : > { %v2839_v37 = vpop.xlane.xlu0 %2838 }
 0xa02   : > { %v2861_v55 = vmul.f32 0.03125, %v2839_v37 }
 0xa03   : > { %v2842_v56 = vpop.xlane.xlu1 %2841 }
 0xa04   : > { %v2869_v12 = vadd.f32 1e-06, %v2861_v55  ;;  %v2862_v38 = vmul.f32 0.03125, %v2842_v56 }
 0xa05   : > { %v2845_v25 = vpop.xlane.xlu0 %2844 }
 0xa06   : > { %4246 = vrsqrt.f32 %v2869_v12  ;;  %v2870_v10 = vadd.f32 1e-06, %v2862_v38  ;;  %v2863_v11 = vmul.f32 0.03125, %v2845_v25 }
 0xa08   : > { %4248 = vrsqrt.f32 %v2870_v10  ;;  %v2871_v54 = vadd.f32 1e-06, %v2863_v11  ;;  %v4095_v11 = vld [vmem:[%s3097_s13 + $0x8] sm:$0xff]  }
 0xa09   : > { %v2848_v53 = vpop.xlane.xlu1 %2847 }
 0xa0a   : > { %4250 = vrsqrt.f32 %v2871_v54  ;;  %v2864_v60 = vmul.f32 0.03125, %v2848_v53  ;;  %v4096_v54 = vld [vmem:[%s3097_s13 + $0x10] sm:$0xff]   ;;  %v4097_v53 = vld [vmem:[%s3097_s13 + $0x18] sm:$0xff]  }
 0xa0c   : > { %v2872_v29 = vadd.f32 1e-06, %v2864_v60  ;;  %v4098_v60 = vld [vmem:[%s3097_s13 + $0x20] sm:$0xff]  }
 0xa0d   : > { %v2854_v20 = vpop.xlane.xlu1 %2853  ;;  %v2851_v52 = vpop.xlane.xlu0 %2850 }
 0xa0e   : > { %4252 = vrsqrt.f32 %v2872_v29  ;;  %v2866_v23 = vmul.f32 0.03125, %v2854_v20  ;;  %v2865_v50 = vmul.f32 0.03125, %v2851_v52  ;;  %v4099_v29 = vld [vmem:[%s3097_s13 + $0x28] sm:$0xff]   ;;  %v4100_v20 = vld [vmem:[%s3097_s13 + $0x30] sm:$0xff]   ;;  %v4101_v52 = vld [vmem:[%s3097_s13 + $0x38] sm:$0xff]  }
 0xa10   : > { %v4247_v7 = vpop.eup %4246  ;;  %v2874_v31 = vadd.f32 1e-06, %v2866_v23  ;;  %v2873_v22 = vadd.f32 1e-06, %v2865_v50  ;;  %v6846_v50 = vld [vmem:[#allocation25_spill] sm:$0xff] }
 0xa11   : > { %v2885_v40 = vmul.f32 %v4247_v7, %v6283_v41  ;;  %v2860_v19 = vpop.xlane.xlu1 %2859  ;;  %v2857_v59 = vpop.xlane.xlu0 %2856 }
 0xa12   : > { %v4249_v1 = vpop.eup %4248  ;;  %4254 = vrsqrt.f32 %v2874_v31  ;;  %v2868_v49 = vmul.f32 0.03125, %v2860_v19  ;;  %v2867_v46 = vmul.f32 0.03125, %v2857_v59 }
 0xa13   : > { %v2886_v26 = vmul.f32 %v4249_v1, %v6286_v27  ;;  %4256 = vrsqrt.f32 %v2873_v22  ;;  %v2897_v17 = vmul.f32 %v6844_v33, %v2885_v40 }
 0xa14   : > { %v4251_v2 = vpop.eup %4250  ;;  %v2876_v42 = vadd.f32 1e-06, %v2868_v49  ;;  %v2875_v34 = vadd.f32 1e-06, %v2867_v46 }
 0xa15   : > { %v2887_v6 = vmul.f32 %v4251_v2, %v6291_v51  ;;  %v2898_v36 = vmul.f32 %v6844_v33, %v2886_v26  ;;  %v2909_v41 = vadd.f32 %v6845_v9, %v2897_v17 }
 0xa16   : > { %4258 = vrsqrt.f32 %v2876_v42 }
 0xa17   : > { %v2899_v4 = vmul.f32 %v6844_v33, %v2887_v6  ;;  %4260 = vrsqrt.f32 %v2875_v34  ;;  %v2910_v8 = vadd.f32 %v6845_v9, %v2898_v36 }
 0xa18   : > { %v4253_v24 = vpop.eup %4252 }
 0xa19   : > { %v2911_v27 = vadd.f32 %v6845_v9, %v2899_v4  ;;  %v2888_v21 = vmul.f32 %v4253_v24, %v6300_v57  ;;  %v2917_v63 = vpack.c.bf16 %v2910_v8, %v2909_v41 }
 0xa1b   : > { %v2900_v32 = vmul.f32 %v6844_v33, %v2888_v21  ;;  %3874 = vmatprep.mubr.msk.bf16.mxu0 %vm533_vm2, %v2917_v63 }
 0xa1c   : > { %v4255_v51 = vpop.eup %4254 }
 0xa1d   : > { %v4257_v48 = vpop.eup %4256  ;;  %v2912_v3 = vadd.f32 %v6845_v9, %v2900_v32  ;;  %v2890_v18 = vmul.f32 %v4255_v51, %v6304_v61 }
 0xa1e   : > { %v2889_v35 = vmul.f32 %v4257_v48, %v6309_v15 }
 0xa1f   : > { %v2918_v39 = vpack.c.bf16 %v2912_v3, %v2911_v27  ;;  %v2902_v43 = vmul.f32 %v6844_v33, %v2890_v18 }
 0xa20   : > { %v4259_v16 = vpop.eup %4258  ;;  %v2901_v57 = vmul.f32 %v6844_v33, %v2889_v35 }
 0xa21   : > { %v4261_v14 = vpop.eup %4260  ;;  %v2892_v37 = vmul.f32 %v4259_v16, %v6315_v30  ;;  %3875 = vmatmul.mubr.msk.bf16.vlgmr.msra.gmra.mrb[48].mxu0 %vm533_vm2, %v2918_v39  ;;  %v2914_v55 = vadd.f32 %v6845_v9, %v2902_v43 }
 0xa22   : > { %v2891_v56 = vmul.f32 %v4261_v14, %v6320_v47  ;;  %v2913_v61 = vadd.f32 %v6845_v9, %v2901_v57  ;;  %v4094_v47 = vld [vmem:[%s3097_s13] sm:$0xff]  }
 0xa23   : > { %v2904_v15 = vmul.f32 %v6844_v33, %v2892_v37  ;;  %3882 = vmatprep.subr.bf16.mxu1 %v4094_v47 }
 0xa24   : > { %v2919_v12 = vpack.c.bf16 %v2914_v55, %v2913_v61  ;;  %v2903_v38 = vmul.f32 %v6844_v33, %v2891_v56  ;;  %3883 = vmatpush3.bf16.msra.mxu1 %v4094_v47 }
 0xa25   : > { %v2916_v25 = vadd.f32 %v6845_v9, %v2904_v15  ;;  %3884 = vmatprep.subr.bf16.mxu1 %v4095_v11 }
 0xa26   : > { %3878 = vmatprep.mubr.msk.bf16.mxu0 %vm533_vm2, %v2919_v12  ;;  %v2915_v10 = vadd.f32 %v6845_v9, %v2903_v38 }
 0xa28   : > { %v2920_v30 = vpack.c.bf16 %v2916_v25, %v2915_v10  ;;  %3885 = vmatpush3.bf16.msra.mxu1 %v4095_v11 }
 0xa29   : > { %3886 = vmatprep.subr.bf16.mxu1 %v4096_v54 }
 0xa2a   : > { %3879 = vmatmul.mubr.msk.bf16.gmra.mrb[52].mxu0 %vm533_vm2, %v2920_v30 }
 0xa2c   : > { %3887 = vmatpush3.bf16.msra.mxu1 %v4096_v54 }
 0xa2d   : > { %3888 = vmatprep.subr.bf16.mxu1 %v4097_v53 }
 0xa30   : > { %3889 = vmatpush3.bf16.msra.mxu1 %v4097_v53 }
 0xa31   : > { %3890 = vmatprep.subr.bf16.mxu1 %v4098_v60 }
 0xa34   : > { %3891 = vmatpush3.bf16.msra.mxu1 %v4098_v60 }
 0xa35   : > { %3892 = vmatprep.subr.bf16.mxu1 %v4099_v29 }
 0xa38   : > { %3893 = vmatpush3.bf16.msra.mxu1 %v4099_v29 }
 0xa39   : > { %3894 = vmatprep.subr.bf16.mxu1 %v4100_v20 }
 0xa3c   : > { %3895 = vmatpush3.bf16.msra.mxu1 %v4100_v20 }
 0xa3d   : > { %3896 = vmatprep.subr.bf16.mxu1 %v4101_v52 }
 0xa40   : > { %3897 = vmatpush3.bf16.msra.mxu1 %v4101_v52 }
 0xaf4   : > { %v3876_v23 = vpop.f32.mrb[48].mxu0 }
 0xaf5   : > { %v6367_v7 = vadd.f32 %v3876_v23, %v6846_v50  ;;  %v2989_v31 = vpop.f32.mrb[49].mxu0 }
 0xaf6   : > { %v6370_v22 = vadd.f32 %v2989_v31, %v6846_v50  ;;  %v3877_v40 = vpop.f32.mrb[50].mxu0 }
 0xaf7   : > { %v3022_v19 = vmul.f32 %v6367_v7, %v6367_v7  ;;  %v6375_v59 = vadd.f32 %v3877_v40, %v6846_v50  ;;  %v2992_v1 = vpop.f32.mrb[51].mxu0 }
 0xaf8   : > { %v3020_v49 = vmul.f32 %v6370_v22, %v6370_v22  ;;  %v6380_v46 = vadd.f32 %v2992_v1, %v6846_v50 }
 0xaf9   : > { %v3030_v26 = vmul.f32 %v3022_v19, %v6367_v7  ;;  %v3023_v33 = vmul.f32 %v6375_v59, %v6375_v59 }
 0xafa   : > { %v3028_v17 = vmul.f32 %v3020_v49, %v6370_v22  ;;  %v3021_v2 = vmul.f32 %v6380_v46, %v6380_v46 }
 0xafb   : > { %v3038_v42 = vmul.f32 0.044715, %v3030_v26  ;;  %v3031_v34 = vmul.f32 %v3023_v33, %v6375_v59 }
 0xafc   : > { %v3036_v6 = vmul.f32 0.044715, %v3028_v17  ;;  %v3029_v36 = vmul.f32 %v3021_v2, %v6380_v46 }
 0xafd   : > { %v3046_v9 = vadd.f32 %v3038_v42, %v6367_v7  ;;  %v3039_v41 = vmul.f32 0.044715, %v3031_v34  ;;  %v3880_v4 = vpop.f32.mrb[52].mxu0 }
 0xafe   : > { %v3044_v8 = vadd.f32 %v3036_v6, %v6370_v22  ;;  %v3037_v24 = vmul.f32 0.044715, %v3029_v36  ;;  %v6393_v27 = vadd.f32 %v3880_v4, %v6846_v50  ;;  %v3005_v21 = vpop.f32.mrb[53].mxu0 }
 0xaff   : > { %v3054_v63 = vmul.f32 0.7978846, %v3046_v9  ;;  %v3047_v32 = vadd.f32 %v3039_v41, %v6375_v59  ;;  %v6397_v51 = vadd.f32 %v3005_v21, %v6846_v50  ;;  %v3881_v48 = vpop.f32.mrb[54].mxu0 }
 0xb00   : > { %v3052_v3 = vmul.f32 0.7978846, %v3044_v8  ;;  %v3045_v18 = vadd.f32 %v3037_v24, %v6380_v46  ;;  %v3026_v35 = vmul.f32 %v6393_v27, %v6393_v27  ;;  %v6403_v39 = vadd.f32 %v3881_v48, %v6846_v50  ;;  %v3008_v43 = vpop.f32.mrb[55].mxu0 }
 0xb01   : > { %4262 = vtanh.f32 %v3054_v63  ;;  %v3055_v16 = vmul.f32 0.7978846, %v3047_v32  ;;  %v3024_v57 = vmul.f32 %v6397_v51, %v6397_v51  ;;  %v3009_v14 = vadd.f32 %v3008_v43, %v6846_v50 }
 0xb02   : > { %4264 = vtanh.f32 %v3052_v3  ;;  %v3053_v37 = vmul.f32 0.7978846, %v3045_v18  ;;  %v3034_v55 = vmul.f32 %v3026_v35, %v6393_v27  ;;  %v3027_v56 = vmul.f32 %v6403_v39, %v6403_v39 }
 0xb03   : > { %4266 = vtanh.f32 %v3055_v16  ;;  %v3032_v61 = vmul.f32 %v3024_v57, %v6397_v51  ;;  %v3025_v15 = vmul.f32 %v3009_v14, %v3009_v14 }
 0xb04   : > { %4268 = vtanh.f32 %v3053_v37  ;;  %v3042_v12 = vmul.f32 0.044715, %v3034_v55  ;;  %v3035_v38 = vmul.f32 %v3027_v56, %v6403_v39 }
 0xb05   : > { %v3040_v25 = vmul.f32 0.044715, %v3032_v61  ;;  %v3033_v10 = vmul.f32 %v3025_v15, %v3009_v14  ;;  %v6847_v15 = vld [vmem:[#allocation19_spill] sm:$0xff] }
 0xb06   : > { %v3050_v30 = vadd.f32 %v3042_v12, %v6393_v27  ;;  %v3043_v47 = vmul.f32 0.044715, %v3035_v38 }
 0xb07   : > { %v3048_v11 = vadd.f32 %v3040_v25, %v6397_v51  ;;  %v3041_v54 = vmul.f32 0.044715, %v3033_v10 }
 0xb08   : > { %v3058_v53 = vmul.f32 0.7978846, %v3050_v30  ;;  %v3051_v60 = vadd.f32 %v3043_v47, %v6403_v39  ;;  %v6848_v30 = vld [vmem:[#allocation20_spill] sm:$0xff] }
 0xb09   : > { %v3056_v29 = vmul.f32 0.7978846, %v3048_v11  ;;  %v3049_v20 = vadd.f32 %v3041_v54, %v3009_v14 }
 0xb0a   : > { %4270 = vtanh.f32 %v3058_v53  ;;  %v3059_v52 = vmul.f32 0.7978846, %v3051_v60 }
 0xb0b   : > { %v4263_v23 = vpop.eup %4262  ;;  %4272 = vtanh.f32 %v3056_v29  ;;  %v3057_v50 = vmul.f32 0.7978846, %v3049_v20 }
 0xb0c   : > { %v4265_v31 = vpop.eup %4264  ;;  %v3070_v40 = vadd.f32 1.0, %v4263_v23  ;;  %4274 = vtanh.f32 %v3059_v52 }
 0xb0d   : > { %v4267_v19 = vpop.eup %4266  ;;  %4276 = vtanh.f32 %v3057_v50  ;;  %v3068_v1 = vadd.f32 1.0, %v4265_v31 }
 0xb0e   : > { %v4269_v49 = vpop.eup %4268  ;;  %v3078_v26 = vmul.f32 0.5, %v3070_v40  ;;  %v3071_v33 = vadd.f32 1.0, %v4267_v19 }
 0xb0f   : > { %v3069_v17 = vadd.f32 1.0, %v4269_v49  ;;  %v3076_v2 = vmul.f32 0.5, %v3068_v1 }
 0xb10   : > { %v3079_v42 = vmul.f32 0.5, %v3071_v33  ;;  %v3086_v6 = vmul.f32 %v3078_v26, %v6367_v7 }
 0xb11   : > { %v3077_v34 = vmul.f32 0.5, %v3069_v17  ;;  %v3084_v9 = vmul.f32 %v3076_v2, %v6370_v22 }
 0xb12   : > { %v3087_v36 = vmul.f32 %v3079_v42, %v6375_v59 }
 0xb13   : > { %v3085_v41 = vmul.f32 %v3077_v34, %v6380_v46 }
 0xb14   : > { %v4271_v4 = vpop.eup %4270  ;;  %v3093_v8 = vpack.c.bf16 %v3087_v36, %v3086_v6 }
 0xb15   : > { %v4273_v24 = vpop.eup %4272  ;;  %v3092_v21 = vpack.c.bf16 %v3085_v41, %v3084_v9  ;;  %v3074_v63 = vadd.f32 1.0, %v4271_v4 }
 0xb16   : > { %v4275_v32 = vpop.eup %4274  ;;  %v3072_v48 = vadd.f32 1.0, %v4273_v24 }
 0xb17   : > { %v4277_v3 = vpop.eup %4276  ;;  %3898 = vmatprep.mubr.bf16.mxu1 %v3092_v21  ;;  %v3075_v18 = vadd.f32 1.0, %v4275_v32  ;;  %v3082_v35 = vmul.f32 0.5, %v3074_v63 }
 0xb18   : > { %3899 = vmatmul.mubr.bf16.vlgmr.msra.gmra.mrb[32].mxu1 %v3093_v8  ;;  %v3073_v43 = vadd.f32 1.0, %v4277_v3  ;;  %v3080_v7 = vmul.f32 0.5, %v3072_v48 }
 0xb19   : > { %v3083_v16 = vmul.f32 0.5, %v3075_v18  ;;  %v3090_v22 = vmul.f32 %v3082_v35, %v6393_v27 }
 0xb1a   : > { %v3081_v59 = vmul.f32 0.5, %v3073_v43  ;;  %v3088_v57 = vmul.f32 %v3080_v7, %v6397_v51 }
 0xb1b   : > { %v3091_v46 = vmul.f32 %v3083_v16, %v6403_v39 }
 0xb1c   : > { %v3089_v37 = vmul.f32 %v3081_v59, %v3009_v14 }
 0xb1d   : > { %v3095_v55 = vpack.c.bf16 %v3091_v46, %v3090_v22 }
 0xb1e   : > { %v3094_v56 = vpack.c.bf16 %v3089_v37, %v3088_v57 }
 0xb20   : > { %3902 = vmatprep.mubr.bf16.mxu1 %v3094_v56 }
 0xb21   : > { %3903 = vmatmul.mubr.bf16.gmra.mrb[36].mxu1 %v3095_v55 }
 0xbeb   : > { %v3900_v61 = vpop.f32.mrb[32].mxu1 }
 0xbec   : > { %v3209_v12 = vadd.f32 %v3900_v61, %v6847_v15  ;;  %v3200_v38 = vpop.f32.mrb[33].mxu1 }
 0xbed   : > { %v3201_v25 = vadd.f32 %v3200_v38, %v6847_v15  ;;  %v3901_v10 = vpop.f32.mrb[34].mxu1 }
 0xbee   : > { %v3237_v47 = vmul.f32 %v6848_v30, %v3209_v12  ;;  %v3212_v27 = vadd.f32 %v3901_v10, %v6847_v15  ;;  %v3203_v11 = vpop.f32.mrb[35].mxu1 }
 0xbef   : > { %v3235_v39 = vmul.f32 %v6848_v30, %v3201_v25  ;;  %v3204_v51 = vadd.f32 %v3203_v11, %v6847_v15 }
 0xbf0   : > { %v3245_v14 = vadd.f32 %v3237_v47, %v6244_v44  ;;  %v3238_v54 = vmul.f32 %v6848_v30, %v3212_v27 }
 0xbf1   : > { %v3243_v53 = vadd.f32 %v3235_v39, %v6241_v45  ;;  %v3236_v60 = vmul.f32 %v6848_v30, %v3204_v51 }
 0xbf2   : > { %3253 = vst.msk [vmem:[#allocation2 + $0x10] sm:$0xff] %vm533_vm2, %v3245_v14  ;;  %v3246_v29 = vadd.f32 %v3238_v54, %v6256_v0 }
 0xbf3   : > { %3251 = vst.msk [vmem:[#allocation2] sm:$0xff] %vm533_vm2, %v3243_v53  ;;  %v3244_v20 = vadd.f32 %v3236_v60, %v6246_v28 }
 0xbf4   : > { %3254 = vst.msk [vmem:[#allocation2 + $0x18] sm:$0xff] %vm533_vm2, %v3246_v29  ;;  %v3904_v52 = vpop.f32.mrb[36].mxu1 }
 0xbf5   : > { %3252 = vst.msk [vmem:[#allocation2 + $0x8] sm:$0xff] %vm533_vm2, %v3244_v20  ;;  %v3225_v44 = vadd.f32 %v3904_v52, %v6847_v15  ;;  %v3216_v23 = vpop.f32.mrb[37].mxu1  ;;  %v3267_v42 = vsel (!%p3591_p10), %vm533_vm2, %v3244_v20, 0.0 }
 0xbf6   : > { %v3217_v45 = vadd.f32 %v3216_v23, %v6847_v15  ;;  %v3905_v50 = vpop.f32.mrb[38].mxu1 }
 0xbf7   : > { %v3241_v31 = vmul.f32 %v6848_v30, %v3225_v44  ;;  %v3228_v40 = vadd.f32 %v3905_v50, %v6847_v15  ;;  %v3219_v0 = vpop.f32.mrb[39].mxu1 }
 0xbf8   : > { %v3239_v19 = vmul.f32 %v6848_v30, %v3217_v45  ;;  %v3220_v28 = vadd.f32 %v3219_v0, %v6847_v15  ;;  %3262 = sbr.rel (%p3591_p10) target bundleno = 3396 (0xd44), region = 72 }
 0xbf9   : > { %v6446_v1 = vadd.f32 %v3241_v31, %v6274_v5  ;;  %v3242_v49 = vmul.f32 %v6848_v30, %v3228_v40  ;;  %v3270_v5 = vsel (!%p3591_p10), %vm533_vm2, %v3245_v14, 0.0 }
 0xbfa   : > { %v3247_v26 = vadd.f32 %v3239_v19, %v6264_v58  ;;  %v3240_v33 = vmul.f32 %v6848_v30, %v3220_v28  ;;  %v3264_v58 = vsel (!%p3591_p10), %vm533_vm2, %v3243_v53, 0.0  ;;  %3271 = vadd.xlane.f32.xlu1 (!%p3591_p10), %v3270_v5 }
 0xbfb   : > { %3257 = vst.msk [vmem:[#allocation2 + $0x30] sm:$0xff] %vm533_vm2, %v6446_v1  ;;  %v3250_v17 = vadd.f32 %v3242_v49, %v6270_v62  ;;  %3265 = vadd.xlane.f32.xlu0 (!%p3591_p10), %v3264_v58  ;;  %v3273_v62 = vsel (!%p3591_p10), %vm533_vm2, %v3246_v29, 0.0  ;;  %v3282_v6 = vsel (!%p3591_p10), %vm533_vm2, %v6446_v1, 0.0 }
 0xbfc   : > { %3255 = vst.msk [vmem:[#allocation2 + $0x20] sm:$0xff] %vm533_vm2, %v3247_v26  ;;  %v3248_v2 = vadd.f32 %v3240_v33, %v6266_v13  ;;  %v3276_v13 = vsel (!%p3591_p10), %vm533_vm2, %v3247_v26, 0.0  ;;  %v3263_v33 = vld [vmem:[%s6610_s8] sm:$0x3] (!%p3591_p10) }
 0xbfd   : > { %3258 = vst.msk [vmem:[#allocation2 + $0x38] sm:$0xff] %vm533_vm2, %v3250_v17  ;;  %v3285_v36 = vsel (!%p3591_p10), %vm533_vm2, %v3250_v17, 0.0 }
 0xbfe   : > { %3256 = vst.msk [vmem:[#allocation2 + $0x28] sm:$0xff] %vm533_vm2, %v3248_v2  ;;  %3274 = vadd.xlane.f32.xlu1 (!%p3591_p10), %v3273_v62  ;;  %v3279_v34 = vsel (!%p3591_p10), %vm533_vm2, %v3248_v2, 0.0 }
 0xbff   : > { %3268 = vadd.xlane.f32.xlu0 %v3267_v42 }
 0xc02   : > { %3280 = vadd.xlane.f32.xlu1 %v3279_v34 }
 0xc03   : > { %3277 = vadd.xlane.f32.xlu0 %v3276_v13  ;;  %v6849_v13 = vld [vmem:[#allocation17_spill] sm:$0xff] }
 0xc04   : > { %v3371_v34 = vrot.slane %v3263_v33, %v6849_v13 }
 0xc06   : > { %3286 = vadd.xlane.f32.xlu1 %v3285_v36 }
 0xc07   : > { %3283 = vadd.xlane.f32.xlu0 %v3282_v6 }
 0xc87   : > { %v3272_v41 = vpop.xlane.xlu1 %3271 }
 0xc88   : > { %v3266_v9 = vpop.xlane.xlu0 %3265  ;;  %v3290_v8 = vmul.f32 0.03125, %v3272_v41 }
 0xc89   : > { %v3288_v4 = vmul.f32 0.03125, %v3266_v9 }
 0xc8a   : > { %v6470_v21 = vsub.f32 %v3245_v14, %v3290_v8 }
 0xc8b   : > { %v6468_v24 = vsub.f32 %v3243_v53, %v3288_v4  ;;  %v3275_v32 = vpop.xlane.xlu1 %3274  ;;  %v6850_v4 = vld [vmem:[#allocation18_spill] sm:$0xff] }
 0xc8c   : > { %v3269_v63 = vpop.xlane.xlu0 %3268  ;;  %v3291_v3 = vmul.f32 0.03125, %v3275_v32  ;;  %v3306_v35 = vmul.f32 %v6470_v21, %v6470_v21  ;;  %v3383_v8 = vrot.slane %v3263_v33, %v6850_v4 }
 0xc8d   : > { %v3289_v48 = vmul.f32 0.03125, %v3269_v63  ;;  %v3304_v18 = vmul.f32 %v6468_v24, %v6468_v24 }
 0xc8e   : > { %v6478_v7 = vsub.f32 %v3246_v29, %v3291_v3  ;;  %v3318_v46 = vsel %vm533_vm2, %v3306_v35, 0.0 }
 0xc8f   : > { %v6476_v43 = vsub.f32 %v3244_v20, %v3289_v48  ;;  %v3312_v16 = vsel %vm533_vm2, %v3304_v18, 0.0  ;;  %v3281_v22 = vpop.xlane.xlu1 %3280 }
 0xc90   : > { %3313 = vadd.xlane.f32.xlu0 %v3312_v16  ;;  %v3278_v59 = vpop.xlane.xlu0 %3277  ;;  %v3293_v37 = vmul.f32 0.03125, %v3281_v22  ;;  %v3307_v56 = vmul.f32 %v6478_v7, %v6478_v7 }
 0xc91   : > { %v3292_v57 = vmul.f32 0.03125, %v3278_v59  ;;  %v3305_v55 = vmul.f32 %v6476_v43, %v6476_v43 }
 0xc92   : > { %v6488_v15 = vsub.f32 %v3248_v2, %v3293_v37  ;;  %v3321_v10 = vsel %vm533_vm2, %v3307_v56, 0.0 }
 0xc93   : > { %v6486_v61 = vsub.f32 %v3247_v26, %v3292_v57  ;;  %v3315_v12 = vsel %vm533_vm2, %v3305_v55, 0.0  ;;  %v3287_v25 = vpop.xlane.xlu1 %3286 }
 0xc94   : > { %3319 = vadd.xlane.f32.xlu0 %v3318_v46  ;;  %3316 = vadd.xlane.f32.xlu1 %v3315_v12  ;;  %v3284_v38 = vpop.xlane.xlu0 %3283  ;;  %v3295_v47 = vmul.f32 0.03125, %v3287_v25  ;;  %v3309_v11 = vmul.f32 %v6488_v15, %v6488_v15 }
 0xc95   : > { %v3294_v30 = vmul.f32 0.03125, %v3284_v38  ;;  %v3308_v27 = vmul.f32 %v6486_v61, %v6486_v61 }
 0xc96   : > { %v6499_v51 = vsub.f32 %v3250_v17, %v3295_v47  ;;  %v3327_v54 = vsel %vm533_vm2, %v3309_v11, 0.0 }
 0xc97   : > { %v6497_v39 = vsub.f32 %v6446_v1, %v3294_v30  ;;  %v3324_v14 = vsel %vm533_vm2, %v3308_v27, 0.0 }
 0xc98   : > { %3322 = vadd.xlane.f32.xlu1 %v3321_v10  ;;  %3325 = vadd.xlane.f32.xlu0 %v3324_v14  ;;  %v3311_v60 = vmul.f32 %v6499_v51, %v6499_v51 }
 0xc99   : > { %v3310_v53 = vmul.f32 %v6497_v39, %v6497_v39 }
 0xc9a   : > { %v3333_v20 = vsel %vm533_vm2, %v3311_v60, 0.0 }
 0xc9b   : > { %v3330_v29 = vsel %vm533_vm2, %v3310_v53, 0.0 }
 0xc9c   : > { %3328 = vadd.xlane.f32.xlu1 %v3327_v54  ;;  %3331 = vadd.xlane.f32.xlu0 %v3330_v29 }
 0xca0   : > { %3334 = vadd.xlane.f32.xlu1 %v3333_v20 }
 0xd1d   : > { %v3314_v52 = vpop.xlane.xlu0 %3313 }
 0xd1e   : > { %v3336_v44 = vmul.f32 0.03125, %v3314_v52 }
 0xd20   : > { %v3344_v23 = vadd.f32 1e-06, %v3336_v44 }
 0xd21   : > { %v3317_v45 = vpop.xlane.xlu1 %3316  ;;  %v3320_v50 = vpop.xlane.xlu0 %3319 }
 0xd22   : > { %4286 = vrsqrt.f32 %v3344_v23  ;;  %v3337_v31 = vmul.f32 0.03125, %v3317_v45  ;;  %v3338_v40 = vmul.f32 0.03125, %v3320_v50 }
 0xd24   : > { %v3345_v0 = vadd.f32 1e-06, %v3337_v31  ;;  %v3346_v19 = vadd.f32 1e-06, %v3338_v40 }
 0xd25   : > { %v3323_v28 = vpop.xlane.xlu1 %3322  ;;  %v3326_v1 = vpop.xlane.xlu0 %3325 }
 0xd26   : > { %4288 = vrsqrt.f32 %v3345_v0  ;;  %v3339_v49 = vmul.f32 0.03125, %v3323_v28  ;;  %v3340_v26 = vmul.f32 0.03125, %v3326_v1 }
 0xd27   : > { %4290 = vrsqrt.f32 %v3346_v19 }
 0xd28   : > { %v3347_v17 = vadd.f32 1e-06, %v3339_v49  ;;  %v3348_v2 = vadd.f32 1e-06, %v3340_v26 }
 0xd29   : > { %v3329_v58 = vpop.xlane.xlu1 %3328  ;;  %v3332_v5 = vpop.xlane.xlu0 %3331 }
 0xd2a   : > { %4292 = vrsqrt.f32 %v3347_v17  ;;  %v3341_v42 = vmul.f32 0.03125, %v3329_v58  ;;  %v3342_v62 = vmul.f32 0.03125, %v3332_v5 }
 0xd2b   : > { %4294 = vrsqrt.f32 %v3348_v2 }
 0xd2c   : > { %v4287_v6 = vpop.eup %4286  ;;  %v3349_v36 = vadd.f32 1e-06, %v3341_v42  ;;  %v3350_v9 = vadd.f32 1e-06, %v3342_v62 }
 0xd2d   : > { %v3360_v41 = vmul.f32 %v4287_v6, %v6468_v24  ;;  %v3335_v63 = vpop.xlane.xlu1 %3334 }
 0xd2e   : > { %4296 = vrsqrt.f32 %v3349_v36  ;;  %v3343_v32 = vmul.f32 0.03125, %v3335_v63 }
 0xd2f   : > { %v3372_v48 = vmul.f32 %v3371_v34, %v3360_v41  ;;  %4298 = vrsqrt.f32 %v3350_v9 }
 0xd30   : > { %v4289_v3 = vpop.eup %4288  ;;  %v3351_v18 = vadd.f32 1e-06, %v3343_v32 }
 0xd31   : > { %v4291_v35 = vpop.eup %4290  ;;  %v3384_v16 = vadd.f32 %v3383_v8, %v3372_v48  ;;  %v3361_v59 = vmul.f32 %v4289_v3, %v6476_v43 }
 0xd32   : > { %v3362_v22 = vmul.f32 %v4291_v35, %v6470_v21  ;;  %4300 = vrsqrt.f32 %v3351_v18 }
 0xd33   : > { %3392 = vst.msk [vmem:[%s4590_s30] sm:$0xff] %vm533_vm2, %v3384_v16  ;;  %v3373_v24 = vmul.f32 %v3371_v34, %v3361_v59 }
 0xd34   : > { %v4293_v46 = vpop.eup %4292  ;;  %v3374_v57 = vmul.f32 %v3371_v34, %v3362_v22 }
 0xd35   : > { %v4295_v37 = vpop.eup %4294  ;;  %v3385_v55 = vadd.f32 %v3383_v8, %v3373_v24  ;;  %v3363_v56 = vmul.f32 %v4293_v46, %v6478_v7 }
 0xd36   : > { %v3386_v12 = vadd.f32 %v3383_v8, %v3374_v57  ;;  %v3364_v38 = vmul.f32 %v4295_v37, %v6486_v61 }
 0xd37   : > { %3393 = vst.msk [vmem:[%s4590_s30 + $0x8] sm:$0xff] %vm533_vm2, %v3385_v55  ;;  %v3375_v43 = vmul.f32 %v3371_v34, %v3363_v56 }
 0xd38   : > { %v4297_v25 = vpop.eup %4296  ;;  %3394 = vst.msk [vmem:[%s4590_s30 + $0x10] sm:$0xff] %vm533_vm2, %v3386_v12  ;;  %v3376_v21 = vmul.f32 %v3371_v34, %v3364_v38 }
 0xd39   : > { %v4299_v10 = vpop.eup %4298  ;;  %v3387_v30 = vadd.f32 %v3383_v8, %v3375_v43  ;;  %v3365_v47 = vmul.f32 %v4297_v25, %v6488_v15 }
 0xd3a   : > { %v3388_v27 = vadd.f32 %v3383_v8, %v3376_v21  ;;  %v3366_v7 = vmul.f32 %v4299_v10, %v6497_v39 }
 0xd3b   : > { %3395 = vst.msk [vmem:[%s4590_s30 + $0x18] sm:$0xff] %vm533_vm2, %v3387_v30  ;;  %v3377_v61 = vmul.f32 %v3371_v34, %v3365_v47 }
 0xd3c   : > { %v4301_v11 = vpop.eup %4300  ;;  %3396 = vst.msk [vmem:[%s4590_s30 + $0x20] sm:$0xff] %vm533_vm2, %v3388_v27  ;;  %v3378_v14 = vmul.f32 %v3371_v34, %v3366_v7 }
 0xd3d   : > { %v3389_v54 = vadd.f32 %v3383_v8, %v3377_v61  ;;  %v3367_v53 = vmul.f32 %v4301_v11, %v6499_v51 }
 0xd3e   : > { %v3390_v60 = vadd.f32 %v3383_v8, %v3378_v14 }
 0xd3f   : > { %3397 = vst.msk [vmem:[%s4590_s30 + $0x28] sm:$0xff] %vm533_vm2, %v3389_v54  ;;  %v3379_v29 = vmul.f32 %v3371_v34, %v3367_v53 }
 0xd40   : > { %3398 = vst.msk [vmem:[%s4590_s30 + $0x30] sm:$0xff] %vm533_vm2, %v3390_v60 }
 0xd41   : > { %v3391_v15 = vadd.f32 %v3383_v8, %v3379_v29 }
 0xd43   : > { %3399 = vst.msk [vmem:[%s4590_s30 + $0x38] sm:$0xff] %vm533_vm2, %v3391_v15 }
 0xd44 PF: > { %s3602_s27 = sshll.u32 %s4403_s17, 10  ;;  %s3414_s11 = sshll.u32 %s4590_s30, 4  ;;  %s6545_s11 = int_to_ptr.vmem [resolvable:$true] %s3414_s11 }
 0xd45   : > { %s6542_s24 = scalar_lea.hbm %s6612_s10, %s3602_s27  ;;  %s6851_s29 = sand.u32 1, %s4391_s14  }
 0xd46   : > { %s6549_s12 = scalar_lea.sflag [#allocation4], %s6851_s29  ;;  %s4317_s21 = scalar_lea.vmem %s6545_s11, 1024 }
 0xd47   : > { %p4318_p12 = scmp.ne.s32.totalorder %s6545_s11, %s4317_s21  ;;  %s4432_s17 = smov [#allocation6]  }
 0xd48   : > { %s4321_s25 = sshll.u32 %s4432_s17, 4  ;;  %s4322_s25 = int_to_ptr.vmem [resolvable:$false] %s4321_s25 }
 0xd49   : > { %p4319_p13 = pnand %p4318_p12, %p4539_p3  ;;  %s4323_s28 = scalar_lea.vmem %s4322_s25, 2048 }
 0xd4a   : > { %p4324_p1 = scmp.lt.s32.totalorder %s6545_s11, %s4322_s25  ;;  %p4325_p2 = scmp.lt.s32.totalorder %s4323_s28, %s4317_s21 }
 0xd4b   : > { %p4320_p0 = pneg %p4319_p13 }
 0xd4c   : > { %p4326_p4 = por %p4325_p2, %p4324_p1 }
 0xd4e   : > { %p4327_p5 = pnand %p4326_p4, %p4320_p0 }
 0xd50   : > { %4330 = shalt.err (!%p4327_p5)
}
 0xd51   : > { %s4331_s30 = scalar_lea.hbm %s6542_s24, 1024  ;;  %s4335_s2 = scalar_lea.hbm %s6612_s10, 2048 }
 0xd52   : > { %p4332_p6 = scmp.ne.s32.totalorder %s6542_s24, %s4331_s30  ;;  %p4336_p11 = scmp.lt.u32.totalorder %s6542_s24, %s6612_s10 }
 0xd53   : > { %p4337_p9 = scmp.lt.u32.totalorder %s4335_s2, %s4331_s30  ;;  %p4339_p12 = scmp.lt.u32.totalorder %s4331_s30, %s6542_s24 }
 0xd54   : > { %p4333_p7 = pnand %p4332_p6, %p4539_p3 }
 0xd55   : > { %p4338_p10 = por %p4337_p9, %p4336_p11 }
 0xd56   : > { %p4334_p8 = pneg %p4333_p7 }
 0xd57   : > { %p4340_p13 = por %p4339_p12, %p4338_p10 }
 0xd59   : > { %p4341_p0 = pnand %p4340_p13, %p4334_p8 }
 0xd5b   : > { %4344 = shalt.err (!%p4341_p0)
}
 0xd5c   : > { %s4433_s7 = smov 128  }
 0xd5d   : > { %3932 = dma.vmem_to_hbm [thread:$0]  (%p4539_p3), %s6545_s11, 1024, %s6542_s24, %s6549_s12, %s4433_s7, %s4433_s7, %s4430_s9  }
 0xd5e PF: > { %s6852_s18 = sld [smem:[#allocation9_spill]]  ;;  %s6853_s13 = sld [smem:[#allocation15_spill]] }
 0xd5f   : > { %p3944_p1 = scmp.ge.s32.totalorder %s4415_s20, 2 }
 0xd64   : > { %s3429_s16 = sand.u32 1, %s6852_s18   ;;  %p6854_p2 = scmp.ne.s32.totalorder %s6853_s13, 0 }
 0xd65   : > { %s3430_s15 = scalar_lea.sflag [#allocation4], %s3429_s16 }
 0xd66   : > { %p3939_p4 = pnand %p3944_p1, %p6854_p2 }
 0xd68   : > { %4382 = dma.done.wait (!%p3939_p4), %s3430_s15, 1024  }
 0xd69   : > { %4384 = vsyncadd (!%p3939_p4), %s3430_s15, 4294966272  ;;  %s24_s20 = sadd.s32 1, %s4415_s20   ;;  %s6855_s26 = sld [smem:[#allocation10_spill]] }
 0xd6a   : > { %p21_p5 = scmp.ge.s32.totalorder %s24_s20, 8   ;;  %s6856_s15 = sld [smem:[#allocation16_spill]] }
 0xd6b   : > { %s6857_s16 = sld [smem:[#allocation11_spill]]  ;;  %s6858_s17 = sld [smem:[#allocation12_spill]] }
 0xd6c   : > { %s6859_s18 = sld [smem:[#allocation13_spill]]  ;;  %s6860_s19 = sld [smem:[#allocation14_spill]] }
 0xd6d   : > { %s6861_s13 = smov %s4391_s14  ;;  %23 = sbr.rel (!%p21_p5) target bundleno = 13 (0xd), region = 113 }
 0xd6f   : > { %s6862_s14 = smov %s6855_s26 }
 0xd74   :  { %3435 = vsyncpa [#allocation4], 1 }
 0xd75   :  { %3437 = vsyncpa [#allocation4 + $0x1], 1 }
 0xd76   :  { %3438 = vsyncpa [#allocation5], 1 }
 0xd77   :  { %3440 = vsyncpa [#allocation5 + $0x1], 1 }

// kernel: a_call__.5
= control target key start
LH: loop header
LB: loop body
LE: loop exit
PB: predicated region body
PF: predicated region fallthrough
CT: control target
= control target key end

     0   :  { %s2151_s0 = inlined_call_operand.vmem [shape: f32[2,16,48], index: 0, kind: input, shape index: {}]   ;;  %s2152_s1 = inlined_call_operand.vmem [shape: bf16[48,16], index: 1, kind: input, shape index: {}]   ;;  %s2153_s2 = inlined_call_operand.vmem [shape: f32[16,16], index: 2, kind: input, shape index: {}]   ;;  %s2154_s3 = inlined_call_operand.vmem [shape: bf16[2,16,48], index: 3, kind: input, shape index: {}]   ;;  %s2155_s4 = inlined_call_operand.vmem [shape: bf16[2,16,16], index: 4, kind: input, shape index: {}]   ;;  %s2156_s5 = inlined_call_operand.vmem [shape: bf16[2,16,64], index: 5, kind: input, shape index: {}]   ;;  %s2157_s6 = inlined_call_operand.vmem [shape: bf16[2,64,16], index: 6, kind: input, shape index: {}]   ;;  %s2158_s7 = inlined_call_operand.vmem [shape: f32[2,10,64], index: 7, kind: input, shape index: {}]   ;;  %s2159_s8 = inlined_call_operand.vmem [shape: f32[2,16], index: 8, kind: input, shape index: {}]   ;;  %s2160_s9 = inlined_call_operand.vmem [shape: f32[24], index: 9, kind: input, shape index: {}]   ;;  %s2161_s10 = inlined_call_operand.hbm [shape: f32[2,16,16], index: 10, kind: output, shape index: {}]  }
   0x1   :  { %2166 = sst [smem:[#allocation13_spill]] %s2151_s0 }
   0x2   :  { %2167 = sst [smem:[#allocation14_spill]] %s2152_s1 }
   0x3   :  { %2168 = sst [smem:[#allocation15_spill]] %s2153_s2 }
   0x4   :  { %2169 = sst [smem:[#allocation16_spill]] %s2160_s9 }
   0x5   :  { %15 = vsyncpa [#allocation5], 0 }
   0x6   :  { %16 = vsyncpa [#allocation4], 0 }
   0x7   :  { %18 = vsyncpa [#allocation4 + $0x1], 0  ;;  %s1783_s13 = smov 0   ;;  %s1785_s14 = smov 0  }
   0x8   :  { %s1787_s15 = smov 0   ;;  %s1789_s16 = smov 0  }
   0x9   :  { %s1791_s17 = smov 0   ;;  %s1793_s18 = smov 0  }
   0xa   :  { %s1795_s19 = smov 0   ;;  %s1797_s20 = smov 0  }
   0xb LB: > { %2170 = sst [smem:[#allocation9_spill]] %s1705_s18  ;;  %s1324_s21 = sadd.s32 4294967295, %s1713_s20   ;;  %s1713_s20 = sphi %s1797_s20, %s24_s20   ;;  %s1709_s19 = sphi %s1795_s19, %s2189_s19   ;;  %s1705_s18 = sphi %s1793_s18, %s2188_s18   ;;  %s1701_s17 = sphi %s1791_s17, %s2187_s17   ;;  %s1697_s16 = sphi %s1789_s16, %s2186_s16   ;;  %s1693_s15 = sphi %s1787_s15, %s2192_s15   ;;  %s1689_s14 = sphi %s1785_s14, %s2191_s14   ;;  %s1685_s13 = sphi %s1783_s13, %s2190_s13  }
   0xc   : > { %2171 = sst [smem:[#allocation10_spill]] %s1709_s19  ;;  %s1325_s22 = sadd.s32 4294967294, %s1713_s20  }
   0xd   : > { %s33_s23 = sadd.s32 1, %s1705_s18  ;;  %s36_s24 = sadd.s32 1, %s1709_s19 }
   0xe   : > { %p34_p0 = scmp.ge.s32.totalorder %s33_s23, 2  ;;  %s258_s25 = sadd.s32 1, %s1693_s15 }
   0xf   : > { %p268_p1 = scmp.ne.s32.totalorder %s1693_s15, %s1689_s14  ;;  %p269_p2 = scmp.eq.s32.totalorder %s1324_s21, 3 }
  0x10   : > { %s2194_s23 = smov (%p34_p0, %s33_s23), 0  ;;  %s2196_s24 = smov (!%p34_p0, %s36_s24), %s1709_s19 }
  0x11   : > { %2172 = sst [smem:[#allocation11_spill]] %s2194_s23  ;;  %p1833_p3 = por %p269_p2, %p268_p1 }
  0x12   : > { %p274_p4 = scmp.ne.s32.totalorder %s1689_s14, %s1685_s13  ;;  %p38_p5 = scmp.ge.s32.totalorder %s2196_s24, 2 }
  0x13   : > { %p275_p6 = scmp.eq.s32.totalorder %s1325_s22, 3  ;;  %p1326_p7 = scmp.ge.s32.totalorder %s1713_s20, 1 }
  0x14   : > { %p282_p8 = scmp.lt.s32.totalorder %s1713_s20, 5  ;;  %s2198_s24 = smov (%p38_p5, %s2196_s24), 0 }
  0x15   : > { %2174 = sst [smem:[#allocation12_spill]] %s2198_s24  ;;  %p1843_p9 = por %p275_p6, %p274_p4 }
  0x16   : > { %p1847_p10 = pnand %p1326_p7, %p282_p8  ;;  %s255_s29 = ssub.s32 %s1709_s19, %s2198_s24 }
  0x17   : > { %s2175_s27 = scalar_select %p1843_p9, 1, 0 }
  0x18   : > { %p256_p11 = scmp.eq.s32.totalorder %s255_s29, 0  ;;  %p1466_p12 = pneg %p1847_p10 }
  0x19   : > { %p1855_p13 = scmp.eq.s32.totalorder %s1324_s21, 0  ;;  %s2178_s9 = sld [smem:[#allocation16_spill]] }
  0x1a   : > { %s1863_s23 = scalar_select %p256_p11, %s1693_s15, %s258_s25  }
  0x1b   : > { %p1467_p0 = pnand %p1855_p13, %p1466_p12 }
  0x1d   : > { %p1602_p2 = pneg %p1467_p0 }
  0x1f   : > { %s319_s22 = sshll.u32 %s2178_s9, 4  ;;  %s320_s22 = int_to_ptr.vmem [resolvable:$true] %s319_s22 }
  0x20   : > { %s1600_s18 = scalar_lea.vmem %s320_s22, 16  ;;  %p1608_p6 = scmp.lt.s32.totalorder %s320_s22, %s320_s22 }
  0x21   : > { %p1601_p1 = scmp.ne.s32.totalorder %s320_s22, %s1600_s18  ;;  %p1609_p7 = scmp.lt.s32.totalorder %s1600_s18, %s1600_s18 }
  0x23   : > { %p1603_p4 = pnand %p1602_p2, %p1601_p1  ;;  %p1610_p8 = por %p1609_p7, %p1608_p6 }
  0x25   : > { %p1604_p5 = pneg %p1603_p4 }
  0x27   : > { %p1611_p9 = pnand %p1610_p8, %p1604_p5 }
  0x29   : > { %1614 = shalt.err (!%p1611_p9)
}
  0x2a   : > { %s1715_s21 = smov [#allocation3]   ;;  %340 = sbr.rel (%p1847_p10) target bundleno = 3191 (0xc77), region = 60 }
  0x2b   : > { %1469 = dma.vmem_to_smem (!%p1467_p0), %s320_s22, 16, %s1715_s21, [#allocation5]  }
  0x31   : > { %1676 = dma.done.wait (%p1855_p13), [#allocation5], 16  }
  0x32   : > { %1678 = vsyncadd (%p1855_p13), [#allocation5], 4294967280 }
  0x33   : > { %346 = sfence }
  0x34   : > { %s2164_s18 = sand.u32 1, %s1689_s14   ;;  %p379_p11 = scmp.lt.s32.totalorder %s1701_s17, 1 }
  0x35   : > { %s1331_s25 = sshll.u32 %s2164_s18, 4  ;;  %s1878_s29 = smul.u32 12, %s1697_s16 }
  0x36   : > { %s380_s28 = scalar_select %p379_p11, %s1701_s17, 1 }
  0x37   : > { %s2179_s0 = sld [smem:[#allocation13_spill]]  ;;  %s1884_s30 = scalar_lea.vmem [#allocation6], %s1331_s25 }
  0x38   : > { %s1367_s11 = sshll.u32 %s380_s28, 4  ;;  %p1334_p9 = scmp.ne.s32.totalorder %s1697_s16, 0 }
  0x39   : > { %s2180_s1 = sld [smem:[#allocation14_spill]] (!%p1334_p9)  ;;  %v1716_v1 = vmov (!%p1334_p9), 0.0   ;;  %vm1717_vm0 = vmmov (!%p1334_p9), 0   ;;  %vm419_vm1 = vcmask (!%p1334_p9), 392192   ;;  %s2181_s2 = sld [smem:[#allocation15_spill]] (!%p1334_p9)  ;;  %vm464_vm2 = vcmask (!%p1334_p9), 130048  }
  0x3a   : > { %389 = sbr.rel (%p1334_p9) target bundleno = 292 (0x124), region = 68  ;;  %1396 = vmatprep.subr.bf16.mxu0 (!%p1334_p9), %v1716_v1  ;;  %1402 = vmatprep.mubr.msk.bf16.mxu0 (!%p1334_p9), %vm1717_vm0, %v1716_v1 }
  0x3d   : > { %s383_s21 = scalar_lea.vmem %s2179_s0, %s1367_s11 }
  0x3e   : > { %v390_v4 = vld [vmem:[%s383_s21] sm:$0xff] (!%p1334_p9)  ;;  %v391_v5 = vld [vmem:[%s383_s21 + $0x8] sm:$0xff] (!%p1334_p9) }
  0x3f   : > { %v1553_v0 = vld [vmem:[%s2180_s1] sm:$0xff] (!%p1334_p9)   ;;  %v1554_v2 = vld [vmem:[%s2180_s1 + $0x8] sm:$0xff] (!%p1334_p9)   ;;  %v1555_v3 = vld [vmem:[%s2180_s1 + $0x10] sm:$0xff] (!%p1334_p9)   ;;  %v392_v6 = vpack.c.bf16 (!%p1334_p9), %v391_v5, %v390_v4 }
  0x40   : > { %1397 = vmatpush3.bf16.msra.mxu0 (!%p1334_p9), %v1553_v0  ;;  %v399_v7 = vld [vmem:[%s2181_s2] sm:$0xff] (!%p1334_p9)  ;;  %v400_v9 = vld [vmem:[%s2181_s2 + $0x8] sm:$0xff] (!%p1334_p9) }
  0x41   : > { %1398 = vmatprep.subr.bf16.mxu0 %v1716_v1 }
  0x44   : > { %1399 = vmatpush3.bf16.msra.mxu0 %v1554_v2 }
  0x45   : > { %1400 = vmatprep.subr.bf16.mxu0 %v1716_v1 }
  0x48   : > { %1401 = vmatpush3.bf16.msra.mxu0 %v1555_v3 }
  0x4b   : > { %1403 = vmatmul.mubr.msk.bf16.vlgmr.msra.gmra.mrb[0].mxu0 %vm419_vm1, %v392_v6 }
 0x11e   : > { %v457_v8 = vpop.f32.mrb[0].mxu0 }
 0x11f   : > { %v458_v10 = vadd.f32 %v457_v8, %v399_v7  ;;  %v1404_v11 = vpop.f32.mrb[1].mxu0 }
 0x120   : > { %v460_v12 = vpop.f32.mrb[2].mxu0 }
 0x121   : > { %465 = vst.msk [vmem:[#allocation2] sm:$0xff] %vm464_vm2, %v458_v10  ;;  %v461_v13 = vadd.f32 %v460_v12, %v400_v9  ;;  %v1405_v14 = vpop.f32.mrb[3].mxu0 }
 0x123   : > { %466 = vst.msk [vmem:[#allocation2 + $0x8] sm:$0xff] %vm464_vm2, %v461_v13 }
 0x124 PF: > { %vm473_vm3 = vcmask 130048   ;;  %s1915_s11 = sshll.u32 %s1697_s16, 3  ;;  %v1718_v29 = vmov 0.0   ;;  %vm1719_vm4 = vmmov 0   ;;  %v501_v35 = vlaneseq  ;;  %s1339_s12 = sshll.u32 %s1697_s16, 4 }
 0x125   : > { %1406 = vmatprep.subr.bf16.mxu0 %v1718_v29  ;;  %s516_s21 = scalar_lea.vmem %s2154_s3, %s1915_s11  ;;  %1408 = vmatprep.mubr.msk.bf16.mxu0 %vm1719_vm4, %v1718_v29  ;;  %s1942_s25 = scalar_lea.vmem %s2158_s7, %s1339_s12  ;;  %vm577_vm5 = vcmask 64512   ;;  %vm1115_vm6 = vcmask 523264  }
 0x126   : > { %v1561_v30 = vld [vmem:[%s516_s21] sm:$0xff]   ;;  %1424 = vmatprep.subr.bf16.mxu1 %v1718_v29  ;;  %1426 = vmatprep.mubr.msk.bf16.mxu1 %vm1719_vm4, %v1718_v29  ;;  %v1937_v38 = vshrl.u32 %v501_v35, 7  ;;  %s1720_s28 = smov 104   ;;  %s1721_s24 = smov 112  }
 0x127   : > { %1407 = vmatpush3.bf16.msra.mxu0 %v1561_v30  ;;  %v1948_v40 = vld [vmem:[%s1942_s25] sm:$0xff]  ;;  %s1722_s19 = smov 120   ;;  %s714_s12 = sadd.s32 2, %s1878_s29 }
 0x128   : > { %v1902_v15 = vld [vmem:[#allocation2] sm:$0xff]  ;;  %1412 = vmatprep.subr.bf16.mxu0 %v1718_v29  ;;  %v1945_v39 = vsub.s32 0, %v1937_v38  ;;  %v1953_v44 = vsub.s32 1, %v1937_v38  ;;  %v521_v53 = vsub.s32 2, %v1937_v38  ;;  %s680_s22 = sadd.s32 1, %s1878_s29  ;;  %s719_s21 = sadd.s32 3, %s1878_s29 }
 0x129   : > { %v474_v17 = vsel %vm473_vm3, %v1902_v15, 0.0  ;;  %s720_s18 = sld [smem:[#allocation3 + %s719_s21]]  ;;  %s726_s9 = sadd.s32 5, %s1878_s29 }
 0x12a   : > { %v1904_v16 = vld [vmem:[#allocation2 + $0x8] sm:$0xff]  ;;  %475 = vadd.xlane.f32.xlu0 %v474_v17  ;;  %v504_v43 = vrot.slane %v1948_v40, %v1945_v39  ;;  %v510_v48 = vrot.slane %v1948_v40, %v1953_v44  ;;  %v522_v54 = vrot.slane %v1948_v40, %v521_v53  ;;  %s687_s0 = sadd.s32 4, %s1878_s29  ;;  %s1984_s1 = sld [smem:[#allocation3 + %s726_s9]] }
 0x12b   : > { %v477_v18 = vsel %vm473_vm3, %v1904_v16, 0.0  ;;  %s688_s2 = sld [smem:[#allocation3 + %s687_s0]]  ;;  %s1723_s0 = smov 88  }
 0x12c   : > { %s758_s9 = sadd.s32 7, %s1878_s29  ;;  %p1361_p10 = scmp.ne.s32.totalorder %s1697_s16, 1 }
 0x12d   : > { %s2003_s21 = sld [smem:[#allocation3 + %s758_s9]] }
 0x12e   : > { %478 = vadd.xlane.f32.xlu0 %v477_v18 }
 0x12f   : > { %v721_v10 = vstv %s720_s18  ;;  %s818_s18 = sadd.s32 8, %s1878_s29 }
 0x1b7   : > { %v476_v19 = vpop.xlane.xlu0 %475 }
 0x1b8   : > { %v481_v20 = vmul.f32 0.0625, %v476_v19 }
 0x1ba   : > { %v483_v21 = vsub.f32 %v1902_v15, %v481_v20 }
 0x1bb   : > { %v479_v22 = vpop.xlane.xlu0 %478 }
 0x1bc   : > { %v482_v23 = vmul.f32 0.0625, %v479_v22  ;;  %v485_v24 = vmul.f32 %v483_v21, %v483_v21  ;;  %v728_v22 = vstv %s1984_s1  ;;  %s1724_s1 = smov 96  }
 0x1be   : > { %v484_v25 = vsub.f32 %v1904_v16, %v482_v23  ;;  %v487_v26 = vsel %vm473_vm3, %v485_v24, 0.0  ;;  %v689_v23 = vstv %s688_s2  ;;  %s823_s2 = sadd.s32 9, %s1878_s29 }
 0x1bf   : > { %488 = vadd.xlane.f32.xlu1 %v487_v26 }
 0x1c0   : > { %v486_v27 = vmul.f32 %v484_v25, %v484_v25 }
 0x1c2   : > { %v490_v28 = vsel %vm473_vm3, %v486_v27, 0.0 }
 0x1c3   : > { %491 = vadd.xlane.f32.xlu1 %v490_v28 }
 0x24c   : > { %v489_v31 = vpop.xlane.xlu1 %488 }
 0x24d   : > { %v493_v32 = vmul.f32 0.0625, %v489_v31 }
 0x24f   : > { %v495_v33 = vadd.f32 1e-06, %v493_v32 }
 0x250   : > { %v492_v34 = vpop.xlane.xlu1 %491 }
 0x251   : > { %1568 = vrsqrt.f32 %v495_v33  ;;  %v494_v36 = vmul.f32 0.0625, %v492_v34 }
 0x253   : > { %v496_v37 = vadd.f32 1e-06, %v494_v36 }
 0x255   : > { %1570 = vrsqrt.f32 %v496_v37 }
 0x25b   : > { %v1569_v41 = vpop.eup %1568 }
 0x25c   : > { %v499_v42 = vmul.f32 %v1569_v41, %v483_v21 }
 0x25e   : > { %v505_v47 = vmul.f32 %v504_v43, %v499_v42 }
 0x25f   : > { %v1571_v45 = vpop.eup %1570 }
 0x260   : > { %v500_v46 = vmul.f32 %v1571_v45, %v484_v25  ;;  %v511_v50 = vadd.f32 %v510_v48, %v505_v47 }
 0x262   : > { %v506_v49 = vmul.f32 %v504_v43, %v500_v46 }
 0x264   : > { %v512_v51 = vadd.f32 %v510_v48, %v506_v49 }
 0x266   : > { %v513_v52 = vpack.c.bf16 %v512_v51, %v511_v50 }
 0x268   : > { %1409 = vmatmul.mubr.msk.bf16.vlgmr.msra.gmra.mrb[0].mxu0 %vm473_vm3, %v513_v52 }
 0x269   : > { %1414 = vmatprep.mubr.msk.bf16.mxu0 %vm1719_vm4, %v1718_v29 }
 0x33b   : > { %v566_v55 = vpop.f32.mrb[0].mxu0 }
 0x33c   : > { %v1410_v56 = vpop.f32.mrb[1].mxu0  ;;  %v567_v58 = vadd.f32 %v566_v55, %v522_v54 }
 0x33d   : > { %v569_v57 = vpop.f32.mrb[2].mxu0 }
 0x33e   : > { %v570_v59 = vadd.f32 %v569_v57, %v522_v54  ;;  %v1411_v60 = vpop.f32.mrb[3].mxu0 }
 0x340   : > { %v1962_v61 = vpack.c.bf16 %v570_v59, %v567_v58 }
 0x342   : > { %627 = vrot.lane.b32.xlu1 %v1962_v61, %s1720_s28  ;;  %575 = vrot.lane.b32.xlu0 %v1962_v61, %s1721_s24  ;;  %s676_s28 = sld [smem:[#allocation3 + %s1878_s29]] }
 0x343   : > { %s715_s24 = sld [smem:[#allocation3 + %s714_s12]]  ;;  %s753_s12 = sadd.s32 6, %s1878_s29 }
 0x346   : > { %625 = vrot.lane.b32.xlu1 %v1962_v61, %s1722_s19  ;;  %s681_s19 = sld [smem:[#allocation3 + %s680_s22]] }
 0x347   : > { %s2001_s22 = sld [smem:[#allocation3 + %s823_s2]] }
 0x348   : > { %v677_v7 = vstv %s676_s28  ;;  %s819_s28 = sld [smem:[#allocation3 + %s818_s18]]  ;;  %s2182_s18 = scalar_lea.vmem %s2155_s4, %s1915_s11 }
 0x349   : > { %v716_v8 = vstv %s715_s24  ;;  %s754_s24 = sld [smem:[#allocation3 + %s753_s12]]  ;;  %s1725_s12 = smov 8  }
 0x34c   : > { %v682_v9 = vstv %s681_s19  ;;  %s765_s19 = sadd.s32 10, %s1878_s29 }
 0x3b4   : > { %v576_v62 = vpop.permute.xlu0 %575  ;;  %v628_v0 = vpop.permute.xlu1 %627 }
 0x3b5   : > { %v582_v63 = vsel %vm577_vm5, %v576_v62, 0  ;;  %v633_v1 = vsel %vm577_vm5, %v628_v0, 0 }
 0x3b6   : > { %1413 = vmatpush3.bf16.xpose.msra.mxu0 %v582_v63 }
 0x3b7   : > { %1418 = vmatprep.subr.bf16.mxu0 %v1718_v29 }
 0x3b8   : > { %v626_v2 = vpop.permute.xlu1 %625 }
 0x3bd   : > { %1415 = vmatmul.mubr.msk.bf16.vlgmr.msra.gmra.mrb[4].mxu0 %vm577_vm5, %v1962_v61 }
 0x3be   : > { %1419 = vmatpush3.bf16.xpose.msra.mxu0 %v633_v1  ;;  %1420 = vmatprep.mubr.msk.bf16.mxu0 %vm1719_vm4, %v1718_v29 }
 0x3bf   : > { %1430 = vmatprep.subr.bf16.mxu0 %v1718_v29 }
 0x3c5   : > { %1421 = vmatmul.mubr.msk.bf16.vlgmr.msra.gmra.mrb[8].mxu0 %vm577_vm5, %v626_v2 }
 0x3c6   : > { %1432 = vmatprep.mubr.msk.bf16.mxu0 %vm1719_vm4, %v1718_v29 }
 0x490   : > { %v618_v3 = vpop.f32.mrb[4].mxu0 }
 0x491   : > { %v1416_v4 = vpop.f32.mrb[5].mxu0  ;;  %v678_v12 = vmul.f32 %v677_v7, %v618_v3  ;;  %v717_v13 = vmul.f32 %v716_v8, %v618_v3 }
 0x492   : > { %v621_v5 = vpop.f32.mrb[6].mxu0 }
 0x493   : > { %v1417_v6 = vpop.f32.mrb[7].mxu0  ;;  %v679_v19 = vmul.f32 %v677_v7, %v621_v5  ;;  %v718_v20 = vmul.f32 %v716_v8, %v621_v5 }
 0x498   : > { %v669_v11 = vpop.f32.mrb[8].mxu0 }
 0x499   : > { %v683_v14 = vmul.f32 %v682_v9, %v669_v11  ;;  %v722_v17 = vmul.f32 %v721_v10, %v669_v11  ;;  %v1422_v18 = vpop.f32.mrb[9].mxu0  ;;  %v760_v11 = vstv %s2003_s21 }
 0x49a   : > { %v672_v21 = vpop.f32.mrb[10].mxu0 }
 0x49b   : > { %v685_v24 = vadd.f32 %v683_v14, %v678_v12  ;;  %v724_v25 = vadd.f32 %v722_v17, %v717_v13  ;;  %v684_v26 = vmul.f32 %v682_v9, %v672_v21  ;;  %v723_v27 = vmul.f32 %v721_v10, %v672_v21  ;;  %v1423_v28 = vpop.f32.mrb[11].mxu0 }
 0x49c   : > { %v825_v10 = vstv %s2001_s22  ;;  %v820_v12 = vstv %s819_s28  ;;  %v755_v17 = vstv %s754_s24  ;;  %s2183_s28 = scalar_lea.vmem %s2156_s5, %s1915_s11  ;;  %s1371_s11 = sshll.u32 %s1697_s16, 5 }
 0x49d   : > { %v686_v30 = vadd.f32 %v684_v26, %v679_v19  ;;  %v725_v31 = vadd.f32 %v723_v27, %v718_v20  ;;  %v729_v32 = vadd.f32 %v728_v22, %v724_v25  ;;  %v690_v33 = vadd.f32 %v689_v23, %v685_v24 }
 0x49f   : > { %v731_v34 = vsel %vm473_vm3, %v729_v32, -inf  ;;  %v692_v35 = vsel %vm473_vm3, %v690_v33, -inf  ;;  %v691_v36 = vadd.f32 %v689_v23, %v686_v30  ;;  %v730_v41 = vadd.f32 %v728_v22, %v725_v31 }
 0x4a0   : > { %732 = vmax.xlane.f32.xlu0 %v731_v34  ;;  %693 = vmax.xlane.f32.xlu1 %v692_v35 }
 0x4a1   : > { %v695_v37 = vsel %vm473_vm3, %v691_v36, -inf  ;;  %v734_v42 = vsel %vm473_vm3, %v730_v41, -inf }
 0x4a4   : > { %696 = vmax.xlane.f32.xlu0 %v695_v37 }
 0x4a8   : > { %735 = vmax.xlane.f32.xlu0 %v734_v42 }
 0x52d   : > { %v733_v43 = vpop.xlane.xlu0 %732  ;;  %v694_v45 = vpop.xlane.xlu1 %693 }
 0x52e   : > { %v737_v46 = vsub.f32 %v729_v32, %v733_v43  ;;  %v698_v47 = vsub.f32 %v690_v33, %v694_v45  ;;  %v1562_v45 = vld [vmem:[%s2182_s18] sm:$0xff]  }
 0x530   : > { %v700_v48 = vmul.f32 1.442695, %v698_v47  ;;  %v739_v49 = vmul.f32 1.442695, %v737_v46 }
 0x531   : > { %v697_v50 = vpop.xlane.xlu0 %696 }
 0x532   : > { %v699_v51 = vsub.f32 %v691_v36, %v697_v50  ;;  %1572 = vpow2.f32 %v700_v48 }
 0x533   : > { %1574 = vpow2.f32 %v739_v49 }
 0x534   : > { %v702_v52 = vmul.f32 1.442695, %v699_v51 }
 0x535   : > { %v736_v53 = vpop.xlane.xlu0 %735 }
 0x536   : > { %1576 = vpow2.f32 %v702_v52  ;;  %v738_v54 = vsub.f32 %v730_v41, %v736_v53 }
 0x538   : > { %v741_v55 = vmul.f32 1.442695, %v738_v54 }
 0x53a   : > { %1578 = vpow2.f32 %v741_v55 }
 0x53c   : > { %v1573_v56 = vpop.eup %1572 }
 0x53d   : > { %v704_v57 = vsel %vm473_vm3, %v1573_v56, 0.0  ;;  %v1575_v58 = vpop.eup %1574 }
 0x53e   : > { %705 = vadd.xlane.f32.xlu1 %v704_v57  ;;  %v743_v62 = vsel %vm473_vm3, %v1575_v58, 0.0 }
 0x540   : > { %v1577_v59 = vpop.eup %1576 }
 0x541   : > { %v707_v60 = vsel %vm473_vm3, %v1577_v59, 0.0 }
 0x542   : > { %708 = vadd.xlane.f32.xlu0 %v707_v60  ;;  %744 = vadd.xlane.f32.xlu1 %v743_v62  ;;  %v900_v62 = vsub.s32 3, %v1937_v38 }
 0x544   : > { %v1579_v63 = vpop.eup %1578 }
 0x545   : > { %v746_v0 = vsel %vm473_vm3, %v1579_v63, 0.0 }
 0x546   : > { %747 = vadd.xlane.f32.xlu0 %v746_v0  ;;  %v901_v0 = vrot.slane %v1948_v40, %v900_v62 }
 0x553   : > { %836 = vrot.lane.b32.xlu1 %v1962_v61, %s1723_s0  ;;  %s830_s0 = sadd.s32 11, %s1878_s29 }
 0x554   : > { %s831_s2 = sld [smem:[#allocation3 + %s830_s0]]  ;;  %s1078_s0 = scalar_lea.vmem %s2157_s6, %s1371_s11 }
 0x55a   : > { %v832_v32 = vstv %s831_s2 }
 0x55c   : > { %771 = vrot.lane.b32.xlu0 %v1962_v61, %s1724_s1  ;;  %s766_s1 = sld [smem:[#allocation3 + %s765_s19]] }
 0x562   : > { %v767_v31 = vstv %s766_s1 }
 0x5cb   : > { %v706_v1 = vpop.xlane.xlu1 %705 }
 0x5cc   : > { %1580 = vrcp.f32 %v706_v1 }
 0x5cf   : > { %v709_v2 = vpop.xlane.xlu0 %708  ;;  %v745_v3 = vpop.xlane.xlu1 %744 }
 0x5d0   : > { %1582 = vrcp.f32 %v709_v2 }
 0x5d1   : > { %1584 = vrcp.f32 %v745_v3 }
 0x5d3   : > { %v748_v4 = vpop.xlane.xlu0 %747  ;;  %v837_v5 = vpop.permute.xlu1 %836 }
 0x5d4   : > { %1586 = vrcp.f32 %v748_v4  ;;  %1431 = vmatpush3.bf16.msra.mxu0 %v837_v5 }
 0x5d5   : > { %1442 = vmatprep.subr.bf16.mxu0 %v1718_v29 }
 0x5d6   : > { %v1581_v6 = vpop.eup %1580 }
 0x5d7   : > { %v772_v61 = vpop.permute.xlu0 %771  ;;  %v711_v9 = vmul.f32 %v1581_v6, %v1573_v56 }
 0x5d8   : > { %1425 = vmatpush3.bf16.msra.mxu1 %v772_v61 }
 0x5d9   : > { %1436 = vmatprep.subr.bf16.mxu1 %v1718_v29  ;;  %v821_v21 = vmul.f32 %v820_v12, %v711_v9  ;;  %v756_v23 = vmul.f32 %v755_v17, %v711_v9 }
 0x5da   : > { %v1583_v7 = vpop.eup %1582 }
 0x5db   : > { %v1585_v8 = vpop.eup %1584  ;;  %v713_v14 = vmul.f32 %v1583_v7, %v1577_v59 }
 0x5dc   : > { %v750_v13 = vmul.f32 %v1585_v8, %v1575_v58 }
 0x5dd   : > { %v822_v24 = vmul.f32 %v820_v12, %v713_v14  ;;  %v757_v25 = vmul.f32 %v755_v17, %v713_v14 }
 0x5de   : > { %v1587_v18 = vpop.eup %1586  ;;  %v826_v19 = vmul.f32 %v825_v10, %v750_v13  ;;  %v761_v20 = vmul.f32 %v760_v11, %v750_v13 }
 0x5df   : > { %v752_v22 = vmul.f32 %v1587_v18, %v1579_v63  ;;  %v954_v63 = vsub.s32 4, %v1937_v38 }
 0x5e0   : > { %v828_v26 = vadd.f32 %v826_v19, %v821_v21  ;;  %v763_v30 = vadd.f32 %v761_v20, %v756_v23  ;;  %v1563_v23 = vld [vmem:[%s2183_s28] sm:$0xff]  }
 0x5e1   : > { %v827_v27 = vmul.f32 %v825_v10, %v752_v22  ;;  %v762_v28 = vmul.f32 %v760_v11, %v752_v22  ;;  %v955_v1 = vrot.slane %v1948_v40, %v954_v63 }
 0x5e2   : > { %v768_v35 = vadd.f32 %v767_v31, %v763_v30  ;;  %v833_v37 = vadd.f32 %v832_v32, %v828_v26 }
 0x5e3   : > { %v829_v33 = vadd.f32 %v827_v27, %v822_v24  ;;  %v764_v34 = vadd.f32 %v762_v28, %v757_v25 }
 0x5e5   : > { %v769_v36 = vadd.f32 %v767_v31, %v764_v34  ;;  %v834_v41 = vadd.f32 %v832_v32, %v829_v33  ;;  %v988_v31 = vsub.s32 5, %v1937_v38  ;;  %v994_v33 = vsub.s32 6, %v1937_v38 }
 0x5e7   : > { %v770_v42 = vpack.c.bf16 %v769_v36, %v768_v35  ;;  %v835_v43 = vpack.c.bf16 %v834_v41, %v833_v37  ;;  %v989_v32 = vrot.slane %v1948_v40, %v988_v31 }
 0x5e9   : > { %1427 = vmatmul.mubr.msk.bf16.vlgmr.msra.gmra.mrb[0].mxu1 %vm473_vm3, %v770_v42  ;;  %1433 = vmatmul.mubr.msk.bf16.vlgmr.msra.gmra.mrb[12].mxu0 %vm473_vm3, %v835_v43  ;;  %v995_v42 = vrot.slane %v1948_v40, %v994_v33 }
 0x5ea   : > { %1438 = vmatprep.mubr.msk.bf16.mxu1 %vm1719_vm4, %v1718_v29  ;;  %1444 = vmatprep.mubr.msk.bf16.mxu0 %vm1719_vm4, %v1718_v29 }
 0x5eb   : > { %1437 = vmatpush3.bf16.msra.mxu1 %v1562_v45  ;;  %1443 = vmatpush3.bf16.msra.mxu0 %v1563_v23 }
 0x5ec   : > { %1448 = vmatprep.subr.bf16.mxu1 %v1718_v29 }
 0x6bc   : > { %v811_v46 = vpop.f32.mrb[0].mxu1  ;;  %v876_v47 = vpop.f32.mrb[12].mxu0 }
 0x6bd   : > { %v1428_v48 = vpop.f32.mrb[1].mxu1  ;;  %v1434_v49 = vpop.f32.mrb[13].mxu0 }
 0x6be   : > { %v814_v50 = vpop.f32.mrb[2].mxu1  ;;  %v879_v51 = vpop.f32.mrb[14].mxu0  ;;  %v1564_v48 = vld [vmem:[%s1078_s0] sm:$0xff]   ;;  %v1565_v49 = vld [vmem:[%s1078_s0 + $0x8] sm:$0xff]  }
 0x6bf   : > { %v1556_v52 = vpack.i.bf16 %v879_v51, %v876_v47  ;;  %v1429_v53 = vpop.f32.mrb[3].mxu1  ;;  %v1435_v54 = vpop.f32.mrb[15].mxu0  ;;  %v1567_v51 = vld [vmem:[%s1078_s0 + $0x18] sm:$0xff]  }
 0x6c1   : > { %1557 = vrot.lane.b32.xlu1 %v1556_v52, %s1725_s12  ;;  %v1005_v52 = vsub.s32 7, %v1937_v38 }
 0x6c3   : > { %v1006_v53 = vrot.slane %v1948_v40, %v1005_v52 }
 0x733   : > { %v1558_v55 = vpop.permute.xlu1 %1557 }
 0x734   : > { %v1560_v56 = vunpack.i.h.bf16 %v1558_v55  ;;  %v1559_v57 = vunpack.i.l.bf16 %v1558_v55 }
 0x736   : > { %v892_v58 = vsel %vm577_vm5, %v814_v50, %v1560_v56  ;;  %v891_v59 = vsel %vm577_vm5, %v811_v46, %v1559_v57  ;;  %v1566_v50 = vld [vmem:[%s1078_s0 + $0x10] sm:$0xff]  }
 0x737   : > { %v893_v60 = vpack.c.bf16 %v892_v58, %v891_v59 }
 0x739   : > { %1439 = vmatmul.mubr.msk.bf16.vlgmr.msra.gmra.mrb[4].mxu1 %vm473_vm3, %v893_v60 }
 0x73a   : > { %1456 = vmatprep.mubr.msk.bf16.mxu1 %vm1719_vm4, %v1718_v29  ;;  %1449 = vmatpush3.bf16.msra.mxu1 %v1564_v48  ;;  %v1174_v48 = vld [vmem:[%s2159_s8] sm:$0x3] (!%p1361_p10) }
 0x73b   : > { %1450 = vmatprep.subr.bf16.mxu1 %v1718_v29  ;;  %v1210_v52 = vrot.slane (!%p1361_p10), %v1174_v48, %v1953_v44 }
 0x73e   : > { %1451 = vmatpush3.bf16.msra.mxu1 %v1565_v49  ;;  %v1204_v49 = vrot.slane (!%p1361_p10), %v1174_v48, %v1945_v39 }
 0x73f   : > { %1452 = vmatprep.subr.bf16.mxu1 %v1718_v29 }
 0x742   : > { %1453 = vmatpush3.bf16.msra.mxu1 %v1566_v50 }
 0x743   : > { %1454 = vmatprep.subr.bf16.mxu1 %v1718_v29 }
 0x746   : > { %1455 = vmatpush3.bf16.msra.mxu1 %v1567_v51 }
 0x80c   : > { %v945_v2 = vpop.f32.mrb[4].mxu1 }
 0x80d   : > { %v946_v3 = vadd.f32 %v945_v2, %v901_v0  ;;  %v1440_v4 = vpop.f32.mrb[5].mxu1 }
 0x80e   : > { %v948_v5 = vpop.f32.mrb[6].mxu1 }
 0x80f   : > { %v956_v61 = vmul.f32 %v955_v1, %v946_v3  ;;  %v949_v6 = vadd.f32 %v948_v5, %v901_v0  ;;  %v1441_v7 = vpop.f32.mrb[7].mxu1 }
 0x811   : > { %v2034_v8 = vadd.f32 %v956_v61, %v1902_v15  ;;  %v957_v9 = vmul.f32 %v955_v1, %v949_v6 }
 0x813   : > { %v2037_v10 = vadd.f32 %v957_v9, %v1904_v16  ;;  %v960_v11 = vsel %vm473_vm3, %v2034_v8, 0.0 }
 0x814   : > { %961 = vadd.xlane.f32.xlu1 %v960_v11 }
 0x815   : > { %v963_v12 = vsel %vm473_vm3, %v2037_v10, 0.0 }
 0x816   : > { %964 = vadd.xlane.f32.xlu0 %v963_v12 }
 0x8a1   : > { %v962_v13 = vpop.xlane.xlu1 %961 }
 0x8a2   : > { %v966_v14 = vmul.f32 0.0625, %v962_v13 }
 0x8a3   : > { %v965_v17 = vpop.xlane.xlu0 %964 }
 0x8a4   : > { %v968_v18 = vsub.f32 %v2034_v8, %v966_v14  ;;  %v967_v15 = vmul.f32 0.0625, %v965_v17  ;;  %v472_v14 = vld [vmem:[%s1942_s25 + $0x8] sm:$0x3] }
 0x8a5   : > { %v1090_v17 = vrot.slane %v472_v14, %v1945_v39 }
 0x8a6   : > { %v969_v19 = vsub.f32 %v2037_v10, %v967_v15  ;;  %v970_v20 = vmul.f32 %v968_v18, %v968_v18 }
 0x8a8   : > { %v972_v16 = vsel %vm473_vm3, %v970_v20, 0.0  ;;  %v971_v21 = vmul.f32 %v969_v19, %v969_v19 }
 0x8a9   : > { %973 = vadd.xlane.f32.xlu0 %v972_v16 }
 0x8aa   : > { %v975_v22 = vsel %vm473_vm3, %v971_v21, 0.0 }
 0x8ab   : > { %976 = vadd.xlane.f32.xlu1 %v975_v22 }
 0x936   : > { %v974_v24 = vpop.xlane.xlu0 %973 }
 0x937   : > { %v978_v25 = vmul.f32 0.0625, %v974_v24 }
 0x938   : > { %v977_v26 = vpop.xlane.xlu1 %976 }
 0x939   : > { %v980_v27 = vadd.f32 1e-06, %v978_v25  ;;  %v979_v28 = vmul.f32 0.0625, %v977_v26 }
 0x93b   : > { %1588 = vrsqrt.f32 %v980_v27  ;;  %v981_v30 = vadd.f32 1e-06, %v979_v28 }
 0x93d   : > { %1590 = vrsqrt.f32 %v981_v30 }
 0x945   : > { %v1589_v34 = vpop.eup %1588 }
 0x946   : > { %v984_v35 = vmul.f32 %v1589_v34, %v968_v18  ;;  %v1163_v18 = vrot.slane %v472_v14, %v1953_v44 }
 0x947   : > { %v1591_v36 = vpop.eup %1590 }
 0x948   : > { %v990_v37 = vmul.f32 %v989_v32, %v984_v35  ;;  %v985_v41 = vmul.f32 %v1591_v36, %v969_v19 }
 0x94a   : > { %v991_v43 = vmul.f32 %v989_v32, %v985_v41  ;;  %v996_v45 = vadd.f32 %v995_v42, %v990_v37 }
 0x94c   : > { %v997_v46 = vadd.f32 %v995_v42, %v991_v43 }
 0x94e   : > { %v998_v47 = vpack.c.bf16 %v997_v46, %v996_v45 }
 0x950   : > { %1445 = vmatmul.mubr.msk.bf16.vlgmr.msra.gmra.mrb[16].mxu0 %vm473_vm3, %v998_v47 }
 0xa23   : > { %v1050_v54 = vpop.f32.mrb[16].mxu0 }
 0xa24   : > { %v1051_v55 = vadd.f32 %v1050_v54, %v1006_v53  ;;  %v1446_v56 = vpop.f32.mrb[17].mxu0 }
 0xa25   : > { %v1053_v57 = vpop.f32.mrb[18].mxu0 }
 0xa26   : > { %v1057_v58 = vmul.f32 %v1051_v55, %v1051_v55  ;;  %v1054_v59 = vadd.f32 %v1053_v57, %v1006_v53  ;;  %v1447_v60 = vpop.f32.mrb[19].mxu0 }
 0xa28   : > { %v1059_v62 = vmul.f32 %v1057_v58, %v1051_v55  ;;  %v1058_v63 = vmul.f32 %v1054_v59, %v1054_v59 }
 0xa2a   : > { %v1061_v0 = vmul.f32 0.044715, %v1059_v62  ;;  %v1060_v1 = vmul.f32 %v1058_v63, %v1054_v59 }
 0xa2c   : > { %v1063_v2 = vadd.f32 %v1061_v0, %v1051_v55  ;;  %v1062_v3 = vmul.f32 0.044715, %v1060_v1 }
 0xa2e   : > { %v1065_v29 = vmul.f32 0.7978846, %v1063_v2  ;;  %v1064_v4 = vadd.f32 %v1062_v3, %v1054_v59 }
 0xa30   : > { %1592 = vtanh.f32 %v1065_v29  ;;  %v1066_v38 = vmul.f32 0.7978846, %v1064_v4 }
 0xa32   : > { %1594 = vtanh.f32 %v1066_v38 }
 0xa3a   : > { %v1593_v40 = vpop.eup %1592 }
 0xa3b   : > { %v1069_v5 = vadd.f32 1.0, %v1593_v40 }
 0xa3c   : > { %v1595_v61 = vpop.eup %1594 }
 0xa3d   : > { %v1071_v6 = vmul.f32 0.5, %v1069_v5  ;;  %v1070_v7 = vadd.f32 1.0, %v1595_v61 }
 0xa3f   : > { %v1072_v9 = vmul.f32 0.5, %v1070_v7  ;;  %v1073_v11 = vmul.f32 %v1071_v6, %v1051_v55 }
 0xa41   : > { %v1074_v12 = vmul.f32 %v1072_v9, %v1054_v59 }
 0xa43   : > { %v1075_v13 = vpack.c.bf16 %v1074_v12, %v1073_v11 }
 0xa45   : > { %1457 = vmatmul.mubr.msk.bf16.vlgmr.msra.gmra.mrb[8].mxu1 %vm1115_vm6, %v1075_v13 }
 0xb18   : > { %v1153_v15 = vpop.f32.mrb[8].mxu1 }
 0xb19   : > { %v1154_v19 = vadd.f32 %v1153_v15, %v1090_v17  ;;  %v1458_v20 = vpop.f32.mrb[9].mxu1 }
 0xb1a   : > { %v1156_v16 = vpop.f32.mrb[10].mxu1 }
 0xb1b   : > { %v1164_v21 = vmul.f32 %v1163_v18, %v1154_v19  ;;  %v1157_v22 = vadd.f32 %v1156_v16, %v1090_v17  ;;  %v1459_v23 = vpop.f32.mrb[11].mxu1  ;;  %1173 = sbr.rel (%p1361_p10) target bundleno = 3165 (0xc5d), region = 72 }
 0xb1d   : > { %v1166_v24 = vadd.f32 %v1164_v21, %v2034_v8  ;;  %v1165_v25 = vmul.f32 %v1163_v18, %v1157_v22 }
 0xb1f   : > { %1168 = vst.msk [vmem:[#allocation2] sm:$0xff] %vm473_vm3, %v1166_v24  ;;  %v1167_v26 = vadd.f32 %v1165_v25, %v2037_v10  ;;  %v1175_v27 = vsel (!%p1361_p10), %vm473_vm3, %v1166_v24, 0.0 }
 0xb20   : > { %1176 = vadd.xlane.f32.xlu0 (!%p1361_p10), %v1175_v27 }
 0xb21   : > { %1169 = vst.msk [vmem:[#allocation2 + $0x8] sm:$0xff] %vm473_vm3, %v1167_v26  ;;  %v1178_v28 = vsel (!%p1361_p10), %vm473_vm3, %v1167_v26, 0.0 }
 0xb24   : > { %1179 = vadd.xlane.f32.xlu0 %v1178_v28 }
 0xbad   : > { %v1177_v30 = vpop.xlane.xlu0 %1176 }
 0xbae   : > { %v1181_v31 = vmul.f32 0.0625, %v1177_v30 }
 0xbb0   : > { %v1183_v32 = vsub.f32 %v1166_v24, %v1181_v31 }
 0xbb1   : > { %v1180_v8 = vpop.xlane.xlu0 %1179 }
 0xbb2   : > { %v1182_v33 = vmul.f32 0.0625, %v1180_v8  ;;  %v1185_v34 = vmul.f32 %v1183_v32, %v1183_v32 }
 0xbb4   : > { %v1184_v35 = vsub.f32 %v1167_v26, %v1182_v33  ;;  %v1187_v10 = vsel %vm473_vm3, %v1185_v34, 0.0 }
 0xbb5   : > { %1188 = vadd.xlane.f32.xlu1 %v1187_v10 }
 0xbb6   : > { %v1186_v36 = vmul.f32 %v1184_v35, %v1184_v35 }
 0xbb8   : > { %v1190_v37 = vsel %vm473_vm3, %v1186_v36, 0.0 }
 0xbb9   : > { %1191 = vadd.xlane.f32.xlu1 %v1190_v37 }
 0xc42   : > { %v1189_v41 = vpop.xlane.xlu1 %1188 }
 0xc43   : > { %v1193_v42 = vmul.f32 0.0625, %v1189_v41 }
 0xc45   : > { %v1195_v43 = vadd.f32 1e-06, %v1193_v42 }
 0xc46   : > { %v1192_v45 = vpop.xlane.xlu1 %1191 }
 0xc47   : > { %1596 = vrsqrt.f32 %v1195_v43  ;;  %v1194_v46 = vmul.f32 0.0625, %v1192_v45 }
 0xc49   : > { %v1196_v47 = vadd.f32 1e-06, %v1194_v46 }
 0xc4b   : > { %1598 = vrsqrt.f32 %v1196_v47 }
 0xc51   : > { %v1597_v50 = vpop.eup %1596 }
 0xc52   : > { %v1199_v51 = vmul.f32 %v1597_v50, %v1183_v32 }
 0xc54   : > { %v1205_v53 = vmul.f32 %v1204_v49, %v1199_v51 }
 0xc55   : > { %v1599_v54 = vpop.eup %1598 }
 0xc56   : > { %v1211_v55 = vadd.f32 %v1210_v52, %v1205_v53  ;;  %v1200_v56 = vmul.f32 %v1599_v54, %v1184_v35 }
 0xc58   : > { %1213 = vst.msk [vmem:[%s1884_s30] sm:$0xff] %vm473_vm3, %v1211_v55  ;;  %v1206_v57 = vmul.f32 %v1204_v49, %v1200_v56 }
 0xc5a   : > { %v1212_v58 = vadd.f32 %v1210_v52, %v1206_v57 }
 0xc5c   : > { %1214 = vst.msk [vmem:[%s1884_s30 + $0x8] sm:$0xff] %vm473_vm3, %v1212_v58 }
 0xc5d PF: > { %s1372_s1 = sshll.u32 %s1701_s17, 8  ;;  %s1229_s18 = sshll.u32 %s1884_s30, 4  ;;  %s2094_s18 = int_to_ptr.vmem [resolvable:$true] %s1229_s18 }
 0xc5e   : > { %s2091_s9 = scalar_lea.hbm %s2161_s10, %s1372_s1  ;;  %s2184_s22 = sand.u32 1, %s1689_s14  }
 0xc5f   : > { %s2098_s21 = scalar_lea.sflag [#allocation4], %s2184_s22  ;;  %s1615_s28 = scalar_lea.vmem %s2094_s18, 256 }
 0xc60   : > { %p1616_p12 = scmp.ne.s32.totalorder %s2094_s18, %s1615_s28  ;;  %s1726_s17 = smov [#allocation6]  }
 0xc61   : > { %s1619_s11 = sshll.u32 %s1726_s17, 4  ;;  %s1620_s11 = int_to_ptr.vmem [resolvable:$false] %s1619_s11 }
 0xc62   : > { %p1617_p13 = pnand %p1616_p12, %p1833_p3  ;;  %s1621_s24 = scalar_lea.vmem %s1620_s11, 512 }
 0xc63   : > { %p1622_p1 = scmp.lt.s32.totalorder %s2094_s18, %s1620_s11  ;;  %p1623_p2 = scmp.lt.s32.totalorder %s1621_s24, %s1615_s28 }
 0xc64   : > { %p1618_p0 = pneg %p1617_p13 }
 0xc65   : > { %p1624_p4 = por %p1623_p2, %p1622_p1 }
 0xc67   : > { %p1625_p5 = pnand %p1624_p4, %p1618_p0 }
 0xc69   : > { %1628 = shalt.err (!%p1625_p5)
}
 0xc6a   : > { %s1629_s30 = scalar_lea.hbm %s2091_s9, 256  ;;  %s1633_s16 = scalar_lea.hbm %s2161_s10, 512 }
 0xc6b   : > { %p1630_p6 = scmp.ne.s32.totalorder %s2091_s9, %s1629_s30  ;;  %p1634_p11 = scmp.lt.u32.totalorder %s2091_s9, %s2161_s10 }
 0xc6c   : > { %p1635_p9 = scmp.lt.u32.totalorder %s1633_s16, %s1629_s30  ;;  %p1637_p12 = scmp.lt.u32.totalorder %s1629_s30, %s2091_s9 }
 0xc6d   : > { %p1631_p7 = pnand %p1630_p6, %p1833_p3 }
 0xc6e   : > { %p1636_p10 = por %p1635_p9, %p1634_p11 }
 0xc6f   : > { %p1632_p8 = pneg %p1631_p7 }
 0xc70   : > { %p1638_p13 = por %p1637_p12, %p1636_p10 }
 0xc72   : > { %p1639_p0 = pnand %p1638_p13, %p1632_p8 }
 0xc74   : > { %1642 = shalt.err (!%p1639_p0)
}
 0xc75   : > { %s1727_s2 = smov 128  }
 0xc76   : > { %1464 = dma.vmem_to_hbm [thread:$0]  (%p1833_p3), %s2094_s18, 256, %s2091_s9, %s2098_s21, %s1727_s2, %s1727_s2, %s1725_s12  }
 0xc77 PF: > { %p1476_p1 = scmp.ge.s32.totalorder %s1713_s20, 2  ;;  %s1244_s29 = sand.u32 1, %s1685_s13  }
 0xc78   : > { %p2185_p2 = scmp.ne.s32.totalorder %s2175_s27, 0  ;;  %s1245_s22 = scalar_lea.sflag [#allocation4], %s1244_s29 }
 0xc7a   : > { %p1471_p4 = pnand %p1476_p1, %p2185_p2 }
 0xc7c   : > { %1680 = dma.done.wait (!%p1471_p4), %s1245_s22, 256  }
 0xc7d   : > { %1682 = vsyncadd (!%p1471_p4), %s1245_s22, 4294967040  ;;  %s24_s20 = sadd.s32 1, %s1713_s20   ;;  %s2186_s16 = sld [smem:[#allocation9_spill]] }
 0xc7e   : > { %p21_p5 = scmp.ge.s32.totalorder %s24_s20, 6   ;;  %s2187_s17 = sld [smem:[#allocation10_spill]] }
 0xc7f   : > { %s2188_s18 = sld [smem:[#allocation11_spill]]  ;;  %s2189_s19 = sld [smem:[#allocation12_spill]] }
 0xc80   : > { %s2190_s13 = smov %s1689_s14  ;;  %s2191_s14 = smov %s1693_s15 }
 0xc81   : > { %s2192_s15 = smov %s1863_s23  ;;  %23 = sbr.rel (!%p21_p5) target bundleno = 11 (0xb), region = 113 }
 0xc88   :  { %1250 = vsyncpa [#allocation4], 1 }
 0xc89   :  { %1252 = vsyncpa [#allocation4 + $0x1], 1 }
 0xc8a   :  { %1253 = vsyncpa [#allocation5], 1 }
 0xc8b   :  { %1255 = vsyncpa [#allocation5 + $0x1], 1 }

</bundles_post_ra>
